<compile_context>
chip_gen: v7x
topology: tpu7x:2x2x1
jax: 0.10.0
libtpu: 0.0.40
codegen_flags: <defaults>
</compile_context>

<pallas_src>
import jax
import jax.numpy as jnp
from jax.experimental import pallas as pl
from jax.experimental.pallas import tpu as pltpu


# ----------------------------- configuration ------------------------------ #
NUM_CLASSES = 8
CHANNELS = 1
IMG_SIZE = 32                          # ds_size = 32 // 2**4 = 2 in the spec
DS_SIZE = IMG_SIZE // 2 ** 4           # 2
FEAT_DIM = 128 * DS_SIZE ** 2          # 512
BATCH = 16

CONV_CH = (CHANNELS, 16, 32, 64, 128)
BN_EPS = 0.8
LRELU_SLOPE = 0.2
TM1 = 1024                             # row tile for the gridded first conv block

VMEM = pl.BlockSpec(memory_space=pltpu.MemorySpace.VMEM)
CPARAMS = pltpu.CompilerParams(vmem_limit_bytes=16 << 20)


# ------------------------------- kernels ----------------------------------- #
def _leaky_relu(x):
    return jnp.where(x >= 0, x, LRELU_SLOPE * x)


def conv_block1_kernel(p_ref, w_ref, b_ref, o_ref):
    # Conv (as im2col matmul, bf16 operands / f32 accumulate) + bias + LeakyReLU.
    z = jnp.dot(p_ref[...], w_ref[...], preferred_element_type=jnp.float32)
    o_ref[...] = _leaky_relu(z + b_ref[...])


def conv_block_bn_kernel(p_ref, w_ref, b_ref, g_ref, be_ref, o_ref):
    z = jnp.dot(p_ref[...], w_ref[...], preferred_element_type=jnp.float32)
    a = _leaky_relu(z + b_ref[...])
    # Training-mode BatchNorm2d: per-channel stats over all B*OH*OW rows,
    # biased variance, eps=0.8.  Fused single pass: var = E[a^2] - mean^2.
    inv_m = 1.0 / jnp.float32(a.shape[0])
    s1 = jnp.sum(a, axis=0, keepdims=True)
    s2 = jnp.sum(a * a, axis=0, keepdims=True)
    mean = s1 * inv_m
    var = s2 * inv_m - mean * mean
    scale = g_ref[...] * jax.lax.rsqrt(var + BN_EPS)
    shift = be_ref[...] - mean * scale
    o_ref[...] = a * scale + shift


def heads_labeled_kernel(f_ref, wa_ref, ba_ref, wx_ref, bx_ref, v_ref, l_ref):
    f = f_ref[...]                                                # (B, 520) bf16
    za = jnp.dot(f, wa_ref[...], preferred_element_type=jnp.float32) + ba_ref[...]
    v_ref[...] = 1.0 / (1.0 + jnp.exp(-za))                       # Sigmoid
    zx = jnp.dot(f, wx_ref[...], preferred_element_type=jnp.float32) + bx_ref[...]
    zx = zx - jnp.max(zx, axis=-1, keepdims=True)                 # stable Softmax
    e = jnp.exp(zx)
    l_ref[...] = e / jnp.sum(e, axis=-1, keepdims=True)


def clf_head_kernel(f_ref, w_ref, b_ref, l_ref):
    z = jnp.dot(f_ref[...], w_ref[...], preferred_element_type=jnp.float32) + b_ref[...]
    z = z - jnp.max(z, axis=-1, keepdims=True)
    e = jnp.exp(z)
    l_ref[...] = e / jnp.sum(e, axis=-1, keepdims=True)


# --------------------------- conv block wrappers ---------------------------- #
def _im2col_s2(x):
    """3x3 / stride 2 / pad 1 patch extraction (JAX glue, pure data movement).

    x: (B, H, W, C) -> (B*OH*OW, 9*C), contraction axis ordered (kh, kw, ci)
    so it matches an HWIO weight reshaped to (9*C, Cout)."""
    b, h, w, c = x.shape
    oh, ow = h // 2, w // 2
    xp = jnp.pad(x, ((0, 0), (1, 1), (1, 1), (0, 0)))
    taps = [xp[:, kh:kh + 2 * oh:2, kw:kw + 2 * ow:2, :]
            for kh in range(3) for kw in range(3)]
    return jnp.concatenate(taps, axis=-1).reshape(b * oh * ow, 9 * c)


def _conv_block1(x, w, b):
    """Block 1 (no BN): gridded over rows, weights loaded once."""
    bsz, h, _, _ = x.shape
    oh = h // 2
    patches = _im2col_s2(x).astype(jnp.bfloat16)              # (M, 9*Cin)
    m, k = patches.shape
    cout = w.shape[-1]
    w2d = w.reshape(k, cout)                                   # bf16 (9*Cin, Cout)
    tm = TM1 if m % TM1 == 0 else m
    out = pl.pallas_call(
        conv_block1_kernel,
        out_shape=jax.ShapeDtypeStruct((m, cout), jnp.float32),
        grid=(m // tm,),
        in_specs=[
            pl.BlockSpec((tm, k), lambda i: (i, 0)),
            pl.BlockSpec((k, cout), lambda i: (0, 0)),         # constant -> DMA'd once
            pl.BlockSpec((1, cout), lambda i: (0, 0)),
        ],
        out_specs=pl.BlockSpec((tm, cout), lambda i: (i, 0)),
        compiler_params=pltpu.CompilerParams(
            dimension_semantics=("parallel",),
            vmem_limit_bytes=16 << 20),
    )(patches, w2d, b)
    return out.reshape(bsz, oh, oh, cout)


def _conv_block_bn(x, w, b, g, be):
    """Blocks 2-4: whole batch in one block so BN batch statistics are exact."""
    bsz, h, _, _ = x.shape
    oh = h // 2
    patches = _im2col_s2(x).astype(jnp.bfloat16)               # (M, 9*Cin)
    m, k = patches.shape
    cout = w.shape[-1]
    out = pl.pallas_call(
        conv_block_bn_kernel,
        out_shape=jax.ShapeDtypeStruct((m, cout), jnp.float32),
        in_specs=[VMEM] * 5,
        out_specs=VMEM,
        compiler_params=CPARAMS,
    )(patches, w.reshape(k, cout), b, g, be)
    return out.reshape(bsz, oh, oh, cout)


def _features(img, params):
    x = jnp.transpose(img, (0, 2, 3, 1))                       # NHWC
    x = _conv_block1(x, params["w1"], params["b1"])
    for i in (2, 3, 4):
        x = _conv_block_bn(x, params[f"w{i}"], params[f"b{i}"],
                           params[f"g{i}"], params[f"be{i}"])
    # PyTorch flattens NCHW: out.view(B, -1)
    return jnp.transpose(x, (0, 3, 1, 2)).reshape(x.shape[0], -1)   # (B, 512)


# ------------------------------- forwards ----------------------------------- #
@jax.jit
def discriminator_forward(img, inlabel, params):
    """img: (B, C, 32, 32) f32, inlabel: (B,) int32 -> (validity (B,1), label (B, nc+1))."""
    flat = _features(img, params)
    emb = params["label_emb"][inlabel]                          # (B, nc) gather (glue)
    feat = jnp.concatenate([flat, emb], axis=-1).astype(jnp.bfloat16)
    validity, label = pl.pallas_call(
        heads_labeled_kernel,
        out_shape=(jax.ShapeDtypeStruct((feat.shape[0], 1), jnp.float32),
                   jax.ShapeDtypeStruct((feat.shape[0], NUM_CLASSES + 1), jnp.float32)),
        in_specs=[VMEM] * 5,
        out_specs=(VMEM, VMEM),
        compiler_params=CPARAMS,
    )(feat, params["w_adv"], params["b_adv"], params["w_aux"], params["b_aux"])
    return validity, label


@jax.jit
def discriminator_forward_unlabeled(img, params):
    """inlabel is None branch: validity = 0, label = Softmax(clf_layer(flat))."""
    flat = _features(img, params).astype(jnp.bfloat16)
    label = pl.pallas_call(
        clf_head_kernel,
        out_shape=jax.ShapeDtypeStruct((flat.shape[0], NUM_CLASSES + 1), jnp.float32),
        in_specs=[VMEM] * 3,
        out_specs=VMEM,
        compiler_params=CPARAMS,
    )(flat, params["w_clf"], params["b_clf"])
    return jnp.float32(0.0), label


# ----------------------------- parameter init ------------------------------- #
def init_params(key):
    params = {}
    key, k_emb = jax.random.split(key)
    params["label_emb"] = jax.random.normal(
        k_emb, (NUM_CLASSES, NUM_CLASSES), jnp.float32)

    # Conv weights stored as HWIO (3,3,Cin,Cout) in bf16 (halves weight DMA,
    # MXU-native on v5e/v6e/v7x); biases / BN affine stay f32.
    for i in range(4):
        cin, cout = CONV_CH[i], CONV_CH[i + 1]
        key, kw, kb = jax.random.split(key, 3)
        s = 1.0 / jnp.sqrt(jnp.float32(cin * 9))
        params[f"w{i+1}"] = jax.random.uniform(
            kw, (3, 3, cin, cout), jnp.float32, -s, s).astype(jnp.bfloat16)
        params[f"b{i+1}"] = jax.random.uniform(kb, (1, cout), jnp.float32, -s, s)
    for i, cout in zip((2, 3, 4), CONV_CH[2:]):
        key, kg, kb = jax.random.split(key, 3)
        params[f"g{i}"] = 1.0 + 0.1 * jax.random.normal(kg, (1, cout), jnp.float32)
        params[f"be{i}"] = 0.1 * jax.random.normal(kb, (1, cout), jnp.float32)

    def linear(k, fan_in, fan_out):
        kw, kb = jax.random.split(k)
        s = 1.0 / jnp.sqrt(jnp.float32(fan_in))
        w = jax.random.uniform(kw, (fan_in, fan_out), jnp.float32, -s, s).astype(jnp.bfloat16)
        b = jax.random.uniform(kb, (1, fan_out), jnp.float32, -s, s)
        return w, b

    key, ka, kx, kc = jax.random.split(key, 4)
    params["w_adv"], params["b_adv"] = linear(ka, FEAT_DIM + NUM_CLASSES, 1)
    params["w_aux"], params["b_aux"] = linear(kx, FEAT_DIM + NUM_CLASSES, NUM_CLASSES + 1)
    params["w_clf"], params["b_clf"] = linear(kc, FEAT_DIM, NUM_CLASSES + 1)
    return params


# ---------------------------- pure-JAX reference ----------------------------- #
def reference_forward(img, inlabel, params):
    def conv(x, w, b):
        z = jax.lax.conv_general_dilated(
            x.astype(jnp.bfloat16), w, window_strides=(2, 2),
            padding=((1, 1), (1, 1)),
            dimension_numbers=("NHWC", "HWIO", "NHWC"),
            preferred_element_type=jnp.float32)
        return z + b[0]

    def lrelu(x):
        return jnp.where(x >= 0, x, LRELU_SLOPE * x)

    x = jnp.transpose(img, (0, 2, 3, 1))
    x = lrelu(conv(x, params["w1"], params["b1"]))
    for i in (2, 3, 4):
        a = lrelu(conv(x, params[f"w{i}"], params[f"b{i}"]))
        mean = a.mean(axis=(0, 1, 2), keepdims=True)
        var = ((a - mean) ** 2).mean(axis=(0, 1, 2), keepdims=True)
        x = (a - mean) / jnp.sqrt(var + BN_EPS) * params[f"g{i}"][0] + params[f"be{i}"][0]
    flat = jnp.transpose(x, (0, 3, 1, 2)).reshape(x.shape[0], -1)

    if inlabel is not None:
        emb = params["label_emb"][inlabel]
        feat = jnp.concatenate([flat, emb], axis=-1).astype(jnp.bfloat16)
        za = jnp.dot(feat, params["w_adv"], preferred_element_type=jnp.float32) + params["b_adv"]
        validity = 1.0 / (1.0 + jnp.exp(-za))
        zx = jnp.dot(feat, params["w_aux"], preferred_element_type=jnp.float32) + params["b_aux"]
        return validity, jax.nn.softmax(zx, axis=-1)
    zc = jnp.dot(flat.astype(jnp.bfloat16), params["w_clf"],
                 preferred_element_type=jnp.float32) + params["b_clf"]
    return jnp.float32(0.0), jax.nn.softmax(zc, axis=-1)


# ---------------------------------- main ------------------------------------- #
if __name__ == "__main__":
    key = jax.random.PRNGKey(0)
    key, k_img, k_lab, k_par = jax.random.split(key, 4)

    img = jax.random.normal(k_img, (BATCH, CHANNELS, IMG_SIZE, IMG_SIZE), jnp.float32)
    labels = jax.random.randint(k_lab, (BATCH,), 0, NUM_CLASSES, dtype=jnp.int32)
    params = init_params(k_par)

    # Labeled branch: (validity, label) = (adv_layer, aux_layer).
    validity, label = discriminator_forward(img, labels, params)
    validity, label = jax.block_until_ready((validity, label))
    assert validity.shape == (BATCH, 1), validity.shape
    assert label.shape == (BATCH, NUM_CLASSES + 1), label.shape

    v_ref, l_ref = reference_forward(img, labels, params)
    assert jnp.allclose(validity, v_ref, atol=2e-3, rtol=2e-3), float(
        jnp.max(jnp.abs(validity - v_ref)))
    assert jnp.allclose(label, l_ref, atol=2e-3, rtol=2e-3), float(
        jnp.max(jnp.abs(label - l_ref)))

    # Unlabeled branch: validity = 0, label = clf_layer(flat).
    _, label_clf = discriminator_forward_unlabeled(img, params)
    label_clf = jax.block_until_ready(label_clf)
    _, l_clf_ref = reference_forward(img, None, params)
    assert jnp.allclose(label_clf, l_clf_ref, atol=2e-3, rtol=2e-3), float(
        jnp.max(jnp.abs(label_clf - l_clf_ref)))

    print("KERNEL_OK")
</pallas_src>

<mosaic_0001>
module attributes {stable_mosaic.version = 11 : i64} {
  func.func @conv_block1_kernel(%arg0: i32, %arg1: memref<1024x9xbf16, #tpu.memory_space<vmem>>, %arg2: memref<9x16xbf16, #tpu.memory_space<vmem>>, %arg3: memref<1x16xf32, #tpu.memory_space<vmem>>, %arg4: memref<1024x16xf32, #tpu.memory_space<vmem>>) attributes {dimension_semantics = [#tpu.dimension_semantics<parallel>], iteration_bounds = array<i64: 4>, scalar_prefetch = 0 : i64, scratch_operands = 0 : i64, tpu.core_type = #tpu.core_type<tc>, window_params = [{transform_indices = @transform_0, window_bounds = array<i64: 1024, 9>}, {pipeline_mode = #tpu.pipeline_mode<synchronous>, transform_indices = @transform_1, window_bounds = array<i64: 9, 16>}, {pipeline_mode = #tpu.pipeline_mode<synchronous>, transform_indices = @transform_2, window_bounds = array<i64: 1, 16>}, {transform_indices = @transform_3, window_bounds = array<i64: 1024, 16>}]} {
    %c0 = arith.constant 0 : index
    %c0_0 = arith.constant 0 : index
    %0 = vector.load %arg1[%c0, %c0_0] : memref<1024x9xbf16, #tpu.memory_space<vmem>>, vector<1024x9xbf16>
    %c0_1 = arith.constant 0 : index
    %c0_2 = arith.constant 0 : index
    %1 = vector.load %arg2[%c0_1, %c0_2] : memref<9x16xbf16, #tpu.memory_space<vmem>>, vector<9x16xbf16>
    %cst = arith.constant dense<0.000000e+00> : vector<1024x16xf32>
    %2 = tpu.matmul %0, %1, %cst {dimension_numbers = #tpu.dot_dimension_numbers<[1], [0], [0], [1], [0, 0, 1, 1], [], []>} : vector<1024x9xbf16>, vector<9x16xbf16>, vector<1024x16xf32> -> vector<1024x16xf32>
    %c0_3 = arith.constant 0 : index
    %c0_4 = arith.constant 0 : index
    %3 = vector.load %arg3[%c0_3, %c0_4] : memref<1x16xf32, #tpu.memory_space<vmem>>, vector<1x16xf32>
    %4 = vector.broadcast %3 : vector<1x16xf32> to vector<1024x16xf32>
    %5 = arith.addf %2, %4 : vector<1024x16xf32>
    %cst_5 = arith.constant 0.000000e+00 : f32
    %6 = vector.broadcast %cst_5 : f32 to vector<1024x16xf32>
    %7 = arith.cmpf oge, %5, %6 : vector<1024x16xf32>
    %cst_6 = arith.constant 2.000000e-01 : f32
    %8 = vector.broadcast %cst_6 : f32 to vector<1024x16xf32>
    %9 = arith.mulf %8, %5 : vector<1024x16xf32>
    %10 = arith.select %7, %5, %9 : vector<1024x16xi1>, vector<1024x16xf32>
    %c0_7 = arith.constant 0 : index
    %c0_8 = arith.constant 0 : index
    %11 = vector.load %arg4[%c0_7, %c0_8] : memref<1024x16xf32, #tpu.memory_space<vmem>>, vector<1024x16xf32>
    tpu.vector_store %arg4[%c0_7, %c0_8], %10 {strides = array<i32>} : memref<1024x16xf32, #tpu.memory_space<vmem>>, vector<1024x16xf32>,
    return
  }
  func.func @transform_0(%arg0: i32) -> (i32, i32) {
    %c0_i32 = arith.constant 0 : i32
    %c0_i32_0 = arith.constant 0 : i32
    return %arg0, %c0_i32 : i32, i32
  }
  func.func @transform_1(%arg0: i32) -> (i32, i32) {
    %c0_i32 = arith.constant 0 : i32
    %c0_i32_0 = arith.constant 0 : i32
    %c0_i32_1 = arith.constant 0 : i32
    return %c0_i32, %c0_i32_0 : i32, i32
  }
  func.func @transform_2(%arg0: i32) -> (i32, i32) {
    %c0_i32 = arith.constant 0 : i32
    %c0_i32_0 = arith.constant 0 : i32
    %c0_i32_1 = arith.constant 0 : i32
    return %c0_i32, %c0_i32_0 : i32, i32
  }
  func.func @transform_3(%arg0: i32) -> (i32, i32) {
    %c0_i32 = arith.constant 0 : i32
    %c0_i32_0 = arith.constant 0 : i32
    return %arg0, %c0_i32 : i32, i32
  }
}

module attributes {stable_mosaic.version = 11 : i64} {
  func.func @conv_block_bn_kernel(%arg0: memref<1024x144xbf16, #tpu.memory_space<vmem>>, %arg1: memref<144x32xbf16, #tpu.memory_space<vmem>>, %arg2: memref<1x32xf32, #tpu.memory_space<vmem>>, %arg3: memref<1x32xf32, #tpu.memory_space<vmem>>, %arg4: memref<1x32xf32, #tpu.memory_space<vmem>>, %arg5: memref<1024x32xf32, #tpu.memory_space<vmem>>) attributes {dimension_semantics = [], scalar_prefetch = 0 : i64, scratch_operands = 0 : i64, tpu.core_type = #tpu.core_type<tc>} {
    %c0 = arith.constant 0 : index
    %c0_0 = arith.constant 0 : index
    %0 = vector.load %arg0[%c0, %c0_0] : memref<1024x144xbf16, #tpu.memory_space<vmem>>, vector<1024x144xbf16>
    %c0_1 = arith.constant 0 : index
    %c0_2 = arith.constant 0 : index
    %1 = vector.load %arg1[%c0_1, %c0_2] : memref<144x32xbf16, #tpu.memory_space<vmem>>, vector<144x32xbf16>
    %cst = arith.constant dense<0.000000e+00> : vector<1024x32xf32>
    %2 = tpu.matmul %0, %1, %cst {dimension_numbers = #tpu.dot_dimension_numbers<[1], [0], [0], [1], [0, 0, 1, 1], [], []>} : vector<1024x144xbf16>, vector<144x32xbf16>, vector<1024x32xf32> -> vector<1024x32xf32>
    %c0_3 = arith.constant 0 : index
    %c0_4 = arith.constant 0 : index
    %3 = vector.load %arg2[%c0_3, %c0_4] : memref<1x32xf32, #tpu.memory_space<vmem>>, vector<1x32xf32>
    %4 = vector.broadcast %3 : vector<1x32xf32> to vector<1024x32xf32>
    %5 = arith.addf %2, %4 : vector<1024x32xf32>
    %cst_5 = arith.constant 0.000000e+00 : f32
    %6 = vector.broadcast %cst_5 : f32 to vector<1024x32xf32>
    %7 = arith.cmpf oge, %5, %6 : vector<1024x32xf32>
    %cst_6 = arith.constant 2.000000e-01 : f32
    %8 = vector.broadcast %cst_6 : f32 to vector<1024x32xf32>
    %9 = arith.mulf %8, %5 : vector<1024x32xf32>
    %10 = arith.select %7, %5, %9 : vector<1024x32xi1>, vector<1024x32xf32>
    %cst_7 = arith.constant 1.000000e+00 : f32
    %cst_8 = arith.constant 1.024000e+03 : f32
    %11 = arith.divf %cst_7, %cst_8 : f32
    %cst_9 = arith.constant dense<0.000000e+00> : vector<32xf32>
    %12 = vector.multi_reduction <add>, %10, %cst_9 [0] : vector<1024x32xf32> to vector<32xf32>
    %13 = vector.shape_cast %12 : vector<32xf32> to vector<1x32xf32>
    %14 = arith.mulf %10, %10 : vector<1024x32xf32>
    %cst_10 = arith.constant dense<0.000000e+00> : vector<32xf32>
    %15 = vector.multi_reduction <add>, %14, %cst_10 [0] : vector<1024x32xf32> to vector<32xf32>
    %16 = vector.shape_cast %15 : vector<32xf32> to vector<1x32xf32>
    %17 = vector.broadcast %11 : f32 to vector<1x32xf32>
    %18 = arith.mulf %13, %17 : vector<1x32xf32>
    %19 = vector.broadcast %11 : f32 to vector<1x32xf32>
    %20 = arith.mulf %16, %19 : vector<1x32xf32>
    %21 = arith.mulf %18, %18 : vector<1x32xf32>
    %22 = arith.subf %20, %21 : vector<1x32xf32>
    %c0_11 = arith.constant 0 : index
    %c0_12 = arith.constant 0 : index
    %23 = vector.load %arg3[%c0_11, %c0_12] : memref<1x32xf32, #tpu.memory_space<vmem>>, vector<1x32xf32>
    %cst_13 = arith.constant 8.000000e-01 : f32
    %24 = vector.broadcast %cst_13 : f32 to vector<1x32xf32>
    %25 = arith.addf %22, %24 : vector<1x32xf32>
    %26 = math.rsqrt %25 : vector<1x32xf32>
    %27 = arith.mulf %23, %26 : vector<1x32xf32>
    %c0_14 = arith.constant 0 : index
    %c0_15 = arith.constant 0 : index
    %28 = vector.load %arg4[%c0_14, %c0_15] : memref<1x32xf32, #tpu.memory_space<vmem>>, vector<1x32xf32>
    %29 = arith.mulf %18, %27 : vector<1x32xf32>
    %30 = arith.subf %28, %29 : vector<1x32xf32>
    %31 = vector.broadcast %27 : vector<1x32xf32> to vector<1024x32xf32>
    %32 = arith.mulf %10, %31 : vector<1024x32xf32>
    %33 = vector.broadcast %30 : vector<1x32xf32> to vector<1024x32xf32>
    %34 = arith.addf %32, %33 : vector<1024x32xf32>
    %c0_16 = arith.constant 0 : index
    %c0_17 = arith.constant 0 : index
    %35 = vector.load %arg5[%c0_16, %c0_17] : memref<1024x32xf32, #tpu.memory_space<vmem>>, vector<1024x32xf32>
    tpu.vector_store %arg5[%c0_16, %c0_17], %34 {strides = array<i32>} : memref<1024x32xf32, #tpu.memory_space<vmem>>, vector<1024x32xf32>,
    return
  }
}

module attributes {stable_mosaic.version = 11 : i64} {
  func.func @conv_block_bn_kernel(%arg0: memref<256x288xbf16, #tpu.memory_space<vmem>>, %arg1: memref<288x64xbf16, #tpu.memory_space<vmem>>, %arg2: memref<1x64xf32, #tpu.memory_space<vmem>>, %arg3: memref<1x64xf32, #tpu.memory_space<vmem>>, %arg4: memref<1x64xf32, #tpu.memory_space<vmem>>, %arg5: memref<256x64xf32, #tpu.memory_space<vmem>>) attributes {dimension_semantics = [], scalar_prefetch = 0 : i64, scratch_operands = 0 : i64, tpu.core_type = #tpu.core_type<tc>} {
    %c0 = arith.constant 0 : index
    %c0_0 = arith.constant 0 : index
    %0 = vector.load %arg0[%c0, %c0_0] : memref<256x288xbf16, #tpu.memory_space<vmem>>, vector<256x288xbf16>
    %c0_1 = arith.constant 0 : index
    %c0_2 = arith.constant 0 : index
    %1 = vector.load %arg1[%c0_1, %c0_2] : memref<288x64xbf16, #tpu.memory_space<vmem>>, vector<288x64xbf16>
    %cst = arith.constant dense<0.000000e+00> : vector<256x64xf32>
    %2 = tpu.matmul %0, %1, %cst {dimension_numbers = #tpu.dot_dimension_numbers<[1], [0], [0], [1], [0, 0, 1, 1], [], []>} : vector<256x288xbf16>, vector<288x64xbf16>, vector<256x64xf32> -> vector<256x64xf32>
    %c0_3 = arith.constant 0 : index
    %c0_4 = arith.constant 0 : index
    %3 = vector.load %arg2[%c0_3, %c0_4] : memref<1x64xf32, #tpu.memory_space<vmem>>, vector<1x64xf32>
    %4 = vector.broadcast %3 : vector<1x64xf32> to vector<256x64xf32>
    %5 = arith.addf %2, %4 : vector<256x64xf32>
    %cst_5 = arith.constant 0.000000e+00 : f32
    %6 = vector.broadcast %cst_5 : f32 to vector<256x64xf32>
    %7 = arith.cmpf oge, %5, %6 : vector<256x64xf32>
    %cst_6 = arith.constant 2.000000e-01 : f32
    %8 = vector.broadcast %cst_6 : f32 to vector<256x64xf32>
    %9 = arith.mulf %8, %5 : vector<256x64xf32>
    %10 = arith.select %7, %5, %9 : vector<256x64xi1>, vector<256x64xf32>
    %cst_7 = arith.constant 1.000000e+00 : f32
    %cst_8 = arith.constant 2.560000e+02 : f32
    %11 = arith.divf %cst_7, %cst_8 : f32
    %cst_9 = arith.constant dense<0.000000e+00> : vector<64xf32>
    %12 = vector.multi_reduction <add>, %10, %cst_9 [0] : vector<256x64xf32> to vector<64xf32>
    %13 = vector.shape_cast %12 : vector<64xf32> to vector<1x64xf32>
    %14 = arith.mulf %10, %10 : vector<256x64xf32>
    %cst_10 = arith.constant dense<0.000000e+00> : vector<64xf32>
    %15 = vector.multi_reduction <add>, %14, %cst_10 [0] : vector<256x64xf32> to vector<64xf32>
    %16 = vector.shape_cast %15 : vector<64xf32> to vector<1x64xf32>
    %17 = vector.broadcast %11 : f32 to vector<1x64xf32>
    %18 = arith.mulf %13, %17 : vector<1x64xf32>
    %19 = vector.broadcast %11 : f32 to vector<1x64xf32>
    %20 = arith.mulf %16, %19 : vector<1x64xf32>
    %21 = arith.mulf %18, %18 : vector<1x64xf32>
    %22 = arith.subf %20, %21 : vector<1x64xf32>
    %c0_11 = arith.constant 0 : index
    %c0_12 = arith.constant 0 : index
    %23 = vector.load %arg3[%c0_11, %c0_12] : memref<1x64xf32, #tpu.memory_space<vmem>>, vector<1x64xf32>
    %cst_13 = arith.constant 8.000000e-01 : f32
    %24 = vector.broadcast %cst_13 : f32 to vector<1x64xf32>
    %25 = arith.addf %22, %24 : vector<1x64xf32>
    %26 = math.rsqrt %25 : vector<1x64xf32>
    %27 = arith.mulf %23, %26 : vector<1x64xf32>
    %c0_14 = arith.constant 0 : index
    %c0_15 = arith.constant 0 : index
    %28 = vector.load %arg4[%c0_14, %c0_15] : memref<1x64xf32, #tpu.memory_space<vmem>>, vector<1x64xf32>
    %29 = arith.mulf %18, %27 : vector<1x64xf32>
    %30 = arith.subf %28, %29 : vector<1x64xf32>
    %31 = vector.broadcast %27 : vector<1x64xf32> to vector<256x64xf32>
    %32 = arith.mulf %10, %31 : vector<256x64xf32>
    %33 = vector.broadcast %30 : vector<1x64xf32> to vector<256x64xf32>
    %34 = arith.addf %32, %33 : vector<256x64xf32>
    %c0_16 = arith.constant 0 : index
    %c0_17 = arith.constant 0 : index
    %35 = vector.load %arg5[%c0_16, %c0_17] : memref<256x64xf32, #tpu.memory_space<vmem>>, vector<256x64xf32>
    tpu.vector_store %arg5[%c0_16, %c0_17], %34 {strides = array<i32>} : memref<256x64xf32, #tpu.memory_space<vmem>>, vector<256x64xf32>,
    return
  }
}

module attributes {stable_mosaic.version = 11 : i64} {
  func.func @conv_block_bn_kernel(%arg0: memref<64x576xbf16, #tpu.memory_space<vmem>>, %arg1: memref<576x128xbf16, #tpu.memory_space<vmem>>, %arg2: memref<1x128xf32, #tpu.memory_space<vmem>>, %arg3: memref<1x128xf32, #tpu.memory_space<vmem>>, %arg4: memref<1x128xf32, #tpu.memory_space<vmem>>, %arg5: memref<64x128xf32, #tpu.memory_space<vmem>>) attributes {dimension_semantics = [], scalar_prefetch = 0 : i64, scratch_operands = 0 : i64, tpu.core_type = #tpu.core_type<tc>} {
    %c0 = arith.constant 0 : index
    %c0_0 = arith.constant 0 : index
    %0 = vector.load %arg0[%c0, %c0_0] : memref<64x576xbf16, #tpu.memory_space<vmem>>, vector<64x576xbf16>
    %c0_1 = arith.constant 0 : index
    %c0_2 = arith.constant 0 : index
    %1 = vector.load %arg1[%c0_1, %c0_2] : memref<576x128xbf16, #tpu.memory_space<vmem>>, vector<576x128xbf16>
    %cst = arith.constant dense<0.000000e+00> : vector<64x128xf32>
    %2 = tpu.matmul %0, %1, %cst {dimension_numbers = #tpu.dot_dimension_numbers<[1], [0], [0], [1], [0, 0, 1, 1], [], []>} : vector<64x576xbf16>, vector<576x128xbf16>, vector<64x128xf32> -> vector<64x128xf32>
    %c0_3 = arith.constant 0 : index
    %c0_4 = arith.constant 0 : index
    %3 = vector.load %arg2[%c0_3, %c0_4] : memref<1x128xf32, #tpu.memory_space<vmem>>, vector<1x128xf32>
    %4 = vector.broadcast %3 : vector<1x128xf32> to vector<64x128xf32>
    %5 = arith.addf %2, %4 : vector<64x128xf32>
    %cst_5 = arith.constant 0.000000e+00 : f32
    %6 = vector.broadcast %cst_5 : f32 to vector<64x128xf32>
    %7 = arith.cmpf oge, %5, %6 : vector<64x128xf32>
    %cst_6 = arith.constant 2.000000e-01 : f32
    %8 = vector.broadcast %cst_6 : f32 to vector<64x128xf32>
    %9 = arith.mulf %8, %5 : vector<64x128xf32>
    %10 = arith.select %7, %5, %9 : vector<64x128xi1>, vector<64x128xf32>
    %cst_7 = arith.constant 1.000000e+00 : f32
    %cst_8 = arith.constant 6.400000e+01 : f32
    %11 = arith.divf %cst_7, %cst_8 : f32
    %cst_9 = arith.constant dense<0.000000e+00> : vector<128xf32>
    %12 = vector.multi_reduction <add>, %10, %cst_9 [0] : vector<64x128xf32> to vector<128xf32>
    %13 = vector.shape_cast %12 : vector<128xf32> to vector<1x128xf32>
    %14 = arith.mulf %10, %10 : vector<64x128xf32>
    %cst_10 = arith.constant dense<0.000000e+00> : vector<128xf32>
    %15 = vector.multi_reduction <add>, %14, %cst_10 [0] : vector<64x128xf32> to vector<128xf32>
    %16 = vector.shape_cast %15 : vector<128xf32> to vector<1x128xf32>
    %17 = vector.broadcast %11 : f32 to vector<1x128xf32>
    %18 = arith.mulf %13, %17 : vector<1x128xf32>
    %19 = vector.broadcast %11 : f32 to vector<1x128xf32>
    %20 = arith.mulf %16, %19 : vector<1x128xf32>
    %21 = arith.mulf %18, %18 : vector<1x128xf32>
    %22 = arith.subf %20, %21 : vector<1x128xf32>
    %c0_11 = arith.constant 0 : index
    %c0_12 = arith.constant 0 : index
    %23 = vector.load %arg3[%c0_11, %c0_12] : memref<1x128xf32, #tpu.memory_space<vmem>>, vector<1x128xf32>
    %cst_13 = arith.constant 8.000000e-01 : f32
    %24 = vector.broadcast %cst_13 : f32 to vector<1x128xf32>
    %25 = arith.addf %22, %24 : vector<1x128xf32>
    %26 = math.rsqrt %25 : vector<1x128xf32>
    %27 = arith.mulf %23, %26 : vector<1x128xf32>
    %c0_14 = arith.constant 0 : index
    %c0_15 = arith.constant 0 : index
    %28 = vector.load %arg4[%c0_14, %c0_15] : memref<1x128xf32, #tpu.memory_space<vmem>>, vector<1x128xf32>
    %29 = arith.mulf %18, %27 : vector<1x128xf32>
    %30 = arith.subf %28, %29 : vector<1x128xf32>
    %31 = vector.broadcast %27 : vector<1x128xf32> to vector<64x128xf32>
    %32 = arith.mulf %10, %31 : vector<64x128xf32>
    %33 = vector.broadcast %30 : vector<1x128xf32> to vector<64x128xf32>
    %34 = arith.addf %32, %33 : vector<64x128xf32>
    %c0_16 = arith.constant 0 : index
    %c0_17 = arith.constant 0 : index
    %35 = vector.load %arg5[%c0_16, %c0_17] : memref<64x128xf32, #tpu.memory_space<vmem>>, vector<64x128xf32>
    tpu.vector_store %arg5[%c0_16, %c0_17], %34 {strides = array<i32>} : memref<64x128xf32, #tpu.memory_space<vmem>>, vector<64x128xf32>,
    return
  }
}

module attributes {stable_mosaic.version = 11 : i64} {
  func.func @heads_labeled_kernel(%arg0: memref<16x520xbf16, #tpu.memory_space<vmem>>, %arg1: memref<520x1xbf16, #tpu.memory_space<vmem>>, %arg2: memref<1x1xf32, #tpu.memory_space<vmem>>, %arg3: memref<520x9xbf16, #tpu.memory_space<vmem>>, %arg4: memref<1x9xf32, #tpu.memory_space<vmem>>, %arg5: memref<16x1xf32, #tpu.memory_space<vmem>>, %arg6: memref<16x9xf32, #tpu.memory_space<vmem>>) attributes {dimension_semantics = [], scalar_prefetch = 0 : i64, scratch_operands = 0 : i64, tpu.core_type = #tpu.core_type<tc>} {
    %c0 = arith.constant 0 : index
    %c0_0 = arith.constant 0 : index
    %0 = vector.load %arg0[%c0, %c0_0] : memref<16x520xbf16, #tpu.memory_space<vmem>>, vector<16x520xbf16>
    %c0_1 = arith.constant 0 : index
    %c0_2 = arith.constant 0 : index
    %1 = vector.load %arg1[%c0_1, %c0_2] : memref<520x1xbf16, #tpu.memory_space<vmem>>, vector<520x1xbf16>
    %cst = arith.constant dense<0.000000e+00> : vector<16x1xf32>
    %2 = tpu.matmul %0, %1, %cst {dimension_numbers = #tpu.dot_dimension_numbers<[1], [0], [0], [1], [0, 0, 1, 1], [], []>} : vector<16x520xbf16>, vector<520x1xbf16>, vector<16x1xf32> -> vector<16x1xf32>
    %c0_3 = arith.constant 0 : index
    %c0_4 = arith.constant 0 : index
    %3 = vector.load %arg2[%c0_3, %c0_4] : memref<1x1xf32, #tpu.memory_space<vmem>>, vector<1x1xf32>
    %4 = vector.broadcast %3 : vector<1x1xf32> to vector<16x1xf32>
    %5 = arith.addf %2, %4 : vector<16x1xf32>
    %cst_5 = arith.constant 0.000000e+00 : f32
    %6 = vector.broadcast %cst_5 : f32 to vector<16x1xf32>
    %7 = arith.subf %6, %5 : vector<16x1xf32>
    %8 = math.exp %7 : vector<16x1xf32>
    %cst_6 = arith.constant 1.000000e+00 : f32
    %9 = vector.broadcast %cst_6 : f32 to vector<16x1xf32>
    %10 = arith.addf %9, %8 : vector<16x1xf32>
    %cst_7 = arith.constant 1.000000e+00 : f32
    %11 = vector.broadcast %cst_7 : f32 to vector<16x1xf32>
    %12 = arith.divf %11, %10 : vector<16x1xf32>
    %c0_8 = arith.constant 0 : index
    %c0_9 = arith.constant 0 : index
    %13 = vector.load %arg5[%c0_8, %c0_9] : memref<16x1xf32, #tpu.memory_space<vmem>>, vector<16x1xf32>
    tpu.vector_store %arg5[%c0_8, %c0_9], %12 {strides = array<i32>} : memref<16x1xf32, #tpu.memory_space<vmem>>, vector<16x1xf32>,
    %c0_10 = arith.constant 0 : index
    %c0_11 = arith.constant 0 : index
    %14 = vector.load %arg3[%c0_10, %c0_11] : memref<520x9xbf16, #tpu.memory_space<vmem>>, vector<520x9xbf16>
    %cst_12 = arith.constant dense<0.000000e+00> : vector<16x9xf32>
    %15 = tpu.matmul %0, %14, %cst_12 {dimension_numbers = #tpu.dot_dimension_numbers<[1], [0], [0], [1], [0, 0, 1, 1], [], []>} : vector<16x520xbf16>, vector<520x9xbf16>, vector<16x9xf32> -> vector<16x9xf32>
    %c0_13 = arith.constant 0 : index
    %c0_14 = arith.constant 0 : index
    %16 = vector.load %arg4[%c0_13, %c0_14] : memref<1x9xf32, #tpu.memory_space<vmem>>, vector<1x9xf32>
    %17 = vector.broadcast %16 : vector<1x9xf32> to vector<16x9xf32>
    %18 = arith.addf %15, %17 : vector<16x9xf32>
    %cst_15 = arith.constant dense<0xFF800000> : vector<16xf32>
    %19 = vector.multi_reduction <maximumf>, %18, %cst_15 [1] : vector<16x9xf32> to vector<16xf32>
    %20 = vector.shape_cast %19 : vector<16xf32> to vector<16x1xf32>
    %21 = vector.broadcast %20 : vector<16x1xf32> to vector<16x9xf32>
    %22 = arith.subf %18, %21 : vector<16x9xf32>
    %23 = math.exp %22 : vector<16x9xf32>
    %cst_16 = arith.constant dense<0.000000e+00> : vector<16xf32>
    %24 = vector.multi_reduction <add>, %23, %cst_16 [1] : vector<16x9xf32> to vector<16xf32>
    %25 = vector.shape_cast %24 : vector<16xf32> to vector<16x1xf32>
    %26 = vector.broadcast %25 : vector<16x1xf32> to vector<16x9xf32>
    %27 = arith.divf %23, %26 : vector<16x9xf32>
    %c0_17 = arith.constant 0 : index
    %c0_18 = arith.constant 0 : index
    %28 = vector.load %arg6[%c0_17, %c0_18] : memref<16x9xf32, #tpu.memory_space<vmem>>, vector<16x9xf32>
    tpu.vector_store %arg6[%c0_17, %c0_18], %27 {strides = array<i32>} : memref<16x9xf32, #tpu.memory_space<vmem>>, vector<16x9xf32>,
    return
  }
}

</mosaic_0001>

<bundles_post_ra>
// kernel: discriminator_forward.5
= control target key start
LH: loop header
LB: loop body
LE: loop exit
PB: predicated region body
PF: predicated region fallthrough
CT: control target
= control target key end

     0   :  { %s2393_s12 = smov 0   ;;  %s2943_s0 = inlined_call_operand.vmem [shape: bf16[4096,9], index: 0, kind: input, shape index: {}]   ;;  %s2944_s1 = inlined_call_operand.vmem [shape: bf16[9,16], index: 1, kind: input, shape index: {}]   ;;  %s2945_s2 = inlined_call_operand.vmem [shape: f32[1,16], index: 2, kind: input, shape index: {}]   ;;  %s2946_s3 = inlined_call_operand.vmem [shape: f32[4096,16], index: 3, kind: output, shape index: {}]  }
   0x1 LB: > { %s1951_s13 = sadd.s32 4294967295, %s2370_s12   ;;  %p1955_p0 = scmp.ge.s32.totalorder %s2370_s12, 1  ;;  %s2370_s12 = sphi %s2393_s12, %s13_s12  }
   0x2   : > { %p138_p1 = scmp.lt.s32.totalorder %s2370_s12, 5 }
   0x4   : > { %p139_p2 = pnand %p1955_p0, %p138_p1 }
   0x5   : > { %v2298_v0 = vld [vmem:[%s2944_s1] sm:$0x1f] (!%p139_p2)   ;;  %vm830_vm0 = vcmask (!%p139_p2), 1043456   ;;  %vm831_vm1 = vcmask (!%p139_p2), 1044480   ;;  %s1956_s16 = sshll.u32 (!%p139_p2), %s1951_s13, 7  ;;  %v2372_v1 = vmov (!%p139_p2), 65535  }
   0x6   : > { %142 = sbr.rel (%p139_p2) target bundleno = 363 (0x16b), region = 32  ;;  %v832_v2 = vsel (!%p139_p2), %vm830_vm0, 4294967295, %v2372_v1  ;;  %p163_p3 = scmp.lt.s32.totalorder (!%p139_p2), %s1956_s16, 511  ;;  %vm637_vm2 = vcmask (!%p139_p2), 72704   ;;  %vm1766_vm3 = vcmask (!%p139_p2), 130048  }
   0x7   : > { %v833_v3 = vsel (!%p139_p2), %vm831_vm1, %v832_v2, 0 }
   0x8   : > { %v835_v4 = vand.u32 (!%p139_p2), %v2298_v0, %v833_v3 }
   0xa   : > { %2157 = vmatprep.subr.bf16.mxu0 (!%p139_p2), %v835_v4  ;;  %2287 = vmatprep.subr.bf16.mxu1 (!%p139_p2), %v835_v4 }
   0xb   : > { %2158 = vmatpush3.bf16.msra.mxu0 (!%p139_p2), %v835_v4  ;;  %2288 = vmatpush3.bf16.msra.mxu1 (!%p139_p2), %v835_v4 }
   0xd   : > { %s2948_s16 = smov (!%p163_p3, %s1956_s16), 511 }
   0xe   : > { %s1957_s17 = sshll.u32 %s2948_s16, 2  ;;  %s1959_s23 = sshll.u32 %s2948_s16, 3 }
   0xf   : > { %s2410_s20 = scalar_lea.vmem %s2943_s0, %s1957_s17  ;;  %s2552_s26 = scalar_lea.vmem %s2946_s3, %s1959_s23 }
  0x10   : > { %v2299_v5 = vld [vmem:[%s2410_s20] sm:$0xff]   ;;  %v2301_v7 = vld [vmem:[%s2410_s20 + $0x8] sm:$0xff]   ;;  %v2303_v9 = vld [vmem:[%s2410_s20 + $0x10] sm:$0xff]  }
  0x11   : > { %v2300_v6 = vld [vmem:[%s2410_s20 + $0x100] sm:$0xff]   ;;  %2159 = vmatprep.mubr.msk.bf16.mxu0 %vm637_vm2, %v2299_v5  ;;  %v2302_v8 = vld [vmem:[%s2410_s20 + $0x108] sm:$0xff]   ;;  %v2304_v10 = vld [vmem:[%s2410_s20 + $0x110] sm:$0xff]  }
  0x12   : > { %2223 = vmatprep.mubr.msk.bf16.mxu1 %vm637_vm2, %v2300_v6  ;;  %2160 = vmatmul.mubr.msk.bf16.vlgmr.msra.gmra.mrb[0].mxu0 %vm637_vm2, %v2301_v7  ;;  %v2305_v11 = vld [vmem:[%s2410_s20 + $0x18] sm:$0xff]   ;;  %v2307_v13 = vld [vmem:[%s2410_s20 + $0x20] sm:$0xff]   ;;  %v2309_v15 = vld [vmem:[%s2410_s20 + $0x28] sm:$0xff]  }
  0x13   : > { %2224 = vmatmul.mubr.msk.bf16.vlgmr.msra.gmra.mrb[0].mxu1 %vm637_vm2, %v2302_v8  ;;  %2163 = vmatprep.mubr.msk.bf16.mxu0 %vm637_vm2, %v2303_v9  ;;  %v2306_v12 = vld [vmem:[%s2410_s20 + $0x118] sm:$0xff]   ;;  %v2308_v14 = vld [vmem:[%s2410_s20 + $0x120] sm:$0xff]   ;;  %v2310_v16 = vld [vmem:[%s2410_s20 + $0x128] sm:$0xff]  }
  0x14   : > { %2227 = vmatprep.mubr.msk.bf16.mxu1 %vm637_vm2, %v2304_v10  ;;  %v2311_v17 = vld [vmem:[%s2410_s20 + $0x30] sm:$0xff]   ;;  %v2313_v19 = vld [vmem:[%s2410_s20 + $0x38] sm:$0xff]   ;;  %v2315_v21 = vld [vmem:[%s2410_s20 + $0x40] sm:$0xff]  }
  0x15   : > { %v2312_v18 = vld [vmem:[%s2410_s20 + $0x130] sm:$0xff]   ;;  %v2314_v20 = vld [vmem:[%s2410_s20 + $0x138] sm:$0xff]   ;;  %v2316_v22 = vld [vmem:[%s2410_s20 + $0x140] sm:$0xff]  }
  0x16   : > { %v2317_v23 = vld [vmem:[%s2410_s20 + $0x48] sm:$0xff]   ;;  %v2319_v25 = vld [vmem:[%s2410_s20 + $0x50] sm:$0xff]   ;;  %v2321_v27 = vld [vmem:[%s2410_s20 + $0x58] sm:$0xff]  }
  0x17   : > { %v2318_v24 = vld [vmem:[%s2410_s20 + $0x148] sm:$0xff]   ;;  %v2320_v26 = vld [vmem:[%s2410_s20 + $0x150] sm:$0xff]   ;;  %v2322_v28 = vld [vmem:[%s2410_s20 + $0x158] sm:$0xff]  }
  0x18   : > { %v2323_v29 = vld [vmem:[%s2410_s20 + $0x60] sm:$0xff]   ;;  %v2325_v31 = vld [vmem:[%s2410_s20 + $0x68] sm:$0xff]   ;;  %v2327_v33 = vld [vmem:[%s2410_s20 + $0x70] sm:$0xff]  }
  0x19   : > { %v2324_v30 = vld [vmem:[%s2410_s20 + $0x160] sm:$0xff]   ;;  %v2326_v32 = vld [vmem:[%s2410_s20 + $0x168] sm:$0xff]   ;;  %v2328_v34 = vld [vmem:[%s2410_s20 + $0x170] sm:$0xff]  }
  0x1a   : > { %2164 = vmatmul.mubr.msk.bf16.gmra.mrb[4].mxu0 %vm637_vm2, %v2305_v11  ;;  %v2329_v35 = vld [vmem:[%s2410_s20 + $0x78] sm:$0xff]   ;;  %v2331_v37 = vld [vmem:[%s2410_s20 + $0x80] sm:$0xff]   ;;  %v2333_v39 = vld [vmem:[%s2410_s20 + $0x88] sm:$0xff]  }
  0x1b   : > { %2228 = vmatmul.mubr.msk.bf16.gmra.mrb[4].mxu1 %vm637_vm2, %v2306_v12  ;;  %2167 = vmatprep.mubr.msk.bf16.mxu0 %vm637_vm2, %v2307_v13  ;;  %v2330_v36 = vld [vmem:[%s2410_s20 + $0x178] sm:$0xff]   ;;  %v2332_v38 = vld [vmem:[%s2410_s20 + $0x180] sm:$0xff]   ;;  %v2334_v40 = vld [vmem:[%s2410_s20 + $0x188] sm:$0xff]  }
  0x1c   : > { %2231 = vmatprep.mubr.msk.bf16.mxu1 %vm637_vm2, %v2308_v14  ;;  %v2335_v41 = vld [vmem:[%s2410_s20 + $0x90] sm:$0xff]   ;;  %v2337_v43 = vld [vmem:[%s2410_s20 + $0x98] sm:$0xff]   ;;  %v2339_v45 = vld [vmem:[%s2410_s20 + $0xa0] sm:$0xff]  }
  0x1d   : > { %v2336_v42 = vld [vmem:[%s2410_s20 + $0x190] sm:$0xff]   ;;  %v2338_v44 = vld [vmem:[%s2410_s20 + $0x198] sm:$0xff]   ;;  %v2340_v46 = vld [vmem:[%s2410_s20 + $0x1a0] sm:$0xff]  }
  0x1e   : > { %v2341_v47 = vld [vmem:[%s2410_s20 + $0xa8] sm:$0xff]   ;;  %v2343_v49 = vld [vmem:[%s2410_s20 + $0xb0] sm:$0xff]   ;;  %v2345_v51 = vld [vmem:[%s2410_s20 + $0xb8] sm:$0xff]  }
  0x1f   : > { %v2342_v48 = vld [vmem:[%s2410_s20 + $0x1a8] sm:$0xff]   ;;  %v2344_v50 = vld [vmem:[%s2410_s20 + $0x1b0] sm:$0xff]   ;;  %v2346_v52 = vld [vmem:[%s2410_s20 + $0x1b8] sm:$0xff]  }
  0x20   : > { %v2347_v53 = vld [vmem:[%s2410_s20 + $0xc0] sm:$0xff]   ;;  %v2349_v55 = vld [vmem:[%s2410_s20 + $0xc8] sm:$0xff]   ;;  %v2351_v57 = vld [vmem:[%s2410_s20 + $0xd0] sm:$0xff]  }
  0x21   : > { %v2348_v54 = vld [vmem:[%s2410_s20 + $0x1c0] sm:$0xff]   ;;  %v2350_v56 = vld [vmem:[%s2410_s20 + $0x1c8] sm:$0xff]   ;;  %v2352_v58 = vld [vmem:[%s2410_s20 + $0x1d0] sm:$0xff]  }
  0x22   : > { %2168 = vmatmul.mubr.msk.bf16.gmra.mrb[8].mxu0 %vm637_vm2, %v2309_v15  ;;  %v2353_v59 = vld [vmem:[%s2410_s20 + $0xd8] sm:$0xff]   ;;  %v2355_v61 = vld [vmem:[%s2410_s20 + $0xe0] sm:$0xff]   ;;  %v2357_v63 = vld [vmem:[%s2410_s20 + $0xe8] sm:$0xff]  }
  0x23   : > { %2232 = vmatmul.mubr.msk.bf16.gmra.mrb[8].mxu1 %vm637_vm2, %v2310_v16  ;;  %2171 = vmatprep.mubr.msk.bf16.mxu0 %vm637_vm2, %v2311_v17  ;;  %v2354_v60 = vld [vmem:[%s2410_s20 + $0x1d8] sm:$0xff]   ;;  %v2356_v62 = vld [vmem:[%s2410_s20 + $0x1e0] sm:$0xff]   ;;  %v2358_v0 = vld [vmem:[%s2410_s20 + $0x1e8] sm:$0xff]  }
  0x24   : > { %2235 = vmatprep.mubr.msk.bf16.mxu1 %vm637_vm2, %v2312_v18  ;;  %v2359_v1 = vld [vmem:[%s2410_s20 + $0xf0] sm:$0xff]   ;;  %v2361_v3 = vld [vmem:[%s2410_s20 + $0xf8] sm:$0xff]   ;;  %v2543_v5 = vld [vmem:[%s2945_s2] ss:$0 sm:$0xff] }
  0x25   : > { %v2360_v2 = vld [vmem:[%s2410_s20 + $0x1f0] sm:$0xff]   ;;  %v2362_v4 = vld [vmem:[%s2410_s20 + $0x1f8] sm:$0xff]  }
  0x2a   : > { %2172 = vmatmul.mubr.msk.bf16.gmra.mrb[12].mxu0 %vm637_vm2, %v2313_v19 }
  0x2b   : > { %2236 = vmatmul.mubr.msk.bf16.gmra.mrb[12].mxu1 %vm637_vm2, %v2314_v20  ;;  %2175 = vmatprep.mubr.msk.bf16.mxu0 %vm637_vm2, %v2315_v21 }
  0x2c   : > { %2239 = vmatprep.mubr.msk.bf16.mxu1 %vm637_vm2, %v2316_v22 }
  0x32   : > { %2176 = vmatmul.mubr.msk.bf16.gmra.mrb[16].mxu0 %vm637_vm2, %v2317_v23 }
  0x33   : > { %2240 = vmatmul.mubr.msk.bf16.gmra.mrb[16].mxu1 %vm637_vm2, %v2318_v24  ;;  %2179 = vmatprep.mubr.msk.bf16.mxu0 %vm637_vm2, %v2319_v25 }
  0x34   : > { %2243 = vmatprep.mubr.msk.bf16.mxu1 %vm637_vm2, %v2320_v26 }
  0x3a   : > { %2180 = vmatmul.mubr.msk.bf16.gmra.mrb[20].mxu0 %vm637_vm2, %v2321_v27 }
  0x3b   : > { %2244 = vmatmul.mubr.msk.bf16.gmra.mrb[20].mxu1 %vm637_vm2, %v2322_v28  ;;  %2183 = vmatprep.mubr.msk.bf16.mxu0 %vm637_vm2, %v2323_v29 }
  0x3c   : > { %2247 = vmatprep.mubr.msk.bf16.mxu1 %vm637_vm2, %v2324_v30 }
  0x42   : > { %2184 = vmatmul.mubr.msk.bf16.gmra.mrb[24].mxu0 %vm637_vm2, %v2325_v31 }
  0x43   : > { %2248 = vmatmul.mubr.msk.bf16.gmra.mrb[24].mxu1 %vm637_vm2, %v2326_v32  ;;  %2187 = vmatprep.mubr.msk.bf16.mxu0 %vm637_vm2, %v2327_v33 }
  0x44   : > { %2251 = vmatprep.mubr.msk.bf16.mxu1 %vm637_vm2, %v2328_v34 }
  0x4a   : > { %2188 = vmatmul.mubr.msk.bf16.gmra.mrb[28].mxu0 %vm637_vm2, %v2329_v35 }
  0x4b   : > { %2252 = vmatmul.mubr.msk.bf16.gmra.mrb[28].mxu1 %vm637_vm2, %v2330_v36  ;;  %2191 = vmatprep.mubr.msk.bf16.mxu0 %vm637_vm2, %v2331_v37 }
  0x4c   : > { %2255 = vmatprep.mubr.msk.bf16.mxu1 %vm637_vm2, %v2332_v38 }
  0x52   : > { %2192 = vmatmul.mubr.msk.bf16.gmra.mrb[32].mxu0 %vm637_vm2, %v2333_v39 }
  0x53   : > { %2256 = vmatmul.mubr.msk.bf16.gmra.mrb[32].mxu1 %vm637_vm2, %v2334_v40  ;;  %2195 = vmatprep.mubr.msk.bf16.mxu0 %vm637_vm2, %v2335_v41 }
  0x54   : > { %2259 = vmatprep.mubr.msk.bf16.mxu1 %vm637_vm2, %v2336_v42 }
  0x5a   : > { %2196 = vmatmul.mubr.msk.bf16.gmra.mrb[36].mxu0 %vm637_vm2, %v2337_v43 }
  0x5b   : > { %2260 = vmatmul.mubr.msk.bf16.gmra.mrb[36].mxu1 %vm637_vm2, %v2338_v44  ;;  %2199 = vmatprep.mubr.msk.bf16.mxu0 %vm637_vm2, %v2339_v45 }
  0x5c   : > { %2263 = vmatprep.mubr.msk.bf16.mxu1 %vm637_vm2, %v2340_v46 }
  0x62   : > { %2200 = vmatmul.mubr.msk.bf16.gmra.mrb[40].mxu0 %vm637_vm2, %v2341_v47 }
  0x63   : > { %2264 = vmatmul.mubr.msk.bf16.gmra.mrb[40].mxu1 %vm637_vm2, %v2342_v48  ;;  %2203 = vmatprep.mubr.msk.bf16.mxu0 %vm637_vm2, %v2343_v49 }
  0x64   : > { %2267 = vmatprep.mubr.msk.bf16.mxu1 %vm637_vm2, %v2344_v50 }
  0x6a   : > { %2204 = vmatmul.mubr.msk.bf16.gmra.mrb[44].mxu0 %vm637_vm2, %v2345_v51 }
  0x6b   : > { %2268 = vmatmul.mubr.msk.bf16.gmra.mrb[44].mxu1 %vm637_vm2, %v2346_v52  ;;  %2207 = vmatprep.mubr.msk.bf16.mxu0 %vm637_vm2, %v2347_v53 }
  0x6c   : > { %2271 = vmatprep.mubr.msk.bf16.mxu1 %vm637_vm2, %v2348_v54 }
  0x72   : > { %2208 = vmatmul.mubr.msk.bf16.gmra.mrb[48].mxu0 %vm637_vm2, %v2349_v55 }
  0x73   : > { %2272 = vmatmul.mubr.msk.bf16.gmra.mrb[48].mxu1 %vm637_vm2, %v2350_v56  ;;  %2211 = vmatprep.mubr.msk.bf16.mxu0 %vm637_vm2, %v2351_v57 }
  0x74   : > { %2275 = vmatprep.mubr.msk.bf16.mxu1 %vm637_vm2, %v2352_v58 }
  0x7a   : > { %2212 = vmatmul.mubr.msk.bf16.gmra.mrb[52].mxu0 %vm637_vm2, %v2353_v59 }
  0x7b   : > { %2276 = vmatmul.mubr.msk.bf16.gmra.mrb[52].mxu1 %vm637_vm2, %v2354_v60  ;;  %2215 = vmatprep.mubr.msk.bf16.mxu0 %vm637_vm2, %v2355_v61 }
  0x7c   : > { %2279 = vmatprep.mubr.msk.bf16.mxu1 %vm637_vm2, %v2356_v62 }
  0x82   : > { %2216 = vmatmul.mubr.msk.bf16.gmra.mrb[56].mxu0 %vm637_vm2, %v2357_v63 }
  0x83   : > { %2280 = vmatmul.mubr.msk.bf16.gmra.mrb[56].mxu1 %vm637_vm2, %v2358_v0  ;;  %2219 = vmatprep.mubr.msk.bf16.mxu0 %vm637_vm2, %v2359_v1 }
  0x84   : > { %2283 = vmatprep.mubr.msk.bf16.mxu1 %vm637_vm2, %v2360_v2 }
  0x8a   : > { %2220 = vmatmul.mubr.msk.bf16.gmra.mrb[60].mxu0 %vm637_vm2, %v2361_v3 }
  0x8b   : > { %2284 = vmatmul.mubr.msk.bf16.gmra.mrb[60].mxu1 %vm637_vm2, %v2362_v4 }
  0xe5   : > { %v2161_v6 = vpop.f32.mrb[0].mxu0 }
  0xe6   : > { %v880_v7 = vadd.f32 %v2161_v6, %v2543_v5  ;;  %v2225_v8 = vpop.f32.mrb[0].mxu1  ;;  %v871_v9 = vpop.f32.mrb[1].mxu0 }
  0xe7   : > { %v1136_v10 = vadd.f32 %v2225_v8, %v2543_v5  ;;  %v872_v11 = vadd.f32 %v2543_v5, %v871_v9  ;;  %v1127_v12 = vpop.f32.mrb[1].mxu1  ;;  %v2162_v13 = vpop.f32.mrb[2].mxu0 }
  0xe8   : > { %vm1384_vm4 = vcmp.ge.f32.partialorder %v880_v7, 0.0  ;;  %v1512_v14 = vmul.f32 0.2, %v880_v7  ;;  %v1128_v15 = vadd.f32 %v2543_v5, %v1127_v12  ;;  %v883_v16 = vadd.f32 %v2162_v13, %v2543_v5  ;;  %v2226_v17 = vpop.f32.mrb[2].mxu1  ;;  %v874_v18 = vpop.f32.mrb[3].mxu0 }
  0xe9   : > { %vm1448_vm5 = vcmp.ge.f32.partialorder %v1136_v10, 0.0  ;;  %v1576_v19 = vmul.f32 0.2, %v1136_v10  ;;  %vm1382_vm6 = vcmp.ge.f32.partialorder %v872_v11, 0.0  ;;  %v1510_v20 = vmul.f32 0.2, %v872_v11 }
  0xea   : > { %v1640_v21 = vsel %vm1384_vm4, %v880_v7, %v1512_v14  ;;  %vm1446_vm7 = vcmp.ge.f32.partialorder %v1128_v15, 0.0  ;;  %v1574_v22 = vmul.f32 0.2, %v1128_v15  ;;  %vm1385_vm8 = vcmp.ge.f32.partialorder %v883_v16, 0.0  ;;  %v1130_v23 = vpop.f32.mrb[3].mxu1 }
  0xeb   : > { %1769 = vst.msk [vmem:[%s2552_s26 + $0x10] sm:$0xff] %vm1766_vm3, %v1640_v21  ;;  %v1704_v24 = vsel %vm1448_vm5, %v1136_v10, %v1576_v19  ;;  %v1638_v25 = vsel %vm1382_vm6, %v872_v11, %v1510_v20  ;;  %v1513_v26 = vmul.f32 0.2, %v883_v16  ;;  %v1139_v27 = vadd.f32 %v2226_v17, %v2543_v5 }
  0xec   : > { %1833 = vst.msk [vmem:[%s2552_s26 + $0x210] sm:$0xff] %vm1766_vm3, %v1704_v24  ;;  %1767 = vst.msk [vmem:[%s2552_s26] sm:$0xff] %vm1766_vm3, %v1638_v25  ;;  %v1702_v28 = vsel %vm1446_vm7, %v1128_v15, %v1574_v22  ;;  %v875_v29 = vadd.f32 %v2543_v5, %v874_v18  ;;  %v1131_v30 = vadd.f32 %v2543_v5, %v1130_v23 }
  0xed   : > { %1831 = vst.msk [vmem:[%s2552_s26 + $0x200] sm:$0xff] %vm1766_vm3, %v1702_v28  ;;  %v1641_v31 = vsel %vm1385_vm8, %v883_v16, %v1513_v26  ;;  %vm1449_vm9 = vcmp.ge.f32.partialorder %v1139_v27, 0.0  ;;  %v1577_v32 = vmul.f32 0.2, %v1139_v27  ;;  %v2165_v33 = vpop.f32.mrb[4].mxu0 }
  0xee   : > { %1770 = vst.msk [vmem:[%s2552_s26 + $0x18] sm:$0xff] %vm1766_vm3, %v1641_v31  ;;  %vm1383_vm10 = vcmp.ge.f32.partialorder %v875_v29, 0.0  ;;  %v1511_v34 = vmul.f32 0.2, %v875_v29  ;;  %vm1447_vm11 = vcmp.ge.f32.partialorder %v1131_v30, 0.0  ;;  %v896_v37 = vadd.f32 %v2165_v33, %v2543_v5  ;;  %v2229_v38 = vpop.f32.mrb[4].mxu1 }
  0xef   : > { %v1575_v35 = vmul.f32 0.2, %v1131_v30  ;;  %v1705_v36 = vsel %vm1449_vm9, %v1139_v27, %v1577_v32  ;;  %v887_v39 = vpop.f32.mrb[5].mxu0  ;;  %v1152_v42 = vadd.f32 %v2229_v38, %v2543_v5  ;;  %v1143_v44 = vpop.f32.mrb[5].mxu1 }
  0xf0   : > { %1834 = vst.msk [vmem:[%s2552_s26 + $0x218] sm:$0xff] %vm1766_vm3, %v1705_v36  ;;  %v1639_v40 = vsel %vm1383_vm10, %v875_v29, %v1511_v34  ;;  %v888_v43 = vadd.f32 %v2543_v5, %v887_v39  ;;  %v2166_v45 = vpop.f32.mrb[6].mxu0  ;;  %vm1388_vm12 = vcmp.ge.f32.partialorder %v896_v37, 0.0  ;;  %v1516_v46 = vmul.f32 0.2, %v896_v37  ;;  %v2230_v49 = vpop.f32.mrb[6].mxu1 }
  0xf1   : > { %v1703_v41 = vsel %vm1447_vm11, %v1131_v30, %v1575_v35  ;;  %1768 = vst.msk [vmem:[%s2552_s26 + $0x8] sm:$0xff] %vm1766_vm3, %v1639_v40  ;;  %v1144_v47 = vadd.f32 %v2543_v5, %v1143_v44  ;;  %v899_v48 = vadd.f32 %v2166_v45, %v2543_v5  ;;  %v890_v50 = vpop.f32.mrb[7].mxu0  ;;  %vm1452_vm13 = vcmp.ge.f32.partialorder %v1152_v42, 0.0  ;;  %v1146_v55 = vpop.f32.mrb[7].mxu1 }
  0xf2   : > { %1832 = vst.msk [vmem:[%s2552_s26 + $0x208] sm:$0xff] %vm1766_vm3, %v1703_v41  ;;  %v1580_v51 = vmul.f32 0.2, %v1152_v42  ;;  %vm1386_vm14 = vcmp.ge.f32.partialorder %v888_v43, 0.0  ;;  %v1514_v52 = vmul.f32 0.2, %v888_v43  ;;  %v1644_v53 = vsel %vm1388_vm12, %v896_v37, %v1516_v46 }
  0xf3   : > { %vm1450_vm15 = vcmp.ge.f32.partialorder %v1144_v47, 0.0  ;;  %v1578_v54 = vmul.f32 0.2, %v1144_v47  ;;  %vm1389_vm0 = vcmp.ge.f32.partialorder %v899_v48, 0.0  ;;  %1773 = vst.msk [vmem:[%s2552_s26 + $0x30] sm:$0xff] %vm1766_vm3, %v1644_v53  ;;  %v1155_v59 = vadd.f32 %v2230_v49, %v2543_v5 }
  0xf4   : > { %v1708_v56 = vsel %vm1452_vm13, %v1152_v42, %v1580_v51  ;;  %v1642_v57 = vsel %vm1386_vm14, %v888_v43, %v1514_v52  ;;  %v1517_v58 = vmul.f32 0.2, %v899_v48  ;;  %v891_v61 = vadd.f32 %v2543_v5, %v890_v50 }
  0xf5   : > { %1837 = vst.msk [vmem:[%s2552_s26 + $0x230] sm:$0xff] %vm1766_vm3, %v1708_v56  ;;  %1771 = vst.msk [vmem:[%s2552_s26 + $0x20] sm:$0xff] %vm1766_vm3, %v1642_v57  ;;  %v1706_v60 = vsel %vm1450_vm15, %v1144_v47, %v1578_v54  ;;  %v1147_v62 = vadd.f32 %v2543_v5, %v1146_v55  ;;  %v2169_v63 = vpop.f32.mrb[8].mxu0  ;;  %vm1453_vm1 = vcmp.ge.f32.partialorder %v1155_v59, 0.0  ;;  %v1581_v1 = vmul.f32 0.2, %v1155_v59 }
  0xf6   : > { %1835 = vst.msk [vmem:[%s2552_s26 + $0x220] sm:$0xff] %vm1766_vm3, %v1706_v60  ;;  %v1645_v0 = vsel %vm1389_vm0, %v899_v48, %v1517_v58  ;;  %v912_v2 = vadd.f32 %v2169_v63, %v2543_v5  ;;  %v2233_v3 = vpop.f32.mrb[8].mxu1  ;;  %v903_v4 = vpop.f32.mrb[9].mxu0  ;;  %vm1387_vm2 = vcmp.ge.f32.partialorder %v891_v61, 0.0  ;;  %v1515_v6 = vmul.f32 0.2, %v891_v61 }
  0xf7   : > { %1774 = vst.msk [vmem:[%s2552_s26 + $0x38] sm:$0xff] %vm1766_vm3, %v1645_v0  ;;  %vm1451_vm4 = vcmp.ge.f32.partialorder %v1147_v62, 0.0  ;;  %v1579_v7 = vmul.f32 0.2, %v1147_v62  ;;  %v1709_v8 = vsel %vm1453_vm1, %v1155_v59, %v1581_v1  ;;  %v1168_v10 = vadd.f32 %v2233_v3, %v2543_v5  ;;  %v1159_v11 = vpop.f32.mrb[9].mxu1  ;;  %v2170_v12 = vpop.f32.mrb[10].mxu0 }
  0xf8   : > { %vm1392_vm5 = vcmp.ge.f32.partialorder %v912_v2, 0.0  ;;  %v1520_v9 = vmul.f32 0.2, %v912_v2  ;;  %1838 = vst.msk [vmem:[%s2552_s26 + $0x238] sm:$0xff] %vm1766_vm3, %v1709_v8  ;;  %v1643_v13 = vsel %vm1387_vm2, %v891_v61, %v1515_v6  ;;  %v904_v15 = vadd.f32 %v2543_v5, %v903_v4  ;;  %v2234_v17 = vpop.f32.mrb[10].mxu1  ;;  %v906_v18 = vpop.f32.mrb[11].mxu0 }
  0xf9   : > { %v1707_v14 = vsel %vm1451_vm4, %v1147_v62, %v1579_v7  ;;  %v1160_v16 = vadd.f32 %v2543_v5, %v1159_v11  ;;  %1772 = vst.msk [vmem:[%s2552_s26 + $0x28] sm:$0xff] %vm1766_vm3, %v1643_v13  ;;  %vm1456_vm6 = vcmp.ge.f32.partialorder %v1168_v10, 0.0  ;;  %v1584_v20 = vmul.f32 0.2, %v1168_v10  ;;  %v1162_v22 = vpop.f32.mrb[11].mxu1 }
  0xfa   : > { %1836 = vst.msk [vmem:[%s2552_s26 + $0x228] sm:$0xff] %vm1766_vm3, %v1707_v14  ;;  %v1648_v19 = vsel %vm1392_vm5, %v912_v2, %v1520_v9  ;;  %v915_v21 = vadd.f32 %v2170_v12, %v2543_v5  ;;  %vm1390_vm7 = vcmp.ge.f32.partialorder %v904_v15, 0.0  ;;  %v1518_v23 = vmul.f32 0.2, %v904_v15 }
  0xfb   : > { %1777 = vst.msk [vmem:[%s2552_s26 + $0x50] sm:$0xff] %vm1766_vm3, %v1648_v19  ;;  %vm1454_vm8 = vcmp.ge.f32.partialorder %v1160_v16, 0.0  ;;  %v1582_v24 = vmul.f32 0.2, %v1160_v16  ;;  %v1712_v25 = vsel %vm1456_vm6, %v1168_v10, %v1584_v20  ;;  %v1171_v27 = vadd.f32 %v2234_v17, %v2543_v5 }
  0xfc   : > { %vm1393_vm9 = vcmp.ge.f32.partialorder %v915_v21, 0.0  ;;  %v1521_v26 = vmul.f32 0.2, %v915_v21  ;;  %1841 = vst.msk [vmem:[%s2552_s26 + $0x250] sm:$0xff] %vm1766_vm3, %v1712_v25  ;;  %v1646_v28 = vsel %vm1390_vm7, %v904_v15, %v1518_v23  ;;  %v907_v30 = vadd.f32 %v2543_v5, %v906_v18 }
  0xfd   : > { %v1710_v29 = vsel %vm1454_vm8, %v1160_v16, %v1582_v24  ;;  %v1163_v31 = vadd.f32 %v2543_v5, %v1162_v22  ;;  %v2173_v32 = vpop.f32.mrb[12].mxu0  ;;  %1775 = vst.msk [vmem:[%s2552_s26 + $0x40] sm:$0xff] %vm1766_vm3, %v1646_v28  ;;  %vm1457_vm10 = vcmp.ge.f32.partialorder %v1171_v27, 0.0  ;;  %v1585_v34 = vmul.f32 0.2, %v1171_v27 }
  0xfe   : > { %1839 = vst.msk [vmem:[%s2552_s26 + $0x240] sm:$0xff] %vm1766_vm3, %v1710_v29  ;;  %v1649_v33 = vsel %vm1393_vm9, %v915_v21, %v1521_v26  ;;  %v928_v35 = vadd.f32 %v2173_v32, %v2543_v5  ;;  %v2237_v36 = vpop.f32.mrb[12].mxu1  ;;  %v919_v37 = vpop.f32.mrb[13].mxu0  ;;  %vm1391_vm11 = vcmp.ge.f32.partialorder %v907_v30, 0.0  ;;  %v1519_v38 = vmul.f32 0.2, %v907_v30 }
  0xff   : > { %1778 = vst.msk [vmem:[%s2552_s26 + $0x58] sm:$0xff] %vm1766_vm3, %v1649_v33  ;;  %vm1455_vm12 = vcmp.ge.f32.partialorder %v1163_v31, 0.0  ;;  %v1583_v39 = vmul.f32 0.2, %v1163_v31  ;;  %v1713_v40 = vsel %vm1457_vm10, %v1171_v27, %v1585_v34  ;;  %v1184_v42 = vadd.f32 %v2237_v36, %v2543_v5  ;;  %v1175_v43 = vpop.f32.mrb[13].mxu1  ;;  %v2174_v44 = vpop.f32.mrb[14].mxu0 }
 0x100   : > { %vm1396_vm13 = vcmp.ge.f32.partialorder %v928_v35, 0.0  ;;  %v1524_v41 = vmul.f32 0.2, %v928_v35  ;;  %1842 = vst.msk [vmem:[%s2552_s26 + $0x258] sm:$0xff] %vm1766_vm3, %v1713_v40  ;;  %v1647_v45 = vsel %vm1391_vm11, %v907_v30, %v1519_v38  ;;  %v920_v47 = vadd.f32 %v2543_v5, %v919_v37  ;;  %v2238_v49 = vpop.f32.mrb[14].mxu1  ;;  %v922_v50 = vpop.f32.mrb[15].mxu0 }
 0x101   : > { %v1711_v46 = vsel %vm1455_vm12, %v1163_v31, %v1583_v39  ;;  %v1176_v48 = vadd.f32 %v2543_v5, %v1175_v43  ;;  %1776 = vst.msk [vmem:[%s2552_s26 + $0x48] sm:$0xff] %vm1766_vm3, %v1647_v45  ;;  %vm1460_vm14 = vcmp.ge.f32.partialorder %v1184_v42, 0.0  ;;  %v1588_v52 = vmul.f32 0.2, %v1184_v42  ;;  %v1178_v54 = vpop.f32.mrb[15].mxu1 }
 0x102   : > { %1840 = vst.msk [vmem:[%s2552_s26 + $0x248] sm:$0xff] %vm1766_vm3, %v1711_v46  ;;  %v1652_v51 = vsel %vm1396_vm13, %v928_v35, %v1524_v41  ;;  %v931_v53 = vadd.f32 %v2174_v44, %v2543_v5  ;;  %vm1394_vm15 = vcmp.ge.f32.partialorder %v920_v47, 0.0  ;;  %v1522_v55 = vmul.f32 0.2, %v920_v47 }
 0x103   : > { %1781 = vst.msk [vmem:[%s2552_s26 + $0x70] sm:$0xff] %vm1766_vm3, %v1652_v51  ;;  %vm1458_vm0 = vcmp.ge.f32.partialorder %v1176_v48, 0.0  ;;  %v1586_v56 = vmul.f32 0.2, %v1176_v48  ;;  %v1716_v57 = vsel %vm1460_vm14, %v1184_v42, %v1588_v52  ;;  %v1187_v59 = vadd.f32 %v2238_v49, %v2543_v5 }
 0x104   : > { %vm1397_vm1 = vcmp.ge.f32.partialorder %v931_v53, 0.0  ;;  %v1525_v58 = vmul.f32 0.2, %v931_v53  ;;  %1845 = vst.msk [vmem:[%s2552_s26 + $0x270] sm:$0xff] %vm1766_vm3, %v1716_v57  ;;  %v1650_v60 = vsel %vm1394_vm15, %v920_v47, %v1522_v55  ;;  %v923_v62 = vadd.f32 %v2543_v5, %v922_v50 }
 0x105   : > { %v1714_v61 = vsel %vm1458_vm0, %v1176_v48, %v1586_v56  ;;  %v1179_v63 = vadd.f32 %v2543_v5, %v1178_v54  ;;  %v2177_v0 = vpop.f32.mrb[16].mxu0  ;;  %1779 = vst.msk [vmem:[%s2552_s26 + $0x60] sm:$0xff] %vm1766_vm3, %v1650_v60  ;;  %vm1461_vm2 = vcmp.ge.f32.partialorder %v1187_v59, 0.0  ;;  %v1589_v2 = vmul.f32 0.2, %v1187_v59 }
 0x106   : > { %1843 = vst.msk [vmem:[%s2552_s26 + $0x260] sm:$0xff] %vm1766_vm3, %v1714_v61  ;;  %v1653_v1 = vsel %vm1397_vm1, %v931_v53, %v1525_v58  ;;  %v944_v3 = vadd.f32 %v2177_v0, %v2543_v5  ;;  %v2241_v4 = vpop.f32.mrb[16].mxu1  ;;  %v935_v6 = vpop.f32.mrb[17].mxu0  ;;  %vm1395_vm4 = vcmp.ge.f32.partialorder %v923_v62, 0.0  ;;  %v1523_v7 = vmul.f32 0.2, %v923_v62 }
 0x107   : > { %1782 = vst.msk [vmem:[%s2552_s26 + $0x78] sm:$0xff] %vm1766_vm3, %v1653_v1  ;;  %vm1459_vm5 = vcmp.ge.f32.partialorder %v1179_v63, 0.0  ;;  %v1587_v8 = vmul.f32 0.2, %v1179_v63  ;;  %v1717_v9 = vsel %vm1461_vm2, %v1187_v59, %v1589_v2  ;;  %v1200_v11 = vadd.f32 %v2241_v4, %v2543_v5  ;;  %v1191_v12 = vpop.f32.mrb[17].mxu1  ;;  %v2178_v13 = vpop.f32.mrb[18].mxu0 }
 0x108   : > { %vm1400_vm6 = vcmp.ge.f32.partialorder %v944_v3, 0.0  ;;  %v1528_v10 = vmul.f32 0.2, %v944_v3  ;;  %1846 = vst.msk [vmem:[%s2552_s26 + $0x278] sm:$0xff] %vm1766_vm3, %v1717_v9  ;;  %v1651_v14 = vsel %vm1395_vm4, %v923_v62, %v1523_v7  ;;  %v936_v16 = vadd.f32 %v2543_v5, %v935_v6  ;;  %v2242_v18 = vpop.f32.mrb[18].mxu1  ;;  %v938_v19 = vpop.f32.mrb[19].mxu0 }
 0x109   : > { %v1715_v15 = vsel %vm1459_vm5, %v1179_v63, %v1587_v8  ;;  %v1192_v17 = vadd.f32 %v2543_v5, %v1191_v12  ;;  %1780 = vst.msk [vmem:[%s2552_s26 + $0x68] sm:$0xff] %vm1766_vm3, %v1651_v14  ;;  %vm1464_vm7 = vcmp.ge.f32.partialorder %v1200_v11, 0.0  ;;  %v1592_v21 = vmul.f32 0.2, %v1200_v11  ;;  %v1194_v23 = vpop.f32.mrb[19].mxu1 }
 0x10a   : > { %1844 = vst.msk [vmem:[%s2552_s26 + $0x268] sm:$0xff] %vm1766_vm3, %v1715_v15  ;;  %v1656_v20 = vsel %vm1400_vm6, %v944_v3, %v1528_v10  ;;  %v947_v22 = vadd.f32 %v2178_v13, %v2543_v5  ;;  %vm1398_vm8 = vcmp.ge.f32.partialorder %v936_v16, 0.0  ;;  %v1526_v24 = vmul.f32 0.2, %v936_v16 }
 0x10b   : > { %1785 = vst.msk [vmem:[%s2552_s26 + $0x90] sm:$0xff] %vm1766_vm3, %v1656_v20  ;;  %vm1462_vm9 = vcmp.ge.f32.partialorder %v1192_v17, 0.0  ;;  %v1590_v25 = vmul.f32 0.2, %v1192_v17  ;;  %v1720_v26 = vsel %vm1464_vm7, %v1200_v11, %v1592_v21  ;;  %v1203_v28 = vadd.f32 %v2242_v18, %v2543_v5 }
 0x10c   : > { %vm1401_vm10 = vcmp.ge.f32.partialorder %v947_v22, 0.0  ;;  %v1529_v27 = vmul.f32 0.2, %v947_v22  ;;  %1849 = vst.msk [vmem:[%s2552_s26 + $0x290] sm:$0xff] %vm1766_vm3, %v1720_v26  ;;  %v1654_v29 = vsel %vm1398_vm8, %v936_v16, %v1526_v24  ;;  %v939_v31 = vadd.f32 %v2543_v5, %v938_v19 }
 0x10d   : > { %v1718_v30 = vsel %vm1462_vm9, %v1192_v17, %v1590_v25  ;;  %v1195_v32 = vadd.f32 %v2543_v5, %v1194_v23  ;;  %v2181_v33 = vpop.f32.mrb[20].mxu0  ;;  %1783 = vst.msk [vmem:[%s2552_s26 + $0x80] sm:$0xff] %vm1766_vm3, %v1654_v29  ;;  %vm1465_vm11 = vcmp.ge.f32.partialorder %v1203_v28, 0.0  ;;  %v1593_v35 = vmul.f32 0.2, %v1203_v28 }
 0x10e   : > { %1847 = vst.msk [vmem:[%s2552_s26 + $0x280] sm:$0xff] %vm1766_vm3, %v1718_v30  ;;  %v1657_v34 = vsel %vm1401_vm10, %v947_v22, %v1529_v27  ;;  %v960_v36 = vadd.f32 %v2181_v33, %v2543_v5  ;;  %v2245_v37 = vpop.f32.mrb[20].mxu1  ;;  %v951_v38 = vpop.f32.mrb[21].mxu0  ;;  %vm1399_vm12 = vcmp.ge.f32.partialorder %v939_v31, 0.0  ;;  %v1527_v39 = vmul.f32 0.2, %v939_v31 }
 0x10f   : > { %1786 = vst.msk [vmem:[%s2552_s26 + $0x98] sm:$0xff] %vm1766_vm3, %v1657_v34  ;;  %vm1463_vm13 = vcmp.ge.f32.partialorder %v1195_v32, 0.0  ;;  %v1591_v40 = vmul.f32 0.2, %v1195_v32  ;;  %v1721_v41 = vsel %vm1465_vm11, %v1203_v28, %v1593_v35  ;;  %v1216_v43 = vadd.f32 %v2245_v37, %v2543_v5  ;;  %v1207_v44 = vpop.f32.mrb[21].mxu1  ;;  %v2182_v45 = vpop.f32.mrb[22].mxu0 }
 0x110   : > { %vm1404_vm14 = vcmp.ge.f32.partialorder %v960_v36, 0.0  ;;  %v1532_v42 = vmul.f32 0.2, %v960_v36  ;;  %1850 = vst.msk [vmem:[%s2552_s26 + $0x298] sm:$0xff] %vm1766_vm3, %v1721_v41  ;;  %v1655_v46 = vsel %vm1399_vm12, %v939_v31, %v1527_v39  ;;  %v952_v48 = vadd.f32 %v2543_v5, %v951_v38  ;;  %v2246_v50 = vpop.f32.mrb[22].mxu1  ;;  %v954_v51 = vpop.f32.mrb[23].mxu0 }
 0x111   : > { %v1719_v47 = vsel %vm1463_vm13, %v1195_v32, %v1591_v40  ;;  %v1208_v49 = vadd.f32 %v2543_v5, %v1207_v44  ;;  %1784 = vst.msk [vmem:[%s2552_s26 + $0x88] sm:$0xff] %vm1766_vm3, %v1655_v46  ;;  %vm1468_vm15 = vcmp.ge.f32.partialorder %v1216_v43, 0.0  ;;  %v1596_v53 = vmul.f32 0.2, %v1216_v43  ;;  %v1210_v55 = vpop.f32.mrb[23].mxu1 }
 0x112   : > { %1848 = vst.msk [vmem:[%s2552_s26 + $0x288] sm:$0xff] %vm1766_vm3, %v1719_v47  ;;  %v1660_v52 = vsel %vm1404_vm14, %v960_v36, %v1532_v42  ;;  %v963_v54 = vadd.f32 %v2182_v45, %v2543_v5  ;;  %vm1402_vm0 = vcmp.ge.f32.partialorder %v952_v48, 0.0  ;;  %v1530_v56 = vmul.f32 0.2, %v952_v48 }
 0x113   : > { %1789 = vst.msk [vmem:[%s2552_s26 + $0xb0] sm:$0xff] %vm1766_vm3, %v1660_v52  ;;  %vm1466_vm1 = vcmp.ge.f32.partialorder %v1208_v49, 0.0  ;;  %v1594_v57 = vmul.f32 0.2, %v1208_v49  ;;  %v1724_v58 = vsel %vm1468_vm15, %v1216_v43, %v1596_v53  ;;  %v1219_v60 = vadd.f32 %v2246_v50, %v2543_v5 }
 0x114   : > { %vm1405_vm2 = vcmp.ge.f32.partialorder %v963_v54, 0.0  ;;  %v1533_v59 = vmul.f32 0.2, %v963_v54  ;;  %1853 = vst.msk [vmem:[%s2552_s26 + $0x2b0] sm:$0xff] %vm1766_vm3, %v1724_v58  ;;  %v1658_v61 = vsel %vm1402_vm0, %v952_v48, %v1530_v56  ;;  %v955_v63 = vadd.f32 %v2543_v5, %v954_v51 }
 0x115   : > { %v1722_v62 = vsel %vm1466_vm1, %v1208_v49, %v1594_v57  ;;  %v1211_v0 = vadd.f32 %v2543_v5, %v1210_v55  ;;  %v2185_v1 = vpop.f32.mrb[24].mxu0  ;;  %1787 = vst.msk [vmem:[%s2552_s26 + $0xa0] sm:$0xff] %vm1766_vm3, %v1658_v61  ;;  %vm1469_vm4 = vcmp.ge.f32.partialorder %v1219_v60, 0.0  ;;  %v1597_v3 = vmul.f32 0.2, %v1219_v60 }
 0x116   : > { %1851 = vst.msk [vmem:[%s2552_s26 + $0x2a0] sm:$0xff] %vm1766_vm3, %v1722_v62  ;;  %v1661_v2 = vsel %vm1405_vm2, %v963_v54, %v1533_v59  ;;  %v976_v4 = vadd.f32 %v2185_v1, %v2543_v5  ;;  %v2249_v6 = vpop.f32.mrb[24].mxu1  ;;  %v967_v7 = vpop.f32.mrb[25].mxu0  ;;  %vm1403_vm5 = vcmp.ge.f32.partialorder %v955_v63, 0.0  ;;  %v1531_v8 = vmul.f32 0.2, %v955_v63 }
 0x117   : > { %1790 = vst.msk [vmem:[%s2552_s26 + $0xb8] sm:$0xff] %vm1766_vm3, %v1661_v2  ;;  %vm1467_vm6 = vcmp.ge.f32.partialorder %v1211_v0, 0.0  ;;  %v1595_v9 = vmul.f32 0.2, %v1211_v0  ;;  %v1725_v10 = vsel %vm1469_vm4, %v1219_v60, %v1597_v3  ;;  %v1232_v12 = vadd.f32 %v2249_v6, %v2543_v5  ;;  %v1223_v13 = vpop.f32.mrb[25].mxu1  ;;  %v2186_v14 = vpop.f32.mrb[26].mxu0 }
 0x118   : > { %vm1408_vm7 = vcmp.ge.f32.partialorder %v976_v4, 0.0  ;;  %v1536_v11 = vmul.f32 0.2, %v976_v4  ;;  %1854 = vst.msk [vmem:[%s2552_s26 + $0x2b8] sm:$0xff] %vm1766_vm3, %v1725_v10  ;;  %v1659_v15 = vsel %vm1403_vm5, %v955_v63, %v1531_v8  ;;  %v968_v17 = vadd.f32 %v2543_v5, %v967_v7  ;;  %v2250_v19 = vpop.f32.mrb[26].mxu1  ;;  %v970_v20 = vpop.f32.mrb[27].mxu0 }
 0x119   : > { %v1723_v16 = vsel %vm1467_vm6, %v1211_v0, %v1595_v9  ;;  %v1224_v18 = vadd.f32 %v2543_v5, %v1223_v13  ;;  %1788 = vst.msk [vmem:[%s2552_s26 + $0xa8] sm:$0xff] %vm1766_vm3, %v1659_v15  ;;  %vm1472_vm8 = vcmp.ge.f32.partialorder %v1232_v12, 0.0  ;;  %v1600_v22 = vmul.f32 0.2, %v1232_v12  ;;  %v1226_v24 = vpop.f32.mrb[27].mxu1 }
 0x11a   : > { %1852 = vst.msk [vmem:[%s2552_s26 + $0x2a8] sm:$0xff] %vm1766_vm3, %v1723_v16  ;;  %v1664_v21 = vsel %vm1408_vm7, %v976_v4, %v1536_v11  ;;  %v979_v23 = vadd.f32 %v2186_v14, %v2543_v5  ;;  %vm1406_vm9 = vcmp.ge.f32.partialorder %v968_v17, 0.0  ;;  %v1534_v25 = vmul.f32 0.2, %v968_v17 }
 0x11b   : > { %1793 = vst.msk [vmem:[%s2552_s26 + $0xd0] sm:$0xff] %vm1766_vm3, %v1664_v21  ;;  %vm1470_vm10 = vcmp.ge.f32.partialorder %v1224_v18, 0.0  ;;  %v1598_v26 = vmul.f32 0.2, %v1224_v18  ;;  %v1728_v27 = vsel %vm1472_vm8, %v1232_v12, %v1600_v22  ;;  %v1235_v29 = vadd.f32 %v2250_v19, %v2543_v5 }
 0x11c   : > { %vm1409_vm11 = vcmp.ge.f32.partialorder %v979_v23, 0.0  ;;  %v1537_v28 = vmul.f32 0.2, %v979_v23  ;;  %1857 = vst.msk [vmem:[%s2552_s26 + $0x2d0] sm:$0xff] %vm1766_vm3, %v1728_v27  ;;  %v1662_v30 = vsel %vm1406_vm9, %v968_v17, %v1534_v25  ;;  %v971_v32 = vadd.f32 %v2543_v5, %v970_v20 }
 0x11d   : > { %v1726_v31 = vsel %vm1470_vm10, %v1224_v18, %v1598_v26  ;;  %v1227_v33 = vadd.f32 %v2543_v5, %v1226_v24  ;;  %v2189_v34 = vpop.f32.mrb[28].mxu0  ;;  %1791 = vst.msk [vmem:[%s2552_s26 + $0xc0] sm:$0xff] %vm1766_vm3, %v1662_v30  ;;  %vm1473_vm12 = vcmp.ge.f32.partialorder %v1235_v29, 0.0  ;;  %v1601_v36 = vmul.f32 0.2, %v1235_v29 }
 0x11e   : > { %1855 = vst.msk [vmem:[%s2552_s26 + $0x2c0] sm:$0xff] %vm1766_vm3, %v1726_v31  ;;  %v1665_v35 = vsel %vm1409_vm11, %v979_v23, %v1537_v28  ;;  %v992_v37 = vadd.f32 %v2189_v34, %v2543_v5  ;;  %v2253_v38 = vpop.f32.mrb[28].mxu1  ;;  %v983_v39 = vpop.f32.mrb[29].mxu0  ;;  %vm1407_vm13 = vcmp.ge.f32.partialorder %v971_v32, 0.0  ;;  %v1535_v40 = vmul.f32 0.2, %v971_v32 }
 0x11f   : > { %1794 = vst.msk [vmem:[%s2552_s26 + $0xd8] sm:$0xff] %vm1766_vm3, %v1665_v35  ;;  %vm1471_vm14 = vcmp.ge.f32.partialorder %v1227_v33, 0.0  ;;  %v1599_v41 = vmul.f32 0.2, %v1227_v33  ;;  %v1729_v42 = vsel %vm1473_vm12, %v1235_v29, %v1601_v36  ;;  %v1248_v44 = vadd.f32 %v2253_v38, %v2543_v5  ;;  %v1239_v45 = vpop.f32.mrb[29].mxu1  ;;  %v2190_v46 = vpop.f32.mrb[30].mxu0 }
 0x120   : > { %vm1412_vm15 = vcmp.ge.f32.partialorder %v992_v37, 0.0  ;;  %v1540_v43 = vmul.f32 0.2, %v992_v37  ;;  %1858 = vst.msk [vmem:[%s2552_s26 + $0x2d8] sm:$0xff] %vm1766_vm3, %v1729_v42  ;;  %v1663_v47 = vsel %vm1407_vm13, %v971_v32, %v1535_v40  ;;  %v984_v49 = vadd.f32 %v2543_v5, %v983_v39  ;;  %v2254_v51 = vpop.f32.mrb[30].mxu1  ;;  %v986_v52 = vpop.f32.mrb[31].mxu0 }
 0x121   : > { %v1727_v48 = vsel %vm1471_vm14, %v1227_v33, %v1599_v41  ;;  %v1240_v50 = vadd.f32 %v2543_v5, %v1239_v45  ;;  %1792 = vst.msk [vmem:[%s2552_s26 + $0xc8] sm:$0xff] %vm1766_vm3, %v1663_v47  ;;  %vm1476_vm0 = vcmp.ge.f32.partialorder %v1248_v44, 0.0  ;;  %v1604_v54 = vmul.f32 0.2, %v1248_v44  ;;  %v1242_v56 = vpop.f32.mrb[31].mxu1 }
 0x122   : > { %1856 = vst.msk [vmem:[%s2552_s26 + $0x2c8] sm:$0xff] %vm1766_vm3, %v1727_v48  ;;  %v1668_v53 = vsel %vm1412_vm15, %v992_v37, %v1540_v43  ;;  %v995_v55 = vadd.f32 %v2190_v46, %v2543_v5  ;;  %vm1410_vm1 = vcmp.ge.f32.partialorder %v984_v49, 0.0  ;;  %v1538_v57 = vmul.f32 0.2, %v984_v49 }
 0x123   : > { %1797 = vst.msk [vmem:[%s2552_s26 + $0xf0] sm:$0xff] %vm1766_vm3, %v1668_v53  ;;  %vm1474_vm2 = vcmp.ge.f32.partialorder %v1240_v50, 0.0  ;;  %v1602_v58 = vmul.f32 0.2, %v1240_v50  ;;  %v1732_v59 = vsel %vm1476_vm0, %v1248_v44, %v1604_v54  ;;  %v1251_v61 = vadd.f32 %v2254_v51, %v2543_v5 }
 0x124   : > { %vm1413_vm4 = vcmp.ge.f32.partialorder %v995_v55, 0.0  ;;  %v1541_v60 = vmul.f32 0.2, %v995_v55  ;;  %1861 = vst.msk [vmem:[%s2552_s26 + $0x2f0] sm:$0xff] %vm1766_vm3, %v1732_v59  ;;  %v1666_v62 = vsel %vm1410_vm1, %v984_v49, %v1538_v57  ;;  %v987_v0 = vadd.f32 %v2543_v5, %v986_v52 }
 0x125   : > { %v1730_v63 = vsel %vm1474_vm2, %v1240_v50, %v1602_v58  ;;  %v1243_v1 = vadd.f32 %v2543_v5, %v1242_v56  ;;  %v2193_v2 = vpop.f32.mrb[32].mxu0  ;;  %1795 = vst.msk [vmem:[%s2552_s26 + $0xe0] sm:$0xff] %vm1766_vm3, %v1666_v62  ;;  %vm1477_vm5 = vcmp.ge.f32.partialorder %v1251_v61, 0.0  ;;  %v1605_v4 = vmul.f32 0.2, %v1251_v61 }
 0x126   : > { %1859 = vst.msk [vmem:[%s2552_s26 + $0x2e0] sm:$0xff] %vm1766_vm3, %v1730_v63  ;;  %v1669_v3 = vsel %vm1413_vm4, %v995_v55, %v1541_v60  ;;  %v1008_v6 = vadd.f32 %v2193_v2, %v2543_v5  ;;  %v2257_v7 = vpop.f32.mrb[32].mxu1  ;;  %v999_v8 = vpop.f32.mrb[33].mxu0  ;;  %vm1411_vm6 = vcmp.ge.f32.partialorder %v987_v0, 0.0  ;;  %v1539_v9 = vmul.f32 0.2, %v987_v0 }
 0x127   : > { %1798 = vst.msk [vmem:[%s2552_s26 + $0xf8] sm:$0xff] %vm1766_vm3, %v1669_v3  ;;  %vm1475_vm7 = vcmp.ge.f32.partialorder %v1243_v1, 0.0  ;;  %v1603_v10 = vmul.f32 0.2, %v1243_v1  ;;  %v1733_v11 = vsel %vm1477_vm5, %v1251_v61, %v1605_v4  ;;  %v1264_v13 = vadd.f32 %v2257_v7, %v2543_v5  ;;  %v1255_v14 = vpop.f32.mrb[33].mxu1  ;;  %v2194_v15 = vpop.f32.mrb[34].mxu0 }
 0x128   : > { %vm1416_vm8 = vcmp.ge.f32.partialorder %v1008_v6, 0.0  ;;  %v1544_v12 = vmul.f32 0.2, %v1008_v6  ;;  %1862 = vst.msk [vmem:[%s2552_s26 + $0x2f8] sm:$0xff] %vm1766_vm3, %v1733_v11  ;;  %v1667_v16 = vsel %vm1411_vm6, %v987_v0, %v1539_v9  ;;  %v1000_v18 = vadd.f32 %v2543_v5, %v999_v8  ;;  %v2258_v20 = vpop.f32.mrb[34].mxu1  ;;  %v1002_v21 = vpop.f32.mrb[35].mxu0 }
 0x129   : > { %v1731_v17 = vsel %vm1475_vm7, %v1243_v1, %v1603_v10  ;;  %v1256_v19 = vadd.f32 %v2543_v5, %v1255_v14  ;;  %1796 = vst.msk [vmem:[%s2552_s26 + $0xe8] sm:$0xff] %vm1766_vm3, %v1667_v16  ;;  %vm1480_vm9 = vcmp.ge.f32.partialorder %v1264_v13, 0.0  ;;  %v1608_v23 = vmul.f32 0.2, %v1264_v13  ;;  %v1258_v25 = vpop.f32.mrb[35].mxu1 }
 0x12a   : > { %1860 = vst.msk [vmem:[%s2552_s26 + $0x2e8] sm:$0xff] %vm1766_vm3, %v1731_v17  ;;  %v1672_v22 = vsel %vm1416_vm8, %v1008_v6, %v1544_v12  ;;  %v1011_v24 = vadd.f32 %v2194_v15, %v2543_v5  ;;  %vm1414_vm10 = vcmp.ge.f32.partialorder %v1000_v18, 0.0  ;;  %v1542_v26 = vmul.f32 0.2, %v1000_v18 }
 0x12b   : > { %1801 = vst.msk [vmem:[%s2552_s26 + $0x110] sm:$0xff] %vm1766_vm3, %v1672_v22  ;;  %vm1478_vm11 = vcmp.ge.f32.partialorder %v1256_v19, 0.0  ;;  %v1606_v27 = vmul.f32 0.2, %v1256_v19  ;;  %v1736_v28 = vsel %vm1480_vm9, %v1264_v13, %v1608_v23  ;;  %v1267_v30 = vadd.f32 %v2258_v20, %v2543_v5 }
 0x12c   : > { %vm1417_vm12 = vcmp.ge.f32.partialorder %v1011_v24, 0.0  ;;  %v1545_v29 = vmul.f32 0.2, %v1011_v24  ;;  %1865 = vst.msk [vmem:[%s2552_s26 + $0x310] sm:$0xff] %vm1766_vm3, %v1736_v28  ;;  %v1670_v31 = vsel %vm1414_vm10, %v1000_v18, %v1542_v26  ;;  %v1003_v33 = vadd.f32 %v2543_v5, %v1002_v21 }
 0x12d   : > { %v1734_v32 = vsel %vm1478_vm11, %v1256_v19, %v1606_v27  ;;  %v1259_v34 = vadd.f32 %v2543_v5, %v1258_v25  ;;  %v2197_v35 = vpop.f32.mrb[36].mxu0  ;;  %1799 = vst.msk [vmem:[%s2552_s26 + $0x100] sm:$0xff] %vm1766_vm3, %v1670_v31  ;;  %vm1481_vm13 = vcmp.ge.f32.partialorder %v1267_v30, 0.0  ;;  %v1609_v37 = vmul.f32 0.2, %v1267_v30 }
 0x12e   : > { %1863 = vst.msk [vmem:[%s2552_s26 + $0x300] sm:$0xff] %vm1766_vm3, %v1734_v32  ;;  %v1673_v36 = vsel %vm1417_vm12, %v1011_v24, %v1545_v29  ;;  %v1024_v38 = vadd.f32 %v2197_v35, %v2543_v5  ;;  %v2261_v39 = vpop.f32.mrb[36].mxu1  ;;  %v1015_v40 = vpop.f32.mrb[37].mxu0  ;;  %vm1415_vm14 = vcmp.ge.f32.partialorder %v1003_v33, 0.0  ;;  %v1543_v41 = vmul.f32 0.2, %v1003_v33 }
 0x12f   : > { %1802 = vst.msk [vmem:[%s2552_s26 + $0x118] sm:$0xff] %vm1766_vm3, %v1673_v36  ;;  %vm1479_vm15 = vcmp.ge.f32.partialorder %v1259_v34, 0.0  ;;  %v1607_v42 = vmul.f32 0.2, %v1259_v34  ;;  %v1737_v43 = vsel %vm1481_vm13, %v1267_v30, %v1609_v37  ;;  %v1280_v45 = vadd.f32 %v2261_v39, %v2543_v5  ;;  %v1271_v46 = vpop.f32.mrb[37].mxu1  ;;  %v2198_v47 = vpop.f32.mrb[38].mxu0 }
 0x130   : > { %vm1420_vm0 = vcmp.ge.f32.partialorder %v1024_v38, 0.0  ;;  %v1548_v44 = vmul.f32 0.2, %v1024_v38  ;;  %1866 = vst.msk [vmem:[%s2552_s26 + $0x318] sm:$0xff] %vm1766_vm3, %v1737_v43  ;;  %v1671_v48 = vsel %vm1415_vm14, %v1003_v33, %v1543_v41  ;;  %v1016_v50 = vadd.f32 %v2543_v5, %v1015_v40  ;;  %v2262_v52 = vpop.f32.mrb[38].mxu1  ;;  %v1018_v53 = vpop.f32.mrb[39].mxu0 }
 0x131   : > { %v1735_v49 = vsel %vm1479_vm15, %v1259_v34, %v1607_v42  ;;  %v1272_v51 = vadd.f32 %v2543_v5, %v1271_v46  ;;  %1800 = vst.msk [vmem:[%s2552_s26 + $0x108] sm:$0xff] %vm1766_vm3, %v1671_v48  ;;  %vm1484_vm1 = vcmp.ge.f32.partialorder %v1280_v45, 0.0  ;;  %v1612_v55 = vmul.f32 0.2, %v1280_v45  ;;  %v1274_v57 = vpop.f32.mrb[39].mxu1 }
 0x132   : > { %1864 = vst.msk [vmem:[%s2552_s26 + $0x308] sm:$0xff] %vm1766_vm3, %v1735_v49  ;;  %v1676_v54 = vsel %vm1420_vm0, %v1024_v38, %v1548_v44  ;;  %v1027_v56 = vadd.f32 %v2198_v47, %v2543_v5  ;;  %vm1418_vm2 = vcmp.ge.f32.partialorder %v1016_v50, 0.0  ;;  %v1546_v58 = vmul.f32 0.2, %v1016_v50  ;;  %v2804_v34 = vld [vmem:[%s2945_s2] ss:$0 sm:$0xff] }
 0x133   : > { %1805 = vst.msk [vmem:[%s2552_s26 + $0x130] sm:$0xff] %vm1766_vm3, %v1676_v54  ;;  %vm1482_vm4 = vcmp.ge.f32.partialorder %v1272_v51, 0.0  ;;  %v1610_v59 = vmul.f32 0.2, %v1272_v51  ;;  %v1740_v60 = vsel %vm1484_vm1, %v1280_v45, %v1612_v55  ;;  %v1283_v62 = vadd.f32 %v2262_v52, %v2543_v5 }
 0x134   : > { %vm1421_vm5 = vcmp.ge.f32.partialorder %v1027_v56, 0.0  ;;  %v1549_v61 = vmul.f32 0.2, %v1027_v56  ;;  %1869 = vst.msk [vmem:[%s2552_s26 + $0x330] sm:$0xff] %vm1766_vm3, %v1740_v60  ;;  %v1674_v63 = vsel %vm1418_vm2, %v1016_v50, %v1546_v58  ;;  %v1019_v1 = vadd.f32 %v2543_v5, %v1018_v53 }
 0x135   : > { %v1738_v0 = vsel %vm1482_vm4, %v1272_v51, %v1610_v59  ;;  %v1275_v2 = vadd.f32 %v2543_v5, %v1274_v57  ;;  %v2201_v3 = vpop.f32.mrb[40].mxu0  ;;  %1803 = vst.msk [vmem:[%s2552_s26 + $0x120] sm:$0xff] %vm1766_vm3, %v1674_v63  ;;  %vm1485_vm6 = vcmp.ge.f32.partialorder %v1283_v62, 0.0  ;;  %v1613_v6 = vmul.f32 0.2, %v1283_v62 }
 0x136   : > { %1867 = vst.msk [vmem:[%s2552_s26 + $0x320] sm:$0xff] %vm1766_vm3, %v1738_v0  ;;  %v1677_v4 = vsel %vm1421_vm5, %v1027_v56, %v1549_v61  ;;  %v1040_v7 = vadd.f32 %v2201_v3, %v2543_v5  ;;  %v2265_v8 = vpop.f32.mrb[40].mxu1  ;;  %v1031_v9 = vpop.f32.mrb[41].mxu0  ;;  %vm1419_vm7 = vcmp.ge.f32.partialorder %v1019_v1, 0.0  ;;  %v1547_v10 = vmul.f32 0.2, %v1019_v1 }
 0x137   : > { %1806 = vst.msk [vmem:[%s2552_s26 + $0x138] sm:$0xff] %vm1766_vm3, %v1677_v4  ;;  %vm1483_vm8 = vcmp.ge.f32.partialorder %v1275_v2, 0.0  ;;  %v1611_v11 = vmul.f32 0.2, %v1275_v2  ;;  %v1741_v12 = vsel %vm1485_vm6, %v1283_v62, %v1613_v6  ;;  %v1296_v14 = vadd.f32 %v2265_v8, %v2543_v5  ;;  %v1287_v15 = vpop.f32.mrb[41].mxu1  ;;  %v2202_v16 = vpop.f32.mrb[42].mxu0 }
 0x138   : > { %vm1424_vm9 = vcmp.ge.f32.partialorder %v1040_v7, 0.0  ;;  %v1552_v13 = vmul.f32 0.2, %v1040_v7  ;;  %1870 = vst.msk [vmem:[%s2552_s26 + $0x338] sm:$0xff] %vm1766_vm3, %v1741_v12  ;;  %v1675_v17 = vsel %vm1419_vm7, %v1019_v1, %v1547_v10  ;;  %v1032_v19 = vadd.f32 %v2543_v5, %v1031_v9  ;;  %v2266_v21 = vpop.f32.mrb[42].mxu1  ;;  %v1034_v22 = vpop.f32.mrb[43].mxu0 }
 0x139   : > { %v1739_v18 = vsel %vm1483_vm8, %v1275_v2, %v1611_v11  ;;  %v1288_v20 = vadd.f32 %v2543_v5, %v1287_v15  ;;  %1804 = vst.msk [vmem:[%s2552_s26 + $0x128] sm:$0xff] %vm1766_vm3, %v1675_v17  ;;  %vm1488_vm10 = vcmp.ge.f32.partialorder %v1296_v14, 0.0  ;;  %v1616_v24 = vmul.f32 0.2, %v1296_v14  ;;  %v1290_v26 = vpop.f32.mrb[43].mxu1 }
 0x13a   : > { %1868 = vst.msk [vmem:[%s2552_s26 + $0x328] sm:$0xff] %vm1766_vm3, %v1739_v18  ;;  %v1680_v23 = vsel %vm1424_vm9, %v1040_v7, %v1552_v13  ;;  %v1043_v25 = vadd.f32 %v2202_v16, %v2543_v5  ;;  %vm1422_vm11 = vcmp.ge.f32.partialorder %v1032_v19, 0.0  ;;  %v1550_v27 = vmul.f32 0.2, %v1032_v19 }
 0x13b   : > { %1809 = vst.msk [vmem:[%s2552_s26 + $0x150] sm:$0xff] %vm1766_vm3, %v1680_v23  ;;  %vm1486_vm12 = vcmp.ge.f32.partialorder %v1288_v20, 0.0  ;;  %v1614_v28 = vmul.f32 0.2, %v1288_v20  ;;  %v1744_v29 = vsel %vm1488_vm10, %v1296_v14, %v1616_v24  ;;  %v1299_v31 = vadd.f32 %v2266_v21, %v2543_v5 }
 0x13c   : > { %vm1425_vm13 = vcmp.ge.f32.partialorder %v1043_v25, 0.0  ;;  %v1553_v30 = vmul.f32 0.2, %v1043_v25  ;;  %1873 = vst.msk [vmem:[%s2552_s26 + $0x350] sm:$0xff] %vm1766_vm3, %v1744_v29  ;;  %v1678_v32 = vsel %vm1422_vm11, %v1032_v19, %v1550_v27  ;;  %v1035_v35 = vadd.f32 %v2804_v34, %v1034_v22 }
 0x13d   : > { %v1742_v33 = vsel %vm1486_vm12, %v1288_v20, %v1614_v28  ;;  %v1291_v36 = vadd.f32 %v2804_v34, %v1290_v26  ;;  %v2205_v37 = vpop.f32.mrb[44].mxu0  ;;  %1807 = vst.msk [vmem:[%s2552_s26 + $0x140] sm:$0xff] %vm1766_vm3, %v1678_v32  ;;  %vm1489_vm14 = vcmp.ge.f32.partialorder %v1299_v31, 0.0  ;;  %v1617_v38 = vmul.f32 0.2, %v1299_v31 }
 0x13e   : > { %1871 = vst.msk [vmem:[%s2552_s26 + $0x340] sm:$0xff] %vm1766_vm3, %v1742_v33  ;;  %v1681_v5 = vsel %vm1425_vm13, %v1043_v25, %v1553_v30  ;;  %v1056_v39 = vadd.f32 %v2804_v34, %v2205_v37  ;;  %v2269_v40 = vpop.f32.mrb[44].mxu1  ;;  %v1047_v41 = vpop.f32.mrb[45].mxu0  ;;  %vm1423_vm15 = vcmp.ge.f32.partialorder %v1035_v35, 0.0  ;;  %v1551_v42 = vmul.f32 0.2, %v1035_v35 }
 0x13f   : > { %1810 = vst.msk [vmem:[%s2552_s26 + $0x158] sm:$0xff] %vm1766_vm3, %v1681_v5  ;;  %vm1487_vm0 = vcmp.ge.f32.partialorder %v1291_v36, 0.0  ;;  %v1615_v43 = vmul.f32 0.2, %v1291_v36  ;;  %v1745_v44 = vsel %vm1489_vm14, %v1299_v31, %v1617_v38  ;;  %v1312_v46 = vadd.f32 %v2804_v34, %v2269_v40  ;;  %v1303_v47 = vpop.f32.mrb[45].mxu1  ;;  %v2206_v48 = vpop.f32.mrb[46].mxu0 }
 0x140   : > { %vm1428_vm1 = vcmp.ge.f32.partialorder %v1056_v39, 0.0  ;;  %v1556_v45 = vmul.f32 0.2, %v1056_v39  ;;  %1874 = vst.msk [vmem:[%s2552_s26 + $0x358] sm:$0xff] %vm1766_vm3, %v1745_v44  ;;  %v1679_v49 = vsel %vm1423_vm15, %v1035_v35, %v1551_v42  ;;  %v1048_v51 = vadd.f32 %v2804_v34, %v1047_v41  ;;  %v2270_v53 = vpop.f32.mrb[46].mxu1  ;;  %v1050_v54 = vpop.f32.mrb[47].mxu0 }
 0x141   : > { %v1743_v50 = vsel %vm1487_vm0, %v1291_v36, %v1615_v43  ;;  %v1304_v52 = vadd.f32 %v2804_v34, %v1303_v47  ;;  %1808 = vst.msk [vmem:[%s2552_s26 + $0x148] sm:$0xff] %vm1766_vm3, %v1679_v49  ;;  %vm1492_vm2 = vcmp.ge.f32.partialorder %v1312_v46, 0.0  ;;  %v1620_v56 = vmul.f32 0.2, %v1312_v46  ;;  %v1306_v58 = vpop.f32.mrb[47].mxu1 }
 0x142   : > { %1872 = vst.msk [vmem:[%s2552_s26 + $0x348] sm:$0xff] %vm1766_vm3, %v1743_v50  ;;  %v1684_v55 = vsel %vm1428_vm1, %v1056_v39, %v1556_v45  ;;  %v1059_v57 = vadd.f32 %v2804_v34, %v2206_v48  ;;  %vm1426_vm4 = vcmp.ge.f32.partialorder %v1048_v51, 0.0  ;;  %v1554_v59 = vmul.f32 0.2, %v1048_v51 }
 0x143   : > { %1813 = vst.msk [vmem:[%s2552_s26 + $0x170] sm:$0xff] %vm1766_vm3, %v1684_v55  ;;  %vm1490_vm5 = vcmp.ge.f32.partialorder %v1304_v52, 0.0  ;;  %v1618_v60 = vmul.f32 0.2, %v1304_v52  ;;  %v1748_v61 = vsel %vm1492_vm2, %v1312_v46, %v1620_v56  ;;  %v1315_v63 = vadd.f32 %v2804_v34, %v2270_v53 }
 0x144   : > { %vm1429_vm6 = vcmp.ge.f32.partialorder %v1059_v57, 0.0  ;;  %v1557_v62 = vmul.f32 0.2, %v1059_v57  ;;  %1877 = vst.msk [vmem:[%s2552_s26 + $0x370] sm:$0xff] %vm1766_vm3, %v1748_v61  ;;  %v1682_v0 = vsel %vm1426_vm4, %v1048_v51, %v1554_v59  ;;  %v1051_v2 = vadd.f32 %v2804_v34, %v1050_v54 }
 0x145   : > { %v1746_v1 = vsel %vm1490_vm5, %v1304_v52, %v1618_v60  ;;  %v1307_v3 = vadd.f32 %v2804_v34, %v1306_v58  ;;  %v2209_v4 = vpop.f32.mrb[48].mxu0  ;;  %1811 = vst.msk [vmem:[%s2552_s26 + $0x160] sm:$0xff] %vm1766_vm3, %v1682_v0  ;;  %vm1493_vm7 = vcmp.ge.f32.partialorder %v1315_v63, 0.0  ;;  %v1621_v7 = vmul.f32 0.2, %v1315_v63 }
 0x146   : > { %1875 = vst.msk [vmem:[%s2552_s26 + $0x360] sm:$0xff] %vm1766_vm3, %v1746_v1  ;;  %v1685_v6 = vsel %vm1429_vm6, %v1059_v57, %v1557_v62  ;;  %v1072_v8 = vadd.f32 %v2804_v34, %v2209_v4  ;;  %v2273_v9 = vpop.f32.mrb[48].mxu1  ;;  %v1063_v10 = vpop.f32.mrb[49].mxu0  ;;  %vm1427_vm8 = vcmp.ge.f32.partialorder %v1051_v2, 0.0  ;;  %v1555_v11 = vmul.f32 0.2, %v1051_v2 }
 0x147   : > { %1814 = vst.msk [vmem:[%s2552_s26 + $0x178] sm:$0xff] %vm1766_vm3, %v1685_v6  ;;  %vm1491_vm9 = vcmp.ge.f32.partialorder %v1307_v3, 0.0  ;;  %v1619_v12 = vmul.f32 0.2, %v1307_v3  ;;  %v1749_v13 = vsel %vm1493_vm7, %v1315_v63, %v1621_v7  ;;  %v1328_v15 = vadd.f32 %v2804_v34, %v2273_v9  ;;  %v1319_v16 = vpop.f32.mrb[49].mxu1  ;;  %v2210_v17 = vpop.f32.mrb[50].mxu0 }
 0x148   : > { %vm1432_vm10 = vcmp.ge.f32.partialorder %v1072_v8, 0.0  ;;  %v1560_v14 = vmul.f32 0.2, %v1072_v8  ;;  %1878 = vst.msk [vmem:[%s2552_s26 + $0x378] sm:$0xff] %vm1766_vm3, %v1749_v13  ;;  %v1683_v18 = vsel %vm1427_vm8, %v1051_v2, %v1555_v11  ;;  %v1064_v20 = vadd.f32 %v2804_v34, %v1063_v10  ;;  %v2274_v22 = vpop.f32.mrb[50].mxu1  ;;  %v1066_v23 = vpop.f32.mrb[51].mxu0 }
 0x149   : > { %v1747_v19 = vsel %vm1491_vm9, %v1307_v3, %v1619_v12  ;;  %v1320_v21 = vadd.f32 %v2804_v34, %v1319_v16  ;;  %1812 = vst.msk [vmem:[%s2552_s26 + $0x168] sm:$0xff] %vm1766_vm3, %v1683_v18  ;;  %vm1496_vm11 = vcmp.ge.f32.partialorder %v1328_v15, 0.0  ;;  %v1624_v25 = vmul.f32 0.2, %v1328_v15  ;;  %v1322_v27 = vpop.f32.mrb[51].mxu1 }
 0x14a   : > { %1876 = vst.msk [vmem:[%s2552_s26 + $0x368] sm:$0xff] %vm1766_vm3, %v1747_v19  ;;  %v1688_v24 = vsel %vm1432_vm10, %v1072_v8, %v1560_v14  ;;  %v1075_v26 = vadd.f32 %v2804_v34, %v2210_v17  ;;  %vm1430_vm12 = vcmp.ge.f32.partialorder %v1064_v20, 0.0  ;;  %v1558_v28 = vmul.f32 0.2, %v1064_v20 }
 0x14b   : > { %1817 = vst.msk [vmem:[%s2552_s26 + $0x190] sm:$0xff] %vm1766_vm3, %v1688_v24  ;;  %vm1494_vm13 = vcmp.ge.f32.partialorder %v1320_v21, 0.0  ;;  %v1622_v29 = vmul.f32 0.2, %v1320_v21  ;;  %v1752_v30 = vsel %vm1496_vm11, %v1328_v15, %v1624_v25  ;;  %v1331_v32 = vadd.f32 %v2804_v34, %v2274_v22 }
 0x14c   : > { %vm1433_vm14 = vcmp.ge.f32.partialorder %v1075_v26, 0.0  ;;  %v1561_v31 = vmul.f32 0.2, %v1075_v26  ;;  %1881 = vst.msk [vmem:[%s2552_s26 + $0x390] sm:$0xff] %vm1766_vm3, %v1752_v30  ;;  %v1686_v33 = vsel %vm1430_vm12, %v1064_v20, %v1558_v28  ;;  %v1067_v36 = vadd.f32 %v2804_v34, %v1066_v23 }
 0x14d   : > { %v1750_v35 = vsel %vm1494_vm13, %v1320_v21, %v1622_v29  ;;  %v1323_v37 = vadd.f32 %v2804_v34, %v1322_v27  ;;  %v2213_v5 = vpop.f32.mrb[52].mxu0  ;;  %1815 = vst.msk [vmem:[%s2552_s26 + $0x180] sm:$0xff] %vm1766_vm3, %v1686_v33  ;;  %vm1497_vm15 = vcmp.ge.f32.partialorder %v1331_v32, 0.0  ;;  %v1625_v39 = vmul.f32 0.2, %v1331_v32 }
 0x14e   : > { %1879 = vst.msk [vmem:[%s2552_s26 + $0x380] sm:$0xff] %vm1766_vm3, %v1750_v35  ;;  %v1689_v38 = vsel %vm1433_vm14, %v1075_v26, %v1561_v31  ;;  %v1088_v40 = vadd.f32 %v2804_v34, %v2213_v5  ;;  %v2277_v41 = vpop.f32.mrb[52].mxu1  ;;  %v1079_v42 = vpop.f32.mrb[53].mxu0  ;;  %vm1431_vm0 = vcmp.ge.f32.partialorder %v1067_v36, 0.0  ;;  %v1559_v43 = vmul.f32 0.2, %v1067_v36 }
 0x14f   : > { %1818 = vst.msk [vmem:[%s2552_s26 + $0x198] sm:$0xff] %vm1766_vm3, %v1689_v38  ;;  %vm1495_vm1 = vcmp.ge.f32.partialorder %v1323_v37, 0.0  ;;  %v1623_v44 = vmul.f32 0.2, %v1323_v37  ;;  %v1753_v45 = vsel %vm1497_vm15, %v1331_v32, %v1625_v39  ;;  %v1344_v47 = vadd.f32 %v2804_v34, %v2277_v41  ;;  %v1335_v48 = vpop.f32.mrb[53].mxu1  ;;  %v2214_v49 = vpop.f32.mrb[54].mxu0 }
 0x150   : > { %vm1436_vm2 = vcmp.ge.f32.partialorder %v1088_v40, 0.0  ;;  %v1564_v46 = vmul.f32 0.2, %v1088_v40  ;;  %1882 = vst.msk [vmem:[%s2552_s26 + $0x398] sm:$0xff] %vm1766_vm3, %v1753_v45  ;;  %v1687_v50 = vsel %vm1431_vm0, %v1067_v36, %v1559_v43  ;;  %v1080_v52 = vadd.f32 %v2804_v34, %v1079_v42  ;;  %v2278_v54 = vpop.f32.mrb[54].mxu1  ;;  %v1082_v55 = vpop.f32.mrb[55].mxu0 }
 0x151   : > { %v1751_v51 = vsel %vm1495_vm1, %v1323_v37, %v1623_v44  ;;  %v1336_v53 = vadd.f32 %v2804_v34, %v1335_v48  ;;  %1816 = vst.msk [vmem:[%s2552_s26 + $0x188] sm:$0xff] %vm1766_vm3, %v1687_v50  ;;  %vm1500_vm4 = vcmp.ge.f32.partialorder %v1344_v47, 0.0  ;;  %v1628_v57 = vmul.f32 0.2, %v1344_v47  ;;  %v1338_v59 = vpop.f32.mrb[55].mxu1 }
 0x152   : > { %1880 = vst.msk [vmem:[%s2552_s26 + $0x388] sm:$0xff] %vm1766_vm3, %v1751_v51  ;;  %v1692_v56 = vsel %vm1436_vm2, %v1088_v40, %v1564_v46  ;;  %v1091_v58 = vadd.f32 %v2804_v34, %v2214_v49  ;;  %vm1434_vm5 = vcmp.ge.f32.partialorder %v1080_v52, 0.0  ;;  %v1562_v60 = vmul.f32 0.2, %v1080_v52 }
 0x153   : > { %1821 = vst.msk [vmem:[%s2552_s26 + $0x1b0] sm:$0xff] %vm1766_vm3, %v1692_v56  ;;  %vm1498_vm6 = vcmp.ge.f32.partialorder %v1336_v53, 0.0  ;;  %v1626_v61 = vmul.f32 0.2, %v1336_v53  ;;  %v1756_v62 = vsel %vm1500_vm4, %v1344_v47, %v1628_v57  ;;  %v1347_v0 = vadd.f32 %v2804_v34, %v2278_v54 }
 0x154   : > { %vm1437_vm7 = vcmp.ge.f32.partialorder %v1091_v58, 0.0  ;;  %v1565_v63 = vmul.f32 0.2, %v1091_v58  ;;  %1885 = vst.msk [vmem:[%s2552_s26 + $0x3b0] sm:$0xff] %vm1766_vm3, %v1756_v62  ;;  %v1690_v1 = vsel %vm1434_vm5, %v1080_v52, %v1562_v60  ;;  %v1083_v3 = vadd.f32 %v2804_v34, %v1082_v55 }
 0x155   : > { %v1754_v2 = vsel %vm1498_vm6, %v1336_v53, %v1626_v61  ;;  %v1339_v4 = vadd.f32 %v2804_v34, %v1338_v59  ;;  %v2217_v6 = vpop.f32.mrb[56].mxu0  ;;  %1819 = vst.msk [vmem:[%s2552_s26 + $0x1a0] sm:$0xff] %vm1766_vm3, %v1690_v1  ;;  %vm1501_vm8 = vcmp.ge.f32.partialorder %v1347_v0, 0.0  ;;  %v1629_v8 = vmul.f32 0.2, %v1347_v0 }
 0x156   : > { %1883 = vst.msk [vmem:[%s2552_s26 + $0x3a0] sm:$0xff] %vm1766_vm3, %v1754_v2  ;;  %v1693_v7 = vsel %vm1437_vm7, %v1091_v58, %v1565_v63  ;;  %v1104_v9 = vadd.f32 %v2804_v34, %v2217_v6  ;;  %v2281_v10 = vpop.f32.mrb[56].mxu1  ;;  %v1095_v11 = vpop.f32.mrb[57].mxu0  ;;  %vm1435_vm9 = vcmp.ge.f32.partialorder %v1083_v3, 0.0  ;;  %v1563_v12 = vmul.f32 0.2, %v1083_v3 }
 0x157   : > { %1822 = vst.msk [vmem:[%s2552_s26 + $0x1b8] sm:$0xff] %vm1766_vm3, %v1693_v7  ;;  %vm1499_vm10 = vcmp.ge.f32.partialorder %v1339_v4, 0.0  ;;  %v1627_v13 = vmul.f32 0.2, %v1339_v4  ;;  %v1757_v14 = vsel %vm1501_vm8, %v1347_v0, %v1629_v8  ;;  %v1360_v16 = vadd.f32 %v2804_v34, %v2281_v10  ;;  %v1351_v17 = vpop.f32.mrb[57].mxu1  ;;  %v2218_v18 = vpop.f32.mrb[58].mxu0 }
 0x158   : > { %vm1440_vm11 = vcmp.ge.f32.partialorder %v1104_v9, 0.0  ;;  %v1568_v15 = vmul.f32 0.2, %v1104_v9  ;;  %1886 = vst.msk [vmem:[%s2552_s26 + $0x3b8] sm:$0xff] %vm1766_vm3, %v1757_v14  ;;  %v1691_v19 = vsel %vm1435_vm9, %v1083_v3, %v1563_v12  ;;  %v1096_v21 = vadd.f32 %v2804_v34, %v1095_v11  ;;  %v2282_v23 = vpop.f32.mrb[58].mxu1  ;;  %v1098_v24 = vpop.f32.mrb[59].mxu0 }
 0x159   : > { %v1755_v20 = vsel %vm1499_vm10, %v1339_v4, %v1627_v13  ;;  %v1352_v22 = vadd.f32 %v2804_v34, %v1351_v17  ;;  %1820 = vst.msk [vmem:[%s2552_s26 + $0x1a8] sm:$0xff] %vm1766_vm3, %v1691_v19  ;;  %vm1504_vm12 = vcmp.ge.f32.partialorder %v1360_v16, 0.0  ;;  %v1632_v26 = vmul.f32 0.2, %v1360_v16  ;;  %v1354_v28 = vpop.f32.mrb[59].mxu1 }
 0x15a   : > { %1884 = vst.msk [vmem:[%s2552_s26 + $0x3a8] sm:$0xff] %vm1766_vm3, %v1755_v20  ;;  %v1696_v25 = vsel %vm1440_vm11, %v1104_v9, %v1568_v15  ;;  %v1107_v27 = vadd.f32 %v2804_v34, %v2218_v18  ;;  %vm1438_vm13 = vcmp.ge.f32.partialorder %v1096_v21, 0.0  ;;  %v1566_v29 = vmul.f32 0.2, %v1096_v21 }
 0x15b   : > { %1825 = vst.msk [vmem:[%s2552_s26 + $0x1d0] sm:$0xff] %vm1766_vm3, %v1696_v25  ;;  %vm1502_vm14 = vcmp.ge.f32.partialorder %v1352_v22, 0.0  ;;  %v1630_v30 = vmul.f32 0.2, %v1352_v22  ;;  %v1760_v31 = vsel %vm1504_vm12, %v1360_v16, %v1632_v26  ;;  %v1363_v33 = vadd.f32 %v2804_v34, %v2282_v23 }
 0x15c   : > { %vm1441_vm15 = vcmp.ge.f32.partialorder %v1107_v27, 0.0  ;;  %v1569_v32 = vmul.f32 0.2, %v1107_v27  ;;  %1889 = vst.msk [vmem:[%s2552_s26 + $0x3d0] sm:$0xff] %vm1766_vm3, %v1760_v31  ;;  %v1694_v35 = vsel %vm1438_vm13, %v1096_v21, %v1566_v29  ;;  %v1099_v37 = vadd.f32 %v2804_v34, %v1098_v24 }
 0x15d   : > { %v1758_v36 = vsel %vm1502_vm14, %v1352_v22, %v1630_v30  ;;  %v1355_v5 = vadd.f32 %v2804_v34, %v1354_v28  ;;  %v2221_v38 = vpop.f32.mrb[60].mxu0  ;;  %1823 = vst.msk [vmem:[%s2552_s26 + $0x1c0] sm:$0xff] %vm1766_vm3, %v1694_v35  ;;  %vm1505_vm0 = vcmp.ge.f32.partialorder %v1363_v33, 0.0  ;;  %v1633_v40 = vmul.f32 0.2, %v1363_v33 }
 0x15e   : > { %1887 = vst.msk [vmem:[%s2552_s26 + $0x3c0] sm:$0xff] %vm1766_vm3, %v1758_v36  ;;  %v1697_v39 = vsel %vm1441_vm15, %v1107_v27, %v1569_v32  ;;  %v1120_v41 = vadd.f32 %v2804_v34, %v2221_v38  ;;  %v2285_v42 = vpop.f32.mrb[60].mxu1  ;;  %v1111_v43 = vpop.f32.mrb[61].mxu0  ;;  %vm1439_vm1 = vcmp.ge.f32.partialorder %v1099_v37, 0.0  ;;  %v1567_v44 = vmul.f32 0.2, %v1099_v37 }
 0x15f   : > { %1826 = vst.msk [vmem:[%s2552_s26 + $0x1d8] sm:$0xff] %vm1766_vm3, %v1697_v39  ;;  %vm1503_vm2 = vcmp.ge.f32.partialorder %v1355_v5, 0.0  ;;  %v1631_v45 = vmul.f32 0.2, %v1355_v5  ;;  %v1761_v46 = vsel %vm1505_vm0, %v1363_v33, %v1633_v40  ;;  %v1376_v48 = vadd.f32 %v2804_v34, %v2285_v42  ;;  %v1367_v49 = vpop.f32.mrb[61].mxu1  ;;  %v2222_v50 = vpop.f32.mrb[62].mxu0 }
 0x160   : > { %vm1444_vm4 = vcmp.ge.f32.partialorder %v1120_v41, 0.0  ;;  %v1572_v47 = vmul.f32 0.2, %v1120_v41  ;;  %1890 = vst.msk [vmem:[%s2552_s26 + $0x3d8] sm:$0xff] %vm1766_vm3, %v1761_v46  ;;  %v1695_v51 = vsel %vm1439_vm1, %v1099_v37, %v1567_v44  ;;  %v1112_v53 = vadd.f32 %v2804_v34, %v1111_v43  ;;  %v2286_v55 = vpop.f32.mrb[62].mxu1  ;;  %v1114_v56 = vpop.f32.mrb[63].mxu0 }
 0x161   : > { %v1759_v52 = vsel %vm1503_vm2, %v1355_v5, %v1631_v45  ;;  %v1368_v54 = vadd.f32 %v2804_v34, %v1367_v49  ;;  %1824 = vst.msk [vmem:[%s2552_s26 + $0x1c8] sm:$0xff] %vm1766_vm3, %v1695_v51  ;;  %vm1508_vm5 = vcmp.ge.f32.partialorder %v1376_v48, 0.0  ;;  %v1636_v58 = vmul.f32 0.2, %v1376_v48  ;;  %v1370_v60 = vpop.f32.mrb[63].mxu1 }
 0x162   : > { %1888 = vst.msk [vmem:[%s2552_s26 + $0x3c8] sm:$0xff] %vm1766_vm3, %v1759_v52  ;;  %v1700_v57 = vsel %vm1444_vm4, %v1120_v41, %v1572_v47  ;;  %v1123_v59 = vadd.f32 %v2804_v34, %v2222_v50  ;;  %vm1442_vm6 = vcmp.ge.f32.partialorder %v1112_v53, 0.0  ;;  %v1570_v61 = vmul.f32 0.2, %v1112_v53 }
 0x163   : > { %1829 = vst.msk [vmem:[%s2552_s26 + $0x1f0] sm:$0xff] %vm1766_vm3, %v1700_v57  ;;  %vm1506_vm7 = vcmp.ge.f32.partialorder %v1368_v54, 0.0  ;;  %v1634_v62 = vmul.f32 0.2, %v1368_v54  ;;  %v1764_v63 = vsel %vm1508_vm5, %v1376_v48, %v1636_v58  ;;  %v1379_v1 = vadd.f32 %v2804_v34, %v2286_v55 }
 0x164   : > { %vm1445_vm8 = vcmp.ge.f32.partialorder %v1123_v59, 0.0  ;;  %v1573_v0 = vmul.f32 0.2, %v1123_v59  ;;  %1893 = vst.msk [vmem:[%s2552_s26 + $0x3f0] sm:$0xff] %vm1766_vm3, %v1764_v63  ;;  %v1698_v2 = vsel %vm1442_vm6, %v1112_v53, %v1570_v61  ;;  %v1115_v4 = vadd.f32 %v2804_v34, %v1114_v56 }
 0x165   : > { %v1762_v3 = vsel %vm1506_vm7, %v1368_v54, %v1634_v62  ;;  %v1371_v6 = vadd.f32 %v2804_v34, %v1370_v60  ;;  %1827 = vst.msk [vmem:[%s2552_s26 + $0x1e0] sm:$0xff] %vm1766_vm3, %v1698_v2  ;;  %vm1509_vm9 = vcmp.ge.f32.partialorder %v1379_v1, 0.0  ;;  %v1637_v8 = vmul.f32 0.2, %v1379_v1 }
 0x166   : > { %1891 = vst.msk [vmem:[%s2552_s26 + $0x3e0] sm:$0xff] %vm1766_vm3, %v1762_v3  ;;  %v1701_v7 = vsel %vm1445_vm8, %v1123_v59, %v1573_v0  ;;  %vm1443_vm10 = vcmp.ge.f32.partialorder %v1115_v4, 0.0  ;;  %v1571_v9 = vmul.f32 0.2, %v1115_v4 }
 0x167   : > { %1830 = vst.msk [vmem:[%s2552_s26 + $0x1f8] sm:$0xff] %vm1766_vm3, %v1701_v7  ;;  %vm1507_vm11 = vcmp.ge.f32.partialorder %v1371_v6, 0.0  ;;  %v1635_v10 = vmul.f32 0.2, %v1371_v6  ;;  %v1765_v11 = vsel %vm1509_vm9, %v1379_v1, %v1637_v8 }
 0x168   : > { %1894 = vst.msk [vmem:[%s2552_s26 + $0x3f8] sm:$0xff] %vm1766_vm3, %v1765_v11  ;;  %v1699_v12 = vsel %vm1443_vm10, %v1115_v4, %v1571_v9 }
 0x169   : > { %v1763_v13 = vsel %vm1507_vm11, %v1371_v6, %v1635_v10  ;;  %1828 = vst.msk [vmem:[%s2552_s26 + $0x1e8] sm:$0xff] %vm1766_vm3, %v1699_v12 }
 0x16a   : > { %1892 = vst.msk [vmem:[%s2552_s26 + $0x3e8] sm:$0xff] %vm1766_vm3, %v1763_v13 }
 0x16b PF: > { %s13_s12 = sadd.s32 1, %s2370_s12  }
 0x16c   : > { %p10_p4 = scmp.ge.s32.totalorder %s13_s12, 6  }
 0x16e   :  { %12 = sbr.rel (!%p10_p4) target bundleno = 1 (0x1), region = 62 }

// kernel: discriminator_forward.6
= control target key start
LH: loop header
LB: loop body
LE: loop exit
PB: predicated region body
PF: predicated region fallthrough
CT: control target
= control target key end

     0   :  { %v3414_v0 = vmov 0   ;;  %vm804_vm0 = vcmask 130048   ;;  %vm1926_vm5 = vcmask 261120   ;;  %s6702_s1 = inlined_call_operand.vmem [shape: bf16[144,32], index: 1, kind: input, shape index: {}]   ;;  %s6703_s0 = inlined_call_operand.vmem [shape: bf16[1024,144], index: 0, kind: input, shape index: {}]   ;;  %s6704_s2 = inlined_call_operand.vmem [shape: f32[1,32], index: 2, kind: input, shape index: {}]   ;;  %s6705_s3 = inlined_call_operand.vmem [shape: f32[1,32], index: 3, kind: input, shape index: {}]   ;;  %s6706_s4 = inlined_call_operand.vmem [shape: f32[1,32], index: 4, kind: input, shape index: {}]   ;;  %s6707_s5 = inlined_call_operand.vmem [shape: f32[1024,32], index: 5, kind: output, shape index: {}]  }
   0x1   :  { %997 = vmatprep.subr.bf16.mxu0 %v3414_v0  ;;  %v3209_v1 = vld [vmem:[%s6702_s1] sm:$0xff]   ;;  %3190 = vmatprep.subr.bf16.mxu1 %v3414_v0  ;;  %v3210_v2 = vld [vmem:[%s6702_s1 + $0x8] sm:$0xff]   ;;  %v3211_v3 = vld [vmem:[%s6702_s1 + $0x10] sm:$0xff]  }
   0x2   :  { %998 = vmatpush1.bf16.msra.mxu0 %v3209_v1  ;;  %3199 = vmatpush1.bf16.msra.mxu1 %v3209_v1  ;;  %v3212_v4 = vld [vmem:[%s6702_s1 + $0x18] sm:$0xff]   ;;  %v3220_v5 = vld [vmem:[%s6703_s0 + $0x4] ss:$8 sps:$4 sm:$0xff]   ;;  %v3215_v8 = vld [vmem:[%s6702_s1 + $0x30] sm:$0xff]  }
   0x3   :  { %999 = vmatprep.subr.bf16.mxu0 %v3414_v0  ;;  %3191 = vmatprep.subr.bf16.mxu1 %v3414_v0  ;;  %v3213_v6 = vld [vmem:[%s6702_s1 + $0x20] sm:$0xff]   ;;  %v3214_v7 = vld [vmem:[%s6702_s1 + $0x28] sm:$0xff]   ;;  %v3216_v9 = vld [vmem:[%s6702_s1 + $0x38] sm:$0xff]  }
   0x4   :  { %3126 = vmatprep.mubr.msk.bf16.mxu0 %vm804_vm0, %v3220_v5  ;;  %v3217_v10 = vld [vmem:[%s6702_s1 + $0x40] sm:$0xff]   ;;  %v3221_v13 = vld [vmem:[%s6703_s0 + $0x14] ss:$8 sps:$4 sm:$0xff]   ;;  %v3223_v16 = vld [vmem:[%s6703_s0 + $0x10] ss:$8 sps:$4 sm:$0xff]  }
   0x5   :  { %v3218_v11 = vld [vmem:[%s6703_s0] ss:$8 sps:$4 sm:$0xff]   ;;  %v3268_v12 = vld [vmem:[%s6703_s0 + $0x204] ss:$8 sps:$4 sm:$0xff]   ;;  %v3272_v15 = vld [vmem:[%s6703_s0 + $0x214] ss:$8 sps:$4 sm:$0xff]  }
   0x6   :  { %1000 = vmatpush1.bf16.msra.mxu0 %v3210_v2  ;;  %3200 = vmatpush1.bf16.msra.mxu1 %v3210_v2  ;;  %v3266_v14 = vld [vmem:[%s6703_s0 + $0x200] ss:$8 sps:$4 sm:$0xff]   ;;  %v3274_v17 = vld [vmem:[%s6703_s0 + $0x210] ss:$8 sps:$4 sm:$0xff]   ;;  %v3224_v18 = vld [vmem:[%s6703_s0 + $0x24] ss:$8 sps:$4 sm:$0xff]  }
   0x7   :  { %1001 = vmatprep.subr.bf16.mxu0 %v3414_v0  ;;  %3192 = vmatprep.subr.bf16.mxu1 %v3414_v0  ;;  %v3278_v19 = vld [vmem:[%s6703_s0 + $0x224] ss:$8 sps:$4 sm:$0xff]   ;;  %v3226_v20 = vld [vmem:[%s6703_s0 + $0x20] ss:$8 sps:$4 sm:$0xff]   ;;  %v3227_v22 = vld [vmem:[%s6703_s0 + $0x34] ss:$8 sps:$4 sm:$0xff]  }
   0x8   :  { %3158 = vmatprep.mubr.msk.bf16.mxu1 %vm804_vm0, %v3268_v12  ;;  %v3280_v21 = vld [vmem:[%s6703_s0 + $0x220] ss:$8 sps:$4 sm:$0xff]   ;;  %v3284_v23 = vld [vmem:[%s6703_s0 + $0x234] ss:$8 sps:$4 sm:$0xff]   ;;  %v3229_v24 = vld [vmem:[%s6703_s0 + $0x30] ss:$8 sps:$4 sm:$0xff]  }
   0x9   :  { %v3286_v25 = vld [vmem:[%s6703_s0 + $0x230] ss:$8 sps:$4 sm:$0xff]   ;;  %v3230_v26 = vld [vmem:[%s6703_s0 + $0x44] ss:$8 sps:$4 sm:$0xff]   ;;  %v3232_v28 = vld [vmem:[%s6703_s0 + $0x40] ss:$8 sps:$4 sm:$0xff]  }
   0xa   :  { %1002 = vmatpush1.bf16.msra.mxu0 %v3211_v3  ;;  %3201 = vmatpush1.bf16.msra.mxu1 %v3211_v3  ;;  %v3290_v27 = vld [vmem:[%s6703_s0 + $0x244] ss:$8 sps:$4 sm:$0xff]   ;;  %v3292_v29 = vld [vmem:[%s6703_s0 + $0x240] ss:$8 sps:$4 sm:$0xff]   ;;  %v3233_v30 = vld [vmem:[%s6703_s0 + $0x54] ss:$8 sps:$4 sm:$0xff]  }
   0xb   :  { %1003 = vmatprep.subr.bf16.mxu0 %v3414_v0  ;;  %3193 = vmatprep.subr.bf16.mxu1 %v3414_v0  ;;  %v3296_v31 = vld [vmem:[%s6703_s0 + $0x254] ss:$8 sps:$4 sm:$0xff]   ;;  %v3235_v32 = vld [vmem:[%s6703_s0 + $0x50] ss:$8 sps:$4 sm:$0xff]   ;;  %v3236_v34 = vld [vmem:[%s6703_s0 + $0x64] ss:$8 sps:$4 sm:$0xff]  }
   0xc   :  { %v3298_v33 = vld [vmem:[%s6703_s0 + $0x250] ss:$8 sps:$4 sm:$0xff]   ;;  %v3302_v35 = vld [vmem:[%s6703_s0 + $0x264] ss:$8 sps:$4 sm:$0xff]   ;;  %v3238_v36 = vld [vmem:[%s6703_s0 + $0x60] ss:$8 sps:$4 sm:$0xff]  }
   0xd   :  { %v3304_v37 = vld [vmem:[%s6703_s0 + $0x260] ss:$8 sps:$4 sm:$0xff]   ;;  %v3239_v38 = vld [vmem:[%s6703_s0 + $0x74] ss:$8 sps:$4 sm:$0xff]   ;;  %v3241_v40 = vld [vmem:[%s6703_s0 + $0x70] ss:$8 sps:$4 sm:$0xff]  }
   0xe   :  { %1004 = vmatpush1.bf16.msra.mxu0 %v3212_v4  ;;  %3202 = vmatpush1.bf16.msra.mxu1 %v3212_v4  ;;  %v3308_v39 = vld [vmem:[%s6703_s0 + $0x274] ss:$8 sps:$4 sm:$0xff]   ;;  %v3310_v41 = vld [vmem:[%s6703_s0 + $0x270] ss:$8 sps:$4 sm:$0xff]   ;;  %v3242_v42 = vld [vmem:[%s6703_s0 + $0x84] ss:$8 sps:$4 sm:$0xff]  }
   0xf   :  { %1005 = vmatprep.subr.bf16.mxu0 %v3414_v0  ;;  %3194 = vmatprep.subr.bf16.mxu1 %v3414_v0  ;;  %v3314_v43 = vld [vmem:[%s6703_s0 + $0x284] ss:$8 sps:$4 sm:$0xff]   ;;  %v3244_v44 = vld [vmem:[%s6703_s0 + $0x80] ss:$8 sps:$4 sm:$0xff]   ;;  %v3245_v46 = vld [vmem:[%s6703_s0 + $0x94] ss:$8 sps:$4 sm:$0xff]  }
  0x10   :  { %v3316_v45 = vld [vmem:[%s6703_s0 + $0x280] ss:$8 sps:$4 sm:$0xff]   ;;  %v3320_v47 = vld [vmem:[%s6703_s0 + $0x294] ss:$8 sps:$4 sm:$0xff]   ;;  %v3247_v48 = vld [vmem:[%s6703_s0 + $0x90] ss:$8 sps:$4 sm:$0xff]  }
  0x11   :  { %v3322_v49 = vld [vmem:[%s6703_s0 + $0x290] ss:$8 sps:$4 sm:$0xff]   ;;  %v3248_v50 = vld [vmem:[%s6703_s0 + $0xa4] ss:$8 sps:$4 sm:$0xff]   ;;  %v3250_v52 = vld [vmem:[%s6703_s0 + $0xa0] ss:$8 sps:$4 sm:$0xff]  }
  0x12   :  { %1006 = vmatpush1.bf16.msra.mxu0 %v3213_v6  ;;  %3203 = vmatpush1.bf16.msra.mxu1 %v3213_v6  ;;  %v3326_v51 = vld [vmem:[%s6703_s0 + $0x2a4] ss:$8 sps:$4 sm:$0xff]   ;;  %v3328_v53 = vld [vmem:[%s6703_s0 + $0x2a0] ss:$8 sps:$4 sm:$0xff]   ;;  %v3251_v54 = vld [vmem:[%s6703_s0 + $0xb4] ss:$8 sps:$4 sm:$0xff]  }
  0x13   :  { %1007 = vmatprep.subr.bf16.mxu0 %v3414_v0  ;;  %3195 = vmatprep.subr.bf16.mxu1 %v3414_v0  ;;  %v3332_v55 = vld [vmem:[%s6703_s0 + $0x2b4] ss:$8 sps:$4 sm:$0xff]   ;;  %v3253_v56 = vld [vmem:[%s6703_s0 + $0xb0] ss:$8 sps:$4 sm:$0xff]   ;;  %v3254_v58 = vld [vmem:[%s6703_s0 + $0xc4] ss:$8 sps:$4 sm:$0xff]  }
  0x14   :  { %v3334_v57 = vld [vmem:[%s6703_s0 + $0x2b0] ss:$8 sps:$4 sm:$0xff]   ;;  %v3338_v59 = vld [vmem:[%s6703_s0 + $0x2c4] ss:$8 sps:$4 sm:$0xff]   ;;  %v3256_v60 = vld [vmem:[%s6703_s0 + $0xc0] ss:$8 sps:$4 sm:$0xff]  }
  0x15   :  { %v3340_v61 = vld [vmem:[%s6703_s0 + $0x2c0] ss:$8 sps:$4 sm:$0xff]   ;;  %v3257_v62 = vld [vmem:[%s6703_s0 + $0xd4] ss:$8 sps:$4 sm:$0xff]   ;;  %v3346_v1 = vld [vmem:[%s6703_s0 + $0x2d0] ss:$8 sps:$4 sm:$0xff]  }
  0x16   :  { %1008 = vmatpush1.bf16.msra.mxu0 %v3214_v7  ;;  %3204 = vmatpush1.bf16.msra.mxu1 %v3214_v7  ;;  %v3344_v63 = vld [vmem:[%s6703_s0 + $0x2d4] ss:$8 sps:$4 sm:$0xff]   ;;  %v3260_v2 = vld [vmem:[%s6703_s0 + $0xe4] ss:$8 sps:$4 sm:$0xff]   ;;  %v3262_v4 = vld [vmem:[%s6703_s0 + $0xe0] ss:$8 sps:$4 sm:$0xff]  }
  0x17   :  { %1009 = vmatprep.subr.bf16.mxu0 %v3414_v0  ;;  %3196 = vmatprep.subr.bf16.mxu1 %v3414_v0  ;;  %v3350_v3 = vld [vmem:[%s6703_s0 + $0x2e4] ss:$8 sps:$4 sm:$0xff]   ;;  %v3352_v5 = vld [vmem:[%s6703_s0 + $0x2e0] ss:$8 sps:$4 sm:$0xff]   ;;  %v3263_v6 = vld [vmem:[%s6703_s0 + $0xf4] ss:$8 sps:$4 sm:$0xff]  }
  0x18   :  { %v3356_v7 = vld [vmem:[%s6703_s0 + $0x2f4] ss:$8 sps:$4 sm:$0xff]   ;;  %v3271_v12 = vld [vmem:[%s6703_s0 + $0x100] ss:$8 sps:$4 sm:$0xff]  }
  0x1a   :  { %1010 = vmatpush1.bf16.msra.mxu0 %v3215_v8  ;;  %3205 = vmatpush1.bf16.msra.mxu1 %v3215_v8  ;;  %v3265_v8 = vld [vmem:[%s6703_s0 + $0xf0] ss:$8 sps:$4 sm:$0xff]  }
  0x1b   :  { %1011 = vmatprep.subr.bf16.mxu0 %v3414_v0  ;;  %3197 = vmatprep.subr.bf16.mxu1 %v3414_v0 }
  0x1e   :  { %1012 = vmatpush1.bf16.msra.mxu0 %v3216_v9  ;;  %3206 = vmatpush1.bf16.msra.mxu1 %v3216_v9  ;;  %v3358_v9 = vld [vmem:[%s6703_s0 + $0x2f0] ss:$8 sps:$4 sm:$0xff]  }
  0x1f   :  { %1013 = vmatprep.subr.bf16.mxu0 %v3414_v0  ;;  %3198 = vmatprep.subr.bf16.mxu1 %v3414_v0  ;;  %v3259_v0 = vld [vmem:[%s6703_s0 + $0xd0] ss:$8 sps:$4 sm:$0xff]  }
  0x22   :  { %1014 = vmatpush1.bf16.msra.mxu0 %v3217_v10  ;;  %3207 = vmatpush1.bf16.msra.mxu1 %v3217_v10  ;;  %v3269_v10 = vld [vmem:[%s6703_s0 + $0x104] ss:$8 sps:$4 sm:$0xff]  }
  0x25   :  { %1030 = vmatmul.mubr.bf16.vlgmr.msra.gmra.mrb[0].mxu0 %v3218_v11  ;;  %1286 = vmatmul.mubr.bf16.vlgmr.msra.gmra.mrb[0].mxu1 %v3266_v14  ;;  %v3362_v11 = vld [vmem:[%s6703_s0 + $0x304] ss:$8 sps:$4 sm:$0xff]   ;;  %v3275_v14 = vld [vmem:[%s6703_s0 + $0x114] ss:$8 sps:$4 sm:$0xff]  }
  0x26   :  { %3127 = vmatprep.mubr.msk.bf16.mxu0 %vm804_vm0, %v3221_v13  ;;  %3159 = vmatprep.mubr.msk.bf16.mxu1 %vm804_vm0, %v3272_v15  ;;  %v3364_v13 = vld [vmem:[%s6703_s0 + $0x300] ss:$8 sps:$4 sm:$0xff]   ;;  %v3365_v15 = vld [vmem:[%s6703_s0 + $0x314] ss:$8 sps:$4 sm:$0xff]  }
  0x2d   :  { %1038 = vmatmul.mubr.bf16.gmra.mrb[4].mxu0 %v3223_v16  ;;  %1294 = vmatmul.mubr.bf16.gmra.mrb[4].mxu1 %v3274_v17  ;;  %v3277_v16 = vld [vmem:[%s6703_s0 + $0x110] ss:$8 sps:$4 sm:$0xff]  }
  0x2e   :  { %3128 = vmatprep.mubr.msk.bf16.mxu0 %vm804_vm0, %v3224_v18  ;;  %3160 = vmatprep.mubr.msk.bf16.mxu1 %vm804_vm0, %v3278_v19  ;;  %v3367_v17 = vld [vmem:[%s6703_s0 + $0x310] ss:$8 sps:$4 sm:$0xff]   ;;  %v3281_v18 = vld [vmem:[%s6703_s0 + $0x124] ss:$8 sps:$4 sm:$0xff]  }
  0x2f   :  { %v3368_v19 = vld [vmem:[%s6703_s0 + $0x324] ss:$8 sps:$4 sm:$0xff]  }
  0x35   :  { %1046 = vmatmul.mubr.bf16.gmra.mrb[8].mxu0 %v3226_v20  ;;  %1302 = vmatmul.mubr.bf16.gmra.mrb[8].mxu1 %v3280_v21  ;;  %v3283_v20 = vld [vmem:[%s6703_s0 + $0x120] ss:$8 sps:$4 sm:$0xff]  }
  0x36   :  { %3129 = vmatprep.mubr.msk.bf16.mxu0 %vm804_vm0, %v3227_v22  ;;  %3161 = vmatprep.mubr.msk.bf16.mxu1 %vm804_vm0, %v3284_v23  ;;  %v3370_v21 = vld [vmem:[%s6703_s0 + $0x320] ss:$8 sps:$4 sm:$0xff]   ;;  %v3287_v22 = vld [vmem:[%s6703_s0 + $0x134] ss:$8 sps:$4 sm:$0xff]  }
  0x37   :  { %v3371_v23 = vld [vmem:[%s6703_s0 + $0x334] ss:$8 sps:$4 sm:$0xff]  }
  0x3d   :  { %1054 = vmatmul.mubr.bf16.gmra.mrb[12].mxu0 %v3229_v24  ;;  %1310 = vmatmul.mubr.bf16.gmra.mrb[12].mxu1 %v3286_v25  ;;  %v3289_v24 = vld [vmem:[%s6703_s0 + $0x130] ss:$8 sps:$4 sm:$0xff]  }
  0x3e   :  { %3130 = vmatprep.mubr.msk.bf16.mxu0 %vm804_vm0, %v3230_v26  ;;  %3162 = vmatprep.mubr.msk.bf16.mxu1 %vm804_vm0, %v3290_v27  ;;  %v3373_v25 = vld [vmem:[%s6703_s0 + $0x330] ss:$8 sps:$4 sm:$0xff]   ;;  %v3293_v26 = vld [vmem:[%s6703_s0 + $0x144] ss:$8 sps:$4 sm:$0xff]  }
  0x3f   :  { %v3374_v27 = vld [vmem:[%s6703_s0 + $0x344] ss:$8 sps:$4 sm:$0xff]  }
  0x45   :  { %1062 = vmatmul.mubr.bf16.gmra.mrb[16].mxu0 %v3232_v28  ;;  %1318 = vmatmul.mubr.bf16.gmra.mrb[16].mxu1 %v3292_v29  ;;  %v3295_v28 = vld [vmem:[%s6703_s0 + $0x140] ss:$8 sps:$4 sm:$0xff]  }
  0x46   :  { %3131 = vmatprep.mubr.msk.bf16.mxu0 %vm804_vm0, %v3233_v30  ;;  %3163 = vmatprep.mubr.msk.bf16.mxu1 %vm804_vm0, %v3296_v31  ;;  %v3376_v29 = vld [vmem:[%s6703_s0 + $0x340] ss:$8 sps:$4 sm:$0xff]   ;;  %v3299_v30 = vld [vmem:[%s6703_s0 + $0x154] ss:$8 sps:$4 sm:$0xff]  }
  0x47   :  { %v3377_v31 = vld [vmem:[%s6703_s0 + $0x354] ss:$8 sps:$4 sm:$0xff]  }
  0x4d   :  { %1070 = vmatmul.mubr.bf16.gmra.mrb[20].mxu0 %v3235_v32  ;;  %1326 = vmatmul.mubr.bf16.gmra.mrb[20].mxu1 %v3298_v33  ;;  %v3301_v32 = vld [vmem:[%s6703_s0 + $0x150] ss:$8 sps:$4 sm:$0xff]  }
  0x4e   :  { %3132 = vmatprep.mubr.msk.bf16.mxu0 %vm804_vm0, %v3236_v34  ;;  %3164 = vmatprep.mubr.msk.bf16.mxu1 %vm804_vm0, %v3302_v35  ;;  %v3379_v33 = vld [vmem:[%s6703_s0 + $0x350] ss:$8 sps:$4 sm:$0xff]   ;;  %v3305_v34 = vld [vmem:[%s6703_s0 + $0x164] ss:$8 sps:$4 sm:$0xff]  }
  0x4f   :  { %v3380_v35 = vld [vmem:[%s6703_s0 + $0x364] ss:$8 sps:$4 sm:$0xff]  }
  0x55   :  { %1078 = vmatmul.mubr.bf16.gmra.mrb[24].mxu0 %v3238_v36  ;;  %1334 = vmatmul.mubr.bf16.gmra.mrb[24].mxu1 %v3304_v37  ;;  %v3307_v36 = vld [vmem:[%s6703_s0 + $0x160] ss:$8 sps:$4 sm:$0xff]  }
  0x56   :  { %3133 = vmatprep.mubr.msk.bf16.mxu0 %vm804_vm0, %v3239_v38  ;;  %3165 = vmatprep.mubr.msk.bf16.mxu1 %vm804_vm0, %v3308_v39  ;;  %v3382_v37 = vld [vmem:[%s6703_s0 + $0x360] ss:$8 sps:$4 sm:$0xff]   ;;  %v3311_v38 = vld [vmem:[%s6703_s0 + $0x174] ss:$8 sps:$4 sm:$0xff]  }
  0x57   :  { %v3383_v39 = vld [vmem:[%s6703_s0 + $0x374] ss:$8 sps:$4 sm:$0xff]  }
  0x5d   :  { %1086 = vmatmul.mubr.bf16.gmra.mrb[28].mxu0 %v3241_v40  ;;  %1342 = vmatmul.mubr.bf16.gmra.mrb[28].mxu1 %v3310_v41  ;;  %v3313_v40 = vld [vmem:[%s6703_s0 + $0x170] ss:$8 sps:$4 sm:$0xff]  }
  0x5e   :  { %3134 = vmatprep.mubr.msk.bf16.mxu0 %vm804_vm0, %v3242_v42  ;;  %3166 = vmatprep.mubr.msk.bf16.mxu1 %vm804_vm0, %v3314_v43  ;;  %v3385_v41 = vld [vmem:[%s6703_s0 + $0x370] ss:$8 sps:$4 sm:$0xff]   ;;  %v3317_v42 = vld [vmem:[%s6703_s0 + $0x184] ss:$8 sps:$4 sm:$0xff]  }
  0x5f   :  { %v3386_v43 = vld [vmem:[%s6703_s0 + $0x384] ss:$8 sps:$4 sm:$0xff]  }
  0x65   :  { %1094 = vmatmul.mubr.bf16.gmra.mrb[32].mxu0 %v3244_v44  ;;  %1350 = vmatmul.mubr.bf16.gmra.mrb[32].mxu1 %v3316_v45  ;;  %v3319_v44 = vld [vmem:[%s6703_s0 + $0x180] ss:$8 sps:$4 sm:$0xff]  }
  0x66   :  { %3135 = vmatprep.mubr.msk.bf16.mxu0 %vm804_vm0, %v3245_v46  ;;  %3167 = vmatprep.mubr.msk.bf16.mxu1 %vm804_vm0, %v3320_v47  ;;  %v3388_v45 = vld [vmem:[%s6703_s0 + $0x380] ss:$8 sps:$4 sm:$0xff]   ;;  %v3323_v46 = vld [vmem:[%s6703_s0 + $0x194] ss:$8 sps:$4 sm:$0xff]  }
  0x67   :  { %v3389_v47 = vld [vmem:[%s6703_s0 + $0x394] ss:$8 sps:$4 sm:$0xff]  }
  0x6d   :  { %1102 = vmatmul.mubr.bf16.gmra.mrb[36].mxu0 %v3247_v48  ;;  %1358 = vmatmul.mubr.bf16.gmra.mrb[36].mxu1 %v3322_v49  ;;  %v3325_v48 = vld [vmem:[%s6703_s0 + $0x190] ss:$8 sps:$4 sm:$0xff]  }
  0x6e   :  { %3136 = vmatprep.mubr.msk.bf16.mxu0 %vm804_vm0, %v3248_v50  ;;  %3168 = vmatprep.mubr.msk.bf16.mxu1 %vm804_vm0, %v3326_v51  ;;  %v3391_v49 = vld [vmem:[%s6703_s0 + $0x390] ss:$8 sps:$4 sm:$0xff]   ;;  %v3329_v50 = vld [vmem:[%s6703_s0 + $0x1a4] ss:$8 sps:$4 sm:$0xff]  }
  0x6f   :  { %v3392_v51 = vld [vmem:[%s6703_s0 + $0x3a4] ss:$8 sps:$4 sm:$0xff]  }
  0x75   :  { %1110 = vmatmul.mubr.bf16.gmra.mrb[40].mxu0 %v3250_v52  ;;  %1366 = vmatmul.mubr.bf16.gmra.mrb[40].mxu1 %v3328_v53  ;;  %v3331_v52 = vld [vmem:[%s6703_s0 + $0x1a0] ss:$8 sps:$4 sm:$0xff]  }
  0x76   :  { %3137 = vmatprep.mubr.msk.bf16.mxu0 %vm804_vm0, %v3251_v54  ;;  %3169 = vmatprep.mubr.msk.bf16.mxu1 %vm804_vm0, %v3332_v55  ;;  %v3394_v53 = vld [vmem:[%s6703_s0 + $0x3a0] ss:$8 sps:$4 sm:$0xff]   ;;  %v3335_v54 = vld [vmem:[%s6703_s0 + $0x1b4] ss:$8 sps:$4 sm:$0xff]  }
  0x77   :  { %v3395_v55 = vld [vmem:[%s6703_s0 + $0x3b4] ss:$8 sps:$4 sm:$0xff]  }
  0x7d   :  { %1118 = vmatmul.mubr.bf16.gmra.mrb[44].mxu0 %v3253_v56  ;;  %1374 = vmatmul.mubr.bf16.gmra.mrb[44].mxu1 %v3334_v57 }
  0x7e   :  { %3138 = vmatprep.mubr.msk.bf16.mxu0 %vm804_vm0, %v3254_v58  ;;  %3170 = vmatprep.mubr.msk.bf16.mxu1 %vm804_vm0, %v3338_v59  ;;  %v3337_v59 = vld [vmem:[%s6703_s0 + $0x1b0] ss:$8 sps:$4 sm:$0xff]  }
  0x85   :  { %1126 = vmatmul.mubr.bf16.gmra.mrb[48].mxu0 %v3256_v60  ;;  %1382 = vmatmul.mubr.bf16.gmra.mrb[48].mxu1 %v3340_v61  ;;  %v3397_v61 = vld [vmem:[%s6703_s0 + $0x3b0] ss:$8 sps:$4 sm:$0xff]  }
  0x86   :  { %3139 = vmatprep.mubr.msk.bf16.mxu0 %vm804_vm0, %v3257_v62  ;;  %3171 = vmatprep.mubr.msk.bf16.mxu1 %vm804_vm0, %v3344_v63  ;;  %v3341_v63 = vld [vmem:[%s6703_s0 + $0x1c4] ss:$8 sps:$4 sm:$0xff]  }
  0x8d   :  { %1134 = vmatmul.mubr.bf16.gmra.mrb[52].mxu0 %v3259_v0  ;;  %1390 = vmatmul.mubr.bf16.gmra.mrb[52].mxu1 %v3346_v1 }
  0x8e   :  { %3140 = vmatprep.mubr.msk.bf16.mxu0 %vm804_vm0, %v3260_v2  ;;  %3172 = vmatprep.mubr.msk.bf16.mxu1 %vm804_vm0, %v3350_v3  ;;  %v3398_v3 = vld [vmem:[%s6703_s0 + $0x3c4] ss:$8 sps:$4 sm:$0xff]  }
  0x95   :  { %1142 = vmatmul.mubr.bf16.gmra.mrb[56].mxu0 %v3262_v4  ;;  %1398 = vmatmul.mubr.bf16.gmra.mrb[56].mxu1 %v3352_v5 }
  0x96   :  { %3141 = vmatprep.mubr.msk.bf16.mxu0 %vm804_vm0, %v3263_v6  ;;  %3173 = vmatprep.mubr.msk.bf16.mxu1 %vm804_vm0, %v3356_v7  ;;  %v3343_v7 = vld [vmem:[%s6703_s0 + $0x1c0] ss:$8 sps:$4 sm:$0xff]  }
  0x9d   :  { %1150 = vmatmul.mubr.bf16.gmra.mrb[60].mxu0 %v3265_v8  ;;  %1406 = vmatmul.mubr.bf16.gmra.mrb[60].mxu1 %v3358_v9  ;;  %v3400_v9 = vld [vmem:[%s6703_s0 + $0x3c0] ss:$8 sps:$4 sm:$0xff]  }
  0x9e   :  { %3142 = vmatprep.mubr.msk.bf16.mxu0 %vm804_vm0, %v3269_v10  ;;  %3174 = vmatprep.mubr.msk.bf16.mxu1 %vm804_vm0, %v3362_v11  ;;  %v3347_v11 = vld [vmem:[%s6703_s0 + $0x1d4] ss:$8 sps:$4 sm:$0xff]  }
  0xa5   :  { %1158 = vmatmul.mubr.bf16.gmra.mrb[64].mxu0 %v3271_v12  ;;  %1414 = vmatmul.mubr.bf16.gmra.mrb[64].mxu1 %v3364_v13 }
  0xa6   :  { %3143 = vmatprep.mubr.msk.bf16.mxu0 %vm804_vm0, %v3275_v14  ;;  %3175 = vmatprep.mubr.msk.bf16.mxu1 %vm804_vm0, %v3365_v15  ;;  %v3401_v15 = vld [vmem:[%s6703_s0 + $0x3d4] ss:$8 sps:$4 sm:$0xff]  }
  0xad   :  { %1166 = vmatmul.mubr.bf16.gmra.mrb[68].mxu0 %v3277_v16  ;;  %1422 = vmatmul.mubr.bf16.gmra.mrb[68].mxu1 %v3367_v17 }
  0xae   :  { %3144 = vmatprep.mubr.msk.bf16.mxu0 %vm804_vm0, %v3281_v18  ;;  %3176 = vmatprep.mubr.msk.bf16.mxu1 %vm804_vm0, %v3368_v19  ;;  %v3349_v19 = vld [vmem:[%s6703_s0 + $0x1d0] ss:$8 sps:$4 sm:$0xff]  }
  0xb5   :  { %1174 = vmatmul.mubr.bf16.gmra.mrb[72].mxu0 %v3283_v20  ;;  %1430 = vmatmul.mubr.bf16.gmra.mrb[72].mxu1 %v3370_v21  ;;  %v3403_v21 = vld [vmem:[%s6703_s0 + $0x3d0] ss:$8 sps:$4 sm:$0xff]  }
  0xb6   :  { %3145 = vmatprep.mubr.msk.bf16.mxu0 %vm804_vm0, %v3287_v22  ;;  %3177 = vmatprep.mubr.msk.bf16.mxu1 %vm804_vm0, %v3371_v23  ;;  %v3353_v23 = vld [vmem:[%s6703_s0 + $0x1e4] ss:$8 sps:$4 sm:$0xff]  }
  0xbd   :  { %1182 = vmatmul.mubr.bf16.gmra.mrb[76].mxu0 %v3289_v24  ;;  %1438 = vmatmul.mubr.bf16.gmra.mrb[76].mxu1 %v3373_v25 }
  0xbe   :  { %3146 = vmatprep.mubr.msk.bf16.mxu0 %vm804_vm0, %v3293_v26  ;;  %3178 = vmatprep.mubr.msk.bf16.mxu1 %vm804_vm0, %v3374_v27  ;;  %v3404_v27 = vld [vmem:[%s6703_s0 + $0x3e4] ss:$8 sps:$4 sm:$0xff]  }
  0xc5   :  { %1190 = vmatmul.mubr.bf16.gmra.mrb[80].mxu0 %v3295_v28  ;;  %1446 = vmatmul.mubr.bf16.gmra.mrb[80].mxu1 %v3376_v29 }
  0xc6   :  { %3147 = vmatprep.mubr.msk.bf16.mxu0 %vm804_vm0, %v3299_v30  ;;  %3179 = vmatprep.mubr.msk.bf16.mxu1 %vm804_vm0, %v3377_v31  ;;  %v3355_v31 = vld [vmem:[%s6703_s0 + $0x1e0] ss:$8 sps:$4 sm:$0xff]  }
  0xcd   :  { %1198 = vmatmul.mubr.bf16.gmra.mrb[84].mxu0 %v3301_v32  ;;  %1454 = vmatmul.mubr.bf16.gmra.mrb[84].mxu1 %v3379_v33  ;;  %v3406_v33 = vld [vmem:[%s6703_s0 + $0x3e0] ss:$8 sps:$4 sm:$0xff]  }
  0xce   :  { %3148 = vmatprep.mubr.msk.bf16.mxu0 %vm804_vm0, %v3305_v34  ;;  %3180 = vmatprep.mubr.msk.bf16.mxu1 %vm804_vm0, %v3380_v35  ;;  %v3359_v35 = vld [vmem:[%s6703_s0 + $0x1f4] ss:$8 sps:$4 sm:$0xff]  }
  0xd5   :  { %1206 = vmatmul.mubr.bf16.gmra.mrb[88].mxu0 %v3307_v36  ;;  %1462 = vmatmul.mubr.bf16.gmra.mrb[88].mxu1 %v3382_v37 }
  0xd6   :  { %3149 = vmatprep.mubr.msk.bf16.mxu0 %vm804_vm0, %v3311_v38  ;;  %3181 = vmatprep.mubr.msk.bf16.mxu1 %vm804_vm0, %v3383_v39  ;;  %v3407_v39 = vld [vmem:[%s6703_s0 + $0x3f4] ss:$8 sps:$4 sm:$0xff]  }
  0xdd   :  { %1214 = vmatmul.mubr.bf16.gmra.mrb[92].mxu0 %v3313_v40  ;;  %1470 = vmatmul.mubr.bf16.gmra.mrb[92].mxu1 %v3385_v41 }
  0xde   :  { %3150 = vmatprep.mubr.msk.bf16.mxu0 %vm804_vm0, %v3317_v42  ;;  %3182 = vmatprep.mubr.msk.bf16.mxu1 %vm804_vm0, %v3386_v43  ;;  %v3361_v43 = vld [vmem:[%s6703_s0 + $0x1f0] ss:$8 sps:$4 sm:$0xff]  }
  0xe5   :  { %1222 = vmatmul.mubr.bf16.gmra.mrb[96].mxu0 %v3319_v44  ;;  %1478 = vmatmul.mubr.bf16.gmra.mrb[96].mxu1 %v3388_v45  ;;  %v3409_v45 = vld [vmem:[%s6703_s0 + $0x3f0] ss:$8 sps:$4 sm:$0xff]  }
  0xe6   :  { %3151 = vmatprep.mubr.msk.bf16.mxu0 %vm804_vm0, %v3323_v46  ;;  %3183 = vmatprep.mubr.msk.bf16.mxu1 %vm804_vm0, %v3389_v47 }
  0xed   :  { %1230 = vmatmul.mubr.bf16.gmra.mrb[100].mxu0 %v3325_v48  ;;  %1486 = vmatmul.mubr.bf16.gmra.mrb[100].mxu1 %v3391_v49 }
  0xee   :  { %3152 = vmatprep.mubr.msk.bf16.mxu0 %vm804_vm0, %v3329_v50  ;;  %3184 = vmatprep.mubr.msk.bf16.mxu1 %vm804_vm0, %v3392_v51 }
  0xf5   :  { %1238 = vmatmul.mubr.bf16.gmra.mrb[104].mxu0 %v3331_v52  ;;  %1494 = vmatmul.mubr.bf16.gmra.mrb[104].mxu1 %v3394_v53 }
  0xf6   :  { %3153 = vmatprep.mubr.msk.bf16.mxu0 %vm804_vm0, %v3335_v54  ;;  %3185 = vmatprep.mubr.msk.bf16.mxu1 %vm804_vm0, %v3395_v55 }
  0xf8   :  { %v3857_v56 = vpop.f32.mrb[0].mxu0  ;;  %v3859_v57 = vpop.f32.mrb[0].mxu1 }
  0xf9   :  { %v1033_v58 = vpop.f32.mrb[1].mxu0  ;;  %v1289_v60 = vpop.f32.mrb[1].mxu1 }
  0xfa   :  { %v3868_v62 = vpop.f32.mrb[2].mxu0  ;;  %v3873_v0 = vpop.f32.mrb[2].mxu1 }
  0xfb   :  { %v1036_v1 = vpop.f32.mrb[3].mxu0  ;;  %v1292_v2 = vpop.f32.mrb[3].mxu1 }
  0xfd   :  { %1246 = vmatmul.mubr.bf16.gmra.mrb[108].mxu0 %v3337_v59  ;;  %1502 = vmatmul.mubr.bf16.gmra.mrb[108].mxu1 %v3397_v61 }
  0xfe   :  { %3154 = vmatprep.mubr.msk.bf16.mxu0 %vm804_vm0, %v3341_v63  ;;  %3186 = vmatprep.mubr.msk.bf16.mxu1 %vm804_vm0, %v3398_v3 }
 0x100   :  { %v3879_v4 = vpop.f32.mrb[4].mxu0  ;;  %v3881_v5 = vpop.f32.mrb[4].mxu1 }
 0x101   :  { %v1041_v6 = vpop.f32.mrb[5].mxu0  ;;  %v1297_v8 = vpop.f32.mrb[5].mxu1 }
 0x102   :  { %v3890_v10 = vpop.f32.mrb[6].mxu0  ;;  %v3895_v12 = vpop.f32.mrb[6].mxu1  ;;  %v3979_v8 = vld [vmem:[%s6704_s2] ss:$0 sm:$0xff] }
 0x103   :  { %v1044_v13 = vpop.f32.mrb[7].mxu0  ;;  %v1300_v14 = vpop.f32.mrb[7].mxu1 }
 0x104   :  { %v1032_v14 = vadd.f32 %v3979_v8, %v3857_v56 }
 0x105   :  { %1254 = vmatmul.mubr.bf16.gmra.mrb[112].mxu0 %v3343_v7  ;;  %1510 = vmatmul.mubr.bf16.gmra.mrb[112].mxu1 %v3400_v9  ;;  %v1035_v9 = vadd.f32 %v3979_v8, %v3868_v62 }
 0x106   :  { %3155 = vmatprep.mubr.msk.bf16.mxu0 %vm804_vm0, %v3347_v11  ;;  %3187 = vmatprep.mubr.msk.bf16.mxu1 %vm804_vm0, %v3401_v15  ;;  %v1040_v15 = vadd.f32 %v3979_v8, %v3879_v4  ;;  %v1670_v62 = vmul.f32 0.2, %v1032_v14  ;;  %vm1542_vm2 = vcmp.ge.f32.partialorder %v1032_v14, 0.0 }
 0x107   :  { %vm1543_vm1 = vcmp.ge.f32.partialorder %v1035_v9, 0.0 }
 0x108   :  { %v3901_v16 = vpop.f32.mrb[8].mxu0  ;;  %v3903_v17 = vpop.f32.mrb[8].mxu1  ;;  %vm1544_vm3 = vcmp.ge.f32.partialorder %v1040_v15, 0.0 }
 0x109   :  { %v1049_v18 = vpop.f32.mrb[9].mxu0  ;;  %v1305_v20 = vpop.f32.mrb[9].mxu1  ;;  %v1048_v4 = vadd.f32 %v3979_v8, %v3901_v16 }
 0x10a   :  { %v3912_v22 = vpop.f32.mrb[10].mxu0  ;;  %v3917_v24 = vpop.f32.mrb[10].mxu1 }
 0x10b   :  { %v1052_v25 = vpop.f32.mrb[11].mxu0  ;;  %v1308_v26 = vpop.f32.mrb[11].mxu1  ;;  %v1674_v16 = vmul.f32 0.2, %v1048_v4  ;;  %vm1546_vm6 = vcmp.ge.f32.partialorder %v1048_v4, 0.0 }
 0x10d   :  { %1262 = vmatmul.mubr.bf16.gmra.mrb[116].mxu0 %v3349_v19  ;;  %1518 = vmatmul.mubr.bf16.gmra.mrb[116].mxu1 %v3403_v21 }
 0x10e   :  { %3156 = vmatprep.mubr.msk.bf16.mxu0 %vm804_vm0, %v3353_v23  ;;  %3188 = vmatprep.mubr.msk.bf16.mxu1 %vm804_vm0, %v3404_v27  ;;  %v1671_v23 = vmul.f32 0.2, %v1035_v9  ;;  %v1672_v27 = vmul.f32 0.2, %v1040_v15 }
 0x110   :  { %v3923_v28 = vpop.f32.mrb[12].mxu0  ;;  %v3925_v29 = vpop.f32.mrb[12].mxu1  ;;  %v3997_v56 = vsel %vm1543_vm1, %v1035_v9, %v1671_v23 }
 0x111   :  { %v1057_v30 = vpop.f32.mrb[13].mxu0  ;;  %v1313_v32 = vpop.f32.mrb[13].mxu1  ;;  %6797 = vst [vmem:[#allocation2_spill] sm:$0xff] %v3997_v56 }
 0x112   :  { %v3934_v34 = vpop.f32.mrb[14].mxu0  ;;  %v3939_v36 = vpop.f32.mrb[14].mxu1  ;;  %v1043_v30 = vadd.f32 %v3979_v8, %v3890_v10  ;;  %v2189_v10 = vmul.f32 %v3997_v56, %v3997_v56 }
 0x113   :  { %v1060_v37 = vpop.f32.mrb[15].mxu0  ;;  %v1316_v38 = vpop.f32.mrb[15].mxu1 }
 0x114   :  { %v1673_v37 = vmul.f32 0.2, %v1043_v30  ;;  %vm1545_vm4 = vcmp.ge.f32.partialorder %v1043_v30, 0.0 }
 0x115   :  { %1270 = vmatmul.mubr.bf16.gmra.mrb[120].mxu0 %v3355_v31  ;;  %1526 = vmatmul.mubr.bf16.gmra.mrb[120].mxu1 %v3406_v33  ;;  %v4005_v33 = vsel %vm1542_vm2, %v1032_v14, %v1670_v62  ;;  %v1059_v62 = vadd.f32 %v3979_v8, %v3934_v34 }
 0x116   :  { %3157 = vmatprep.mubr.msk.bf16.mxu0 %vm804_vm0, %v3359_v35  ;;  %3189 = vmatprep.mubr.msk.bf16.mxu1 %vm804_vm0, %v3407_v39  ;;  %6798 = vst [vmem:[#allocation3_spill] sm:$0xff] %v4005_v33  ;;  %v4007_v35 = vsel %vm1544_vm3, %v1040_v15, %v1672_v27 }
 0x117   :  { %6799 = vst [vmem:[#allocation4_spill] sm:$0xff] %v4007_v35  ;;  %vm1549_vm9 = vcmp.ge.f32.partialorder %v1059_v62, 0.0 }
 0x118   :  { %v3945_v40 = vpop.f32.mrb[16].mxu0  ;;  %v3947_v41 = vpop.f32.mrb[16].mxu1 }
 0x119   :  { %v1065_v42 = vpop.f32.mrb[17].mxu0  ;;  %v1321_v44 = vpop.f32.mrb[17].mxu1 }
 0x11a   :  { %v3956_v46 = vpop.f32.mrb[18].mxu0  ;;  %v3958_v47 = vpop.f32.mrb[18].mxu1  ;;  %v1051_v44 = vadd.f32 %v3979_v8, %v3912_v22  ;;  %v1927_v22 = vsel %vm1926_vm5, %v4005_v33, 0.0 }
 0x11b   :  { %v1068_v48 = vpop.f32.mrb[19].mxu0  ;;  %v1324_v49 = vpop.f32.mrb[19].mxu1 }
 0x11c   :  { %v2188_v49 = vmul.f32 %v4005_v33, %v4005_v33  ;;  %v1675_v9 = vmul.f32 0.2, %v1051_v44  ;;  %vm1547_vm7 = vcmp.ge.f32.partialorder %v1051_v44, 0.0 }
 0x11d   :  { %1278 = vmatmul.mubr.bf16.gmra.mrb[124].mxu0 %v3361_v43  ;;  %1534 = vmatmul.mubr.bf16.gmra.mrb[124].mxu1 %v3409_v45 }
 0x11e   :  { %v2316_v14 = vsel %vm1926_vm5, %v2188_v49, 0.0 }
 0x120   :  { %v3960_v50 = vpop.f32.mrb[20].mxu0  ;;  %v3962_v51 = vpop.f32.mrb[20].mxu1 }
 0x121   :  { %v1073_v52 = vpop.f32.mrb[21].mxu0  ;;  %v1329_v53 = vpop.f32.mrb[21].mxu1 }
 0x122   :  { %v3964_v54 = vpop.f32.mrb[22].mxu0  ;;  %v3966_v55 = vpop.f32.mrb[22].mxu1  ;;  %v1928_v52 = vsel %vm1926_vm5, %v3997_v56, 0.0  ;;  %v2190_v53 = vmul.f32 %v4007_v35, %v4007_v35 }
 0x123   :  { %v1076_v58 = vpop.f32.mrb[23].mxu0  ;;  %v1332_v59 = vpop.f32.mrb[23].mxu1 }
 0x124   :  { %v4023_v58 = vsel %vm1545_vm4, %v1043_v30, %v1673_v37  ;;  %v1056_v59 = vadd.f32 %v3979_v8, %v3923_v28  ;;  %v2319_v15 = vsel %vm1926_vm5, %v2190_v53, 0.0 }
 0x125   :  { %6800 = vst [vmem:[#allocation5_spill] sm:$0xff] %v4023_v58 }
 0x126   :  { %vm1548_vm8 = vcmp.ge.f32.partialorder %v1056_v59, 0.0 }
 0x128   :  { %v3968_v60 = vpop.f32.mrb[24].mxu0  ;;  %v3970_v61 = vpop.f32.mrb[24].mxu1 }
 0x129   :  { %v1081_v63 = vpop.f32.mrb[25].mxu0  ;;  %v1337_v1 = vpop.f32.mrb[25].mxu1 }
 0x12a   :  { %v3972_v2 = vpop.f32.mrb[26].mxu0  ;;  %v3974_v3 = vpop.f32.mrb[26].mxu1  ;;  %v2317_v63 = vsel %vm1926_vm5, %v2189_v10, 0.0  ;;  %v1930_v1 = vsel %vm1926_vm5, %v4007_v35, 0.0 }
 0x12b   :  { %v1084_v6 = vpop.f32.mrb[27].mxu0  ;;  %v1340_v7 = vpop.f32.mrb[27].mxu1  ;;  %v2318_v23 = vadd.f32 %v2317_v63, %v2316_v14  ;;  %v1677_v63 = vmul.f32 0.2, %v1059_v62  ;;  %v1067_v14 = vadd.f32 %v3979_v8, %v3956_v46 }
 0x12c   :  { %v1929_v6 = vadd.f32 %v1928_v52, %v1927_v22  ;;  %v4032_v7 = vsel %vm1546_vm6, %v1048_v4, %v1674_v16  ;;  %v1932_v4 = vsel %vm1926_vm5, %v4023_v58, 0.0  ;;  %v4052_v16 = vsel %vm1547_vm7, %v1051_v44, %v1675_v9 }
 0x12d   :  { %6801 = vst [vmem:[#allocation6_spill] sm:$0xff] %v4032_v7  ;;  %v2192_v37 = vmul.f32 %v4032_v7, %v4032_v7  ;;  %v2320_v10 = vadd.f32 %v2319_v15, %v2318_v23  ;;  %6802 = vst [vmem:[#allocation7_spill] sm:$0xff] %v4052_v16  ;;  %v1934_v52 = vsel %vm1926_vm5, %v4032_v7, 0.0  ;;  %v2193_v44 = vmul.f32 %v4052_v16, %v4052_v16 }
 0x12e   :  { %v1936_v15 = vsel %vm1926_vm5, %v4052_v16, 0.0  ;;  %vm1551_vm11 = vcmp.ge.f32.partialorder %v1067_v14, 0.0 }
 0x12f   :  { %v2325_v46 = vsel %vm1926_vm5, %v2193_v44, 0.0 }
 0x130   :  { %v3983_v11 = vpop.f32.mrb[28].mxu0  ;;  %v3985_v13 = vpop.f32.mrb[28].mxu1 }
 0x131   :  { %v1089_v18 = vpop.f32.mrb[29].mxu0  ;;  %v1345_v19 = vpop.f32.mrb[29].mxu1 }
 0x132   :  { %v3991_v20 = vpop.f32.mrb[30].mxu0  ;;  %v3993_v21 = vpop.f32.mrb[30].mxu1  ;;  %v2191_v18 = vmul.f32 %v4023_v58, %v4023_v58 }
 0x133   :  { %v1092_v25 = vpop.f32.mrb[31].mxu0  ;;  %v1348_v26 = vpop.f32.mrb[31].mxu1 }
 0x134   :  { %v1931_v25 = vadd.f32 %v1930_v1, %v1929_v6  ;;  %v1676_v26 = vmul.f32 0.2, %v1056_v59  ;;  %v2321_v49 = vsel %vm1926_vm5, %v2191_v18, 0.0  ;;  %v2323_v1 = vsel %vm1926_vm5, %v2192_v37, 0.0 }
 0x135   :  { %v2322_v6 = vadd.f32 %v2321_v49, %v2320_v10 }
 0x136   :  { %v1933_v53 = vadd.f32 %v1932_v4, %v1931_v25  ;;  %v4059_v22 = vsel %vm1548_vm8, %v1056_v59, %v1676_v26  ;;  %v4074_v26 = vsel %vm1549_vm9, %v1059_v62, %v1677_v63 }
 0x137   :  { %6803 = vst [vmem:[#allocation8_spill] sm:$0xff] %v4059_v22  ;;  %v2194_v59 = vmul.f32 %v4059_v22, %v4059_v22  ;;  %v2324_v25 = vadd.f32 %v2323_v1, %v2322_v6  ;;  %6804 = vst [vmem:[#allocation9_spill] sm:$0xff] %v4074_v26  ;;  %v1938_v37 = vsel %vm1926_vm5, %v4059_v22, 0.0 }
 0x138   :  { %v4001_v31 = vpop.f32.mrb[32].mxu0  ;;  %v4003_v32 = vpop.f32.mrb[32].mxu1  ;;  %v1935_v9 = vadd.f32 %v1934_v52, %v1933_v53  ;;  %v1679_v52 = vmul.f32 0.2, %v1067_v14 }
 0x139   :  { %v1097_v38 = vpop.f32.mrb[33].mxu0  ;;  %v1353_v39 = vpop.f32.mrb[33].mxu1  ;;  %v2327_v63 = vsel %vm1926_vm5, %v2194_v59, 0.0  ;;  %v2326_v1 = vadd.f32 %v2325_v46, %v2324_v25  ;;  %v1080_v59 = vadd.f32 %v3979_v8, %v3968_v60 }
 0x13a   :  { %v4011_v42 = vpop.f32.mrb[34].mxu0  ;;  %v4013_v43 = vpop.f32.mrb[34].mxu1 }
 0x13b   :  { %v1100_v45 = vpop.f32.mrb[35].mxu0  ;;  %v1356_v48 = vpop.f32.mrb[35].mxu1  ;;  %vm1554_vm14 = vcmp.ge.f32.partialorder %v1080_v59, 0.0 }
 0x13c   :  { %v1064_v45 = vadd.f32 %v3979_v8, %v3945_v40 }
 0x13e   :  { %v1678_v40 = vmul.f32 0.2, %v1064_v45  ;;  %vm1550_vm10 = vcmp.ge.f32.partialorder %v1064_v45, 0.0 }
 0x140   :  { %v4038_v28 = vpop.f32.mrb[36].mxu0  ;;  %v4040_v19 = vpop.f32.mrb[36].mxu1  ;;  %v4085_v49 = vsel %vm1550_vm10, %v1064_v45, %v1678_v40  ;;  %v2328_v40 = vadd.f32 %v2327_v63, %v2326_v1 }
 0x141   :  { %v1105_v27 = vpop.f32.mrb[37].mxu0  ;;  %v1361_v30 = vpop.f32.mrb[37].mxu1  ;;  %6805 = vst [vmem:[#allocation10_spill] sm:$0xff] %v4085_v49  ;;  %v2196_v45 = vmul.f32 %v4085_v49, %v4085_v49 }
 0x142   :  { %v4048_v38 = vpop.f32.mrb[38].mxu0  ;;  %v4050_v39 = vpop.f32.mrb[38].mxu1  ;;  %v1072_v27 = vadd.f32 %v3979_v8, %v3960_v50  ;;  %v2195_v50 = vmul.f32 %v4074_v26, %v4074_v26 }
 0x143   :  { %v1108_v34 = vpop.f32.mrb[39].mxu0  ;;  %v1364_v48 = vpop.f32.mrb[39].mxu1 }
 0x144   :  { %v1937_v48 = vadd.f32 %v1936_v15, %v1935_v9  ;;  %v1680_v6 = vmul.f32 0.2, %v1072_v27  ;;  %v1940_v9 = vsel %vm1926_vm5, %v4074_v26, 0.0  ;;  %vm1552_vm12 = vcmp.ge.f32.partialorder %v1072_v27, 0.0 }
 0x145   :  { %v4096_v15 = vsel %vm1551_vm11, %v1067_v14, %v1679_v52  ;;  %v2329_v25 = vsel %vm1926_vm5, %v2195_v50, 0.0  ;;  %v2331_v14 = vsel %vm1926_vm5, %v2196_v45, 0.0  ;;  %v1682_v26 = vmul.f32 0.2, %v1080_v59 }
 0x146   :  { %v1939_v44 = vadd.f32 %v1938_v37, %v1937_v48  ;;  %6806 = vst [vmem:[#allocation11_spill] sm:$0xff] %v4096_v15  ;;  %v4107_v48 = vsel %vm1552_vm12, %v1072_v27, %v1680_v6  ;;  %v2197_v60 = vmul.f32 %v4096_v15, %v4096_v15  ;;  %v2330_v1 = vadd.f32 %v2329_v25, %v2328_v40 }
 0x147   :  { %6807 = vst [vmem:[#allocation12_spill] sm:$0xff] %v4107_v48  ;;  %v1083_v27 = vadd.f32 %v3979_v8, %v3972_v2  ;;  %v2198_v45 = vmul.f32 %v4107_v48, %v4107_v48  ;;  %v1088_v40 = vadd.f32 %v3979_v8, %v3983_v11  ;;  %v1946_v2 = vsel %vm1926_vm5, %v4107_v48, 0.0 }
 0x148   :  { %v4070_v18 = vpop.f32.mrb[40].mxu0  ;;  %v4072_v23 = vpop.f32.mrb[40].mxu1  ;;  %v1941_v37 = vadd.f32 %v1940_v9, %v1939_v44  ;;  %v1944_v9 = vsel %vm1926_vm5, %v4096_v15, 0.0  ;;  %v2333_v25 = vsel %vm1926_vm5, %v2197_v60, 0.0 }
 0x149   :  { %v1113_v30 = vpop.f32.mrb[41].mxu0  ;;  %v1369_v4 = vpop.f32.mrb[41].mxu1  ;;  %vm1555_vm15 = vcmp.ge.f32.partialorder %v1083_v27, 0.0  ;;  %v1684_v60 = vmul.f32 0.2, %v1088_v40  ;;  %vm1556_vm0 = vcmp.ge.f32.partialorder %v1088_v40, 0.0 }
 0x14a   :  { %v4081_v10 = vpop.f32.mrb[42].mxu0  ;;  %v4083_v34 = vpop.f32.mrb[42].mxu1  ;;  %v1075_v30 = vadd.f32 %v3979_v8, %v3964_v54  ;;  %v1942_v4 = vsel %vm1926_vm5, %v4085_v49, 0.0 }
 0x14b   :  { %v1116_v62 = vpop.f32.mrb[43].mxu0  ;;  %v1372_v53 = vpop.f32.mrb[43].mxu1  ;;  %v1943_v49 = vadd.f32 %v1942_v4, %v1941_v37  ;;  %v4129_v37 = vsel %vm1554_vm14, %v1080_v59, %v1682_v26 }
 0x14c   :  { %v1681_v62 = vmul.f32 0.2, %v1075_v30  ;;  %vm1553_vm13 = vcmp.ge.f32.partialorder %v1075_v30, 0.0  ;;  %6809 = vst [vmem:[#allocation14_spill] sm:$0xff] %v4129_v37 }
 0x14d   :  { %v1945_v4 = vadd.f32 %v1944_v9, %v1943_v49  ;;  %v2200_v9 = vmul.f32 %v4129_v37, %v4129_v37 }
 0x14f   :  { %v2339_v7 = vsel %vm1926_vm5, %v2200_v9, 0.0 }
 0x150   :  { %v4103_v46 = vpop.f32.mrb[44].mxu0  ;;  %v4105_v54 = vpop.f32.mrb[44].mxu1 }
 0x151   :  { %v1121_v53 = vpop.f32.mrb[45].mxu0  ;;  %v1377_v63 = vpop.f32.mrb[45].mxu1 }
 0x152   :  { %v4112_v52 = vpop.f32.mrb[46].mxu0  ;;  %v4114_v50 = vpop.f32.mrb[46].mxu1  ;;  %v2332_v53 = vadd.f32 %v2331_v14, %v2330_v1  ;;  %v4122_v63 = vsel %vm1553_vm13, %v1075_v30, %v1681_v62  ;;  %v1947_v14 = vadd.f32 %v1946_v2, %v1945_v4  ;;  %v1091_v1 = vadd.f32 %v3979_v8, %v3991_v20 }
 0x153   :  { %v1124_v44 = vpop.f32.mrb[47].mxu0  ;;  %v1380_v6 = vpop.f32.mrb[47].mxu1  ;;  %6808 = vst [vmem:[#allocation13_spill] sm:$0xff] %v4122_v63  ;;  %v2199_v15 = vmul.f32 %v4122_v63, %v4122_v63  ;;  %v1948_v59 = vsel %vm1926_vm5, %v4122_v63, 0.0  ;;  %v4155_v63 = vsel %vm1556_vm0, %v1088_v40, %v1684_v60 }
 0x154   :  { %v1683_v44 = vmul.f32 0.2, %v1083_v27  ;;  %v2335_v6 = vsel %vm1926_vm5, %v2198_v45, 0.0  ;;  %v2334_v11 = vadd.f32 %v2333_v25, %v2332_v53  ;;  %v1096_v25 = vadd.f32 %v3979_v8, %v4001_v31  ;;  %6811 = vst [vmem:[#allocation16_spill] sm:$0xff] %v4155_v63 }
 0x155   :  { %v2337_v4 = vsel %vm1926_vm5, %v2199_v15, 0.0  ;;  %v1685_v16 = vmul.f32 0.2, %v1091_v1  ;;  %vm1557_vm1 = vcmp.ge.f32.partialorder %v1091_v1, 0.0  ;;  %v2202_v40 = vmul.f32 %v4155_v63, %v4155_v63 }
 0x156   :  { %v2336_v22 = vadd.f32 %v2335_v6, %v2334_v11  ;;  %v4148_v53 = vsel %vm1555_vm15, %v1083_v27, %v1683_v44  ;;  %v1686_v31 = vmul.f32 0.2, %v1096_v25  ;;  %v1099_v11 = vadd.f32 %v3979_v8, %v4011_v42 }
 0x157   :  { %6810 = vst [vmem:[#allocation15_spill] sm:$0xff] %v4148_v53  ;;  %v2201_v27 = vmul.f32 %v4148_v53, %v4148_v53  ;;  %v1952_v15 = vsel %vm1926_vm5, %v4148_v53, 0.0  ;;  %vm1558_vm2 = vcmp.ge.f32.partialorder %v1096_v25, 0.0  ;;  %v4170_v9 = vsel %vm1557_vm1, %v1091_v1, %v1685_v16 }
 0x158   :  { %v4134_v30 = vpop.f32.mrb[48].mxu0  ;;  %v4136_v62 = vpop.f32.mrb[48].mxu1  ;;  %v2338_v44 = vadd.f32 %v2337_v4, %v2336_v22  ;;  %6812 = vst [vmem:[#allocation17_spill] sm:$0xff] %v4170_v9  ;;  %v1104_v22 = vadd.f32 %v3979_v8, %v4038_v28  ;;  %v1954_v4 = vsel %vm1926_vm5, %v4155_v63, 0.0  ;;  %v2203_v28 = vmul.f32 %v4170_v9, %v4170_v9 }
 0x159   :  { %v1129_v49 = vpop.f32.mrb[49].mxu0  ;;  %v1385_v26 = vpop.f32.mrb[49].mxu1  ;;  %v2341_v42 = vsel %vm1926_vm5, %v2201_v27, 0.0  ;;  %vm1559_vm3 = vcmp.ge.f32.partialorder %v1099_v11, 0.0  ;;  %v1107_v63 = vadd.f32 %v3979_v8, %v4048_v38 }
 0x15a   :  { %v4144_v45 = vpop.f32.mrb[50].mxu0  ;;  %v4146_v48 = vpop.f32.mrb[50].mxu1  ;;  %v1950_v49 = vsel %vm1926_vm5, %v4129_v37, 0.0  ;;  %v1949_v26 = vadd.f32 %v1948_v59, %v1947_v14  ;;  %v2340_v59 = vadd.f32 %v2339_v7, %v2338_v44  ;;  %v4181_v37 = vsel %vm1558_vm2, %v1096_v25, %v1686_v31 }
 0x15b   :  { %v1132_v20 = vpop.f32.mrb[51].mxu0  ;;  %v1388_v2 = vpop.f32.mrb[51].mxu1  ;;  %6813 = vst [vmem:[#allocation18_spill] sm:$0xff] %v4181_v37  ;;  %v1687_v7 = vmul.f32 0.2, %v1099_v11  ;;  %v2343_v44 = vsel %vm1926_vm5, %v2202_v40, 0.0  ;;  %v2204_v25 = vmul.f32 %v4181_v37, %v4181_v37  ;;  %v1112_v40 = vadd.f32 %v3979_v8, %v4070_v18 }
 0x15c   :  { %v1951_v6 = vadd.f32 %v1950_v49, %v1949_v26  ;;  %v2342_v27 = vadd.f32 %v2341_v42, %v2340_v59  ;;  %vm1560_vm4 = vcmp.ge.f32.partialorder %v1104_v22, 0.0  ;;  %v2345_v59 = vsel %vm1926_vm5, %v2203_v28, 0.0 }
 0x15d   :  { %vm1561_vm6 = vcmp.ge.f32.partialorder %v1107_v63, 0.0  ;;  %v1690_v58 = vmul.f32 0.2, %v1112_v40  ;;  %vm1562_vm7 = vcmp.ge.f32.partialorder %v1112_v40, 0.0 }
 0x15e   :  { %v1953_v53 = vadd.f32 %v1952_v15, %v1951_v6  ;;  %v1956_v6 = vsel %vm1926_vm5, %v4170_v9, 0.0  ;;  %v2344_v31 = vadd.f32 %v2343_v44, %v2342_v27  ;;  %v4192_v15 = vsel %vm1559_vm3, %v1099_v11, %v1687_v7 }
 0x15f   :  { %6814 = vst [vmem:[#allocation19_spill] sm:$0xff] %v4192_v15  ;;  %v2347_v11 = vsel %vm1926_vm5, %v2204_v25, 0.0  ;;  %v2205_v18 = vmul.f32 %v4192_v15, %v4192_v15 }
 0x160   :  { %v4166_v14 = vpop.f32.mrb[52].mxu0  ;;  %v4168_v60 = vpop.f32.mrb[52].mxu1  ;;  %v2346_v27 = vadd.f32 %v2345_v59, %v2344_v31  ;;  %v1120_v31 = vadd.f32 %v3979_v8, %v4103_v46 }
 0x161   :  { %v1137_v20 = vpop.f32.mrb[53].mxu0  ;;  %v1393_v2 = vpop.f32.mrb[53].mxu1  ;;  %v2349_v59 = vsel %vm1926_vm5, %v2205_v18, 0.0 }
 0x162   :  { %v4177_v49 = vpop.f32.mrb[54].mxu0  ;;  %v4179_v26 = vpop.f32.mrb[54].mxu1  ;;  %v1955_v20 = vadd.f32 %v1954_v4, %v1953_v53  ;;  %v1688_v2 = vmul.f32 0.2, %v1104_v22  ;;  %v1958_v53 = vsel %vm1926_vm5, %v4181_v37, 0.0  ;;  %v2348_v25 = vadd.f32 %v2347_v11, %v2346_v27 }
 0x163   :  { %v1140_v16 = vpop.f32.mrb[55].mxu0  ;;  %v1396_v1 = vpop.f32.mrb[55].mxu1  ;;  %v1692_v18 = vmul.f32 0.2, %v1120_v31  ;;  %v1123_v27 = vadd.f32 %v3979_v8, %v4112_v52  ;;  %vm1564_vm9 = vcmp.ge.f32.partialorder %v1120_v31, 0.0 }
 0x164   :  { %v1957_v4 = vadd.f32 %v1956_v6, %v1955_v20  ;;  %v4203_v16 = vsel %vm1560_vm4, %v1104_v22, %v1688_v2  ;;  %v1689_v1 = vmul.f32 0.2, %v1107_v63  ;;  %v1115_v22 = vadd.f32 %v3979_v8, %v4081_v10 }
 0x165   :  { %6815 = vst [vmem:[#allocation20_spill] sm:$0xff] %v4203_v16  ;;  %v2206_v6 = vmul.f32 %v4203_v16, %v4203_v16  ;;  %v1962_v10 = vsel %vm1926_vm5, %v4203_v16, 0.0  ;;  %v2350_v46 = vadd.f32 %v2349_v59, %v2348_v25  ;;  %v1128_v59 = vadd.f32 %v3979_v8, %v4134_v30 }
 0x166   :  { %v1959_v37 = vadd.f32 %v1958_v53, %v1957_v4  ;;  %v4225_v4 = vsel %vm1562_vm7, %v1112_v40, %v1690_v58  ;;  %vm1563_vm8 = vcmp.ge.f32.partialorder %v1115_v22, 0.0  ;;  %v1693_v56 = vmul.f32 0.2, %v1123_v27 }
 0x167   :  { %6817 = vst [vmem:[#allocation22_spill] sm:$0xff] %v4225_v4  ;;  %vm1565_vm10 = vcmp.ge.f32.partialorder %v1123_v27, 0.0  ;;  %v1694_v30 = vmul.f32 0.2, %v1128_v59  ;;  %vm1566_vm11 = vcmp.ge.f32.partialorder %v1128_v59, 0.0 }
 0x168   :  { %v4199_v42 = vpop.f32.mrb[56].mxu0  ;;  %v4201_v38 = vpop.f32.mrb[56].mxu1 }
 0x169   :  { %v1145_v9 = vpop.f32.mrb[57].mxu0  ;;  %v1401_v44 = vpop.f32.mrb[57].mxu1 }
 0x16a   :  { %v4208_v7 = vpop.f32.mrb[58].mxu0  ;;  %v4210_v28 = vpop.f32.mrb[58].mxu1  ;;  %v1960_v9 = vsel %vm1926_vm5, %v4192_v15, 0.0  ;;  %v4218_v44 = vsel %vm1561_vm6, %v1107_v63, %v1689_v1 }
 0x16b   :  { %v1148_v20 = vpop.f32.mrb[59].mxu0  ;;  %v1404_v2 = vpop.f32.mrb[59].mxu1  ;;  %6816 = vst [vmem:[#allocation21_spill] sm:$0xff] %v4218_v44  ;;  %v1961_v53 = vadd.f32 %v1960_v9, %v1959_v37  ;;  %v2207_v15 = vmul.f32 %v4218_v44, %v4218_v44  ;;  %v1964_v40 = vsel %vm1926_vm5, %v4218_v44, 0.0  ;;  %v2208_v9 = vmul.f32 %v4225_v4, %v4225_v4 }
 0x16c   :  { %v1691_v20 = vmul.f32 0.2, %v1115_v22  ;;  %v2351_v2 = vsel %vm1926_vm5, %v2206_v6, 0.0  ;;  %v4251_v44 = vsel %vm1564_vm9, %v1120_v31, %v1692_v18 }
 0x16d   :  { %v1963_v11 = vadd.f32 %v1962_v10, %v1961_v53  ;;  %v2352_v35 = vadd.f32 %v2351_v2, %v2350_v46  ;;  %v2353_v53 = vsel %vm1926_vm5, %v2207_v15, 0.0  ;;  %6819 = vst [vmem:[#allocation24_spill] sm:$0xff] %v4251_v44  ;;  %v2355_v33 = vsel %vm1926_vm5, %v2208_v9, 0.0 }
 0x16e   :  { %v4244_v25 = vsel %vm1563_vm8, %v1115_v22, %v1691_v20  ;;  %v1131_v46 = vadd.f32 %v3979_v8, %v4144_v45  ;;  %v2210_v31 = vmul.f32 %v4251_v44, %v4251_v44  ;;  %v4266_v9 = vsel %vm1565_vm10, %v1123_v27, %v1693_v56 }
 0x16f   :  { %6818 = vst [vmem:[#allocation23_spill] sm:$0xff] %v4244_v25  ;;  %v2209_v22 = vmul.f32 %v4244_v25, %v4244_v25  ;;  %v2354_v20 = vadd.f32 %v2353_v53, %v2352_v35  ;;  %v1968_v15 = vsel %vm1926_vm5, %v4244_v25, 0.0  ;;  %6820 = vst [vmem:[#allocation25_spill] sm:$0xff] %v4266_v9  ;;  %v1136_v35 = vadd.f32 %v3979_v8, %v4166_v14 }
 0x170   :  { %v4230_v63 = vpop.f32.mrb[60].mxu0  ;;  %v4232_v1 = vpop.f32.mrb[60].mxu1  ;;  %v1970_v53 = vsel %vm1926_vm5, %v4251_v44, 0.0  ;;  %v2211_v14 = vmul.f32 %v4266_v9, %v4266_v9  ;;  %vm1567_vm12 = vcmp.ge.f32.partialorder %v1131_v46, 0.0  ;;  %v1139_v44 = vadd.f32 %v3979_v8, %v4177_v49 }
 0x171   :  { %v1153_v37 = vpop.f32.mrb[61].mxu0  ;;  %v1409_v58 = vpop.f32.mrb[61].mxu1  ;;  %v2357_v45 = vsel %vm1926_vm5, %v2209_v22, 0.0  ;;  %vm1568_vm13 = vcmp.ge.f32.partialorder %v1136_v35, 0.0 }
 0x172   :  { %v4240_v6 = vpop.f32.mrb[62].mxu0  ;;  %v4242_v16 = vpop.f32.mrb[62].mxu1  ;;  %v1966_v37 = vsel %vm1926_vm5, %v4225_v4, 0.0  ;;  %v1965_v58 = vadd.f32 %v1964_v40, %v1963_v11  ;;  %v2356_v40 = vadd.f32 %v2355_v33, %v2354_v20  ;;  %v4277_v4 = vsel %vm1566_vm11, %v1128_v59, %v1694_v30 }
 0x173   :  { %v1156_v52 = vpop.f32.mrb[63].mxu0  ;;  %v1412_v10 = vpop.f32.mrb[63].mxu1  ;;  %6822 = vst [vmem:[#allocation27_spill] sm:$0xff] %v4277_v4  ;;  %v1695_v33 = vmul.f32 0.2, %v1131_v46  ;;  %v2359_v20 = vsel %vm1926_vm5, %v2210_v31, 0.0  ;;  %v2212_v59 = vmul.f32 %v4277_v4, %v4277_v4  ;;  %v1144_v31 = vadd.f32 %v3979_v8, %v4199_v42 }
 0x174   :  { %v1967_v2 = vadd.f32 %v1966_v37, %v1965_v58  ;;  %v2358_v22 = vadd.f32 %v2357_v45, %v2356_v40  ;;  %v2361_v40 = vsel %vm1926_vm5, %v2211_v14, 0.0  ;;  %vm1569_vm14 = vcmp.ge.f32.partialorder %v1139_v44, 0.0 }
 0x175   :  { %vm1570_vm15 = vcmp.ge.f32.partialorder %v1144_v31, 0.0 }
 0x176   :  { %v1969_v25 = vadd.f32 %v1968_v15, %v1967_v2  ;;  %v1972_v2 = vsel %vm1926_vm5, %v4266_v9, 0.0  ;;  %v2360_v30 = vadd.f32 %v2359_v20, %v2358_v22  ;;  %v4288_v15 = vsel %vm1567_vm12, %v1131_v46, %v1695_v33 }
 0x177   :  { %6823 = vst [vmem:[#allocation28_spill] sm:$0xff] %v4288_v15  ;;  %v2363_v46 = vsel %vm1926_vm5, %v2212_v59, 0.0  ;;  %v2213_v42 = vmul.f32 %v4288_v15, %v4288_v15 }
 0x178   :  { %v4262_v11 = vpop.f32.mrb[64].mxu0  ;;  %v4264_v18 = vpop.f32.mrb[64].mxu1  ;;  %v2362_v22 = vadd.f32 %v2361_v40, %v2360_v30  ;;  %v1152_v30 = vadd.f32 %v3979_v8, %v4230_v63 }
 0x179   :  { %v1161_v52 = vpop.f32.mrb[65].mxu0  ;;  %v1417_v10 = vpop.f32.mrb[65].mxu1  ;;  %v2365_v40 = vsel %vm1926_vm5, %v2213_v42, 0.0  ;;  %v1155_v42 = vadd.f32 %v3979_v8, %v4240_v6 }
 0x17a   :  { %v4273_v37 = vpop.f32.mrb[66].mxu0  ;;  %v4275_v58 = vpop.f32.mrb[66].mxu1  ;;  %v1971_v52 = vadd.f32 %v1970_v53, %v1969_v25  ;;  %v1696_v10 = vmul.f32 0.2, %v1136_v35  ;;  %v1974_v25 = vsel %vm1926_vm5, %v4277_v4, 0.0  ;;  %v2364_v59 = vadd.f32 %v2363_v46, %v2362_v22 }
 0x17b   :  { %6821 = vst [vmem:[#allocation26_spill] sm:$0xff] %v4275_v58  ;;  %v1164_v56 = vpop.f32.mrb[67].mxu0  ;;  %v1420_v27 = vpop.f32.mrb[67].mxu1  ;;  %v1698_v58 = vmul.f32 0.2, %v1144_v31  ;;  %vm1572_vm1 = vcmp.ge.f32.partialorder %v1152_v30, 0.0 }
 0x17c   :  { %v1973_v53 = vadd.f32 %v1972_v2, %v1971_v52  ;;  %v4299_v56 = vsel %vm1568_vm13, %v1136_v35, %v1696_v10  ;;  %v1697_v27 = vmul.f32 0.2, %v1139_v44  ;;  %v1147_v35 = vadd.f32 %v3979_v8, %v4208_v7 }
 0x17d   :  { %6825 = vst [vmem:[#allocation30_spill] sm:$0xff] %v4299_v56  ;;  %v2214_v2 = vmul.f32 %v4299_v56, %v4299_v56  ;;  %v1978_v7 = vsel %vm1926_vm5, %v4299_v56, 0.0  ;;  %v2366_v46 = vadd.f32 %v2365_v40, %v2364_v59  ;;  %v1700_v22 = vmul.f32 0.2, %v1152_v30 }
 0x17e   :  { %v1975_v4 = vadd.f32 %v1974_v25, %v1973_v53  ;;  %v4321_v53 = vsel %vm1570_vm15, %v1144_v31, %v1698_v58  ;;  %vm1571_vm0 = vcmp.ge.f32.partialorder %v1147_v35, 0.0  ;;  %v1160_v40 = vadd.f32 %v3979_v8, %v4262_v11 }
 0x17f   :  { %6828 = vst [vmem:[#allocation33_spill] sm:$0xff] %v4321_v53  ;;  %v2216_v31 = vmul.f32 %v4321_v53, %v4321_v53  ;;  %vm1573_vm2 = vcmp.ge.f32.partialorder %v1155_v42, 0.0 }
 0x180   :  { %v4295_v45 = vpop.f32.mrb[68].mxu0  ;;  %v4297_v49 = vpop.f32.mrb[68].mxu1  ;;  %v1702_v11 = vmul.f32 0.2, %v1160_v40  ;;  %vm1574_vm3 = vcmp.ge.f32.partialorder %v1160_v40, 0.0 }
 0x181   :  { %6824 = vst [vmem:[#allocation29_spill] sm:$0xff] %v4297_v49  ;;  %v1169_v9 = vpop.f32.mrb[69].mxu0  ;;  %v1425_v20 = vpop.f32.mrb[69].mxu1  ;;  %v2371_v49 = vsel %vm1926_vm5, %v2216_v31, 0.0 }
 0x182   :  { %v4304_v33 = vpop.f32.mrb[70].mxu0  ;;  %v4306_v14 = vpop.f32.mrb[70].mxu1  ;;  %v1976_v9 = vsel %vm1926_vm5, %v4288_v15, 0.0  ;;  %v4314_v20 = vsel %vm1569_vm14, %v1139_v44, %v1697_v27 }
 0x183   :  { %6826 = vst [vmem:[#allocation31_spill] sm:$0xff] %v4306_v14  ;;  %v1172_v52 = vpop.f32.mrb[71].mxu0  ;;  %v1428_v10 = vpop.f32.mrb[71].mxu1  ;;  %6827 = vst [vmem:[#allocation32_spill] sm:$0xff] %v4314_v20  ;;  %v1977_v25 = vadd.f32 %v1976_v9, %v1975_v4  ;;  %v2215_v15 = vmul.f32 %v4314_v20, %v4314_v20  ;;  %v1980_v58 = vsel %vm1926_vm5, %v4314_v20, 0.0  ;;  %v4345_v20 = vsel %vm1572_vm1, %v1152_v30, %v1700_v22 }
 0x184   :  { %v1699_v52 = vmul.f32 0.2, %v1147_v35  ;;  %v2367_v10 = vsel %vm1926_vm5, %v2214_v2, 0.0  ;;  %6832 = vst [vmem:[#allocation37_spill] sm:$0xff] %v4345_v20  ;;  %v1701_v14 = vmul.f32 0.2, %v1155_v42  ;;  %v2218_v30 = vmul.f32 %v4345_v20, %v4345_v20 }
 0x185   :  { %v1979_v63 = vadd.f32 %v1978_v7, %v1977_v25  ;;  %v2369_v7 = vsel %vm1926_vm5, %v2215_v15, 0.0  ;;  %v1982_v25 = vsel %vm1926_vm5, %v4321_v53, 0.0  ;;  %v4367_v53 = vsel %vm1574_vm3, %v1160_v40, %v1702_v11 }
 0x186   :  { %v4338_v59 = vsel %vm1571_vm0, %v1147_v35, %v1699_v52  ;;  %v4358_v31 = vsel %vm1573_vm2, %v1155_v42, %v1701_v14  ;;  %6836 = vst [vmem:[#allocation41_spill] sm:$0xff] %v4367_v53  ;;  %v2375_v42 = vsel %vm1926_vm5, %v2218_v30, 0.0  ;;  %v2220_v40 = vmul.f32 %v4367_v53, %v4367_v53 }
 0x187   :  { %6831 = vst [vmem:[#allocation36_spill] sm:$0xff] %v4338_v59  ;;  %v2217_v35 = vmul.f32 %v4338_v59, %v4338_v59  ;;  %v1984_v15 = vsel %vm1926_vm5, %v4338_v59, 0.0  ;;  %6834 = vst [vmem:[#allocation39_spill] sm:$0xff] %v4358_v31 }
 0x188   :  { %v1175_v44 = vpop.f32.mrb[72].mxu0  ;;  %v4326_v27 = vpop.f32.mrb[72].mxu1 }
 0x189   :  { %6829 = vst [vmem:[#allocation34_spill] sm:$0xff] %v4326_v27  ;;  %v1177_v56 = vpop.f32.mrb[73].mxu0  ;;  %v1433_v4 = vpop.f32.mrb[73].mxu1  ;;  %v2368_v27 = vadd.f32 %v2367_v10, %v2366_v46  ;;  %v1163_v46 = vadd.f32 %v3979_v8, %v4273_v37  ;;  %v2373_v37 = vsel %vm1926_vm5, %v2217_v35, 0.0  ;;  %v1176_v30 = vadd.f32 %v3979_v8, %v1175_v44 }
 0x18a   :  { %v4334_v9 = vpop.f32.mrb[74].mxu0  ;;  %v4336_v2 = vpop.f32.mrb[74].mxu1  ;;  %v1981_v4 = vadd.f32 %v1980_v58, %v1979_v63 }
 0x18b   :  { %6830 = vst [vmem:[#allocation35_spill] sm:$0xff] %v4336_v2  ;;  %v1180_v6 = vpop.f32.mrb[75].mxu0  ;;  %v1436_v56 = vpop.f32.mrb[75].mxu1  ;;  %v2370_v52 = vadd.f32 %v2369_v7, %v2368_v27  ;;  %v1168_v27 = vadd.f32 %v3979_v8, %v4295_v45  ;;  %v1986_v7 = vsel %vm1926_vm5, %v4345_v20, 0.0  ;;  %v2219_v45 = vmul.f32 %v4358_v31, %v4358_v31 }
 0x18c   :  { %v1983_v10 = vadd.f32 %v1982_v25, %v1981_v4  ;;  %vm1575_vm4 = vcmp.ge.f32.partialorder %v1163_v46, 0.0  ;;  %vm1578_vm8 = vcmp.ge.f32.partialorder %v1176_v30, 0.0 }
 0x18d   :  { %v2372_v58 = vadd.f32 %v2371_v49, %v2370_v52  ;;  %vm1576_vm6 = vcmp.ge.f32.partialorder %v1168_v27, 0.0 }
 0x18e   :  { %v1985_v59 = vadd.f32 %v1984_v15, %v1983_v10  ;;  %v1988_v10 = vsel %vm1926_vm5, %v4358_v31, 0.0 }
 0x18f   :  { %v2374_v52 = vadd.f32 %v2373_v37, %v2372_v58 }
 0x190   :  { %v1183_v63 = vpop.f32.mrb[76].mxu0  ;;  %v4356_v22 = vpop.f32.mrb[76].mxu1  ;;  %v1987_v35 = vadd.f32 %v1986_v7, %v1985_v59  ;;  %v1990_v59 = vsel %vm1926_vm5, %v4367_v53, 0.0  ;;  %v1706_v53 = vmul.f32 0.2, %v1176_v30 }
 0x191   :  { %6833 = vst [vmem:[#allocation38_spill] sm:$0xff] %v4356_v22  ;;  %v1185_v6 = vpop.f32.mrb[77].mxu0  ;;  %v1441_v56 = vpop.f32.mrb[77].mxu1  ;;  %v1703_v22 = vmul.f32 0.2, %v1163_v46  ;;  %v2376_v11 = vadd.f32 %v2375_v42, %v2374_v52  ;;  %v2379_v42 = vsel %vm1926_vm5, %v2220_v40, 0.0 }
 0x192   :  { %v1186_v25 = vpop.f32.mrb[78].mxu0  ;;  %v4365_v4 = vpop.f32.mrb[78].mxu1  ;;  %v1704_v6 = vmul.f32 0.2, %v1168_v27  ;;  %v1171_v56 = vadd.f32 %v3979_v8, %v4304_v33  ;;  %v1989_v33 = vadd.f32 %v1988_v10, %v1987_v35  ;;  %v1179_v35 = vadd.f32 %v3979_v8, %v4334_v9 }
 0x193   :  { %6835 = vst [vmem:[#allocation40_spill] sm:$0xff] %v4365_v4  ;;  %v1188_v49 = vpop.f32.mrb[79].mxu0  ;;  %v1444_v14 = vpop.f32.mrb[79].mxu1  ;;  %v4378_v15 = vsel %vm1575_vm4, %v1163_v46, %v1703_v22 }
 0x194   :  { %6837 = vst [vmem:[#allocation42_spill] sm:$0xff] %v4378_v15  ;;  %v2377_v49 = vsel %vm1926_vm5, %v2219_v45, 0.0  ;;  %v4386_v7 = vsel %vm1576_vm6, %v1168_v27, %v1704_v6  ;;  %v1705_v14 = vmul.f32 0.2, %v1171_v56  ;;  %v2221_v46 = vmul.f32 %v4378_v15, %v4378_v15 }
 0x195   :  { %6839 = vst [vmem:[#allocation44_spill] sm:$0xff] %v4386_v7  ;;  %vm1577_vm7 = vcmp.ge.f32.partialorder %v1171_v56, 0.0  ;;  %v2378_v45 = vadd.f32 %v2377_v49, %v2376_v11  ;;  %v1991_v52 = vadd.f32 %v1990_v59, %v1989_v33  ;;  %v1994_v49 = vsel %vm1926_vm5, %v4386_v7, 0.0 }
 0x196   :  { %v4399_v40 = vsel %vm1577_vm7, %v1171_v56, %v1705_v14  ;;  %v2381_v11 = vsel %vm1926_vm5, %v2221_v46, 0.0  ;;  %v4405_v59 = vsel %vm1578_vm8, %v1176_v30, %v1706_v53  ;;  %v1707_v33 = vmul.f32 0.2, %v1179_v35 }
 0x197   :  { %v2380_v10 = vadd.f32 %v2379_v42, %v2378_v45  ;;  %6841 = vst [vmem:[#allocation46_spill] sm:$0xff] %v4399_v40  ;;  %6842 = vst [vmem:[#allocation47_spill] sm:$0xff] %v4405_v59  ;;  %vm1579_vm9 = vcmp.ge.f32.partialorder %v1179_v35, 0.0  ;;  %v1187_v46 = vadd.f32 %v3979_v8, %v1186_v25  ;;  %v1996_v53 = vsel %vm1926_vm5, %v4399_v40, 0.0 }
 0x198   :  { %v1191_v58 = vpop.f32.mrb[80].mxu0  ;;  %v4384_v37 = vpop.f32.mrb[80].mxu1  ;;  %v2224_v30 = vmul.f32 %v4405_v59, %v4405_v59 }
 0x199   :  { %6838 = vst [vmem:[#allocation43_spill] sm:$0xff] %v4384_v37  ;;  %v1193_v31 = vpop.f32.mrb[81].mxu0  ;;  %v1449_v20 = vpop.f32.mrb[81].mxu1  ;;  %v2382_v14 = vadd.f32 %v2381_v11, %v2380_v10  ;;  %v4419_v37 = vsel %vm1579_vm9, %v1179_v35, %v1707_v33  ;;  %v1192_v10 = vadd.f32 %v3979_v8, %v1191_v58  ;;  %vm1581_vm11 = vcmp.ge.f32.partialorder %v1187_v46, 0.0 }
 0x19a   :  { %v1194_v44 = vpop.f32.mrb[82].mxu0  ;;  %v4391_v22 = vpop.f32.mrb[82].mxu1  ;;  %v1992_v20 = vsel %vm1926_vm5, %v4378_v15, 0.0  ;;  %v2222_v31 = vmul.f32 %v4386_v7, %v4386_v7  ;;  %6845 = vst [vmem:[#allocation50_spill] sm:$0xff] %v4419_v37 }
 0x19b   :  { %6840 = vst [vmem:[#allocation45_spill] sm:$0xff] %v4391_v22  ;;  %v1196_v27 = vpop.f32.mrb[83].mxu0  ;;  %v1452_v6 = vpop.f32.mrb[83].mxu1  ;;  %v1184_v22 = vadd.f32 %v3979_v8, %v1183_v63  ;;  %v1993_v9 = vadd.f32 %v1992_v20, %v1991_v52  ;;  %v1710_v58 = vmul.f32 0.2, %v1192_v10  ;;  %vm1582_vm12 = vcmp.ge.f32.partialorder %v1192_v10, 0.0 }
 0x19c   :  { %v2383_v27 = vsel %vm1926_vm5, %v2222_v31, 0.0  ;;  %v2223_v6 = vmul.f32 %v4399_v40, %v4399_v40  ;;  %v1709_v40 = vmul.f32 0.2, %v1187_v46 }
 0x19d   :  { %v1995_v63 = vadd.f32 %v1994_v49, %v1993_v9  ;;  %v1708_v45 = vmul.f32 0.2, %v1184_v22  ;;  %vm1580_vm10 = vcmp.ge.f32.partialorder %v1184_v22, 0.0  ;;  %v2384_v31 = vadd.f32 %v2383_v27, %v2382_v14 }
 0x19e   :  { %v2385_v25 = vsel %vm1926_vm5, %v2223_v6, 0.0  ;;  %v2225_v27 = vmul.f32 %v4419_v37, %v4419_v37  ;;  %v1195_v14 = vadd.f32 %v3979_v8, %v1194_v44  ;;  %v2000_v6 = vsel %vm1926_vm5, %v4419_v37, 0.0 }
 0x19f   :  { %v4425_v9 = vsel %vm1580_vm10, %v1184_v22, %v1708_v45  ;;  %v2386_v35 = vadd.f32 %v2385_v25, %v2384_v31 }
 0x1a0   :  { %v1199_v42 = vpop.f32.mrb[84].mxu0  ;;  %v4410_v56 = vpop.f32.mrb[84].mxu1  ;;  %6846 = vst [vmem:[#allocation51_spill] sm:$0xff] %v4425_v9  ;;  %v2389_v25 = vsel %vm1926_vm5, %v2225_v27, 0.0  ;;  %v2002_v44 = vsel %vm1926_vm5, %v4425_v9, 0.0  ;;  %vm1583_vm13 = vcmp.ge.f32.partialorder %v1195_v14, 0.0 }
 0x1a1   :  { %6843 = vst [vmem:[#allocation48_spill] sm:$0xff] %v4410_v56  ;;  %v1201_v15 = vpop.f32.mrb[85].mxu0  ;;  %v1457_v7 = vpop.f32.mrb[85].mxu1  ;;  %v2387_v56 = vsel %vm1926_vm5, %v2224_v30, 0.0  ;;  %v4437_v30 = vsel %vm1581_vm11, %v1187_v46, %v1709_v40 }
 0x1a2   :  { %v1202_v52 = vpop.f32.mrb[86].mxu0  ;;  %v4417_v20 = vpop.f32.mrb[86].mxu1  ;;  %v1998_v15 = vsel %vm1926_vm5, %v4405_v59, 0.0  ;;  %v1997_v7 = vadd.f32 %v1996_v53, %v1995_v63  ;;  %v2226_v63 = vmul.f32 %v4425_v9, %v4425_v9  ;;  %v2388_v53 = vadd.f32 %v2387_v56, %v2386_v35  ;;  %6848 = vst [vmem:[#allocation53_spill] sm:$0xff] %v4437_v30 }
 0x1a3   :  { %6844 = vst [vmem:[#allocation49_spill] sm:$0xff] %v4417_v20  ;;  %v1204_v11 = vpop.f32.mrb[87].mxu0  ;;  %v1460_v49 = vpop.f32.mrb[87].mxu1  ;;  %v4445_v59 = vsel %vm1582_vm12, %v1192_v10, %v1710_v58  ;;  %v1711_v20 = vmul.f32 0.2, %v1195_v14 }
 0x1a4   :  { %v1999_v33 = vadd.f32 %v1998_v15, %v1997_v7  ;;  %v1200_v11 = vadd.f32 %v3979_v8, %v1199_v42  ;;  %6850 = vst [vmem:[#allocation55_spill] sm:$0xff] %v4445_v59  ;;  %v2391_v40 = vsel %vm1926_vm5, %v2226_v63, 0.0  ;;  %v2227_v42 = vmul.f32 %v4437_v30, %v4437_v30 }
 0x1a5   :  { %v2390_v46 = vadd.f32 %v2389_v25, %v2388_v53  ;;  %v2228_v10 = vmul.f32 %v4445_v59, %v4445_v59  ;;  %v4455_v58 = vsel %vm1583_vm13, %v1195_v14, %v1711_v20 }
 0x1a6   :  { %v2001_v37 = vadd.f32 %v2000_v6, %v1999_v33  ;;  %v1712_v35 = vmul.f32 0.2, %v1200_v11  ;;  %vm1584_vm14 = vcmp.ge.f32.partialorder %v1200_v11, 0.0  ;;  %6851 = vst [vmem:[#allocation56_spill] sm:$0xff] %v4455_v58  ;;  %v2393_v63 = vsel %vm1926_vm5, %v2227_v42, 0.0 }
 0x1a7   :  { %v2392_v33 = vadd.f32 %v2391_v40, %v2390_v46  ;;  %v2395_v40 = vsel %vm1926_vm5, %v2228_v10, 0.0  ;;  %v2229_v20 = vmul.f32 %v4455_v58, %v4455_v58 }
 0x1a8   :  { %v1207_v22 = vpop.f32.mrb[88].mxu0  ;;  %v4435_v45 = vpop.f32.mrb[88].mxu1  ;;  %v2003_v27 = vadd.f32 %v2002_v44, %v2001_v37  ;;  %v2006_v37 = vsel %vm1926_vm5, %v4445_v59, 0.0  ;;  %v4463_v25 = vsel %vm1584_vm14, %v1200_v11, %v1712_v35  ;;  %v4473_v11 = vld [vmem:[%s6704_s2] ss:$0 sm:$0xff] }
 0x1a9   :  { %6847 = vst [vmem:[#allocation52_spill] sm:$0xff] %v4435_v45  ;;  %v1209_v31 = vpop.f32.mrb[89].mxu0  ;;  %v1465_v49 = vpop.f32.mrb[89].mxu1  ;;  %v1208_v6 = vadd.f32 %v3979_v8, %v1207_v22  ;;  %6853 = vst [vmem:[#allocation58_spill] sm:$0xff] %v4463_v25  ;;  %v2394_v22 = vadd.f32 %v2393_v63, %v2392_v33  ;;  %v2230_v10 = vmul.f32 %v4463_v25, %v4463_v25  ;;  %v2397_v63 = vsel %vm1926_vm5, %v2229_v20, 0.0 }
 0x1aa   :  { %v1210_v15 = vpop.f32.mrb[90].mxu0  ;;  %v4443_v7 = vpop.f32.mrb[90].mxu1  ;;  %v1203_v31 = vadd.f32 %v3979_v8, %v1202_v52  ;;  %v2004_v49 = vsel %vm1926_vm5, %v4437_v30, 0.0 }
 0x1ab   :  { %6849 = vst [vmem:[#allocation54_spill] sm:$0xff] %v4443_v7  ;;  %v1212_v45 = vpop.f32.mrb[91].mxu0  ;;  %v1468_v56 = vpop.f32.mrb[91].mxu1  ;;  %v2005_v52 = vadd.f32 %v2004_v49, %v2003_v27  ;;  %v1714_v46 = vmul.f32 0.2, %v1208_v6  ;;  %v1211_v27 = vadd.f32 %v4473_v11, %v1210_v15  ;;  %v2008_v49 = vsel %vm1926_vm5, %v4455_v58, 0.0 }
 0x1ac   :  { %v1713_v44 = vmul.f32 0.2, %v1203_v31  ;;  %vm1585_vm15 = vcmp.ge.f32.partialorder %v1203_v31, 0.0  ;;  %vm1586_vm0 = vcmp.ge.f32.partialorder %v1208_v6, 0.0  ;;  %v2399_v58 = vsel %vm1926_vm5, %v2230_v10, 0.0 }
 0x1ad   :  { %v2007_v42 = vadd.f32 %v2006_v37, %v2005_v52  ;;  %v2010_v37 = vsel %vm1926_vm5, %v4463_v25, 0.0  ;;  %vm1587_vm1 = vcmp.ge.f32.partialorder %v1211_v27, 0.0 }
 0x1ae   :  { %v4480_v33 = vsel %vm1585_vm15, %v1203_v31, %v1713_v44  ;;  %v1288_v44 = vadd.f32 %v4473_v11, %v3859_v57 }
 0x1af   :  { %6855 = vst [vmem:[#allocation60_spill] sm:$0xff] %v4480_v33  ;;  %v2009_v15 = vadd.f32 %v2008_v49, %v2007_v42  ;;  %v2231_v59 = vmul.f32 %v4480_v33, %v4480_v33 }
 0x1b0   :  { %v1215_v45 = vpop.f32.mrb[92].mxu0  ;;  %v4461_v53 = vpop.f32.mrb[92].mxu1  ;;  %vm1606_vm3 = vcmp.ge.f32.partialorder %v1288_v44, 0.0 }
 0x1b1   :  { %6852 = vst [vmem:[#allocation57_spill] sm:$0xff] %v4461_v53  ;;  %v1217_v56 = vpop.f32.mrb[93].mxu0  ;;  %v1473_v30 = vpop.f32.mrb[93].mxu1  ;;  %v1216_v52 = vadd.f32 %v4473_v11, %v1215_v45 }
 0x1b2   :  { %v1218_v8 = vpop.f32.mrb[94].mxu0  ;;  %v4468_v14 = vpop.f32.mrb[94].mxu1  ;;  %v2396_v56 = vadd.f32 %v2395_v40, %v2394_v22  ;;  %v2011_v22 = vadd.f32 %v2010_v37, %v2009_v15  ;;  %v1734_v37 = vmul.f32 0.2, %v1288_v44 }
 0x1b3   :  { %6854 = vst [vmem:[#allocation59_spill] sm:$0xff] %v4468_v14  ;;  %v1220_v30 = vpop.f32.mrb[95].mxu0  ;;  %v1476_v35 = vpop.f32.mrb[95].mxu1  ;;  %v1219_v49 = vadd.f32 %v4473_v11, %v1218_v8  ;;  %vm1588_vm2 = vcmp.ge.f32.partialorder %v1216_v52, 0.0 }
 0x1b4   :  { %v4486_v30 = vsel %vm1586_vm0, %v1208_v6, %v1714_v46  ;;  %v1715_v35 = vmul.f32 0.2, %v1211_v27  ;;  %v2398_v20 = vadd.f32 %v2397_v63, %v2396_v56  ;;  %v2012_v6 = vsel %vm1926_vm5, %v4480_v33, 0.0 }
 0x1b5   :  { %6856 = vst [vmem:[#allocation61_spill] sm:$0xff] %v4486_v30  ;;  %v2232_v42 = vmul.f32 %v4486_v30, %v4486_v30  ;;  %v1716_v46 = vmul.f32 0.2, %v1216_v52  ;;  %v2401_v63 = vsel %vm1926_vm5, %v2231_v59, 0.0  ;;  %v2013_v15 = vadd.f32 %v2012_v6, %v2011_v22 }
 0x1b6   :  { %v4502_v14 = vsel %vm1587_vm1, %v1211_v27, %v1715_v35  ;;  %v1717_v35 = vmul.f32 0.2, %v1219_v49  ;;  %vm1589_vm4 = vcmp.ge.f32.partialorder %v1219_v49, 0.0  ;;  %v1296_v22 = vadd.f32 %v4473_v11, %v3881_v5 }
 0x1b7   :  { %6859 = vst [vmem:[#allocation64_spill] sm:$0xff] %v4502_v14  ;;  %v2403_v8 = vsel %vm1926_vm5, %v2232_v42, 0.0  ;;  %v4511_v27 = vsel %vm1588_vm2, %v1216_v52, %v1716_v46  ;;  %v2016_v52 = vsel %vm1926_vm5, %v4502_v14, 0.0 }
 0x1b8   :  { %v1223_v40 = vpop.f32.mrb[96].mxu0  ;;  %v4491_v31 = vpop.f32.mrb[96].mxu1  ;;  %6860 = vst [vmem:[#allocation65_spill] sm:$0xff] %v4511_v27  ;;  %vm1608_vm8 = vcmp.ge.f32.partialorder %v1296_v22, 0.0 }
 0x1b9   :  { %6857 = vst [vmem:[#allocation62_spill] sm:$0xff] %v4491_v31  ;;  %v1225_v25 = vpop.f32.mrb[97].mxu0  ;;  %v1481_v45 = vpop.f32.mrb[97].mxu1  ;;  %v2400_v31 = vadd.f32 %v2399_v58, %v2398_v20  ;;  %v1224_v57 = vadd.f32 %v4473_v11, %v1223_v40  ;;  %v2233_v58 = vmul.f32 %v4502_v14, %v4502_v14  ;;  %v1291_v40 = vadd.f32 %v4473_v11, %v3873_v0 }
 0x1ba   :  { %v1226_v10 = vpop.f32.mrb[98].mxu0  ;;  %v4500_v9 = vpop.f32.mrb[98].mxu1  ;;  %v2014_v45 = vsel %vm1926_vm5, %v4486_v30, 0.0  ;;  %v2234_v0 = vmul.f32 %v4511_v27, %v4511_v27 }
 0x1bb   :  { %6858 = vst [vmem:[#allocation63_spill] sm:$0xff] %v4500_v9  ;;  %v1228_v25 = vpop.f32.mrb[99].mxu0  ;;  %v1484_v56 = vpop.f32.mrb[99].mxu1  ;;  %v2402_v20 = vadd.f32 %v2401_v63, %v2400_v31  ;;  %v1718_v59 = vmul.f32 0.2, %v1224_v57  ;;  %v2015_v6 = vadd.f32 %v2014_v45, %v2013_v15  ;;  %vm1590_vm6 = vcmp.ge.f32.partialorder %v1224_v57, 0.0 }
 0x1bc   :  { %v1227_v25 = vadd.f32 %v4473_v11, %v1226_v10  ;;  %v4525_v63 = vsel %vm1606_vm3, %v1288_v44, %v1734_v37  ;;  %v2405_v5 = vsel %vm1926_vm5, %v2233_v58, 0.0  ;;  %v4528_v15 = vsel %vm1589_vm4, %v1219_v49, %v1717_v35 }
 0x1bd   :  { %v2404_v30 = vadd.f32 %v2403_v8, %v2402_v20  ;;  %6862 = vst [vmem:[#allocation67_spill] sm:$0xff] %v4525_v63  ;;  %6863 = vst [vmem:[#allocation68_spill] sm:$0xff] %v4528_v15  ;;  %vm1607_vm7 = vcmp.ge.f32.partialorder %v1291_v40, 0.0  ;;  %v1735_v8 = vmul.f32 0.2, %v1291_v40  ;;  %v2018_v20 = vsel %vm1926_vm5, %v4511_v27, 0.0 }
 0x1be   :  { %v1736_v37 = vmul.f32 0.2, %v1296_v22  ;;  %v2017_v58 = vadd.f32 %v2016_v52, %v2015_v6  ;;  %v1719_v49 = vmul.f32 0.2, %v1227_v25  ;;  %v2235_v14 = vmul.f32 %v4528_v15, %v4528_v15 }
 0x1bf   :  { %v2406_v35 = vadd.f32 %v2405_v5, %v2404_v30  ;;  %vm1591_vm9 = vcmp.ge.f32.partialorder %v1227_v25, 0.0  ;;  %v2020_v30 = vsel %vm1926_vm5, %v4528_v15, 0.0  ;;  %v4551_v6 = vsel %vm1607_vm7, %v1291_v40, %v1735_v8 }
 0x1c0   :  { %v1231_v42 = vpop.f32.mrb[100].mxu0  ;;  %v4518_v56 = vpop.f32.mrb[100].mxu1  ;;  %6866 = vst [vmem:[#allocation71_spill] sm:$0xff] %v4551_v6  ;;  %v4555_v52 = vadd.f32 %v4473_v11, %v3895_v12  ;;  %v4557_v5 = vsel %vm1591_vm9, %v1227_v25, %v1719_v49 }
 0x1c1   :  { %6861 = vst [vmem:[#allocation66_spill] sm:$0xff] %v4518_v56  ;;  %v1233_v31 = vpop.f32.mrb[101].mxu0  ;;  %v1489_v46 = vpop.f32.mrb[101].mxu1  ;;  %v1232_v10 = vadd.f32 %v4473_v11, %v1231_v42  ;;  %v2407_v42 = vsel %vm1926_vm5, %v2234_v0, 0.0  ;;  %6867 = vst [vmem:[#allocation72_spill] sm:$0xff] %v4557_v5 }
 0x1c2   :  { %v1234_v45 = vpop.f32.mrb[102].mxu0  ;;  %v4531_v33 = vpop.f32.mrb[102].mxu1  ;;  %v4536_v31 = vsel %vm1590_vm6, %v1224_v57, %v1718_v59  ;;  %v4546_v59 = vsel %vm1926_vm5, %v4525_v63, 0.0  ;;  %v2408_v0 = vadd.f32 %v2407_v42, %v2406_v35  ;;  %vm1609_vm13 = vcmp.ge.f32.partialorder %v4555_v52, 0.0 }
 0x1c3   :  { %6864 = vst [vmem:[#allocation69_spill] sm:$0xff] %v4531_v33  ;;  %6865 = vst [vmem:[#allocation70_spill] sm:$0xff] %v4536_v31  ;;  %v1236_v46 = vpop.f32.mrb[103].mxu0  ;;  %v1492_v44 = vpop.f32.mrb[103].mxu1  ;;  %v2019_v33 = vadd.f32 %v2018_v20, %v2017_v58  ;;  %v2236_v27 = vmul.f32 %v4536_v31, %v4536_v31  ;;  %v1720_v56 = vmul.f32 0.2, %v1232_v10  ;;  %v1235_v57 = vadd.f32 %v4473_v11, %v1234_v45 }
 0x1c4   :  { %vm1592_vm10 = vcmp.ge.f32.partialorder %v1232_v10, 0.0  ;;  %v4562_v46 = vsel %vm1608_vm8, %v1296_v22, %v1736_v37  ;;  %v2409_v44 = vsel %vm1926_vm5, %v2235_v14, 0.0  ;;  %v2022_v58 = vsel %vm1926_vm5, %v4536_v31, 0.0 }
 0x1c5   :  { %6869 = vst [vmem:[#allocation74_spill] sm:$0xff] %v4562_v46  ;;  %v2021_v12 = vadd.f32 %v2020_v30, %v2019_v33  ;;  %v2411_v35 = vsel %vm1926_vm5, %v2236_v27, 0.0  ;;  %v4569_v25 = vsel %vm1592_vm10, %v1232_v10, %v1720_v56  ;;  %v1721_v49 = vmul.f32 0.2, %v1235_v57 }
 0x1c6   :  { %6870 = vst [vmem:[#allocation75_spill] sm:$0xff] %v4569_v25  ;;  %v2237_v22 = vmul.f32 %v4557_v5, %v4557_v5  ;;  %vm1593_vm11 = vcmp.ge.f32.partialorder %v1235_v57, 0.0  ;;  %v1304_v33 = vadd.f32 %v4473_v11, %v3903_v17  ;;  %v2252_v56 = vmul.f32 %v4525_v63, %v4525_v63 }
 0x1c7   :  { %v2023_v27 = vadd.f32 %v2022_v58, %v2021_v12  ;;  %v2253_v10 = vmul.f32 %v4551_v6, %v4551_v6  ;;  %v2024_v30 = vsel %vm1926_vm5, %v4557_v5, 0.0  ;;  %v2026_v58 = vsel %vm1926_vm5, %v4569_v25, 0.0 }
 0x1c8   :  { %v1239_v20 = vpop.f32.mrb[104].mxu0  ;;  %v4559_v45 = vpop.f32.mrb[104].mxu1  ;;  %vm1610_vm14 = vcmp.ge.f32.partialorder %v1304_v33, 0.0 }
 0x1c9   :  { %6868 = vst [vmem:[#allocation73_spill] sm:$0xff] %v4559_v45  ;;  %v1240_v40 = vadd.f32 %v4473_v11, %v1239_v20  ;;  %v1241_v8 = vpop.f32.mrb[105].mxu0  ;;  %v1497_v15 = vpop.f32.mrb[105].mxu1  ;;  %v2025_v63 = vadd.f32 %v2024_v30, %v2023_v27 }
 0x1ca   :  { %v1242_v42 = vpop.f32.mrb[106].mxu0  ;;  %v4571_v45 = vpop.f32.mrb[106].mxu1  ;;  %v2410_v15 = vadd.f32 %v2409_v44, %v2408_v0  ;;  %v2238_v8 = vmul.f32 %v4569_v25, %v4569_v25  ;;  %v4590_v0 = vsel %vm1593_vm11, %v1235_v57, %v1721_v49  ;;  %v2413_v44 = vsel %vm1926_vm5, %v2237_v22, 0.0 }
 0x1cb   :  { %6871 = vst [vmem:[#allocation76_spill] sm:$0xff] %v4571_v45  ;;  %v1722_v14 = vmul.f32 0.2, %v1240_v40  ;;  %v1243_v37 = vadd.f32 %v4473_v11, %v1242_v42  ;;  %v1244_v31 = vpop.f32.mrb[107].mxu0  ;;  %v1500_v20 = vpop.f32.mrb[107].mxu1  ;;  %vm1594_vm12 = vcmp.ge.f32.partialorder %v1240_v40, 0.0  ;;  %v2239_v49 = vmul.f32 %v4590_v0, %v4590_v0 }
 0x1cc   :  { %v2254_v31 = vmul.f32 %v4562_v46, %v4562_v46  ;;  %v2412_v17 = vadd.f32 %v2411_v35, %v2410_v15  ;;  %6872 = vst [vmem:[#allocation77_spill] sm:$0xff] %v4590_v0  ;;  %v1737_v20 = vmul.f32 0.2, %v4555_v52  ;;  %v1738_v35 = vmul.f32 0.2, %v1304_v33 }
 0x1cd   :  { %v4595_v12 = vsel %vm1594_vm12, %v1240_v40, %v1722_v14  ;;  %v1723_v42 = vmul.f32 0.2, %v1243_v37  ;;  %vm1595_vm15 = vcmp.ge.f32.partialorder %v1243_v37, 0.0  ;;  %v2415_v57 = vsel %vm1926_vm5, %v2238_v8, 0.0 }
 0x1ce   :  { %6873 = vst [vmem:[#allocation78_spill] sm:$0xff] %v4595_v12  ;;  %v2414_v14 = vadd.f32 %v2413_v44, %v2412_v17  ;;  %v2027_v25 = vadd.f32 %v2026_v58, %v2025_v63  ;;  %v2028_v9 = vsel %vm1926_vm5, %v4590_v0, 0.0  ;;  %v2240_v27 = vmul.f32 %v4595_v12, %v4595_v12 }
 0x1cf   :  { %v4610_v53 = vsel %vm1595_vm15, %v1243_v37, %v1723_v42  ;;  %v4614_v17 = vsel %vm1926_vm5, %v2252_v56, 0.0  ;;  %v4618_v63 = vsel %vm1926_vm5, %v4551_v6, 0.0  ;;  %v4621_v44 = vsel %vm1926_vm5, %v2253_v10, 0.0 }
 0x1d0   :  { %v1247_v5 = vpop.f32.mrb[108].mxu0  ;;  %v4598_v45 = vpop.f32.mrb[108].mxu1  ;;  %6876 = vst [vmem:[#allocation81_spill] sm:$0xff] %v4610_v53  ;;  %v2416_v58 = vadd.f32 %v2415_v57, %v2414_v14  ;;  %v4626_v37 = vsel %vm1609_vm13, %v4555_v52, %v1737_v20  ;;  %v2417_v42 = vsel %vm1926_vm5, %v2239_v49, 0.0  ;;  %v2241_v10 = vmul.f32 %v4610_v53, %v4610_v53 }
 0x1d1   :  { %6874 = vst [vmem:[#allocation79_spill] sm:$0xff] %v4598_v45  ;;  %v1248_v22 = vadd.f32 %v4473_v11, %v1247_v5  ;;  %v1249_v15 = vpop.f32.mrb[109].mxu0  ;;  %v1505_v40 = vpop.f32.mrb[109].mxu1  ;;  %6877 = vst [vmem:[#allocation82_spill] sm:$0xff] %v4626_v37  ;;  %v4640_v14 = vsel %vm1926_vm5, %v4562_v46, 0.0  ;;  %v4643_v52 = vsel %vm1926_vm5, %v2254_v31, 0.0  ;;  %v1307_v49 = vadd.f32 %v4473_v11, %v3917_v24 }
 0x1d2   :  { %v1250_v30 = vpop.f32.mrb[110].mxu0  ;;  %v4608_v45 = vpop.f32.mrb[110].mxu1  ;;  %v2030_v40 = vsel %vm1926_vm5, %v4595_v12, 0.0  ;;  %v2419_v20 = vsel %vm1926_vm5, %v2240_v27, 0.0  ;;  %v2032_v27 = vsel %vm1926_vm5, %v4610_v53, 0.0 }
 0x1d3   :  { %6875 = vst [vmem:[#allocation80_spill] sm:$0xff] %v4608_v45  ;;  %vm1596_vm0 = vcmp.ge.f32.partialorder %v1248_v22, 0.0  ;;  %v1724_v8 = vmul.f32 0.2, %v1248_v22  ;;  %v1251_v7 = vadd.f32 %v4473_v11, %v1250_v30  ;;  %v1252_v5 = vpop.f32.mrb[111].mxu0  ;;  %v1508_v15 = vpop.f32.mrb[111].mxu1  ;;  %v4634_v30 = vsel %vm1610_vm14, %v1304_v33, %v1738_v35 }
 0x1d4   :  { %6879 = vst [vmem:[#allocation84_spill] sm:$0xff] %v4634_v30  ;;  %v2029_v5 = vadd.f32 %v2028_v9, %v2027_v25  ;;  %v2418_v33 = vadd.f32 %v2417_v42, %v2416_v58  ;;  %v2256_v31 = vmul.f32 %v4634_v30, %v4634_v30  ;;  %v1312_v42 = vadd.f32 %v4473_v11, %v3925_v29 }
 0x1d5   :  { %v4631_v56 = vsel %vm1596_vm0, %v1248_v22, %v1724_v8  ;;  %v1725_v57 = vmul.f32 0.2, %v1251_v7  ;;  %vm1597_vm1 = vcmp.ge.f32.partialorder %v1251_v7, 0.0  ;;  %v2255_v8 = vmul.f32 %v4626_v37, %v4626_v37 }
 0x1d6   :  { %6878 = vst [vmem:[#allocation83_spill] sm:$0xff] %v4631_v56  ;;  %v2031_v35 = vadd.f32 %v2030_v40, %v2029_v5  ;;  %v2242_v9 = vmul.f32 %v4631_v56, %v4631_v56  ;;  %v2420_v40 = vadd.f32 %v2419_v20, %v2418_v33  ;;  %v2421_v5 = vsel %vm1926_vm5, %v2241_v10, 0.0 }
 0x1d7   :  { %v4663_v46 = vsel %vm1597_vm1, %v1251_v7, %v1725_v57  ;;  %v2034_v0 = vsel %vm1926_vm5, %v4631_v56, 0.0  ;;  %vm1611_vm3 = vcmp.ge.f32.partialorder %v1307_v49, 0.0  ;;  %v1739_v29 = vmul.f32 0.2, %v1307_v49 }
 0x1d8   :  { %v1255_v25 = vpop.f32.mrb[112].mxu0  ;;  %v4650_v22 = vpop.f32.mrb[112].mxu1  ;;  %6881 = vst [vmem:[#allocation86_spill] sm:$0xff] %v4663_v46  ;;  %v2033_v20 = vadd.f32 %v2032_v27, %v2031_v35  ;;  %v2423_v10 = vsel %vm1926_vm5, %v2242_v9, 0.0  ;;  %v2243_v7 = vmul.f32 %v4663_v46, %v4663_v46  ;;  %v2422_v56 = vadd.f32 %v2421_v5, %v2420_v40 }
 0x1d9   :  { %6880 = vst [vmem:[#allocation85_spill] sm:$0xff] %v4650_v22  ;;  %v1256_v15 = vadd.f32 %v4473_v11, %v1255_v25  ;;  %v1257_v24 = vpop.f32.mrb[113].mxu0  ;;  %v1513_v58 = vpop.f32.mrb[113].mxu1  ;;  %v4682_v35 = vsel %vm1926_vm5, %v2255_v8, 0.0  ;;  %vm1612_vm6 = vcmp.ge.f32.partialorder %v1312_v42, 0.0  ;;  %v4688_v9 = vsel %vm1926_vm5, %v4634_v30, 0.0 }
 0x1da   :  { %v1258_v6 = vpop.f32.mrb[114].mxu0  ;;  %v4665_v12 = vpop.f32.mrb[114].mxu1  ;;  %v2035_v22 = vadd.f32 %v2034_v0, %v2033_v20  ;;  %v4691_v0 = vsel %vm1926_vm5, %v2256_v31, 0.0  ;;  %v2424_v27 = vadd.f32 %v2423_v10, %v2422_v56  ;;  %v4698_v8 = vsel %vm1611_vm3, %v1307_v49, %v1739_v29 }
 0x1db   :  { %6882 = vst [vmem:[#allocation87_spill] sm:$0xff] %v4665_v12  ;;  %vm1598_vm2 = vcmp.ge.f32.partialorder %v1256_v15, 0.0  ;;  %v1726_v53 = vmul.f32 0.2, %v1256_v15  ;;  %v1259_v25 = vadd.f32 %v4473_v11, %v1258_v6  ;;  %v1260_v24 = vpop.f32.mrb[115].mxu0  ;;  %v1516_v58 = vpop.f32.mrb[115].mxu1 }
 0x1dc   :  { %v1740_v12 = vmul.f32 0.2, %v1312_v42  ;;  %v4679_v24 = vsel %vm1926_vm5, %v4626_v37, 0.0  ;;  %6886 = vst [vmem:[#allocation91_spill] sm:$0xff] %v4698_v8  ;;  %v1315_v58 = vadd.f32 %v4473_v11, %v3939_v36  ;;  %v2425_v20 = vsel %vm1926_vm5, %v2243_v7, 0.0 }
 0x1dd   :  { %v4673_v57 = vsel %vm1598_vm2, %v1256_v15, %v1726_v53  ;;  %vm1599_vm4 = vcmp.ge.f32.partialorder %v1259_v25, 0.0  ;;  %v1727_v33 = vmul.f32 0.2, %v1259_v25  ;;  %v2036_v53 = vsel %vm1926_vm5, %v4663_v46, 0.0 }
 0x1de   :  { %6883 = vst [vmem:[#allocation88_spill] sm:$0xff] %v4673_v57  ;;  %v2244_v6 = vmul.f32 %v4673_v57, %v4673_v57  ;;  %v4704_v31 = vsel %vm1612_vm6, %v1312_v42, %v1740_v12  ;;  %v2037_v56 = vadd.f32 %v2036_v53, %v2035_v22  ;;  %v4716_v12 = vsel %vm1926_vm5, %v4698_v8, 0.0 }
 0x1df   :  { %v4693_v15 = vsel %vm1599_vm4, %v1259_v25, %v1727_v33  ;;  %6887 = vst [vmem:[#allocation92_spill] sm:$0xff] %v4704_v31  ;;  %v2038_v25 = vsel %vm1926_vm5, %v4673_v57, 0.0  ;;  %v2257_v22 = vmul.f32 %v4698_v8, %v4698_v8  ;;  %v1320_v42 = vadd.f32 %v4473_v11, %v3947_v41 }
 0x1e0   :  { %6884 = vst [vmem:[#allocation89_spill] sm:$0xff] %v4693_v15  ;;  %v1263_v40 = vpop.f32.mrb[116].mxu0  ;;  %v4695_v5 = vpop.f32.mrb[116].mxu1  ;;  %v2427_v10 = vsel %vm1926_vm5, %v2244_v6, 0.0  ;;  %v2245_v36 = vmul.f32 %v4693_v15, %v4693_v15  ;;  %v2426_v6 = vadd.f32 %v2425_v20, %v2424_v27  ;;  %v2039_v53 = vadd.f32 %v2038_v25, %v2037_v56 }
 0x1e1   :  { %6885 = vst [vmem:[#allocation90_spill] sm:$0xff] %v4695_v5  ;;  %v1264_v30 = vadd.f32 %v4473_v11, %v1263_v40  ;;  %v1265_v37 = vpop.f32.mrb[117].mxu0  ;;  %v1521_v46 = vpop.f32.mrb[117].mxu1  ;;  %v4732_v8 = vsel %vm1926_vm5, %v4704_v31, 0.0  ;;  %v1741_v41 = vmul.f32 0.2, %v1315_v58  ;;  %v1323_v25 = vadd.f32 %v4473_v11, %v3958_v47 }
 0x1e2   :  { %v1266_v33 = vpop.f32.mrb[118].mxu0  ;;  %v4709_v49 = vpop.f32.mrb[118].mxu1  ;;  %v4738_v20 = vsel %vm1926_vm5, %v2257_v22, 0.0  ;;  %v1742_v56 = vmul.f32 0.2, %v1320_v42  ;;  %vm1613_vm9 = vcmp.ge.f32.partialorder %v1315_v58, 0.0 }
 0x1e3   :  { %6888 = vst [vmem:[#allocation93_spill] sm:$0xff] %v4709_v49  ;;  %vm1600_vm7 = vcmp.ge.f32.partialorder %v1264_v30, 0.0  ;;  %v1728_v29 = vmul.f32 0.2, %v1264_v30  ;;  %v1267_v7 = vadd.f32 %v4473_v11, %v1266_v33  ;;  %v1268_v37 = vpop.f32.mrb[119].mxu0  ;;  %v1524_v46 = vpop.f32.mrb[119].mxu1  ;;  %v2258_v33 = vmul.f32 %v4704_v31, %v4704_v31 }
 0x1e4   :  { %v2428_v37 = vadd.f32 %v2427_v10, %v2426_v6  ;;  %v2040_v46 = vsel %vm1926_vm5, %v4693_v15, 0.0  ;;  %vm1614_vm10 = vcmp.ge.f32.partialorder %v1320_v42, 0.0  ;;  %vm1615_vm13 = vcmp.ge.f32.partialorder %v1323_v25, 0.0 }
 0x1e5   :  { %v4722_v40 = vsel %vm1600_vm7, %v1264_v30, %v1728_v29  ;;  %vm1601_vm8 = vcmp.ge.f32.partialorder %v1267_v7, 0.0  ;;  %v1729_v57 = vmul.f32 0.2, %v1267_v7  ;;  %v2429_v30 = vsel %vm1926_vm5, %v2245_v36, 0.0 }
 0x1e6   :  { %6889 = vst [vmem:[#allocation94_spill] sm:$0xff] %v4722_v40  ;;  %v2246_v49 = vmul.f32 %v4722_v40, %v4722_v40  ;;  %v2042_v10 = vsel %vm1926_vm5, %v4722_v40, 0.0  ;;  %v2041_v31 = vadd.f32 %v2040_v46, %v2039_v53  ;;  %v4748_v22 = vsel %vm1926_vm5, %v2258_v33, 0.0 }
 0x1e7   :  { %v4735_v27 = vsel %vm1601_vm8, %v1267_v7, %v1729_v57  ;;  %v2430_v15 = vadd.f32 %v2429_v30, %v2428_v37  ;;  %v4760_v33 = vsel %vm1614_vm10, %v1320_v42, %v1742_v56 }
 0x1e8   :  { %6890 = vst [vmem:[#allocation95_spill] sm:$0xff] %v4735_v27  ;;  %v1271_v29 = vpop.f32.mrb[120].mxu0  ;;  %v4744_v6 = vpop.f32.mrb[120].mxu1  ;;  %v2431_v5 = vsel %vm1926_vm5, %v2246_v49, 0.0  ;;  %v2247_v47 = vmul.f32 %v4735_v27, %v4735_v27  ;;  %6894 = vst [vmem:[#allocation99_spill] sm:$0xff] %v4760_v33  ;;  %v2044_v37 = vsel %vm1926_vm5, %v4735_v27, 0.0 }
 0x1e9   :  { %6891 = vst [vmem:[#allocation96_spill] sm:$0xff] %v4744_v6  ;;  %v1272_v36 = vadd.f32 %v4473_v11, %v1271_v29  ;;  %v1273_v57 = vpop.f32.mrb[121].mxu0  ;;  %v1529_v7 = vpop.f32.mrb[121].mxu1  ;;  %v2043_v6 = vadd.f32 %v2042_v10, %v2041_v31  ;;  %v1743_v49 = vmul.f32 0.2, %v1323_v25  ;;  %v2432_v30 = vadd.f32 %v2431_v5, %v2430_v15 }
 0x1ea   :  { %v1274_v40 = vpop.f32.mrb[122].mxu0  ;;  %v4753_v45 = vpop.f32.mrb[122].mxu1  ;;  %v4757_v57 = vsel %vm1613_vm9, %v1315_v58, %v1741_v41  ;;  %v2433_v10 = vsel %vm1926_vm5, %v2247_v47, 0.0 }
 0x1eb   :  { %6892 = vst [vmem:[#allocation97_spill] sm:$0xff] %v4753_v45  ;;  %vm1602_vm11 = vcmp.ge.f32.partialorder %v1272_v36, 0.0  ;;  %v1730_v4 = vmul.f32 0.2, %v1272_v36  ;;  %v1275_v53 = vadd.f32 %v4473_v11, %v1274_v40  ;;  %v1276_v46 = vpop.f32.mrb[123].mxu0  ;;  %v1532_v29 = vpop.f32.mrb[123].mxu1  ;;  %v1328_v40 = vadd.f32 %v4473_v11, %v3962_v51 }
 0x1ec   :  { %6893 = vst [vmem:[#allocation98_spill] sm:$0xff] %v4757_v57  ;;  %v4775_v41 = vsel %vm1926_vm5, %v4757_v57, 0.0  ;;  %v2259_v5 = vmul.f32 %v4757_v57, %v4757_v57  ;;  %v1331_v51 = vadd.f32 %v4473_v11, %v3966_v55  ;;  %v4790_v29 = vsel %vm1926_vm5, %v4760_v33, 0.0 }
 0x1ed   :  { %v4764_v7 = vsel %vm1602_vm11, %v1272_v36, %v1730_v4  ;;  %vm1603_vm12 = vcmp.ge.f32.partialorder %v1275_v53, 0.0  ;;  %v1731_v31 = vmul.f32 0.2, %v1275_v53  ;;  %v2045_v4 = vadd.f32 %v2044_v37, %v2043_v6 }
 0x1ee   :  { %6895 = vst [vmem:[#allocation100_spill] sm:$0xff] %v4764_v7  ;;  %v2046_v58 = vsel %vm1926_vm5, %v4764_v7, 0.0  ;;  %v2248_v42 = vmul.f32 %v4764_v7, %v4764_v7  ;;  %v2434_v6 = vadd.f32 %v2433_v10, %v2432_v30  ;;  %v2260_v55 = vmul.f32 %v4760_v33, %v4760_v33 }
 0x1ef   :  { %v4777_v15 = vsel %vm1603_vm12, %v1275_v53, %v1731_v31  ;;  %v2047_v53 = vadd.f32 %v2046_v58, %v2045_v4  ;;  %vm1616_vm14 = vcmp.ge.f32.partialorder %v1328_v40, 0.0  ;;  %v1744_v4 = vmul.f32 0.2, %v1328_v40 }
 0x1f0   :  { %6896 = vst [vmem:[#allocation101_spill] sm:$0xff] %v4777_v15  ;;  %v2435_v56 = vsel %vm1926_vm5, %v2248_v42, 0.0  ;;  %v2249_v36 = vmul.f32 %v4777_v15, %v4777_v15  ;;  %v1279_v47 = vpop.f32.mrb[124].mxu0  ;;  %v4786_v46 = vpop.f32.mrb[124].mxu1  ;;  %v4796_v42 = vsel %vm1615_vm13, %v1323_v25, %v1743_v49  ;;  %v2048_v7 = vsel %vm1926_vm5, %v4777_v15, 0.0 }
 0x1f1   :  { %6897 = vst [vmem:[#allocation102_spill] sm:$0xff] %v4786_v46  ;;  %v1280_v37 = vadd.f32 %v4473_v11, %v1279_v47  ;;  %v1281_v31 = vpop.f32.mrb[125].mxu0  ;;  %v1537_v57 = vpop.f32.mrb[125].mxu1  ;;  %v2436_v45 = vadd.f32 %v2435_v56, %v2434_v6  ;;  %v1745_v47 = vmul.f32 0.2, %v1331_v51  ;;  %v1336_v25 = vadd.f32 %v4473_v11, %v3970_v61 }
 0x1f2   :  { %v1282_v27 = vpop.f32.mrb[126].mxu0  ;;  %v4800_v46 = vpop.f32.mrb[126].mxu1  ;;  %v2437_v49 = vsel %vm1926_vm5, %v2249_v36, 0.0  ;;  %v2049_v31 = vadd.f32 %v2048_v7, %v2047_v53  ;;  %vm1617_vm1 = vcmp.ge.f32.partialorder %v1331_v51, 0.0  ;;  %v1339_v56 = vadd.f32 %v4473_v11, %v3974_v3 }
 0x1f3   :  { %6898 = vst [vmem:[#allocation103_spill] sm:$0xff] %v4800_v46  ;;  %vm1604_vm15 = vcmp.ge.f32.partialorder %v1280_v37, 0.0  ;;  %v1732_v30 = vmul.f32 0.2, %v1280_v37  ;;  %v1283_v10 = vadd.f32 %v4473_v11, %v1282_v27  ;;  %v1284_v58 = vpop.f32.mrb[127].mxu0  ;;  %v1540_v57 = vpop.f32.mrb[127].mxu1  ;;  %v2261_v61 = vmul.f32 %v4796_v42, %v4796_v42 }
 0x1f4   :  { %v2438_v58 = vadd.f32 %v2437_v49, %v2436_v45  ;;  %v4819_v53 = vsel %vm1616_vm14, %v1328_v40, %v1744_v4  ;;  %v4826_v57 = vsel %vm1617_vm1, %v1331_v51, %v1745_v47  ;;  %vm1618_vm2 = vcmp.ge.f32.partialorder %v1336_v25, 0.0 }
 0x1f5   :  { %v4806_v33 = vsel %vm1604_vm15, %v1280_v37, %v1732_v30  ;;  %vm1605_vm0 = vcmp.ge.f32.partialorder %v1283_v10, 0.0  ;;  %v1733_v15 = vmul.f32 0.2, %v1283_v10  ;;  %v1747_v45 = vmul.f32 0.2, %v1339_v56 }
 0x1f6   :  { %6899 = vst [vmem:[#allocation104_spill] sm:$0xff] %v4806_v33  ;;  %v2050_v27 = vsel %vm1926_vm5, %v4806_v33, 0.0  ;;  %v2250_v6 = vmul.f32 %v4806_v33, %v4806_v33  ;;  %v1746_v33 = vmul.f32 0.2, %v1336_v25  ;;  %vm1619_vm3 = vcmp.ge.f32.partialorder %v1339_v56, 0.0 }
 0x1f7   :  { %v2051_v36 = vadd.f32 %v2050_v27, %v2049_v31  ;;  %v4816_v7 = vsel %vm1605_vm0, %v1283_v10, %v1733_v15  ;;  %v1344_v15 = vadd.f32 %v4473_v11, %v3985_v13  ;;  %v4832_v10 = vsel %vm1926_vm5, %v2259_v5, 0.0 }
 0x1f8   :  { %v2439_v37 = vsel %vm1926_vm5, %v2250_v6, 0.0  ;;  %v2052_v3 = vsel %vm1926_vm5, %v4816_v7, 0.0  ;;  %v2251_v30 = vmul.f32 %v4816_v7, %v4816_v7  ;;  %v4836_v51 = vsel %vm1926_vm5, %v2260_v55, 0.0 }
 0x1f9   :  { %v2440_v46 = vadd.f32 %v2439_v37, %v2438_v58  ;;  %v2053_v2 = vadd.f32 %v2052_v3, %v2051_v36  ;;  %v4840_v47 = vsel %vm1926_vm5, %v4796_v42, 0.0  ;;  %v4844_v31 = vsel %vm1926_vm5, %v4819_v53, 0.0 }
 0x1fa   :  { %v2441_v40 = vsel %vm1926_vm5, %v2251_v30, 0.0  ;;  %v2262_v13 = vmul.f32 %v4819_v53, %v4819_v53  ;;  %v2263_v5 = vmul.f32 %v4826_v57, %v4826_v57  ;;  %v4850_v27 = vsel %vm1618_vm2, %v1336_v25, %v1746_v33 }
 0x1fb   :  { %v2055_v4 = vadd.f32 %v4546_v59, %v2053_v2  ;;  %v2442_v49 = vadd.f32 %v2441_v40, %v2440_v46  ;;  %v4855_v46 = vsel %vm1926_vm5, %v2261_v61, 0.0  ;;  %v4857_v55 = vsel %vm1619_vm3, %v1339_v56, %v1747_v45 }
 0x1fc   :  { %v1748_v6 = vmul.f32 0.2, %v1344_v15  ;;  %v1347_v58 = vadd.f32 %v4473_v11, %v3993_v21  ;;  %vm1620_vm4 = vcmp.ge.f32.partialorder %v1344_v15, 0.0  ;;  %v1352_v36 = vadd.f32 %v4473_v11, %v4003_v32 }
 0x1fd   :  { %v2057_v2 = vadd.f32 %v4618_v63, %v2055_v4  ;;  %v2444_v59 = vadd.f32 %v4614_v17, %v2442_v49  ;;  %v4866_v63 = vsel %vm1926_vm5, %v2262_v13, 0.0  ;;  %v4870_v17 = vsel %vm1926_vm5, %v4826_v57, 0.0 }
 0x1fe   :  { %v2264_v56 = vmul.f32 %v4850_v27, %v4850_v27  ;;  %v1355_v21 = vadd.f32 %v4473_v11, %v4013_v43  ;;  %v4877_v61 = vsel %vm1926_vm5, %v2263_v5, 0.0  ;;  %v4881_v32 = vsel %vm1926_vm5, %v4850_v27, 0.0 }
 0x1ff   :  { %v2059_v33 = vadd.f32 %v4640_v14, %v2057_v2  ;;  %v2446_v25 = vadd.f32 %v4621_v44, %v2444_v59  ;;  %v2265_v37 = vmul.f32 %v4857_v55, %v4857_v55  ;;  %v4887_v3 = vsel %vm1620_vm4, %v1344_v15, %v1748_v6 }
 0x200   :  { %vm1621_vm6 = vcmp.ge.f32.partialorder %v1347_v58, 0.0  ;;  %v1749_v30 = vmul.f32 0.2, %v1347_v58  ;;  %v1750_v45 = vmul.f32 0.2, %v1352_v36  ;;  %v1360_v43 = vadd.f32 %v4473_v11, %v4040_v19 }
 0x201   :  { %v2061_v44 = vadd.f32 %v4679_v24, %v2059_v33  ;;  %v2448_v14 = vadd.f32 %v4643_v52, %v2446_v25  ;;  %v4894_v49 = vsel %vm1926_vm5, %v2264_v56, 0.0  ;;  %vm1622_vm7 = vcmp.ge.f32.partialorder %v1352_v36, 0.0 }
 0x202   :  { %v1751_v52 = vmul.f32 0.2, %v1355_v21  ;;  %v1363_v24 = vadd.f32 %v4473_v11, %v4050_v39  ;;  %v2266_v15 = vmul.f32 %v4887_v3, %v4887_v3  ;;  %vm1623_vm8 = vcmp.ge.f32.partialorder %v1355_v21, 0.0 }
 0x203   :  { %v2063_v40 = vadd.f32 %v4688_v9, %v2061_v44  ;;  %v2450_v4 = vadd.f32 %v4682_v35, %v2448_v14  ;;  %v4904_v9 = vsel %vm1926_vm5, %v4857_v55, 0.0  ;;  %v4907_v35 = vsel %vm1926_vm5, %v2265_v37, 0.0 }
 0x204   :  { %v4911_v5 = vsel %vm1926_vm5, %v4887_v3, 0.0  ;;  %v4914_v39 = vsel %vm1621_vm6, %v1347_v58, %v1749_v30  ;;  %v4916_v2 = vsel %vm1622_vm7, %v1352_v36, %v1750_v45  ;;  %v1752_v59 = vmul.f32 0.2, %v1360_v43 }
 0x205   :  { %v2065_v13 = vadd.f32 %v4716_v12, %v2063_v40  ;;  %v2452_v19 = vadd.f32 %v4691_v0, %v2450_v4  ;;  %v4920_v6 = vsel %vm1623_vm8, %v1355_v21, %v1751_v52  ;;  %vm1624_vm9 = vcmp.ge.f32.partialorder %v1360_v43, 0.0 }
 0x206   :  { %v1753_v33 = vmul.f32 0.2, %v1363_v24  ;;  %v1368_v25 = vadd.f32 %v4473_v11, %v4072_v23  ;;  %v4925_v56 = vsel %vm1926_vm5, %v2266_v15, 0.0  ;;  %vm1625_vm10 = vcmp.ge.f32.partialorder %v1363_v24, 0.0 }
 0x207   :  { %v2067_v12 = vadd.f32 %v4732_v8, %v2065_v13  ;;  %v2454_v0 = vadd.f32 %v4738_v20, %v2452_v19  ;;  %v2084_v8 = vsel %vm1926_vm5, %v4914_v39, 0.0  ;;  %v2267_v20 = vmul.f32 %v4914_v39, %v4914_v39 }
 0x208   :  { %v4935_v21 = vsel %vm1926_vm5, %v4916_v2, 0.0  ;;  %v2268_v23 = vmul.f32 %v4916_v2, %v4916_v2  ;;  %v2269_v44 = vmul.f32 %v4920_v6, %v4920_v6  ;;  %v4941_v14 = vsel %vm1624_vm9, %v1360_v43, %v1752_v59 }
 0x209   :  { %v2069_v58 = vadd.f32 %v4775_v41, %v2067_v12  ;;  %v2456_v36 = vadd.f32 %v4748_v22, %v2454_v0  ;;  %v4945_v37 = vsel %vm1625_vm10, %v1363_v24, %v1753_v33  ;;  %vm1626_vm11 = vcmp.ge.f32.partialorder %v1368_v25, 0.0 }
 0x20a   :  { %v1754_v30 = vmul.f32 0.2, %v1368_v25  ;;  %v1371_v45 = vadd.f32 %v4473_v11, %v4083_v34  ;;  %v1376_v40 = vadd.f32 %v4473_v11, %v4105_v54  ;;  %v1379_v4 = vadd.f32 %v4473_v11, %v4114_v50 }
 0x20b   :  { %v2071_v22 = vadd.f32 %v4790_v29, %v2069_v58  ;;  %v2458_v41 = vadd.f32 %v4832_v10, %v2456_v36  ;;  %v2473_v29 = vsel %vm1926_vm5, %v2267_v20, 0.0  ;;  %v2475_v10 = vsel %vm1926_vm5, %v2268_v23, 0.0 }
 0x20c   :  { %v2088_v24 = vsel %vm1926_vm5, %v4920_v6, 0.0  ;;  %v4961_v34 = vsel %vm1926_vm5, %v4941_v14, 0.0  ;;  %v4964_v54 = vsel %vm1926_vm5, %v2269_v44, 0.0  ;;  %v2270_v50 = vmul.f32 %v4941_v14, %v4941_v14 }
 0x20d   :  { %v2073_v43 = vadd.f32 %v4840_v47, %v2071_v22  ;;  %v2460_v52 = vadd.f32 %v4836_v51, %v2458_v41  ;;  %v2271_v15 = vmul.f32 %v4945_v37, %v4945_v37  ;;  %v4973_v13 = vsel %vm1626_vm11, %v1368_v25, %v1754_v30 }
 0x20e   :  { %vm1627_vm12 = vcmp.ge.f32.partialorder %v1371_v45, 0.0  ;;  %v1755_v19 = vmul.f32 0.2, %v1371_v45  ;;  %v1756_v59 = vmul.f32 0.2, %v1376_v40  ;;  %vm1628_vm13 = vcmp.ge.f32.partialorder %v1376_v40, 0.0 }
 0x20f   :  { %v2075_v47 = vadd.f32 %v4844_v31, %v2073_v43  ;;  %v2462_v51 = vadd.f32 %v4855_v46, %v2460_v52  ;;  %v1757_v12 = vmul.f32 0.2, %v1379_v4  ;;  %vm1629_vm14 = vcmp.ge.f32.partialorder %v1379_v4, 0.0 }
 0x210   :  { %v1384_v31 = vadd.f32 %v4473_v11, %v4136_v62  ;;  %v1387_v46 = vadd.f32 %v4473_v11, %v4146_v48  ;;  %v2479_v58 = vsel %vm1926_vm5, %v2270_v50, 0.0  ;;  %v2092_v25 = vsel %vm1926_vm5, %v4945_v37, 0.0 }
 0x211   :  { %v2077_v0 = vadd.f32 %v4870_v17, %v2075_v47  ;;  %v2464_v33 = vadd.f32 %v4866_v63, %v2462_v51  ;;  %v4987_v17 = vsel %vm1926_vm5, %v2271_v15, 0.0  ;;  %v2094_v63 = vsel %vm1926_vm5, %v4973_v13, 0.0 }
 0x212   :  { %v2272_v62 = vmul.f32 %v4973_v13, %v4973_v13  ;;  %v4994_v48 = vsel %vm1627_vm12, %v1371_v45, %v1755_v19  ;;  %v4996_v23 = vsel %vm1628_vm13, %v1376_v40, %v1756_v59  ;;  %v4998_v44 = vsel %vm1629_vm14, %v1379_v4, %v1757_v12 }
 0x213   :  { %v2079_v36 = vadd.f32 %v4881_v32, %v2077_v0  ;;  %v2466_v20 = vadd.f32 %v4877_v61, %v2464_v33  ;;  %vm1630_vm15 = vcmp.ge.f32.partialorder %v1384_v31, 0.0  ;;  %v1758_v22 = vmul.f32 0.2, %v1384_v31 }
 0x214   :  { %v1759_v41 = vmul.f32 0.2, %v1387_v46  ;;  %v1392_v30 = vadd.f32 %v4473_v11, %v4168_v60  ;;  %vm1631_vm0 = vcmp.ge.f32.partialorder %v1387_v46, 0.0  ;;  %v1395_v43 = vadd.f32 %v4473_v11, %v4179_v26 }
 0x215   :  { %v2081_v32 = vadd.f32 %v4904_v9, %v2079_v36  ;;  %v2468_v61 = vadd.f32 %v4894_v49, %v2466_v20  ;;  %v2483_v4 = vsel %vm1926_vm5, %v2272_v62, 0.0  ;;  %v2096_v9 = vsel %vm1926_vm5, %v4994_v48, 0.0 }
 0x216   :  { %v2273_v49 = vmul.f32 %v4994_v48, %v4994_v48  ;;  %v2274_v52 = vmul.f32 %v4996_v23, %v4996_v23  ;;  %v2098_v60 = vsel %vm1926_vm5, %v4996_v23, 0.0  ;;  %v2275_v26 = vmul.f32 %v4998_v44, %v4998_v44 }
 0x217   :  { %v2083_v45 = vadd.f32 %v4911_v5, %v2081_v32  ;;  %v2470_v40 = vadd.f32 %v4907_v35, %v2468_v61  ;;  %v5021_v50 = vsel %vm1630_vm15, %v1384_v31, %v1758_v22  ;;  %v5023_v47 = vsel %vm1631_vm0, %v1387_v46, %v1759_v41 }
 0x218   :  { %vm1632_vm1 = vcmp.ge.f32.partialorder %v1392_v30, 0.0  ;;  %v1760_v51 = vmul.f32 0.2, %v1392_v30  ;;  %v1761_v15 = vmul.f32 0.2, %v1395_v43  ;;  %v1400_v19 = vadd.f32 %v4473_v11, %v4201_v38 }
 0x219   :  { %v2085_v5 = vadd.f32 %v2084_v8, %v2083_v45  ;;  %v2472_v35 = vadd.f32 %v4925_v56, %v2470_v40  ;;  %v2485_v0 = vsel %vm1926_vm5, %v2273_v49, 0.0  ;;  %v2487_v8 = vsel %vm1926_vm5, %v2274_v52, 0.0 }
 0x21a   :  { %vm1633_vm2 = vcmp.ge.f32.partialorder %v1395_v43, 0.0  ;;  %v1403_v56 = vadd.f32 %v4473_v11, %v4210_v28  ;;  %v2100_v33 = vsel %vm1926_vm5, %v4998_v44, 0.0  ;;  %v2276_v31 = vmul.f32 %v5021_v50, %v5021_v50 }
 0x21b   :  { %v2087_v59 = vadd.f32 %v4935_v21, %v2085_v5  ;;  %v2474_v12 = vadd.f32 %v2473_v29, %v2472_v35  ;;  %v2489_v38 = vsel %vm1926_vm5, %v2275_v26, 0.0  ;;  %v2102_v21 = vsel %vm1926_vm5, %v5021_v50, 0.0 }
 0x21c   :  { %v2277_v29 = vmul.f32 %v5023_v47, %v5023_v47  ;;  %v5042_v20 = vsel %vm1632_vm1, %v1392_v30, %v1760_v51  ;;  %v5044_v28 = vsel %vm1633_vm2, %v1395_v43, %v1761_v15  ;;  %v1762_v62 = vmul.f32 0.2, %v1400_v19 }
 0x21d   :  { %v2476_v46 = vadd.f32 %v2475_v10, %v2474_v12  ;;  %v2089_v36 = vadd.f32 %v2088_v24, %v2087_v59  ;;  %vm1634_vm3 = vcmp.ge.f32.partialorder %v1400_v19, 0.0  ;;  %v1763_v10 = vmul.f32 0.2, %v1403_v56 }
 0x21e   :  { %v1408_v24 = vadd.f32 %v4473_v11, %v4232_v1  ;;  %v1411_v22 = vadd.f32 %v4473_v11, %v4242_v16  ;;  %v2491_v41 = vsel %vm1926_vm5, %v2276_v31, 0.0  ;;  %vm1635_vm4 = vcmp.ge.f32.partialorder %v1403_v56, 0.0  ;;  %v5086_v31 = vld [vmem:[%s6704_s2] ss:$0 sm:$0xff] }
 0x21f   :  { %v2091_v32 = vadd.f32 %v4961_v34, %v2089_v36  ;;  %v2478_v61 = vadd.f32 %v4964_v54, %v2476_v46  ;;  %v2104_v43 = vsel %vm1926_vm5, %v5023_v47, 0.0  ;;  %v2493_v34 = vsel %vm1926_vm5, %v2277_v29, 0.0  ;;  %v6900_v46 = vld [vmem:[#allocation26_spill] sm:$0xff] }
 0x220   :  { %v2106_v54 = vsel %vm1926_vm5, %v5042_v20, 0.0  ;;  %v2278_v40 = vmul.f32 %v5042_v20, %v5042_v20  ;;  %v2279_v1 = vmul.f32 %v5044_v28, %v5044_v28  ;;  %v5062_v16 = vsel %vm1634_vm3, %v1400_v19, %v1762_v62 }
 0x221   :  { %v2093_v30 = vadd.f32 %v2092_v25, %v2091_v32  ;;  %v2480_v45 = vadd.f32 %v2479_v58, %v2478_v61  ;;  %v5065_v58 = vsel %vm1635_vm4, %v1403_v56, %v1763_v10  ;;  %v1764_v52 = vmul.f32 0.2, %v1408_v24  ;;  %v6901_v32 = vld [vmem:[#allocation29_spill] sm:$0xff]  ;;  %v6902_v10 = vld [vmem:[#allocation31_spill] sm:$0xff] }
 0x222   :  { %v1765_v26 = vmul.f32 0.2, %v1411_v22  ;;  %v1416_v5 = vadd.f32 %v4473_v11, %v4264_v18  ;;  %vm1636_vm6 = vcmp.ge.f32.partialorder %v1408_v24, 0.0  ;;  %vm1637_vm7 = vcmp.ge.f32.partialorder %v1411_v22, 0.0 }
 0x223   :  { %v2095_v49 = vadd.f32 %v2094_v63, %v2093_v30  ;;  %v2482_v25 = vadd.f32 %v4987_v17, %v2480_v45  ;;  %v2495_v15 = vsel %vm1926_vm5, %v2278_v40, 0.0  ;;  %v2108_v19 = vsel %vm1926_vm5, %v5044_v28, 0.0 }
 0x224   :  { %v2110_v63 = vsel %vm1926_vm5, %v5062_v16, 0.0  ;;  %v2280_v17 = vmul.f32 %v5062_v16, %v5062_v16  ;;  %v2497_v59 = vsel %vm1926_vm5, %v2279_v1, 0.0  ;;  %v2281_v18 = vmul.f32 %v5065_v58, %v5065_v58 }
 0x225   :  { %v2097_v35 = vadd.f32 %v2096_v9, %v2095_v49  ;;  %v2484_v51 = vadd.f32 %v2483_v4, %v2482_v25  ;;  %v5079_v9 = vsel %vm1636_vm6, %v1408_v24, %v1764_v52  ;;  %v5081_v4 = vsel %vm1637_vm7, %v1411_v22, %v1765_v26  ;;  %v6903_v22 = vld [vmem:[#allocation34_spill] sm:$0xff] }
 0x226   :  { %v1766_v56 = vmul.f32 0.2, %v1416_v5  ;;  %v1419_v36 = vadd.f32 %v5086_v31, %v6900_v46  ;;  %vm1638_vm8 = vcmp.ge.f32.partialorder %v1416_v5, 0.0  ;;  %v2112_v61 = vsel %vm1926_vm5, %v5065_v58, 0.0 }
 0x227   :  { %v2099_v11 = vadd.f32 %v2098_v60, %v2097_v35  ;;  %v2486_v12 = vadd.f32 %v2485_v0, %v2484_v51  ;;  %v1424_v60 = vadd.f32 %v5086_v31, %v6901_v32  ;;  %v2499_v0 = vsel %vm1926_vm5, %v2280_v17, 0.0 }
 0x228   :  { %v1427_v24 = vadd.f32 %v5086_v31, %v6902_v10  ;;  %v1432_v30 = vadd.f32 %v5086_v31, %v6903_v22  ;;  %v2114_v45 = vsel %vm1926_vm5, %v5079_v9, 0.0  ;;  %v2501_v1 = vsel %vm1926_vm5, %v2281_v18, 0.0 }
 0x229   :  { %v2101_v29 = vadd.f32 %v2100_v33, %v2099_v11  ;;  %v2488_v62 = vadd.f32 %v2487_v8, %v2486_v12  ;;  %v2282_v8 = vmul.f32 %v5079_v9, %v5079_v9  ;;  %v2283_v49 = vmul.f32 %v5081_v4, %v5081_v4  ;;  %v6904_v12 = vld [vmem:[#allocation35_spill] sm:$0xff] }
 0x22a   :  { %v5106_v25 = vsel %vm1638_vm8, %v1416_v5, %v1766_v56  ;;  %vm1639_vm9 = vcmp.ge.f32.partialorder %v1419_v36, 0.0  ;;  %v1767_v35 = vmul.f32 0.2, %v1419_v36  ;;  %vm1640_vm10 = vcmp.ge.f32.partialorder %v1424_v60, 0.0 }
 0x22b   :  { %v2103_v33 = vadd.f32 %v2102_v21, %v2101_v29  ;;  %v2490_v40 = vadd.f32 %v2489_v38, %v2488_v62  ;;  %v1768_v51 = vmul.f32 0.2, %v1424_v60  ;;  %v1769_v17 = vmul.f32 0.2, %v1427_v24 }
 0x22c   :  { %v1770_v11 = vmul.f32 0.2, %v1432_v30  ;;  %v1435_v46 = vadd.f32 %v5086_v31, %v6904_v12  ;;  %vm1641_vm11 = vcmp.ge.f32.partialorder %v1427_v24, 0.0  ;;  %vm1642_vm12 = vcmp.ge.f32.partialorder %v1432_v30, 0.0 }
 0x22d   :  { %v2105_v52 = vadd.f32 %v2104_v43, %v2103_v33  ;;  %v2492_v26 = vadd.f32 %v2491_v41, %v2490_v40  ;;  %v2503_v18 = vsel %vm1926_vm5, %v2282_v8, 0.0  ;;  %v2116_v5 = vsel %vm1926_vm5, %v5081_v4, 0.0  ;;  %v6905_v40 = vld [vmem:[#allocation38_spill] sm:$0xff] }
 0x22e   :  { %v2118_v41 = vsel %vm1926_vm5, %v5106_v25, 0.0  ;;  %v2284_v43 = vmul.f32 %v5106_v25, %v5106_v25  ;;  %v2505_v56 = vsel %vm1926_vm5, %v2283_v49, 0.0  ;;  %v5124_v32 = vsel %vm1641_vm11, %v1427_v24, %v1769_v17  ;;  %v6907_v49 = vld [vmem:[#allocation43_spill] sm:$0xff] }
 0x22f   :  { %v2107_v21 = vadd.f32 %v2106_v54, %v2105_v52  ;;  %v2494_v38 = vadd.f32 %v2493_v34, %v2492_v26  ;;  %v5119_v54 = vsel %vm1639_vm9, %v1419_v36, %v1767_v35  ;;  %v5122_v34 = vsel %vm1640_vm10, %v1424_v60, %v1768_v51  ;;  %v6906_v36 = vld [vmem:[#allocation40_spill] sm:$0xff] }
 0x230   :  { %v5126_v10 = vsel %vm1642_vm12, %v1432_v30, %v1770_v11  ;;  %v1771_v22 = vmul.f32 0.2, %v1435_v46  ;;  %vm1643_vm13 = vcmp.ge.f32.partialorder %v1435_v46, 0.0  ;;  %v1440_v52 = vadd.f32 %v5086_v31, %v6905_v40 }
 0x231   :  { %v2109_v29 = vadd.f32 %v2108_v19, %v2107_v21  ;;  %v2496_v62 = vadd.f32 %v2495_v15, %v2494_v38  ;;  %v2507_v19 = vsel %vm1926_vm5, %v2284_v43, 0.0  ;;  %v2120_v15 = vsel %vm1926_vm5, %v5119_v54, 0.0 }
 0x232   :  { %v1443_v60 = vadd.f32 %v5086_v31, %v6906_v36  ;;  %v1448_v24 = vadd.f32 %v5086_v31, %v6907_v49  ;;  %v2286_v35 = vmul.f32 %v5122_v34, %v5122_v34  ;;  %v2287_v51 = vmul.f32 %v5124_v32, %v5124_v32 }
 0x233   :  { %v2111_v8 = vadd.f32 %v2110_v63, %v2109_v29  ;;  %v2498_v33 = vadd.f32 %v2497_v59, %v2496_v62  ;;  %v2285_v63 = vmul.f32 %v5119_v54, %v5119_v54  ;;  %v2122_v59 = vsel %vm1926_vm5, %v5122_v34, 0.0  ;;  %v6909_v62 = vld [vmem:[#allocation45_spill] sm:$0xff] }
 0x234   :  { %v2288_v17 = vmul.f32 %v5126_v10, %v5126_v10  ;;  %v5147_v11 = vsel %vm1643_vm13, %v1435_v46, %v1771_v22  ;;  %vm1644_vm14 = vcmp.ge.f32.partialorder %v1440_v52, 0.0  ;;  %vm1645_vm15 = vcmp.ge.f32.partialorder %v1443_v60, 0.0 }
 0x235   :  { %v2113_v30 = vadd.f32 %v2112_v61, %v2111_v8  ;;  %v2500_v26 = vadd.f32 %v2499_v0, %v2498_v33  ;;  %6908 = vst [vmem:[#allocation26_spill] sm:$0xff] %v5147_v11  ;;  %v1772_v0 = vmul.f32 0.2, %v1440_v52  ;;  %v1773_v21 = vmul.f32 0.2, %v1443_v60  ;;  %v6910_v33 = vld [vmem:[#allocation48_spill] sm:$0xff] }
 0x236   :  { %vm1646_vm0 = vcmp.ge.f32.partialorder %v1448_v24, 0.0  ;;  %v1774_v38 = vmul.f32 0.2, %v1448_v24  ;;  %v1451_v8 = vadd.f32 %v5086_v31, %v6909_v62  ;;  %v1456_v40 = vadd.f32 %v5086_v31, %v6910_v33 }
 0x237   :  { %v2115_v12 = vadd.f32 %v2114_v45, %v2113_v30  ;;  %v2502_v61 = vadd.f32 %v2501_v1, %v2500_v26  ;;  %v2509_v36 = vsel %vm1926_vm5, %v2285_v63, 0.0  ;;  %v2511_v46 = vsel %vm1926_vm5, %v2286_v35, 0.0 }
 0x238   :  { %v2124_v45 = vsel %vm1926_vm5, %v5124_v32, 0.0  ;;  %v2126_v1 = vsel %vm1926_vm5, %v5126_v10, 0.0  ;;  %v2289_v30 = vmul.f32 %v5147_v11, %v5147_v11  ;;  %v5164_v26 = vsel %vm1644_vm14, %v1440_v52, %v1772_v0 }
 0x239   :  { %v2117_v43 = vadd.f32 %v2116_v5, %v2115_v12  ;;  %v2504_v29 = vadd.f32 %v2503_v18, %v2502_v61  ;;  %v2513_v18 = vsel %vm1926_vm5, %v2287_v51, 0.0  ;;  %v2515_v5 = vsel %vm1926_vm5, %v2288_v17, 0.0  ;;  %6911 = vst [vmem:[#allocation29_spill] sm:$0xff] %v5164_v26  ;;  %v6912_v51 = vld [vmem:[#allocation49_spill] sm:$0xff] }
 0x23a   :  { %v5167_v63 = vsel %vm1645_vm15, %v1443_v60, %v1773_v21  ;;  %v5170_v35 = vsel %vm1646_vm0, %v1448_v24, %v1774_v38  ;;  %vm1647_vm1 = vcmp.ge.f32.partialorder %v1451_v8, 0.0  ;;  %vm1648_vm2 = vcmp.ge.f32.partialorder %v1456_v40, 0.0 }
 0x23b   :  { %v2119_v22 = vadd.f32 %v2118_v41, %v2117_v43  ;;  %v2506_v49 = vadd.f32 %v2505_v56, %v2504_v29  ;;  %v1775_v41 = vmul.f32 0.2, %v1451_v8  ;;  %v1776_v56 = vmul.f32 0.2, %v1456_v40  ;;  %v6913_v43 = vld [vmem:[#allocation52_spill] sm:$0xff] }
 0x23c   :  { %v1459_v17 = vadd.f32 %v5086_v31, %v6912_v51  ;;  %v1464_v29 = vadd.f32 %v5086_v31, %v6913_v43  ;;  %v2128_v60 = vsel %vm1926_vm5, %v5147_v11, 0.0  ;;  %v2130_v24 = vsel %vm1926_vm5, %v5164_v26, 0.0  ;;  %v6917_v43 = vld [vmem:[#allocation57_spill] sm:$0xff] }
 0x23d   :  { %v2508_v12 = vadd.f32 %v2507_v19, %v2506_v49  ;;  %v2121_v61 = vadd.f32 %v2120_v15, %v2119_v22  ;;  %v2517_v19 = vsel %vm1926_vm5, %v2289_v30, 0.0  ;;  %v2290_v15 = vmul.f32 %v5164_v26, %v5164_v26 }
 0x23e   :  { %v2291_v21 = vmul.f32 %v5167_v63, %v5167_v63  ;;  %v2292_v38 = vmul.f32 %v5170_v35, %v5170_v35  ;;  %vm1649_vm3 = vcmp.ge.f32.partialorder %v1459_v17, 0.0  ;;  %v1777_v22 = vmul.f32 0.2, %v1459_v17 }
 0x23f   :  { %v2510_v52 = vadd.f32 %v2509_v36, %v2508_v12  ;;  %v2123_v0 = vadd.f32 %v2122_v59, %v2121_v61  ;;  %v5187_v59 = vsel %vm1647_vm1, %v1451_v8, %v1775_v41  ;;  %v5189_v36 = vsel %vm1648_vm2, %v1456_v40, %v1776_v56  ;;  %v6916_v61 = vld [vmem:[#allocation54_spill] sm:$0xff] }
 0x240   :  { %6914 = vst [vmem:[#allocation31_spill] sm:$0xff] %v5187_v59  ;;  %6915 = vst [vmem:[#allocation34_spill] sm:$0xff] %v5189_v36  ;;  %vm1650_vm4 = vcmp.ge.f32.partialorder %v1464_v29, 0.0  ;;  %v1778_v49 = vmul.f32 0.2, %v1464_v29  ;;  %v1467_v51 = vadd.f32 %v5086_v31, %v6916_v61  ;;  %v1472_v26 = vadd.f32 %v5086_v31, %v6917_v43 }
 0x241   :  { %v2512_v62 = vadd.f32 %v2511_v46, %v2510_v52  ;;  %v2125_v33 = vadd.f32 %v2124_v45, %v2123_v0  ;;  %v2519_v11 = vsel %vm1926_vm5, %v2290_v15, 0.0  ;;  %v2132_v8 = vsel %vm1926_vm5, %v5167_v63, 0.0 }
 0x242   :  { %v2521_v40 = vsel %vm1926_vm5, %v2291_v21, 0.0  ;;  %v2134_v46 = vsel %vm1926_vm5, %v5170_v35, 0.0  ;;  %v2136_v56 = vsel %vm1926_vm5, %v5187_v59, 0.0  ;;  %v2294_v52 = vmul.f32 %v5189_v36, %v5189_v36 }
 0x243   :  { %v2514_v30 = vadd.f32 %v2513_v18, %v2512_v62  ;;  %v2127_v12 = vadd.f32 %v2126_v1, %v2125_v33  ;;  %v2523_v1 = vsel %vm1926_vm5, %v2292_v38, 0.0  ;;  %v2293_v18 = vmul.f32 %v5187_v59, %v5187_v59  ;;  %v6919_v38 = vld [vmem:[#allocation59_spill] sm:$0xff] }
 0x244   :  { %v5209_v0 = vsel %vm1649_vm3, %v1459_v17, %v1777_v22  ;;  %v5212_v15 = vsel %vm1650_vm4, %v1464_v29, %v1778_v49  ;;  %v1780_v62 = vmul.f32 0.2, %v1472_v26  ;;  %vm1651_vm6 = vcmp.ge.f32.partialorder %v1467_v51, 0.0 }
 0x245   :  { %v2516_v45 = vadd.f32 %v2515_v5, %v2514_v30  ;;  %v2129_v41 = vadd.f32 %v2128_v60, %v2127_v12  ;;  %6918 = vst [vmem:[#allocation35_spill] sm:$0xff] %v5209_v0  ;;  %v1779_v60 = vmul.f32 0.2, %v1467_v51  ;;  %vm1652_vm7 = vcmp.ge.f32.partialorder %v1472_v26, 0.0  ;;  %v6920_v30 = vld [vmem:[#allocation62_spill] sm:$0xff] }
 0x246   :  { %v1475_v33 = vadd.f32 %v5086_v31, %v6919_v38  ;;  %v1480_v12 = vadd.f32 %v5086_v31, %v6920_v30  ;;  %v2525_v17 = vsel %vm1926_vm5, %v2293_v18, 0.0  ;;  %v2138_v29 = vsel %vm1926_vm5, %v5189_v36, 0.0  ;;  %v6923_v36 = vld [vmem:[#allocation66_spill] sm:$0xff] }
 0x247   :  { %v2518_v21 = vadd.f32 %v2517_v19, %v2516_v45  ;;  %v2131_v5 = vadd.f32 %v2130_v24, %v2129_v41  ;;  %v2527_v19 = vsel %vm1926_vm5, %v2294_v52, 0.0  ;;  %v2140_v24 = vsel %vm1926_vm5, %v5209_v0, 0.0 }
 0x248   :  { %v2295_v22 = vmul.f32 %v5209_v0, %v5209_v0  ;;  %v2296_v49 = vmul.f32 %v5212_v15, %v5212_v15  ;;  %vm1653_vm8 = vcmp.ge.f32.partialorder %v1475_v33, 0.0  ;;  %v1781_v18 = vmul.f32 0.2, %v1475_v33 }
 0x249   :  { %v2520_v61 = vadd.f32 %v2519_v11, %v2518_v21  ;;  %v2133_v43 = vadd.f32 %v2132_v8, %v2131_v5  ;;  %v5228_v11 = vsel %vm1651_vm6, %v1467_v51, %v1779_v60  ;;  %v5230_v8 = vsel %vm1652_vm7, %v1472_v26, %v1780_v62  ;;  %v6922_v5 = vld [vmem:[#allocation63_spill] sm:$0xff] }
 0x24a   :  { %6921 = vst [vmem:[#allocation38_spill] sm:$0xff] %v5230_v8  ;;  %v1782_v21 = vmul.f32 0.2, %v1480_v12  ;;  %v1483_v52 = vadd.f32 %v5086_v31, %v6922_v5  ;;  %vm1654_vm9 = vcmp.ge.f32.partialorder %v1480_v12, 0.0  ;;  %v1488_v0 = vadd.f32 %v5086_v31, %v6923_v36  ;;  %v6926_v5 = vld [vmem:[#allocation73_spill] sm:$0xff] }
 0x24b   :  { %v2522_v45 = vadd.f32 %v2521_v40, %v2520_v61  ;;  %v2135_v41 = vadd.f32 %v2134_v46, %v2133_v43  ;;  %v2529_v59 = vsel %vm1926_vm5, %v2295_v22, 0.0  ;;  %v2142_v51 = vsel %vm1926_vm5, %v5212_v15, 0.0  ;;  %v6924_v40 = vld [vmem:[#allocation69_spill] sm:$0xff] }
 0x24c   :  { %v2531_v26 = vsel %vm1926_vm5, %v2296_v49, 0.0  ;;  %v1491_v46 = vadd.f32 %v5086_v31, %v6924_v40  ;;  %v2298_v36 = vmul.f32 %v5230_v8, %v5230_v8  ;;  %v5249_v61 = vsel %vm1653_vm8, %v1475_v33, %v1781_v18 }
 0x24d   :  { %v2524_v38 = vadd.f32 %v2523_v1, %v2522_v45  ;;  %v2137_v30 = vadd.f32 %v2136_v56, %v2135_v41  ;;  %v2144_v1 = vsel %vm1926_vm5, %v5228_v11, 0.0  ;;  %v2297_v56 = vmul.f32 %v5228_v11, %v5228_v11 }
 0x24e   :  { %v5251_v43 = vsel %vm1654_vm9, %v1480_v12, %v1782_v21  ;;  %v1783_v22 = vmul.f32 0.2, %v1483_v52  ;;  %vm1655_vm10 = vcmp.ge.f32.partialorder %v1483_v52, 0.0  ;;  %vm1656_vm11 = vcmp.ge.f32.partialorder %v1488_v0, 0.0 }
 0x24f   :  { %v2526_v60 = vadd.f32 %v2525_v17, %v2524_v38  ;;  %v2139_v62 = vadd.f32 %v2138_v29, %v2137_v30  ;;  %6925 = vst [vmem:[#allocation40_spill] sm:$0xff] %v5251_v43  ;;  %v1784_v17 = vmul.f32 0.2, %v1488_v0  ;;  %v2146_v29 = vsel %vm1926_vm5, %v5230_v8, 0.0 }
 0x250   :  { %v1785_v41 = vmul.f32 0.2, %v1491_v46  ;;  %v1496_v38 = vadd.f32 %v5086_v31, %v6926_v5  ;;  %v2533_v33 = vsel %vm1926_vm5, %v2297_v56, 0.0  ;;  %vm1657_vm12 = vcmp.ge.f32.partialorder %v1491_v46, 0.0  ;;  %v6929_v5 = vld [vmem:[#allocation76_spill] sm:$0xff] }
 0x251   :  { %v2528_v49 = vadd.f32 %v2527_v19, %v2526_v60  ;;  %v2141_v45 = vadd.f32 %v2140_v24, %v2139_v62  ;;  %v2535_v12 = vsel %vm1926_vm5, %v2298_v36, 0.0  ;;  %v2299_v19 = vmul.f32 %v5249_v61, %v5249_v61 }
 0x252   :  { %v2300_v24 = vmul.f32 %v5251_v43, %v5251_v43  ;;  %v5263_v18 = vsel %vm1655_vm10, %v1483_v52, %v1783_v22  ;;  %v5265_v62 = vsel %vm1656_vm11, %v1488_v0, %v1784_v17  ;;  %v2150_v56 = vsel %vm1926_vm5, %v5251_v43, 0.0  ;;  %v6931_v52 = vld [vmem:[#allocation79_spill] sm:$0xff] }
 0x253   :  { %v2530_v30 = vadd.f32 %v2529_v59, %v2528_v49  ;;  %v2143_v40 = vadd.f32 %v2142_v51, %v2141_v45  ;;  %6927 = vst [vmem:[#allocation43_spill] sm:$0xff] %v5263_v18  ;;  %6928 = vst [vmem:[#allocation45_spill] sm:$0xff] %v5265_v62  ;;  %v1499_v59 = vadd.f32 %v5086_v31, %v6929_v5  ;;  %v2148_v51 = vsel %vm1926_vm5, %v5249_v61, 0.0  ;;  %v6933_v5 = vld [vmem:[#allocation80_spill] sm:$0xff] }
 0x254   :  { %v5273_v36 = vsel %vm1657_vm12, %v1491_v46, %v1785_v41  ;;  %v1786_v49 = vmul.f32 0.2, %v1496_v38  ;;  %vm1658_vm13 = vcmp.ge.f32.partialorder %v1496_v38, 0.0  ;;  %v2537_v0 = vsel %vm1926_vm5, %v2299_v19, 0.0 }
 0x255   :  { %v2532_v21 = vadd.f32 %v2531_v26, %v2530_v30  ;;  %v2145_v60 = vadd.f32 %v2144_v1, %v2143_v40  ;;  %6930 = vst [vmem:[#allocation48_spill] sm:$0xff] %v5273_v36  ;;  %v1504_v26 = vadd.f32 %v5086_v31, %v6931_v52  ;;  %v2539_v1 = vsel %vm1926_vm5, %v2300_v24, 0.0 }
 0x256   :  { %v2301_v22 = vmul.f32 %v5263_v18, %v5263_v18  ;;  %v2302_v17 = vmul.f32 %v5265_v62, %v5265_v62  ;;  %v2152_v41 = vsel %vm1926_vm5, %v5263_v18, 0.0  ;;  %v2154_v40 = vsel %vm1926_vm5, %v5265_v62, 0.0 }
 0x257   :  { %v2534_v45 = vadd.f32 %v2533_v33, %v2532_v21  ;;  %v2147_v8 = vadd.f32 %v2146_v29, %v2145_v60  ;;  %v1787_v29 = vmul.f32 0.2, %v1499_v59  ;;  %v2303_v33 = vmul.f32 %v5273_v36, %v5273_v36 }
 0x258   :  { %v5289_v19 = vsel %vm1658_vm13, %v1496_v38, %v1786_v49  ;;  %vm1659_vm14 = vcmp.ge.f32.partialorder %v1499_v59, 0.0  ;;  %v1788_v60 = vmul.f32 0.2, %v1504_v26  ;;  %vm1660_vm15 = vcmp.ge.f32.partialorder %v1504_v26, 0.0 }
 0x259   :  { %v2536_v30 = vadd.f32 %v2535_v12, %v2534_v45  ;;  %v2149_v46 = vadd.f32 %v2148_v51, %v2147_v8  ;;  %6932 = vst [vmem:[#allocation49_spill] sm:$0xff] %v5289_v19  ;;  %v1507_v12 = vadd.f32 %v5086_v31, %v6933_v5  ;;  %v2541_v8 = vsel %vm1926_vm5, %v2301_v22, 0.0  ;;  %v6934_v45 = vld [vmem:[#allocation85_spill] sm:$0xff] }
 0x25a   :  { %v2543_v51 = vsel %vm1926_vm5, %v2302_v17, 0.0  ;;  %v1512_v52 = vadd.f32 %v5086_v31, %v6934_v45  ;;  %v2304_v38 = vmul.f32 %v5289_v19, %v5289_v19  ;;  %v5299_v49 = vsel %vm1659_vm14, %v1499_v59, %v1787_v29  ;;  %v6936_v17 = vld [vmem:[#allocation87_spill] sm:$0xff] }
 0x25b   :  { %v2538_v24 = vadd.f32 %v2537_v0, %v2536_v30  ;;  %v2151_v21 = vadd.f32 %v2150_v56, %v2149_v46  ;;  %6935 = vst [vmem:[#allocation52_spill] sm:$0xff] %v5299_v49  ;;  %v2156_v56 = vsel %vm1926_vm5, %v5273_v36, 0.0  ;;  %v2545_v0 = vsel %vm1926_vm5, %v2303_v33, 0.0 }
 0x25c   :  { %v2158_v22 = vsel %vm1926_vm5, %v5289_v19, 0.0  ;;  %v1515_v30 = vadd.f32 %v5086_v31, %v6936_v17  ;;  %v2305_v59 = vmul.f32 %v5299_v49, %v5299_v49  ;;  %vm1661_vm0 = vcmp.ge.f32.partialorder %v1507_v12, 0.0 }
 0x25d   :  { %v2540_v62 = vadd.f32 %v2539_v1, %v2538_v24  ;;  %v2153_v18 = vadd.f32 %v2152_v41, %v2151_v21  ;;  %v5308_v1 = vsel %vm1660_vm15, %v1504_v26, %v1788_v60  ;;  %v1789_v41 = vmul.f32 0.2, %v1507_v12  ;;  %v6937_v24 = vld [vmem:[#allocation90_spill] sm:$0xff] }
 0x25e   :  { %v1790_v29 = vmul.f32 0.2, %v1512_v52  ;;  %v1520_v21 = vadd.f32 %v5086_v31, %v6937_v24  ;;  %v2547_v19 = vsel %vm1926_vm5, %v2304_v38, 0.0  ;;  %vm1662_vm1 = vcmp.ge.f32.partialorder %v1512_v52, 0.0 }
 0x25f   :  { %v2542_v46 = vadd.f32 %v2541_v8, %v2540_v62  ;;  %v2155_v5 = vadd.f32 %v2154_v40, %v2153_v18  ;;  %v2160_v62 = vsel %vm1926_vm5, %v5299_v49, 0.0  ;;  %v2306_v18 = vmul.f32 %v5308_v1, %v5308_v1  ;;  %v6938_v40 = vld [vmem:[#allocation93_spill] sm:$0xff]  ;;  %v6940_v49 = vld [vmem:[#allocation96_spill] sm:$0xff] }
 0x260   :  { %v1791_v26 = vmul.f32 0.2, %v1515_v30  ;;  %v1523_v60 = vadd.f32 %v5086_v31, %v6938_v40  ;;  %v5321_v36 = vsel %vm1661_vm0, %v1507_v12, %v1789_v41  ;;  %vm1663_vm2 = vcmp.ge.f32.partialorder %v1515_v30, 0.0  ;;  %v6942_v40 = vld [vmem:[#allocation102_spill] sm:$0xff] }
 0x261   :  { %v2544_v33 = vadd.f32 %v2543_v51, %v2542_v46  ;;  %v2157_v45 = vadd.f32 %v2156_v56, %v2155_v5  ;;  %v2549_v51 = vsel %vm1926_vm5, %v2305_v59, 0.0  ;;  %v2162_v38 = vsel %vm1926_vm5, %v5308_v1, 0.0 }
 0x262   :  { %v5326_v56 = vsel %vm1662_vm1, %v1512_v52, %v1790_v29  ;;  %v1792_v46 = vmul.f32 0.2, %v1520_v21  ;;  %vm1664_vm3 = vcmp.ge.f32.partialorder %v1520_v21, 0.0  ;;  %v1528_v43 = vadd.f32 %v5086_v31, %v6940_v49  ;;  %v6941_v52 = vld [vmem:[#allocation97_spill] sm:$0xff] }
 0x263   :  { %v2546_v8 = vadd.f32 %v2545_v0, %v2544_v33  ;;  %v2159_v17 = vadd.f32 %v2158_v22, %v2157_v45  ;;  %6939 = vst [vmem:[#allocation54_spill] sm:$0xff] %v5326_v56  ;;  %v2551_v0 = vsel %vm1926_vm5, %v2306_v18, 0.0  ;;  %v2307_v12 = vmul.f32 %v5321_v36, %v5321_v36 }
 0x264   :  { %v5333_v22 = vsel %vm1663_vm2, %v1515_v30, %v1791_v26  ;;  %v1793_v41 = vmul.f32 0.2, %v1523_v60  ;;  %vm1665_vm4 = vcmp.ge.f32.partialorder %v1523_v60, 0.0  ;;  %v1531_v29 = vadd.f32 %v5086_v31, %v6941_v52 }
 0x265   :  { %v2548_v5 = vadd.f32 %v2547_v19, %v2546_v8  ;;  %v2161_v24 = vadd.f32 %v2160_v62, %v2159_v17  ;;  %v2164_v19 = vsel %vm1926_vm5, %v5321_v36, 0.0  ;;  %v2166_v49 = vsel %vm1926_vm5, %v5326_v56, 0.0 }
 0x266   :  { %v2308_v45 = vmul.f32 %v5326_v56, %v5326_v56  ;;  %v5343_v62 = vsel %vm1664_vm3, %v1520_v21, %v1792_v46  ;;  %v1794_v26 = vmul.f32 0.2, %v1528_v43  ;;  %v1536_v8 = vadd.f32 %v5086_v31, %v6942_v40  ;;  %v6943_v56 = vld [vmem:[#allocation103_spill] sm:$0xff] }
 0x267   :  { %v2550_v59 = vadd.f32 %v2549_v51, %v2548_v5  ;;  %v2163_v33 = vadd.f32 %v2162_v38, %v2161_v24  ;;  %v2553_v17 = vsel %vm1926_vm5, %v2307_v12, 0.0  ;;  %v2309_v51 = vmul.f32 %v5333_v22, %v5333_v22 }
 0x268   :  { %v5350_v38 = vsel %vm1665_vm4, %v1523_v60, %v1793_v41  ;;  %vm1666_vm6 = vcmp.ge.f32.partialorder %v1528_v43, 0.0  ;;  %v1795_v52 = vmul.f32 0.2, %v1531_v29  ;;  %v1539_v21 = vadd.f32 %v5086_v31, %v6943_v56 }
 0x269   :  { %v2552_v30 = vadd.f32 %v2551_v0, %v2550_v59  ;;  %v2165_v18 = vadd.f32 %v2164_v19, %v2163_v33  ;;  %v2555_v46 = vsel %vm1926_vm5, %v2308_v45, 0.0  ;;  %v2168_v0 = vsel %vm1926_vm5, %v5333_v22, 0.0 }
 0x26a   :  { %v2310_v12 = vmul.f32 %v5343_v62, %v5343_v62  ;;  %vm1667_vm7 = vcmp.ge.f32.partialorder %v1531_v29, 0.0  ;;  %v5359_v60 = vsel %vm1666_vm6, %v1528_v43, %v1794_v26  ;;  %v1796_v41 = vmul.f32 0.2, %v1536_v8 }
 0x26b   :  { %v2554_v5 = vadd.f32 %v2553_v17, %v2552_v30  ;;  %v2167_v24 = vadd.f32 %v2166_v49, %v2165_v18  ;;  %v2557_v19 = vsel %vm1926_vm5, %v2309_v51, 0.0  ;;  %v2170_v49 = vsel %vm1926_vm5, %v5343_v62, 0.0 }
 0x26c   :  { %v2311_v31 = vmul.f32 %v5350_v38, %v5350_v38  ;;  %vm1668_vm8 = vcmp.ge.f32.partialorder %v1536_v8, 0.0  ;;  %v5366_v30 = vsel %vm1667_vm7, %v1531_v29, %v1795_v52  ;;  %v1797_v18 = vmul.f32 0.2, %v1539_v21 }
 0x26d   :  { %v2556_v59 = vadd.f32 %v2555_v46, %v2554_v5  ;;  %v2169_v33 = vadd.f32 %v2168_v0, %v2167_v24  ;;  %6944 = vst [vmem:[#allocation57_spill] sm:$0xff] %v5366_v30  ;;  %v2559_v40 = vsel %vm1926_vm5, %v2310_v12, 0.0  ;;  %v2172_v43 = vsel %vm1926_vm5, %v5350_v38, 0.0 }
 0x26e   :  { %v2312_v26 = vmul.f32 %v5359_v60, %v5359_v60  ;;  %vm1669_vm9 = vcmp.ge.f32.partialorder %v1539_v21, 0.0  ;;  %v5373_v5 = vsel %vm1668_vm8, %v1536_v8, %v1796_v41  ;;  %v2561_v24 = vsel %vm1926_vm5, %v2311_v31, 0.0 }
 0x26f   :  { %v2558_v56 = vadd.f32 %v2557_v19, %v2556_v59  ;;  %v2171_v45 = vadd.f32 %v2170_v49, %v2169_v33  ;;  %6945 = vst [vmem:[#allocation59_spill] sm:$0xff] %v5373_v5  ;;  %v2174_v29 = vsel %vm1926_vm5, %v5359_v60, 0.0  ;;  %v2313_v52 = vmul.f32 %v5366_v30, %v5366_v30 }
 0x270   :  { %v5380_v12 = vsel %vm1669_vm9, %v1539_v21, %v1797_v18  ;;  %v2563_v59 = vsel %vm1926_vm5, %v2312_v26, 0.0  ;;  %v2176_v33 = vsel %vm1926_vm5, %v5366_v30, 0.0  ;;  %v2314_v8 = vmul.f32 %v5373_v5, %v5373_v5 }
 0x271   :  { %v2560_v17 = vadd.f32 %v2559_v40, %v2558_v56  ;;  %v2173_v51 = vadd.f32 %v2172_v43, %v2171_v45  ;;  %6946 = vst [vmem:[#allocation62_spill] sm:$0xff] %v5380_v12  ;;  %v2565_v49 = vsel %vm1926_vm5, %v2313_v52, 0.0  ;;  %v2178_v31 = vsel %vm1926_vm5, %v5373_v5, 0.0 }
 0x272   :  { %v2315_v56 = vmul.f32 %v5380_v12, %v5380_v12  ;;  %v2567_v18 = vsel %vm1926_vm5, %v2314_v8, 0.0  ;;  %v2180_v40 = vsel %vm1926_vm5, %v5380_v12, 0.0 }
 0x273   :  { %v2562_v46 = vadd.f32 %v2561_v24, %v2560_v17  ;;  %v2175_v0 = vadd.f32 %v2174_v29, %v2173_v51 }
 0x274   :  { %v2569_v17 = vsel %vm1926_vm5, %v2315_v56, 0.0  ;;  %v2589_v56 = vlaneseq }
 0x275   :  { %v2564_v41 = vadd.f32 %v2563_v59, %v2562_v46  ;;  %v2177_v19 = vadd.f32 %v2176_v33, %v2175_v0 }
 0x277   :  { %v2566_v21 = vadd.f32 %v2565_v49, %v2564_v41  ;;  %v2179_v45 = vadd.f32 %v2178_v31, %v2177_v19 }
 0x279   :  { %v2568_v43 = vadd.f32 %v2567_v18, %v2566_v21  ;;  %v2181_v26 = vadd.f32 %v2180_v40, %v2179_v45  ;;  %v5396_v18 = vshrl.u32 %v2589_v56, 7  ;;  %v2581_v40 = vld [vmem:[%s6705_s3] sm:$0x1]  ;;  %v6954_v56 = vld [vmem:[#allocation9_spill] sm:$0xff] }
 0x27b   :  { %v2182_v51 = vrot.slane %v2181_v26, 4  ;;  %v2570_v24 = vadd.f32 %v2569_v17, %v2568_v43  ;;  %v6796_v43 = vsub.s32 0, %v5396_v18 }
 0x27d   :  { %v2183_v29 = vadd.f32 %v2182_v51, %v2181_v26  ;;  %v2571_v52 = vrot.slane %v2570_v24, 4 }
 0x27f   :  { %v2184_v46 = vrot.slane %v2183_v29, 2  ;;  %v2572_v0 = vadd.f32 %v2571_v52, %v2570_v24  ;;  %v6947_v24 = vld [vmem:[#allocation3_spill] sm:$0xff]  ;;  %v6948_v52 = vld [vmem:[#allocation2_spill] sm:$0xff] }
 0x281   :  { %v2185_v59 = vadd.f32 %v2184_v46, %v2183_v29  ;;  %v2573_v33 = vrot.slane %v2572_v0, 2 }
 0x283   :  { %v2186_v5 = vrot.slane %v2185_v59, 1  ;;  %v2574_v41 = vadd.f32 %v2573_v33, %v2572_v0  ;;  %v6949_v0 = vld [vmem:[#allocation4_spill] sm:$0xff]  ;;  %v6950_v33 = vld [vmem:[#allocation5_spill] sm:$0xff] }
 0x285   :  { %v2187_v19 = vadd.f32 %v2186_v5, %v2185_v59  ;;  %v2575_v49 = vrot.slane %v2574_v41, 1  ;;  %v5405_v5 = vld [vmem:[%s6706_s4] sm:$0x1] }
 0x287   :  { %v2576_v8 = vadd.f32 %v2575_v49, %v2574_v41  ;;  %v2577_v31 = vmul.f32 0.0009765625, %v2187_v19  ;;  %v6951_v19 = vld [vmem:[#allocation6_spill] sm:$0xff] }
 0x289   :  { %v2578_v30 = vmul.f32 0.0009765625, %v2576_v8  ;;  %v2579_v12 = vmul.f32 %v2577_v31, %v2577_v31  ;;  %v6952_v8 = vld [vmem:[#allocation7_spill] sm:$0xff] }
 0x28b   :  { %v2580_v21 = vsub.f32 %v2578_v30, %v2579_v12  ;;  %v6964_v12 = vld [vmem:[#allocation15_spill] sm:$0xff] }
 0x28d   :  { %v2582_v45 = vadd.f32 0.8, %v2580_v21  ;;  %v6953_v21 = vld [vmem:[#allocation8_spill] sm:$0xff] }
 0x28f   :  { %3410 = vrsqrt.f32 %v2582_v45 }
 0x299   :  { %v3411_v26 = vpop.eup %3410 }
 0x29a   :  { %v2584_v17 = vmul.f32 %v3411_v26, %v2581_v40  ;;  %v6955_v26 = vld [vmem:[#allocation10_spill] sm:$0xff] }
 0x29c   :  { %v5407_v51 = vmul.f32 %v2584_v17, %v2577_v31  ;;  %v5411_v30 = vrot.slane %v2584_v17, %v6796_v43  ;;  %v6966_v43 = vld [vmem:[#allocation16_spill] sm:$0xff] }
 0x29e   :  { %v5417_v29 = vmul.f32 %v5411_v30, %v6947_v24  ;;  %v5421_v46 = vmul.f32 %v5411_v30, %v6948_v52  ;;  %v5425_v59 = vmul.f32 %v5411_v30, %v6949_v0  ;;  %v5429_v41 = vmul.f32 %v5411_v30, %v6950_v33  ;;  %v6956_v24 = vld [vmem:[#allocation11_spill] sm:$0xff]  ;;  %v6958_v0 = vld [vmem:[#allocation12_spill] sm:$0xff] }
 0x29f   :  { %v5433_v49 = vmul.f32 %v5411_v30, %v6951_v19  ;;  %v5437_v31 = vmul.f32 %v5411_v30, %v6952_v8  ;;  %v5441_v45 = vmul.f32 %v5411_v30, %v6953_v21  ;;  %v5445_v40 = vmul.f32 %v5411_v30, %v6954_v56  ;;  %v6960_v19 = vld [vmem:[#allocation13_spill] sm:$0xff]  ;;  %v6962_v21 = vld [vmem:[#allocation14_spill] sm:$0xff] }
 0x2a0   :  { %v5449_v17 = vmul.f32 %v5411_v30, %v6955_v26  ;;  %v5453_v52 = vmul.f32 %v5411_v30, %v6956_v24  ;;  %v5457_v33 = vmul.f32 %v5411_v30, %v6958_v0  ;;  %v5461_v8 = vmul.f32 %v5411_v30, %v6960_v19 }
 0x2a1   :  { %v5465_v56 = vmul.f32 %v5411_v30, %v6962_v21  ;;  %v5469_v26 = vmul.f32 %v5411_v30, %v6964_v12  ;;  %v5473_v24 = vmul.f32 %v5411_v30, %v6966_v43 }
 0x2a2   :  { %6957 = vst [vmem:[#allocation63_spill] sm:$0xff] %v5453_v52  ;;  %6959 = vst [vmem:[#allocation66_spill] sm:$0xff] %v5457_v33  ;;  %v6968_v52 = vld [vmem:[#allocation17_spill] sm:$0xff]  ;;  %v6970_v33 = vld [vmem:[#allocation18_spill] sm:$0xff] }
 0x2a3   :  { %6961 = vst [vmem:[#allocation69_spill] sm:$0xff] %v5461_v8  ;;  %6963 = vst [vmem:[#allocation73_spill] sm:$0xff] %v5465_v56  ;;  %v5477_v0 = vmul.f32 %v5411_v30, %v6968_v52  ;;  %v5481_v19 = vmul.f32 %v5411_v30, %v6970_v33  ;;  %v6972_v8 = vld [vmem:[#allocation19_spill] sm:$0xff]  ;;  %v6974_v56 = vld [vmem:[#allocation20_spill] sm:$0xff] }
 0x2a4   :  { %6965 = vst [vmem:[#allocation76_spill] sm:$0xff] %v5469_v26  ;;  %6967 = vst [vmem:[#allocation79_spill] sm:$0xff] %v5473_v24  ;;  %v5485_v21 = vmul.f32 %v5411_v30, %v6972_v8  ;;  %v5489_v12 = vmul.f32 %v5411_v30, %v6974_v56  ;;  %v6976_v26 = vld [vmem:[#allocation21_spill] sm:$0xff]  ;;  %v6978_v24 = vld [vmem:[#allocation22_spill] sm:$0xff] }
 0x2a5   :  { %6969 = vst [vmem:[#allocation80_spill] sm:$0xff] %v5477_v0  ;;  %6971 = vst [vmem:[#allocation85_spill] sm:$0xff] %v5481_v19  ;;  %v5493_v43 = vmul.f32 %v5411_v30, %v6976_v26  ;;  %v5497_v52 = vmul.f32 %v5411_v30, %v6978_v24  ;;  %v6980_v0 = vld [vmem:[#allocation23_spill] sm:$0xff]  ;;  %v6982_v19 = vld [vmem:[#allocation24_spill] sm:$0xff] }
 0x2a6   :  { %6973 = vst [vmem:[#allocation87_spill] sm:$0xff] %v5485_v21  ;;  %6975 = vst [vmem:[#allocation90_spill] sm:$0xff] %v5489_v12  ;;  %v5501_v33 = vmul.f32 %v5411_v30, %v6980_v0  ;;  %v5505_v8 = vmul.f32 %v5411_v30, %v6982_v19  ;;  %v6984_v21 = vld [vmem:[#allocation25_spill] sm:$0xff]  ;;  %v6986_v12 = vld [vmem:[#allocation27_spill] sm:$0xff] }
 0x2a7   :  { %6977 = vst [vmem:[#allocation93_spill] sm:$0xff] %v5493_v43  ;;  %6979 = vst [vmem:[#allocation96_spill] sm:$0xff] %v5497_v52  ;;  %v5509_v56 = vmul.f32 %v5411_v30, %v6984_v21  ;;  %v5513_v26 = vmul.f32 %v5411_v30, %v6986_v12  ;;  %v6988_v43 = vld [vmem:[#allocation28_spill] sm:$0xff]  ;;  %v6990_v52 = vld [vmem:[#allocation30_spill] sm:$0xff] }
 0x2a8   :  { %6981 = vst [vmem:[#allocation97_spill] sm:$0xff] %v5501_v33  ;;  %6983 = vst [vmem:[#allocation102_spill] sm:$0xff] %v5505_v8  ;;  %v5517_v24 = vmul.f32 %v5411_v30, %v6988_v43  ;;  %v5521_v0 = vmul.f32 %v5411_v30, %v6990_v52  ;;  %v6992_v33 = vld [vmem:[#allocation32_spill] sm:$0xff]  ;;  %v6994_v8 = vld [vmem:[#allocation33_spill] sm:$0xff] }
 0x2a9   :  { %6985 = vst [vmem:[#allocation103_spill] sm:$0xff] %v5509_v56  ;;  %6987 = vst [vmem:[#allocation3_spill] sm:$0xff] %v5513_v26  ;;  %v5525_v19 = vmul.f32 %v5411_v30, %v6992_v33  ;;  %v5529_v21 = vmul.f32 %v5411_v30, %v6994_v8  ;;  %v6996_v56 = vld [vmem:[#allocation36_spill] sm:$0xff]  ;;  %v6998_v26 = vld [vmem:[#allocation37_spill] sm:$0xff] }
 0x2aa   :  { %6989 = vst [vmem:[#allocation2_spill] sm:$0xff] %v5517_v24  ;;  %6991 = vst [vmem:[#allocation4_spill] sm:$0xff] %v5521_v0  ;;  %v5533_v12 = vmul.f32 %v5411_v30, %v6996_v56  ;;  %v5537_v43 = vmul.f32 %v5411_v30, %v6998_v26  ;;  %v7000_v24 = vld [vmem:[#allocation39_spill] sm:$0xff]  ;;  %v7002_v0 = vld [vmem:[#allocation41_spill] sm:$0xff] }
 0x2ab   :  { %6993 = vst [vmem:[#allocation5_spill] sm:$0xff] %v5525_v19  ;;  %6995 = vst [vmem:[#allocation6_spill] sm:$0xff] %v5529_v21  ;;  %v5541_v52 = vmul.f32 %v5411_v30, %v7000_v24  ;;  %v5545_v33 = vmul.f32 %v5411_v30, %v7002_v0  ;;  %v7004_v19 = vld [vmem:[#allocation42_spill] sm:$0xff]  ;;  %v7006_v21 = vld [vmem:[#allocation44_spill] sm:$0xff] }
 0x2ac   :  { %6997 = vst [vmem:[#allocation7_spill] sm:$0xff] %v5533_v12  ;;  %6999 = vst [vmem:[#allocation8_spill] sm:$0xff] %v5537_v43  ;;  %v5549_v8 = vmul.f32 %v5411_v30, %v7004_v19  ;;  %v5553_v56 = vmul.f32 %v5411_v30, %v7006_v21  ;;  %v7008_v12 = vld [vmem:[#allocation46_spill] sm:$0xff]  ;;  %v7010_v43 = vld [vmem:[#allocation47_spill] sm:$0xff] }
 0x2ad   :  { %7001 = vst [vmem:[#allocation9_spill] sm:$0xff] %v5541_v52  ;;  %7003 = vst [vmem:[#allocation10_spill] sm:$0xff] %v5545_v33  ;;  %v5557_v26 = vmul.f32 %v5411_v30, %v7008_v12  ;;  %v5561_v24 = vmul.f32 %v5411_v30, %v7010_v43  ;;  %v7012_v52 = vld [vmem:[#allocation50_spill] sm:$0xff]  ;;  %v7014_v33 = vld [vmem:[#allocation51_spill] sm:$0xff] }
 0x2ae   :  { %7005 = vst [vmem:[#allocation11_spill] sm:$0xff] %v5549_v8  ;;  %7007 = vst [vmem:[#allocation12_spill] sm:$0xff] %v5553_v56  ;;  %v5565_v0 = vmul.f32 %v5411_v30, %v7012_v52  ;;  %v5569_v19 = vmul.f32 %v5411_v30, %v7014_v33  ;;  %v7016_v8 = vld [vmem:[#allocation53_spill] sm:$0xff]  ;;  %v7018_v56 = vld [vmem:[#allocation55_spill] sm:$0xff] }
 0x2af   :  { %7009 = vst [vmem:[#allocation13_spill] sm:$0xff] %v5557_v26  ;;  %7011 = vst [vmem:[#allocation14_spill] sm:$0xff] %v5561_v24  ;;  %v5573_v21 = vmul.f32 %v5411_v30, %v7016_v8  ;;  %v5577_v12 = vmul.f32 %v5411_v30, %v7018_v56  ;;  %v7020_v26 = vld [vmem:[#allocation56_spill] sm:$0xff]  ;;  %v7022_v24 = vld [vmem:[#allocation58_spill] sm:$0xff] }
 0x2b0   :  { %7013 = vst [vmem:[#allocation15_spill] sm:$0xff] %v5565_v0  ;;  %7015 = vst [vmem:[#allocation16_spill] sm:$0xff] %v5569_v19  ;;  %v5581_v43 = vmul.f32 %v5411_v30, %v7020_v26  ;;  %v5585_v52 = vmul.f32 %v5411_v30, %v7022_v24  ;;  %v7024_v0 = vld [vmem:[#allocation60_spill] sm:$0xff]  ;;  %v7026_v19 = vld [vmem:[#allocation61_spill] sm:$0xff] }
 0x2b1   :  { %7017 = vst [vmem:[#allocation17_spill] sm:$0xff] %v5573_v21  ;;  %7019 = vst [vmem:[#allocation18_spill] sm:$0xff] %v5577_v12  ;;  %v5589_v33 = vmul.f32 %v5411_v30, %v7024_v0  ;;  %v5593_v8 = vmul.f32 %v5411_v30, %v7026_v19  ;;  %v7028_v21 = vld [vmem:[#allocation64_spill] sm:$0xff]  ;;  %v7030_v12 = vld [vmem:[#allocation65_spill] sm:$0xff] }
 0x2b2   :  { %7021 = vst [vmem:[#allocation19_spill] sm:$0xff] %v5581_v43  ;;  %7023 = vst [vmem:[#allocation20_spill] sm:$0xff] %v5585_v52  ;;  %v5597_v56 = vmul.f32 %v5411_v30, %v7028_v21  ;;  %v5601_v26 = vmul.f32 %v5411_v30, %v7030_v12  ;;  %v7032_v43 = vld [vmem:[#allocation68_spill] sm:$0xff]  ;;  %v7034_v52 = vld [vmem:[#allocation70_spill] sm:$0xff] }
 0x2b3   :  { %7025 = vst [vmem:[#allocation21_spill] sm:$0xff] %v5589_v33  ;;  %7027 = vst [vmem:[#allocation22_spill] sm:$0xff] %v5593_v8  ;;  %v5605_v24 = vmul.f32 %v5411_v30, %v7032_v43  ;;  %v5609_v0 = vmul.f32 %v5411_v30, %v7034_v52  ;;  %v7036_v33 = vld [vmem:[#allocation72_spill] sm:$0xff]  ;;  %v7038_v8 = vld [vmem:[#allocation75_spill] sm:$0xff] }
 0x2b4   :  { %7029 = vst [vmem:[#allocation23_spill] sm:$0xff] %v5597_v56  ;;  %7031 = vst [vmem:[#allocation24_spill] sm:$0xff] %v5601_v26  ;;  %v5613_v19 = vmul.f32 %v5411_v30, %v7036_v33  ;;  %v5617_v21 = vmul.f32 %v5411_v30, %v7038_v8  ;;  %v7040_v56 = vld [vmem:[#allocation77_spill] sm:$0xff]  ;;  %v7042_v26 = vld [vmem:[#allocation78_spill] sm:$0xff] }
 0x2b5   :  { %7033 = vst [vmem:[#allocation25_spill] sm:$0xff] %v5605_v24  ;;  %7035 = vst [vmem:[#allocation27_spill] sm:$0xff] %v5609_v0  ;;  %v5621_v12 = vmul.f32 %v5411_v30, %v7040_v56  ;;  %v5625_v43 = vmul.f32 %v5411_v30, %v7042_v26  ;;  %v7044_v24 = vld [vmem:[#allocation81_spill] sm:$0xff]  ;;  %v7046_v0 = vld [vmem:[#allocation83_spill] sm:$0xff] }
 0x2b6   :  { %7037 = vst [vmem:[#allocation28_spill] sm:$0xff] %v5613_v19  ;;  %7039 = vst [vmem:[#allocation30_spill] sm:$0xff] %v5617_v21  ;;  %v5629_v52 = vmul.f32 %v5411_v30, %v7044_v24  ;;  %v5633_v33 = vmul.f32 %v5411_v30, %v7046_v0  ;;  %v7048_v19 = vld [vmem:[#allocation86_spill] sm:$0xff]  ;;  %v7050_v21 = vld [vmem:[#allocation88_spill] sm:$0xff] }
 0x2b7   :  { %7041 = vst [vmem:[#allocation32_spill] sm:$0xff] %v5621_v12  ;;  %7043 = vst [vmem:[#allocation33_spill] sm:$0xff] %v5625_v43  ;;  %v5637_v8 = vmul.f32 %v5411_v30, %v7048_v19  ;;  %v5641_v56 = vmul.f32 %v5411_v30, %v7050_v21  ;;  %v7052_v12 = vld [vmem:[#allocation89_spill] sm:$0xff]  ;;  %v7053_v43 = vld [vmem:[#allocation94_spill] sm:$0xff] }
 0x2b8   :  { %7045 = vst [vmem:[#allocation36_spill] sm:$0xff] %v5629_v52  ;;  %7047 = vst [vmem:[#allocation37_spill] sm:$0xff] %v5633_v33  ;;  %v5645_v26 = vmul.f32 %v5411_v30, %v7052_v12  ;;  %v5649_v24 = vmul.f32 %v5411_v30, %v7053_v43  ;;  %v7055_v52 = vld [vmem:[#allocation95_spill] sm:$0xff]  ;;  %v7057_v33 = vld [vmem:[#allocation100_spill] sm:$0xff]  ;;  %v5669_v43 = vmul.f32 %v5411_v30, %v4816_v7 }
 0x2b9   :  { %7049 = vst [vmem:[#allocation39_spill] sm:$0xff] %v5637_v8  ;;  %7051 = vst [vmem:[#allocation41_spill] sm:$0xff] %v5641_v56  ;;  %v5653_v0 = vmul.f32 %v5411_v30, %v7055_v52  ;;  %v5657_v19 = vmul.f32 %v5411_v30, %v7057_v33  ;;  %v7059_v8 = vld [vmem:[#allocation101_spill] sm:$0xff]  ;;  %v7061_v56 = vld [vmem:[#allocation104_spill] sm:$0xff] }
 0x2ba   :  { %7054 = vst [vmem:[#allocation42_spill] sm:$0xff] %v5649_v24  ;;  %v5661_v21 = vmul.f32 %v5411_v30, %v7059_v8  ;;  %v5665_v12 = vmul.f32 %v5411_v30, %v7061_v56  ;;  %7063 = vst [vmem:[#allocation51_spill] sm:$0xff] %v5669_v43  ;;  %v7064_v24 = vld [vmem:[#allocation67_spill] sm:$0xff] }
 0x2bb   :  { %7056 = vst [vmem:[#allocation44_spill] sm:$0xff] %v5653_v0  ;;  %7058 = vst [vmem:[#allocation46_spill] sm:$0xff] %v5657_v19  ;;  %v5673_v52 = vmul.f32 %v5411_v30, %v7064_v24  ;;  %v7066_v0 = vld [vmem:[#allocation71_spill] sm:$0xff]  ;;  %v7068_v19 = vld [vmem:[#allocation74_spill] sm:$0xff] }
 0x2bc   :  { %7060 = vst [vmem:[#allocation47_spill] sm:$0xff] %v5661_v21  ;;  %7062 = vst [vmem:[#allocation50_spill] sm:$0xff] %v5665_v12  ;;  %v5677_v33 = vmul.f32 %v5411_v30, %v7066_v0  ;;  %v5681_v8 = vmul.f32 %v5411_v30, %v7068_v19  ;;  %v7070_v21 = vld [vmem:[#allocation82_spill] sm:$0xff]  ;;  %v7071_v12 = vld [vmem:[#allocation84_spill] sm:$0xff] }
 0x2bd   :  { %7065 = vst [vmem:[#allocation53_spill] sm:$0xff] %v5673_v52  ;;  %v5685_v56 = vmul.f32 %v5411_v30, %v7070_v21  ;;  %v5689_v7 = vmul.f32 %v5411_v30, %v7071_v12  ;;  %v7072_v43 = vld [vmem:[#allocation91_spill] sm:$0xff]  ;;  %v7073_v52 = vld [vmem:[#allocation92_spill] sm:$0xff]  ;;  %v5709_v12 = vmul.f32 %v5411_v30, %v4796_v42  ;;  %v5729_v42 = vmul.f32 %v5411_v30, %v4887_v3 }
 0x2be   :  { %7067 = vst [vmem:[#allocation55_spill] sm:$0xff] %v5677_v33  ;;  %7069 = vst [vmem:[#allocation56_spill] sm:$0xff] %v5681_v8  ;;  %v5693_v24 = vmul.f32 %v5411_v30, %v7072_v43  ;;  %v5697_v0 = vmul.f32 %v5411_v30, %v7073_v52  ;;  %v7074_v33 = vld [vmem:[#allocation98_spill] sm:$0xff]  ;;  %v7075_v8 = vld [vmem:[#allocation99_spill] sm:$0xff]  ;;  %v5713_v43 = vmul.f32 %v5411_v30, %v4819_v53 }
 0x2bf   :  { %v5701_v19 = vmul.f32 %v5411_v30, %v7074_v33  ;;  %v5705_v21 = vmul.f32 %v5411_v30, %v7075_v8  ;;  %v5717_v52 = vmul.f32 %v5411_v30, %v4826_v57  ;;  %v5721_v33 = vmul.f32 %v5411_v30, %v4850_v27 }
 0x2c0   :  { %v5725_v8 = vmul.f32 %v5411_v30, %v4857_v55  ;;  %v5733_v53 = vmul.f32 %v5411_v30, %v4914_v39  ;;  %v5737_v57 = vmul.f32 %v5411_v30, %v4916_v2  ;;  %v5741_v27 = vmul.f32 %v5411_v30, %v4920_v6 }
 0x2c1   :  { %v5745_v55 = vmul.f32 %v5411_v30, %v4941_v14  ;;  %v5749_v3 = vmul.f32 %v5411_v30, %v4945_v37  ;;  %v5753_v39 = vmul.f32 %v5411_v30, %v4973_v13  ;;  %v5757_v2 = vmul.f32 %v5411_v30, %v4994_v48 }
 0x2c2   :  { %v5761_v6 = vmul.f32 %v5411_v30, %v4996_v23  ;;  %v5765_v14 = vmul.f32 %v5411_v30, %v4998_v44  ;;  %v5769_v37 = vmul.f32 %v5411_v30, %v5021_v50  ;;  %v5773_v13 = vmul.f32 %v5411_v30, %v5023_v47 }
 0x2c3   :  { %v5777_v48 = vmul.f32 %v5411_v30, %v5042_v20  ;;  %v5781_v23 = vmul.f32 %v5411_v30, %v5044_v28  ;;  %v5785_v44 = vmul.f32 %v5411_v30, %v5062_v16  ;;  %v5789_v50 = vmul.f32 %v5411_v30, %v5065_v58 }
 0x2c4   :  { %v5793_v47 = vmul.f32 %v5411_v30, %v5079_v9  ;;  %v5797_v20 = vmul.f32 %v5411_v30, %v5081_v4  ;;  %v5801_v28 = vmul.f32 %v5411_v30, %v5106_v25  ;;  %v5805_v16 = vmul.f32 %v5411_v30, %v5119_v54 }
 0x2c5   :  { %v5809_v58 = vmul.f32 %v5411_v30, %v5122_v34  ;;  %v5813_v9 = vmul.f32 %v5411_v30, %v5124_v32  ;;  %v5817_v4 = vmul.f32 %v5411_v30, %v5126_v10  ;;  %v5829_v34 = vmul.f32 %v5411_v30, %v5167_v63 }
 0x2c6   :  { %7076 = vst [vmem:[#allocation58_spill] sm:$0xff] %v5797_v20  ;;  %7077 = vst [vmem:[#allocation60_spill] sm:$0xff] %v5801_v28  ;;  %v7080_v20 = vld [vmem:[#allocation26_spill] sm:$0xff]  ;;  %v7082_v28 = vld [vmem:[#allocation29_spill] sm:$0xff]  ;;  %v5833_v32 = vmul.f32 %v5411_v30, %v5170_v35  ;;  %v5849_v63 = vmul.f32 %v5411_v30, %v5212_v15  ;;  %v5853_v35 = vmul.f32 %v5411_v30, %v5228_v11 }
 0x2c7   :  { %7078 = vst [vmem:[#allocation61_spill] sm:$0xff] %v5813_v9  ;;  %7079 = vst [vmem:[#allocation64_spill] sm:$0xff] %v5817_v4  ;;  %v5821_v25 = vmul.f32 %v5411_v30, %v7080_v20  ;;  %v5825_v54 = vmul.f32 %v5411_v30, %v7082_v28  ;;  %v7084_v9 = vld [vmem:[#allocation31_spill] sm:$0xff]  ;;  %v7085_v4 = vld [vmem:[#allocation34_spill] sm:$0xff] }
 0x2c8   :  { %7083 = vst [vmem:[#allocation68_spill] sm:$0xff] %v5833_v32  ;;  %v5837_v10 = vmul.f32 %v5411_v30, %v7084_v9  ;;  %v5841_v20 = vmul.f32 %v5411_v30, %v7085_v4  ;;  %7089 = vst [vmem:[#allocation75_spill] sm:$0xff] %v5849_v63  ;;  %v7091_v32 = vld [vmem:[#allocation38_spill] sm:$0xff]  ;;  %v5861_v4 = vmul.f32 %v5411_v30, %v5249_v61  ;;  %v7096_v63 = vld [vmem:[#allocation45_spill] sm:$0xff] }
 0x2c9   :  { %7081 = vst [vmem:[#allocation65_spill] sm:$0xff] %v5821_v25  ;;  %v7087_v25 = vld [vmem:[#allocation35_spill] sm:$0xff]  ;;  %7090 = vst [vmem:[#allocation77_spill] sm:$0xff] %v5853_v35  ;;  %v5857_v9 = vmul.f32 %v5411_v30, %v7091_v32  ;;  %v5873_v11 = vmul.f32 %v5411_v30, %v7096_v63  ;;  %v7098_v35 = vld [vmem:[#allocation48_spill] sm:$0xff]  ;;  %v5893_v63 = vmul.f32 %v5411_v30, %v5321_v36 }
 0x2ca   :  { %7086 = vst [vmem:[#allocation70_spill] sm:$0xff] %v5841_v20  ;;  %v5845_v28 = vmul.f32 %v5411_v30, %v7087_v25  ;;  %7093 = vst [vmem:[#allocation81_spill] sm:$0xff] %v5861_v4  ;;  %v7094_v20 = vld [vmem:[#allocation40_spill] sm:$0xff]  ;;  %v5877_v32 = vmul.f32 %v5411_v30, %v7098_v35  ;;  %v7107_v36 = vsub.f32 %v5405_v5, %v5407_v51 }
 0x2cb   :  { %7092 = vst [vmem:[#allocation78_spill] sm:$0xff] %v5857_v9  ;;  %v5865_v25 = vmul.f32 %v5411_v30, %v7094_v20  ;;  %7097 = vst [vmem:[#allocation83_spill] sm:$0xff] %v5873_v11  ;;  %v7099_v9 = vld [vmem:[#allocation49_spill] sm:$0xff]  ;;  %v7100_v4 = vld [vmem:[#allocation52_spill] sm:$0xff] }
 0x2cc   :  { %7088 = vst [vmem:[#allocation72_spill] sm:$0xff] %v5845_v28  ;;  %v7095_v28 = vld [vmem:[#allocation43_spill] sm:$0xff]  ;;  %v5881_v61 = vmul.f32 %v5411_v30, %v7099_v9  ;;  %v5885_v20 = vmul.f32 %v5411_v30, %v7100_v4  ;;  %7102 = vst [vmem:[#allocation88_spill] sm:$0xff] %v5893_v63  ;;  %v7103_v11 = vld [vmem:[#allocation54_spill] sm:$0xff]  ;;  %v5901_v9 = vmul.f32 %v5411_v30, %v5333_v22 }
 0x2cd   :  { %v5869_v15 = vmul.f32 %v5411_v30, %v7095_v28  ;;  %v5889_v28 = vmul.f32 %v5411_v30, %v5308_v1  ;;  %v5897_v35 = vmul.f32 %v5411_v30, %v7103_v11  ;;  %v5905_v4 = vmul.f32 %v5411_v30, %v5343_v62  ;;  %v7108_v22 = vld [vmem:[#allocation57_spill] sm:$0xff]  ;;  %v7109_v62 = vld [vmem:[#allocation59_spill] sm:$0xff] }
 0x2ce   :  { %7104 = vst [vmem:[#allocation89_spill] sm:$0xff] %v5901_v9  ;;  %v5909_v1 = vmul.f32 %v5411_v30, %v5350_v38  ;;  %v5920_v11 = vmul.f32 %v5411_v30, %v5359_v60  ;;  %v5924_v9 = vmul.f32 %v5411_v30, %v7108_v22  ;;  %v7110_v38 = vld [vmem:[#allocation62_spill] sm:$0xff] }
 0x2cf   :  { %7101 = vst [vmem:[#allocation86_spill] sm:$0xff] %v5889_v28  ;;  %7105 = vst [vmem:[#allocation94_spill] sm:$0xff] %v5905_v4  ;;  %v7106_v28 = vsub.s32 0, %v5396_v18  ;;  %v5928_v4 = vmul.f32 %v5411_v30, %v7109_v62  ;;  %v5932_v18 = vmul.f32 %v5411_v30, %v7110_v38  ;;  %v7112_v62 = vld [vmem:[#allocation63_spill] sm:$0xff]  ;;  %v7113_v38 = vld [vmem:[#allocation66_spill] sm:$0xff] }
 0x2d1   :  { %v5916_v63 = vrot.slane %v7107_v36, %v7106_v28  ;;  %7111 = vst [vmem:[#allocation95_spill] sm:$0xff] %v5932_v18  ;;  %v7114_v18 = vld [vmem:[#allocation69_spill] sm:$0xff] }
 0x2d3   :  { %v2728_v5 = vadd.f32 %v5916_v63, %v5417_v29  ;;  %v2729_v51 = vadd.f32 %v5916_v63, %v5421_v46  ;;  %v2730_v60 = vadd.f32 %v5916_v63, %v5425_v59  ;;  %v2731_v28 = vadd.f32 %v5916_v63, %v5429_v41 }
 0x2d4   :  { %v2732_v36 = vadd.f32 %v5916_v63, %v5433_v49  ;;  %v2733_v22 = vadd.f32 %v5916_v63, %v5437_v31  ;;  %v2734_v30 = vadd.f32 %v5916_v63, %v5441_v45  ;;  %v2735_v29 = vadd.f32 %v5916_v63, %v5445_v40  ;;  %v7115_v31 = vld [vmem:[#allocation73_spill] sm:$0xff]  ;;  %v7116_v40 = vld [vmem:[#allocation76_spill] sm:$0xff] }
 0x2d5   :  { %v2736_v46 = vadd.f32 %v5916_v63, %v5449_v17  ;;  %v2737_v59 = vadd.f32 %v5916_v63, %v7112_v62  ;;  %v2738_v41 = vadd.f32 %v5916_v63, %v7113_v38  ;;  %v2739_v49 = vadd.f32 %v5916_v63, %v7114_v18  ;;  %2856 = vst.msk [vmem:[%s6707_s5] sm:$0xff] %vm1926_vm5, %v2728_v5  ;;  %v7117_v18 = vld [vmem:[#allocation79_spill] sm:$0xff] }
 0x2d6   :  { %2857 = vst.msk [vmem:[%s6707_s5 + $0x8] sm:$0xff] %vm1926_vm5, %v2729_v51  ;;  %2858 = vst.msk [vmem:[%s6707_s5 + $0x10] sm:$0xff] %vm1926_vm5, %v2730_v60  ;;  %v2740_v45 = vadd.f32 %v5916_v63, %v7115_v31  ;;  %v2741_v17 = vadd.f32 %v5916_v63, %v7116_v40  ;;  %v2742_v5 = vadd.f32 %v5916_v63, %v7117_v18  ;;  %v7118_v51 = vld [vmem:[#allocation80_spill] sm:$0xff]  ;;  %v7119_v60 = vld [vmem:[#allocation85_spill] sm:$0xff] }
 0x2d7   :  { %2859 = vst.msk [vmem:[%s6707_s5 + $0x18] sm:$0xff] %vm1926_vm5, %v2731_v28  ;;  %v2743_v62 = vadd.f32 %v5916_v63, %v7118_v51  ;;  %2860 = vst.msk [vmem:[%s6707_s5 + $0x20] sm:$0xff] %vm1926_vm5, %v2732_v36  ;;  %v2744_v28 = vadd.f32 %v5916_v63, %v7119_v60  ;;  %v7120_v38 = vld [vmem:[#allocation87_spill] sm:$0xff]  ;;  %v7121_v31 = vld [vmem:[#allocation90_spill] sm:$0xff] }
 0x2d8   :  { %2861 = vst.msk [vmem:[%s6707_s5 + $0x28] sm:$0xff] %vm1926_vm5, %v2733_v22  ;;  %2862 = vst.msk [vmem:[%s6707_s5 + $0x30] sm:$0xff] %vm1926_vm5, %v2734_v30  ;;  %v2745_v36 = vadd.f32 %v5916_v63, %v7120_v38  ;;  %v2746_v40 = vadd.f32 %v5916_v63, %v7121_v31  ;;  %v7122_v22 = vld [vmem:[#allocation93_spill] sm:$0xff]  ;;  %v7123_v30 = vld [vmem:[#allocation96_spill] sm:$0xff] }
 0x2d9   :  { %2863 = vst.msk [vmem:[%s6707_s5 + $0x38] sm:$0xff] %vm1926_vm5, %v2735_v29  ;;  %v2747_v18 = vadd.f32 %v5916_v63, %v7122_v22  ;;  %2864 = vst.msk [vmem:[%s6707_s5 + $0x40] sm:$0xff] %vm1926_vm5, %v2736_v46  ;;  %v2748_v29 = vadd.f32 %v5916_v63, %v7123_v30  ;;  %v7124_v51 = vld [vmem:[#allocation97_spill] sm:$0xff]  ;;  %v7125_v60 = vld [vmem:[#allocation102_spill] sm:$0xff] }
 0x2da   :  { %2865 = vst.msk [vmem:[%s6707_s5 + $0x48] sm:$0xff] %vm1926_vm5, %v2737_v59  ;;  %2866 = vst.msk [vmem:[%s6707_s5 + $0x50] sm:$0xff] %vm1926_vm5, %v2738_v41  ;;  %v2749_v46 = vadd.f32 %v5916_v63, %v7124_v51  ;;  %v2750_v38 = vadd.f32 %v5916_v63, %v7125_v60  ;;  %v7126_v59 = vld [vmem:[#allocation103_spill] sm:$0xff]  ;;  %v7128_v22 = vld [vmem:[#allocation2_spill] sm:$0xff] }
 0x2db   :  { %2867 = vst.msk [vmem:[%s6707_s5 + $0x58] sm:$0xff] %vm1926_vm5, %v2739_v49  ;;  %v2751_v31 = vadd.f32 %v5916_v63, %v7126_v59  ;;  %2868 = vst.msk [vmem:[%s6707_s5 + $0x60] sm:$0xff] %vm1926_vm5, %v2740_v45  ;;  %v7127_v41 = vld [vmem:[#allocation3_spill] sm:$0xff]  ;;  %v2753_v45 = vadd.f32 %v5916_v63, %v7128_v22  ;;  %v7129_v30 = vld [vmem:[#allocation4_spill] sm:$0xff] }
 0x2dc   :  { %2869 = vst.msk [vmem:[%s6707_s5 + $0x68] sm:$0xff] %vm1926_vm5, %v2741_v17  ;;  %2870 = vst.msk [vmem:[%s6707_s5 + $0x70] sm:$0xff] %vm1926_vm5, %v2742_v5  ;;  %v2752_v49 = vadd.f32 %v5916_v63, %v7127_v41  ;;  %v2754_v51 = vadd.f32 %v5916_v63, %v7129_v30  ;;  %v7130_v17 = vld [vmem:[#allocation5_spill] sm:$0xff]  ;;  %v7131_v5 = vld [vmem:[#allocation6_spill] sm:$0xff] }
 0x2dd   :  { %2871 = vst.msk [vmem:[%s6707_s5 + $0x78] sm:$0xff] %vm1926_vm5, %v2743_v62  ;;  %v2755_v60 = vadd.f32 %v5916_v63, %v7130_v17  ;;  %2872 = vst.msk [vmem:[%s6707_s5 + $0x80] sm:$0xff] %vm1926_vm5, %v2744_v28  ;;  %v2756_v62 = vadd.f32 %v5916_v63, %v7131_v5  ;;  %v7132_v59 = vld [vmem:[#allocation7_spill] sm:$0xff]  ;;  %v7133_v41 = vld [vmem:[#allocation8_spill] sm:$0xff] }
 0x2de   :  { %2873 = vst.msk [vmem:[%s6707_s5 + $0x88] sm:$0xff] %vm1926_vm5, %v2745_v36  ;;  %2874 = vst.msk [vmem:[%s6707_s5 + $0x90] sm:$0xff] %vm1926_vm5, %v2746_v40  ;;  %v2757_v28 = vadd.f32 %v5916_v63, %v7132_v59  ;;  %v2758_v22 = vadd.f32 %v5916_v63, %v7133_v41  ;;  %v7134_v36 = vld [vmem:[#allocation9_spill] sm:$0xff]  ;;  %v7135_v40 = vld [vmem:[#allocation10_spill] sm:$0xff] }
 0x2df   :  { %2875 = vst.msk [vmem:[%s6707_s5 + $0x98] sm:$0xff] %vm1926_vm5, %v2747_v18  ;;  %v2759_v30 = vadd.f32 %v5916_v63, %v7134_v36  ;;  %2876 = vst.msk [vmem:[%s6707_s5 + $0xa0] sm:$0xff] %vm1926_vm5, %v2748_v29  ;;  %v2760_v18 = vadd.f32 %v5916_v63, %v7135_v40  ;;  %v7136_v17 = vld [vmem:[#allocation11_spill] sm:$0xff]  ;;  %v7137_v5 = vld [vmem:[#allocation12_spill] sm:$0xff] }
 0x2e0   :  { %2877 = vst.msk [vmem:[%s6707_s5 + $0xa8] sm:$0xff] %vm1926_vm5, %v2749_v46  ;;  %2878 = vst.msk [vmem:[%s6707_s5 + $0xb0] sm:$0xff] %vm1926_vm5, %v2750_v38  ;;  %v2761_v29 = vadd.f32 %v5916_v63, %v7136_v17  ;;  %v2762_v59 = vadd.f32 %v5916_v63, %v7137_v5  ;;  %v7138_v46 = vld [vmem:[#allocation13_spill] sm:$0xff]  ;;  %v7139_v38 = vld [vmem:[#allocation14_spill] sm:$0xff] }
 0x2e1   :  { %2879 = vst.msk [vmem:[%s6707_s5 + $0xb8] sm:$0xff] %vm1926_vm5, %v2751_v31  ;;  %v2763_v41 = vadd.f32 %v5916_v63, %v7138_v46  ;;  %2880 = vst.msk [vmem:[%s6707_s5 + $0xc0] sm:$0xff] %vm1926_vm5, %v2752_v49  ;;  %v2764_v31 = vadd.f32 %v5916_v63, %v7139_v38  ;;  %v7140_v36 = vld [vmem:[#allocation15_spill] sm:$0xff]  ;;  %v7141_v40 = vld [vmem:[#allocation16_spill] sm:$0xff] }
 0x2e2   :  { %2881 = vst.msk [vmem:[%s6707_s5 + $0xc8] sm:$0xff] %vm1926_vm5, %v2753_v45  ;;  %2882 = vst.msk [vmem:[%s6707_s5 + $0xd0] sm:$0xff] %vm1926_vm5, %v2754_v51  ;;  %v2765_v49 = vadd.f32 %v5916_v63, %v7140_v36  ;;  %v2766_v17 = vadd.f32 %v5916_v63, %v7141_v40  ;;  %v7142_v45 = vld [vmem:[#allocation17_spill] sm:$0xff]  ;;  %v7143_v51 = vld [vmem:[#allocation18_spill] sm:$0xff] }
 0x2e3   :  { %2883 = vst.msk [vmem:[%s6707_s5 + $0xd8] sm:$0xff] %vm1926_vm5, %v2755_v60  ;;  %v2767_v5 = vadd.f32 %v5916_v63, %v7142_v45  ;;  %2884 = vst.msk [vmem:[%s6707_s5 + $0xe0] sm:$0xff] %vm1926_vm5, %v2756_v62  ;;  %v2768_v60 = vadd.f32 %v5916_v63, %v7143_v51  ;;  %v7144_v46 = vld [vmem:[#allocation19_spill] sm:$0xff]  ;;  %v7145_v38 = vld [vmem:[#allocation20_spill] sm:$0xff] }
 0x2e4   :  { %2885 = vst.msk [vmem:[%s6707_s5 + $0xe8] sm:$0xff] %vm1926_vm5, %v2757_v28  ;;  %2886 = vst.msk [vmem:[%s6707_s5 + $0xf0] sm:$0xff] %vm1926_vm5, %v2758_v22  ;;  %v2769_v62 = vadd.f32 %v5916_v63, %v7144_v46  ;;  %v2770_v36 = vadd.f32 %v5916_v63, %v7145_v38  ;;  %v7146_v28 = vld [vmem:[#allocation21_spill] sm:$0xff]  ;;  %v7147_v22 = vld [vmem:[#allocation22_spill] sm:$0xff] }
 0x2e5   :  { %2887 = vst.msk [vmem:[%s6707_s5 + $0xf8] sm:$0xff] %vm1926_vm5, %v2759_v30  ;;  %v2771_v40 = vadd.f32 %v5916_v63, %v7146_v28  ;;  %2888 = vst.msk [vmem:[%s6707_s5 + $0x100] sm:$0xff] %vm1926_vm5, %v2760_v18  ;;  %v2772_v30 = vadd.f32 %v5916_v63, %v7147_v22  ;;  %v7148_v45 = vld [vmem:[#allocation23_spill] sm:$0xff]  ;;  %v7149_v51 = vld [vmem:[#allocation24_spill] sm:$0xff] }
 0x2e6   :  { %2889 = vst.msk [vmem:[%s6707_s5 + $0x108] sm:$0xff] %vm1926_vm5, %v2761_v29  ;;  %2890 = vst.msk [vmem:[%s6707_s5 + $0x110] sm:$0xff] %vm1926_vm5, %v2762_v59  ;;  %v2773_v18 = vadd.f32 %v5916_v63, %v7148_v45  ;;  %v2774_v46 = vadd.f32 %v5916_v63, %v7149_v51  ;;  %v7150_v29 = vld [vmem:[#allocation25_spill] sm:$0xff]  ;;  %v7151_v59 = vld [vmem:[#allocation27_spill] sm:$0xff] }
 0x2e7   :  { %2891 = vst.msk [vmem:[%s6707_s5 + $0x118] sm:$0xff] %vm1926_vm5, %v2763_v41  ;;  %v2775_v38 = vadd.f32 %v5916_v63, %v7150_v29  ;;  %2892 = vst.msk [vmem:[%s6707_s5 + $0x120] sm:$0xff] %vm1926_vm5, %v2764_v31  ;;  %v2776_v41 = vadd.f32 %v5916_v63, %v7151_v59  ;;  %v7152_v28 = vld [vmem:[#allocation28_spill] sm:$0xff]  ;;  %v7153_v22 = vld [vmem:[#allocation30_spill] sm:$0xff] }
 0x2e8   :  { %2893 = vst.msk [vmem:[%s6707_s5 + $0x128] sm:$0xff] %vm1926_vm5, %v2765_v49  ;;  %2894 = vst.msk [vmem:[%s6707_s5 + $0x130] sm:$0xff] %vm1926_vm5, %v2766_v17  ;;  %v2777_v31 = vadd.f32 %v5916_v63, %v7152_v28  ;;  %v2778_v45 = vadd.f32 %v5916_v63, %v7153_v22  ;;  %v7154_v49 = vld [vmem:[#allocation32_spill] sm:$0xff]  ;;  %v7155_v17 = vld [vmem:[#allocation33_spill] sm:$0xff] }
 0x2e9   :  { %2895 = vst.msk [vmem:[%s6707_s5 + $0x138] sm:$0xff] %vm1926_vm5, %v2767_v5  ;;  %v2779_v51 = vadd.f32 %v5916_v63, %v7154_v49  ;;  %2896 = vst.msk [vmem:[%s6707_s5 + $0x140] sm:$0xff] %vm1926_vm5, %v2768_v60  ;;  %v2780_v5 = vadd.f32 %v5916_v63, %v7155_v17  ;;  %v7156_v29 = vld [vmem:[#allocation36_spill] sm:$0xff]  ;;  %v7157_v59 = vld [vmem:[#allocation37_spill] sm:$0xff] }
 0x2ea   :  { %2897 = vst.msk [vmem:[%s6707_s5 + $0x148] sm:$0xff] %vm1926_vm5, %v2769_v62  ;;  %2898 = vst.msk [vmem:[%s6707_s5 + $0x150] sm:$0xff] %vm1926_vm5, %v2770_v36  ;;  %v2781_v60 = vadd.f32 %v5916_v63, %v7156_v29  ;;  %v2782_v28 = vadd.f32 %v5916_v63, %v7157_v59  ;;  %v7158_v62 = vld [vmem:[#allocation39_spill] sm:$0xff]  ;;  %v7159_v36 = vld [vmem:[#allocation41_spill] sm:$0xff] }
 0x2eb   :  { %2899 = vst.msk [vmem:[%s6707_s5 + $0x158] sm:$0xff] %vm1926_vm5, %v2771_v40  ;;  %v2783_v22 = vadd.f32 %v5916_v63, %v7158_v62  ;;  %2900 = vst.msk [vmem:[%s6707_s5 + $0x160] sm:$0xff] %vm1926_vm5, %v2772_v30  ;;  %v2784_v40 = vadd.f32 %v5916_v63, %v7159_v36  ;;  %v2785_v30 = vadd.f32 %v5916_v63, %v5645_v26  ;;  %v7160_v49 = vld [vmem:[#allocation42_spill] sm:$0xff] }
 0x2ec   :  { %2901 = vst.msk [vmem:[%s6707_s5 + $0x168] sm:$0xff] %vm1926_vm5, %v2773_v18  ;;  %2902 = vst.msk [vmem:[%s6707_s5 + $0x170] sm:$0xff] %vm1926_vm5, %v2774_v46  ;;  %v2786_v17 = vadd.f32 %v5916_v63, %v7160_v49  ;;  %v7161_v18 = vld [vmem:[#allocation44_spill] sm:$0xff]  ;;  %v7162_v26 = vld [vmem:[#allocation46_spill] sm:$0xff] }
 0x2ed   :  { %2903 = vst.msk [vmem:[%s6707_s5 + $0x178] sm:$0xff] %vm1926_vm5, %v2775_v38  ;;  %v2787_v29 = vadd.f32 %v5916_v63, %v7161_v18  ;;  %2904 = vst.msk [vmem:[%s6707_s5 + $0x180] sm:$0xff] %vm1926_vm5, %v2776_v41  ;;  %v2788_v46 = vadd.f32 %v5916_v63, %v7162_v26  ;;  %v7163_v38 = vld [vmem:[#allocation47_spill] sm:$0xff]  ;;  %v7164_v59 = vld [vmem:[#allocation50_spill] sm:$0xff] }
 0x2ee   :  { %2905 = vst.msk [vmem:[%s6707_s5 + $0x188] sm:$0xff] %vm1926_vm5, %v2777_v31  ;;  %2906 = vst.msk [vmem:[%s6707_s5 + $0x190] sm:$0xff] %vm1926_vm5, %v2778_v45  ;;  %v2789_v41 = vadd.f32 %v5916_v63, %v7163_v38  ;;  %v2790_v62 = vadd.f32 %v5916_v63, %v7164_v59  ;;  %v7165_v31 = vld [vmem:[#allocation51_spill] sm:$0xff]  ;;  %v7166_v45 = vld [vmem:[#allocation53_spill] sm:$0xff]  ;;  %v2830_v59 = vadd.f32 %v5916_v63, %v5825_v54 }
 0x2ef   :  { %2907 = vst.msk [vmem:[%s6707_s5 + $0x198] sm:$0xff] %vm1926_vm5, %v2779_v51  ;;  %v2791_v36 = vadd.f32 %v5916_v63, %v7165_v31  ;;  %2908 = vst.msk [vmem:[%s6707_s5 + $0x1a0] sm:$0xff] %vm1926_vm5, %v2780_v5  ;;  %v2792_v51 = vadd.f32 %v5916_v63, %v7166_v45  ;;  %v7167_v49 = vld [vmem:[#allocation55_spill] sm:$0xff]  ;;  %v7168_v18 = vld [vmem:[#allocation56_spill] sm:$0xff]  ;;  %v2833_v31 = vadd.f32 %v5916_v63, %v5837_v10 }
 0x2f0   :  { %2909 = vst.msk [vmem:[%s6707_s5 + $0x1a8] sm:$0xff] %vm1926_vm5, %v2781_v60  ;;  %2910 = vst.msk [vmem:[%s6707_s5 + $0x1b0] sm:$0xff] %vm1926_vm5, %v2782_v28  ;;  %v2793_v5 = vadd.f32 %v5916_v63, %v7167_v49  ;;  %v2794_v26 = vadd.f32 %v5916_v63, %v7168_v18  ;;  %v2795_v60 = vadd.f32 %v5916_v63, %v5685_v56  ;;  %v7173_v38 = vld [vmem:[#allocation65_spill] sm:$0xff]  ;;  %v7174_v54 = vld [vmem:[#allocation68_spill] sm:$0xff] }
 0x2f1   :  { %2911 = vst.msk [vmem:[%s6707_s5 + $0x1b8] sm:$0xff] %vm1926_vm5, %v2783_v22  ;;  %2912 = vst.msk [vmem:[%s6707_s5 + $0x1c0] sm:$0xff] %vm1926_vm5, %v2784_v40  ;;  %v2796_v56 = vadd.f32 %v5916_v63, %v5689_v7  ;;  %v2797_v28 = vadd.f32 %v5916_v63, %v5693_v24  ;;  %v2798_v22 = vadd.f32 %v5916_v63, %v5697_v0  ;;  %v7177_v10 = vld [vmem:[#allocation75_spill] sm:$0xff]  ;;  %v7178_v18 = vld [vmem:[#allocation77_spill] sm:$0xff] }
 0x2f2   :  { %2913 = vst.msk [vmem:[%s6707_s5 + $0x1c8] sm:$0xff] %vm1926_vm5, %v2785_v30  ;;  %2914 = vst.msk [vmem:[%s6707_s5 + $0x1d0] sm:$0xff] %vm1926_vm5, %v2786_v17  ;;  %v2799_v40 = vadd.f32 %v5916_v63, %v5701_v19  ;;  %v2800_v7 = vadd.f32 %v5916_v63, %v5705_v21  ;;  %v2801_v24 = vadd.f32 %v5916_v63, %v5709_v12 }
 0x2f3   :  { %2915 = vst.msk [vmem:[%s6707_s5 + $0x1d8] sm:$0xff] %vm1926_vm5, %v2787_v29  ;;  %2916 = vst.msk [vmem:[%s6707_s5 + $0x1e0] sm:$0xff] %vm1926_vm5, %v2788_v46  ;;  %v2802_v0 = vadd.f32 %v5916_v63, %v5713_v43  ;;  %v2803_v19 = vadd.f32 %v5916_v63, %v5717_v52  ;;  %v2804_v21 = vadd.f32 %v5916_v63, %v5721_v33  ;;  %v7171_v29 = vld [vmem:[#allocation61_spill] sm:$0xff] }
 0x2f4   :  { %2917 = vst.msk [vmem:[%s6707_s5 + $0x1e8] sm:$0xff] %vm1926_vm5, %v2789_v41  ;;  %2918 = vst.msk [vmem:[%s6707_s5 + $0x1f0] sm:$0xff] %vm1926_vm5, %v2790_v62  ;;  %v2805_v12 = vadd.f32 %v5916_v63, %v5725_v8  ;;  %v2806_v43 = vadd.f32 %v5916_v63, %v5729_v42  ;;  %v2807_v52 = vadd.f32 %v5916_v63, %v5733_v53 }
 0x2f5   :  { %2919 = vst.msk [vmem:[%s6707_s5 + $0x1f8] sm:$0xff] %vm1926_vm5, %v2791_v36  ;;  %2920 = vst.msk [vmem:[%s6707_s5 + $0x200] sm:$0xff] %vm1926_vm5, %v2792_v51  ;;  %v2808_v33 = vadd.f32 %v5916_v63, %v5737_v57  ;;  %v2809_v8 = vadd.f32 %v5916_v63, %v5741_v27  ;;  %v2810_v42 = vadd.f32 %v5916_v63, %v5745_v55  ;;  %v7175_v36 = vld [vmem:[#allocation70_spill] sm:$0xff]  ;;  %v7176_v51 = vld [vmem:[#allocation72_spill] sm:$0xff] }
 0x2f6   :  { %2921 = vst.msk [vmem:[%s6707_s5 + $0x208] sm:$0xff] %vm1926_vm5, %v2793_v5  ;;  %2922 = vst.msk [vmem:[%s6707_s5 + $0x210] sm:$0xff] %vm1926_vm5, %v2794_v26  ;;  %v2811_v53 = vadd.f32 %v5916_v63, %v5749_v3  ;;  %v2812_v57 = vadd.f32 %v5916_v63, %v5753_v39  ;;  %v2813_v27 = vadd.f32 %v5916_v63, %v5757_v2 }
 0x2f7   :  { %2923 = vst.msk [vmem:[%s6707_s5 + $0x218] sm:$0xff] %vm1926_vm5, %v2795_v60  ;;  %2924 = vst.msk [vmem:[%s6707_s5 + $0x220] sm:$0xff] %vm1926_vm5, %v2796_v56  ;;  %v2814_v55 = vadd.f32 %v5916_v63, %v5761_v6  ;;  %v2815_v3 = vadd.f32 %v5916_v63, %v5765_v14  ;;  %v2816_v39 = vadd.f32 %v5916_v63, %v5769_v37  ;;  %v7179_v60 = vld [vmem:[#allocation78_spill] sm:$0xff] }
 0x2f8   :  { %2925 = vst.msk [vmem:[%s6707_s5 + $0x228] sm:$0xff] %vm1926_vm5, %v2797_v28  ;;  %2926 = vst.msk [vmem:[%s6707_s5 + $0x230] sm:$0xff] %vm1926_vm5, %v2798_v22  ;;  %v2817_v2 = vadd.f32 %v5916_v63, %v5773_v13  ;;  %v2818_v6 = vadd.f32 %v5916_v63, %v5777_v48  ;;  %v2819_v14 = vadd.f32 %v5916_v63, %v5781_v23  ;;  %v7169_v23 = vld [vmem:[#allocation58_spill] sm:$0xff]  ;;  %v7180_v28 = vld [vmem:[#allocation81_spill] sm:$0xff] }
 0x2f9   :  { %2927 = vst.msk [vmem:[%s6707_s5 + $0x238] sm:$0xff] %vm1926_vm5, %v2799_v40  ;;  %2928 = vst.msk [vmem:[%s6707_s5 + $0x240] sm:$0xff] %vm1926_vm5, %v2800_v7  ;;  %v2820_v37 = vadd.f32 %v5916_v63, %v5785_v44  ;;  %v2821_v13 = vadd.f32 %v5916_v63, %v5789_v50  ;;  %v2822_v48 = vadd.f32 %v5916_v63, %v5793_v47  ;;  %v7170_v44 = vld [vmem:[#allocation60_spill] sm:$0xff] }
 0x2fa   :  { %2929 = vst.msk [vmem:[%s6707_s5 + $0x248] sm:$0xff] %vm1926_vm5, %v2801_v24  ;;  %2930 = vst.msk [vmem:[%s6707_s5 + $0x250] sm:$0xff] %vm1926_vm5, %v2802_v0  ;;  %v2823_v30 = vadd.f32 %v5916_v63, %v7169_v23  ;;  %v2824_v50 = vadd.f32 %v5916_v63, %v7170_v44  ;;  %v2825_v47 = vadd.f32 %v5916_v63, %v5805_v16  ;;  %v7172_v16 = vld [vmem:[#allocation64_spill] sm:$0xff]  ;;  %v7181_v24 = vld [vmem:[#allocation83_spill] sm:$0xff] }
 0x2fb   :  { %2931 = vst.msk [vmem:[%s6707_s5 + $0x258] sm:$0xff] %vm1926_vm5, %v2803_v19  ;;  %2932 = vst.msk [vmem:[%s6707_s5 + $0x260] sm:$0xff] %vm1926_vm5, %v2804_v21  ;;  %v2826_v17 = vadd.f32 %v5916_v63, %v5809_v58  ;;  %v2827_v46 = vadd.f32 %v5916_v63, %v7171_v29  ;;  %v2828_v58 = vadd.f32 %v5916_v63, %v7172_v16 }
 0x2fc   :  { %2933 = vst.msk [vmem:[%s6707_s5 + $0x268] sm:$0xff] %vm1926_vm5, %v2805_v12  ;;  %2934 = vst.msk [vmem:[%s6707_s5 + $0x270] sm:$0xff] %vm1926_vm5, %v2806_v43  ;;  %v2829_v41 = vadd.f32 %v5916_v63, %v7173_v38  ;;  %v2831_v62 = vadd.f32 %v5916_v63, %v5829_v34  ;;  %v2832_v34 = vadd.f32 %v5916_v63, %v7174_v54  ;;  %v7183_v12 = vld [vmem:[#allocation88_spill] sm:$0xff] }
 0x2fd   :  { %2935 = vst.msk [vmem:[%s6707_s5 + $0x278] sm:$0xff] %vm1926_vm5, %v2807_v52  ;;  %2936 = vst.msk [vmem:[%s6707_s5 + $0x280] sm:$0xff] %vm1926_vm5, %v2808_v33  ;;  %v2834_v45 = vadd.f32 %v5916_v63, %v7175_v36  ;;  %v2835_v49 = vadd.f32 %v5916_v63, %v7176_v51  ;;  %v2836_v5 = vadd.f32 %v5916_v63, %v7177_v10  ;;  %v7185_v33 = vld [vmem:[#allocation94_spill] sm:$0xff] }
 0x2fe   :  { %2937 = vst.msk [vmem:[%s6707_s5 + $0x288] sm:$0xff] %vm1926_vm5, %v2809_v8  ;;  %2938 = vst.msk [vmem:[%s6707_s5 + $0x290] sm:$0xff] %vm1926_vm5, %v2810_v42  ;;  %v2837_v26 = vadd.f32 %v5916_v63, %v7178_v18  ;;  %v2838_v56 = vadd.f32 %v5916_v63, %v7179_v60  ;;  %v2839_v22 = vadd.f32 %v5916_v63, %v7180_v28 }
 0x2ff   :  { %2939 = vst.msk [vmem:[%s6707_s5 + $0x298] sm:$0xff] %vm1926_vm5, %v2811_v53  ;;  %2940 = vst.msk [vmem:[%s6707_s5 + $0x2a0] sm:$0xff] %vm1926_vm5, %v2812_v57  ;;  %v2840_v40 = vadd.f32 %v5916_v63, %v5865_v25  ;;  %v2841_v7 = vadd.f32 %v5916_v63, %v5869_v15  ;;  %v2842_v0 = vadd.f32 %v5916_v63, %v7181_v24  ;;  %v7186_v57 = vld [vmem:[#allocation95_spill] sm:$0xff] }
 0x300   :  { %2941 = vst.msk [vmem:[%s6707_s5 + $0x2a8] sm:$0xff] %vm1926_vm5, %v2813_v27  ;;  %2942 = vst.msk [vmem:[%s6707_s5 + $0x2b0] sm:$0xff] %vm1926_vm5, %v2814_v55  ;;  %v2843_v19 = vadd.f32 %v5916_v63, %v5877_v32  ;;  %v2844_v25 = vadd.f32 %v5916_v63, %v5881_v61  ;;  %v2845_v15 = vadd.f32 %v5916_v63, %v5885_v20  ;;  %v7182_v32 = vld [vmem:[#allocation86_spill] sm:$0xff]  ;;  %v7184_v20 = vld [vmem:[#allocation89_spill] sm:$0xff] }
 0x301   :  { %2943 = vst.msk [vmem:[%s6707_s5 + $0x2b8] sm:$0xff] %vm1926_vm5, %v2815_v3  ;;  %2944 = vst.msk [vmem:[%s6707_s5 + $0x2c0] sm:$0xff] %vm1926_vm5, %v2816_v39  ;;  %v2846_v21 = vadd.f32 %v5916_v63, %v7182_v32  ;;  %v2847_v43 = vadd.f32 %v5916_v63, %v7183_v12  ;;  %v2848_v61 = vadd.f32 %v5916_v63, %v5897_v35 }
 0x302   :  { %2945 = vst.msk [vmem:[%s6707_s5 + $0x2c8] sm:$0xff] %vm1926_vm5, %v2817_v2  ;;  %2946 = vst.msk [vmem:[%s6707_s5 + $0x2d0] sm:$0xff] %vm1926_vm5, %v2818_v6  ;;  %v2849_v52 = vadd.f32 %v5916_v63, %v7184_v20  ;;  %v2850_v8 = vadd.f32 %v5916_v63, %v7185_v33  ;;  %v2851_v42 = vadd.f32 %v5916_v63, %v5909_v1 }
 0x303   :  { %2947 = vst.msk [vmem:[%s6707_s5 + $0x2d8] sm:$0xff] %vm1926_vm5, %v2819_v14  ;;  %2948 = vst.msk [vmem:[%s6707_s5 + $0x2e0] sm:$0xff] %vm1926_vm5, %v2820_v37  ;;  %v2852_v35 = vadd.f32 %v5916_v63, %v5920_v11  ;;  %v2853_v1 = vadd.f32 %v5916_v63, %v5924_v9  ;;  %v2854_v53 = vadd.f32 %v5916_v63, %v5928_v4 }
 0x304   :  { %2949 = vst.msk [vmem:[%s6707_s5 + $0x2e8] sm:$0xff] %vm1926_vm5, %v2821_v13  ;;  %2950 = vst.msk [vmem:[%s6707_s5 + $0x2f0] sm:$0xff] %vm1926_vm5, %v2822_v48  ;;  %v2855_v27 = vadd.f32 %v5916_v63, %v7186_v57 }
 0x305   :  { %2951 = vst.msk [vmem:[%s6707_s5 + $0x2f8] sm:$0xff] %vm1926_vm5, %v2823_v30  ;;  %2952 = vst.msk [vmem:[%s6707_s5 + $0x300] sm:$0xff] %vm1926_vm5, %v2824_v50 }
 0x306   :  { %2953 = vst.msk [vmem:[%s6707_s5 + $0x308] sm:$0xff] %vm1926_vm5, %v2825_v47  ;;  %2954 = vst.msk [vmem:[%s6707_s5 + $0x310] sm:$0xff] %vm1926_vm5, %v2826_v17 }
 0x307   :  { %2955 = vst.msk [vmem:[%s6707_s5 + $0x318] sm:$0xff] %vm1926_vm5, %v2827_v46  ;;  %2956 = vst.msk [vmem:[%s6707_s5 + $0x320] sm:$0xff] %vm1926_vm5, %v2828_v58 }
 0x308   :  { %2957 = vst.msk [vmem:[%s6707_s5 + $0x328] sm:$0xff] %vm1926_vm5, %v2829_v41  ;;  %2958 = vst.msk [vmem:[%s6707_s5 + $0x330] sm:$0xff] %vm1926_vm5, %v2830_v59 }
 0x309   :  { %2959 = vst.msk [vmem:[%s6707_s5 + $0x338] sm:$0xff] %vm1926_vm5, %v2831_v62  ;;  %2960 = vst.msk [vmem:[%s6707_s5 + $0x340] sm:$0xff] %vm1926_vm5, %v2832_v34 }
 0x30a   :  { %2961 = vst.msk [vmem:[%s6707_s5 + $0x348] sm:$0xff] %vm1926_vm5, %v2833_v31  ;;  %2962 = vst.msk [vmem:[%s6707_s5 + $0x350] sm:$0xff] %vm1926_vm5, %v2834_v45 }
 0x30b   :  { %2963 = vst.msk [vmem:[%s6707_s5 + $0x358] sm:$0xff] %vm1926_vm5, %v2835_v49  ;;  %2964 = vst.msk [vmem:[%s6707_s5 + $0x360] sm:$0xff] %vm1926_vm5, %v2836_v5 }
 0x30c   :  { %2965 = vst.msk [vmem:[%s6707_s5 + $0x368] sm:$0xff] %vm1926_vm5, %v2837_v26  ;;  %2966 = vst.msk [vmem:[%s6707_s5 + $0x370] sm:$0xff] %vm1926_vm5, %v2838_v56 }
 0x30d   :  { %2967 = vst.msk [vmem:[%s6707_s5 + $0x378] sm:$0xff] %vm1926_vm5, %v2839_v22  ;;  %2968 = vst.msk [vmem:[%s6707_s5 + $0x380] sm:$0xff] %vm1926_vm5, %v2840_v40 }
 0x30e   :  { %2969 = vst.msk [vmem:[%s6707_s5 + $0x388] sm:$0xff] %vm1926_vm5, %v2841_v7  ;;  %2970 = vst.msk [vmem:[%s6707_s5 + $0x390] sm:$0xff] %vm1926_vm5, %v2842_v0 }
 0x30f   :  { %2971 = vst.msk [vmem:[%s6707_s5 + $0x398] sm:$0xff] %vm1926_vm5, %v2843_v19  ;;  %2972 = vst.msk [vmem:[%s6707_s5 + $0x3a0] sm:$0xff] %vm1926_vm5, %v2844_v25 }
 0x310   :  { %2973 = vst.msk [vmem:[%s6707_s5 + $0x3a8] sm:$0xff] %vm1926_vm5, %v2845_v15  ;;  %2974 = vst.msk [vmem:[%s6707_s5 + $0x3b0] sm:$0xff] %vm1926_vm5, %v2846_v21 }
 0x311   :  { %2975 = vst.msk [vmem:[%s6707_s5 + $0x3b8] sm:$0xff] %vm1926_vm5, %v2847_v43  ;;  %2976 = vst.msk [vmem:[%s6707_s5 + $0x3c0] sm:$0xff] %vm1926_vm5, %v2848_v61 }
 0x312   :  { %2977 = vst.msk [vmem:[%s6707_s5 + $0x3c8] sm:$0xff] %vm1926_vm5, %v2849_v52  ;;  %2978 = vst.msk [vmem:[%s6707_s5 + $0x3d0] sm:$0xff] %vm1926_vm5, %v2850_v8 }
 0x313   :  { %2979 = vst.msk [vmem:[%s6707_s5 + $0x3d8] sm:$0xff] %vm1926_vm5, %v2851_v42  ;;  %2980 = vst.msk [vmem:[%s6707_s5 + $0x3e0] sm:$0xff] %vm1926_vm5, %v2852_v35 }
 0x314   :  { %2981 = vst.msk [vmem:[%s6707_s5 + $0x3e8] sm:$0xff] %vm1926_vm5, %v2853_v1  ;;  %2982 = vst.msk [vmem:[%s6707_s5 + $0x3f0] sm:$0xff] %vm1926_vm5, %v2854_v53 }
 0x315   :  { %2983 = vst.msk [vmem:[%s6707_s5 + $0x3f8] sm:$0xff] %vm1926_vm5, %v2855_v27 }

// kernel: discriminator_forward.7
= control target key start
LH: loop header
LB: loop body
LE: loop exit
PB: predicated region body
PF: predicated region fallthrough
CT: control target
= control target key end

     0   :  { %vm476_vm0 = vcmask 261120   ;;  %vm943_vm3 = vcmask 523264   ;;  %s2336_s1 = inlined_call_operand.vmem [shape: bf16[288,64], index: 1, kind: input, shape index: {}]   ;;  %s2337_s0 = inlined_call_operand.vmem [shape: bf16[256,288], index: 0, kind: input, shape index: {}]   ;;  %s2338_s2 = inlined_call_operand.vmem [shape: f32[1,64], index: 2, kind: input, shape index: {}]   ;;  %s2339_s3 = inlined_call_operand.vmem [shape: f32[1,64], index: 3, kind: input, shape index: {}]   ;;  %s2340_s4 = inlined_call_operand.vmem [shape: f32[1,64], index: 4, kind: input, shape index: {}]   ;;  %s2341_s5 = inlined_call_operand.vmem [shape: f32[256,64], index: 5, kind: output, shape index: {}]  }
   0x1   :  { %v1502_v0 = vld [vmem:[%s2336_s1 + $0x40] sm:$0xff]   ;;  %v1504_v2 = vld [vmem:[%s2336_s1 + $0x48] sm:$0xff]   ;;  %v1506_v4 = vld [vmem:[%s2336_s1 + $0x50] sm:$0xff]  }
   0x2   :  { %v1503_v1 = vld [vmem:[%s2336_s1] sm:$0xff]   ;;  %1320 = vmatprep.subr.bf16.mxu0 %v1502_v0  ;;  %1486 = vmatprep.subr.bf16.mxu1 %v1502_v0  ;;  %v1505_v3 = vld [vmem:[%s2336_s1 + $0x8] sm:$0xff]   ;;  %v1507_v5 = vld [vmem:[%s2336_s1 + $0x10] sm:$0xff]  }
   0x3   :  { %1321 = vmatpush3.bf16.msra.mxu0 %v1503_v1  ;;  %1494 = vmatpush3.bf16.msra.mxu1 %v1503_v1  ;;  %v1508_v6 = vld [vmem:[%s2336_s1 + $0x58] sm:$0xff]   ;;  %v1510_v8 = vld [vmem:[%s2336_s1 + $0x60] sm:$0xff]   ;;  %v1512_v10 = vld [vmem:[%s2336_s1 + $0x68] sm:$0xff]  }
   0x4   :  { %1322 = vmatprep.subr.bf16.mxu0 %v1504_v2  ;;  %1487 = vmatprep.subr.bf16.mxu1 %v1504_v2  ;;  %v1509_v7 = vld [vmem:[%s2336_s1 + $0x18] sm:$0xff]   ;;  %v1511_v9 = vld [vmem:[%s2336_s1 + $0x20] sm:$0xff]   ;;  %v1513_v13 = vld [vmem:[%s2336_s1 + $0x28] sm:$0xff]  }
   0x5   :  { %v1520_v11 = vld [vmem:[%s2337_s0 + $0x4] ss:$12 sps:$4 sm:$0xff]   ;;  %v1516_v16 = vld [vmem:[%s2336_s1 + $0x78] sm:$0xff]   ;;  %v1518_v19 = vld [vmem:[%s2337_s0] ss:$12 sps:$4 sm:$0xff]  }
   0x6   :  { %v1523_v12 = vld [vmem:[%s2337_s0 + $0x124] ss:$12 sps:$4 sm:$0xff]   ;;  %557 = vmatprep.mubr.bf16.mxu0 %v1520_v11  ;;  %v1517_v17 = vld [vmem:[%s2336_s1 + $0x38] sm:$0xff]   ;;  %v1521_v20 = vld [vmem:[%s2337_s0 + $0x120] ss:$12 sps:$4 sm:$0xff]  }
   0x7   :  { %1323 = vmatpush3.bf16.msra.mxu0 %v1505_v3  ;;  %1495 = vmatpush3.bf16.msra.mxu1 %v1505_v3  ;;  %v1514_v14 = vld [vmem:[%s2336_s1 + $0x70] sm:$0xff]   ;;  %v1534_v18 = vld [vmem:[%s2336_s1 + $0x80] sm:$0xff]   ;;  %v1524_v21 = vld [vmem:[%s2337_s0 + $0x1c] ss:$12 sps:$4 sm:$0xff]  }
   0x8   :  { %1324 = vmatprep.subr.bf16.mxu0 %v1506_v4  ;;  %1488 = vmatprep.subr.bf16.mxu1 %v1506_v4  ;;  %v1515_v15 = vld [vmem:[%s2336_s1 + $0x30] sm:$0xff]   ;;  %v1526_v22 = vld [vmem:[%s2337_s0 + $0x13c] ss:$12 sps:$4 sm:$0xff]   ;;  %v1528_v24 = vld [vmem:[%s2337_s0 + $0x18] ss:$12 sps:$4 sm:$0xff]  }
   0x9   :  { %653 = vmatprep.mubr.bf16.mxu1 %v1523_v12  ;;  %v1543_v23 = vld [vmem:[%s2336_s1 + $0x88] sm:$0xff]   ;;  %v1529_v25 = vld [vmem:[%s2337_s0 + $0x138] ss:$12 sps:$4 sm:$0xff]   ;;  %v1530_v26 = vld [vmem:[%s2337_s0 + $0x34] ss:$12 sps:$4 sm:$0xff]  }
   0xa   :  { %v1532_v27 = vld [vmem:[%s2337_s0 + $0x154] ss:$12 sps:$4 sm:$0xff]   ;;  %v1535_v28 = vld [vmem:[%s2337_s0 + $0x30] ss:$12 sps:$4 sm:$0xff]   ;;  %v1537_v30 = vld [vmem:[%s2337_s0 + $0x4c] ss:$12 sps:$4 sm:$0xff]  }
   0xb   :  { %1325 = vmatpush3.bf16.msra.mxu0 %v1507_v5  ;;  %1496 = vmatpush3.bf16.msra.mxu1 %v1507_v5  ;;  %v1536_v29 = vld [vmem:[%s2337_s0 + $0x150] ss:$12 sps:$4 sm:$0xff]   ;;  %v1539_v31 = vld [vmem:[%s2337_s0 + $0x16c] ss:$12 sps:$4 sm:$0xff]   ;;  %v1541_v32 = vld [vmem:[%s2337_s0 + $0x48] ss:$12 sps:$4 sm:$0xff]  }
   0xc   :  { %1326 = vmatprep.subr.bf16.mxu0 %v1508_v6  ;;  %1489 = vmatprep.subr.bf16.mxu1 %v1508_v6  ;;  %v1542_v33 = vld [vmem:[%s2337_s0 + $0x168] ss:$12 sps:$4 sm:$0xff]   ;;  %v1544_v34 = vld [vmem:[%s2337_s0 + $0x64] ss:$12 sps:$4 sm:$0xff]   ;;  %v1547_v36 = vld [vmem:[%s2337_s0 + $0x60] ss:$12 sps:$4 sm:$0xff]  }
   0xd   :  { %v1546_v35 = vld [vmem:[%s2337_s0 + $0x8] ss:$12 sps:$4 sm:$0xff]   ;;  %v1548_v37 = vld [vmem:[%s2337_s0 + $0x20] ss:$12 sps:$4 sm:$0xff]   ;;  %v1551_v39 = vld [vmem:[%s2337_s0 + $0x38] ss:$12 sps:$4 sm:$0xff]  }
   0xe   :  { %v1549_v38 = vld [vmem:[%s2337_s0 + $0x7c] ss:$12 sps:$4 sm:$0xff]   ;;  %v1552_v40 = vld [vmem:[%s2337_s0 + $0x78] ss:$12 sps:$4 sm:$0xff]   ;;  %v1554_v42 = vld [vmem:[%s2337_s0 + $0x94] ss:$12 sps:$4 sm:$0xff]  }
   0xf   :  { %1327 = vmatpush3.bf16.msra.mxu0 %v1509_v7  ;;  %1497 = vmatpush3.bf16.msra.mxu1 %v1509_v7  ;;  %v1553_v41 = vld [vmem:[%s2337_s0 + $0x50] ss:$12 sps:$4 sm:$0xff]   ;;  %v1556_v43 = vld [vmem:[%s2337_s0 + $0x68] ss:$12 sps:$4 sm:$0xff]   ;;  %v1558_v45 = vld [vmem:[%s2337_s0 + $0x80] ss:$12 sps:$4 sm:$0xff]  }
  0x10   :  { %1328 = vmatprep.subr.bf16.mxu0 %v1510_v8  ;;  %1490 = vmatprep.subr.bf16.mxu1 %v1510_v8  ;;  %v1557_v44 = vld [vmem:[%s2337_s0 + $0x90] ss:$12 sps:$4 sm:$0xff]   ;;  %v1559_v46 = vld [vmem:[%s2337_s0 + $0xac] ss:$12 sps:$4 sm:$0xff]   ;;  %v1562_v48 = vld [vmem:[%s2337_s0 + $0xa8] ss:$12 sps:$4 sm:$0xff]  }
  0x11   :  { %v1561_v47 = vld [vmem:[%s2337_s0 + $0x98] ss:$12 sps:$4 sm:$0xff]   ;;  %v1563_v49 = vld [vmem:[%s2337_s0 + $0xb0] ss:$12 sps:$4 sm:$0xff]   ;;  %v1566_v51 = vld [vmem:[%s2337_s0 + $0xc8] ss:$12 sps:$4 sm:$0xff]  }
  0x12   :  { %v1564_v50 = vld [vmem:[%s2337_s0 + $0xc4] ss:$12 sps:$4 sm:$0xff]   ;;  %v1567_v52 = vld [vmem:[%s2337_s0 + $0xc0] ss:$12 sps:$4 sm:$0xff]   ;;  %v1569_v54 = vld [vmem:[%s2337_s0 + $0xdc] ss:$12 sps:$4 sm:$0xff]  }
  0x13   :  { %1329 = vmatpush3.bf16.msra.mxu0 %v1511_v9  ;;  %1498 = vmatpush3.bf16.msra.mxu1 %v1511_v9  ;;  %v1568_v53 = vld [vmem:[%s2337_s0 + $0xe0] ss:$12 sps:$4 sm:$0xff]   ;;  %v1571_v55 = vld [vmem:[%s2337_s0 + $0xf8] ss:$12 sps:$4 sm:$0xff]   ;;  %v1573_v57 = vld [vmem:[%s2337_s0 + $0x110] ss:$12 sps:$4 sm:$0xff]  }
  0x14   :  { %1330 = vmatprep.subr.bf16.mxu0 %v1512_v10  ;;  %1491 = vmatprep.subr.bf16.mxu1 %v1512_v10  ;;  %v1572_v56 = vld [vmem:[%s2337_s0 + $0xd8] ss:$12 sps:$4 sm:$0xff]   ;;  %v1574_v58 = vld [vmem:[%s2337_s0 + $0xf4] ss:$12 sps:$4 sm:$0xff]   ;;  %v1577_v60 = vld [vmem:[%s2337_s0 + $0xf0] ss:$12 sps:$4 sm:$0xff]  }
  0x15   :  { %v1576_v59 = vld [vmem:[%s2337_s0 + $0x128] ss:$12 sps:$4 sm:$0xff]   ;;  %v1578_v61 = vld [vmem:[%s2337_s0 + $0x140] ss:$12 sps:$4 sm:$0xff]   ;;  %v1581_v63 = vld [vmem:[%s2337_s0 + $0x158] ss:$12 sps:$4 sm:$0xff]  }
  0x16   :  { %v1579_v62 = vld [vmem:[%s2337_s0 + $0x10c] ss:$12 sps:$4 sm:$0xff]   ;;  %v1582_v0 = vld [vmem:[%s2337_s0 + $0x108] ss:$12 sps:$4 sm:$0xff]   ;;  %v1583_v1 = vld [vmem:[%s2337_s0 + $0x170] ss:$12 sps:$4 sm:$0xff]  }
  0x17   :  { %1331 = vmatpush3.bf16.msra.mxu0 %v1513_v13  ;;  %1499 = vmatpush3.bf16.msra.mxu1 %v1513_v13 }
  0x18   :  { %1332 = vmatprep.subr.bf16.mxu0 %v1514_v14  ;;  %1492 = vmatprep.subr.bf16.mxu1 %v1514_v14 }
  0x1b   :  { %1333 = vmatpush3.bf16.msra.mxu0 %v1515_v15  ;;  %1500 = vmatpush3.bf16.msra.mxu1 %v1515_v15 }
  0x1c   :  { %1334 = vmatprep.subr.bf16.mxu0 %v1516_v16  ;;  %1493 = vmatprep.subr.bf16.mxu1 %v1516_v16 }
  0x1f   :  { %1335 = vmatpush3.bf16.msra.mxu0 %v1517_v17  ;;  %1501 = vmatpush3.bf16.msra.mxu1 %v1517_v17 }
  0x20   :  { %1450 = vmatprep.subr.bf16.mxu1 %v1534_v18 }
  0x22   :  { %558 = vmatmul.mubr.bf16.vlgmr.msra.gmra.mrb[0].mxu0 %v1518_v19  ;;  %654 = vmatmul.mubr.bf16.vlgmr.msra.gmra.mrb[0].mxu1 %v1521_v20 }
  0x23   :  { %565 = vmatprep.mubr.bf16.mxu0 %v1524_v21  ;;  %661 = vmatprep.mubr.bf16.mxu1 %v1526_v22 }
  0x24   :  { %1451 = vmatpush3.bf16.msra.mxu1 %v1534_v18 }
  0x25   :  { %1452 = vmatprep.subr.bf16.mxu1 %v1543_v23 }
  0x28   :  { %1453 = vmatpush3.bf16.msra.mxu1 %v1543_v23 }
  0x2a   :  { %566 = vmatmul.mubr.bf16.gmra.mrb[4].mxu0 %v1528_v24  ;;  %662 = vmatmul.mubr.bf16.gmra.mrb[4].mxu1 %v1529_v25 }
  0x2b   :  { %573 = vmatprep.mubr.bf16.mxu0 %v1530_v26  ;;  %669 = vmatprep.mubr.bf16.mxu1 %v1532_v27 }
  0x32   :  { %574 = vmatmul.mubr.bf16.gmra.mrb[8].mxu0 %v1535_v28  ;;  %670 = vmatmul.mubr.bf16.gmra.mrb[8].mxu1 %v1536_v29 }
  0x33   :  { %581 = vmatprep.mubr.bf16.mxu0 %v1537_v30  ;;  %677 = vmatprep.mubr.bf16.mxu1 %v1539_v31 }
  0x3a   :  { %582 = vmatmul.mubr.bf16.gmra.mrb[12].mxu0 %v1541_v32  ;;  %678 = vmatmul.mubr.bf16.gmra.mrb[12].mxu1 %v1542_v33 }
  0x3b   :  { %589 = vmatprep.mubr.bf16.mxu0 %v1544_v34  ;;  %1454 = vmatprep.mubr.msk.bf16.mxu1 %vm476_vm0, %v1546_v35 }
  0x42   :  { %590 = vmatmul.mubr.bf16.gmra.mrb[16].mxu0 %v1547_v36  ;;  %1455 = vmatmul.mubr.msk.bf16.vlgmr.msra.gmra.mrb[16].mxu1 %vm476_vm0, %v1548_v37 }
  0x43   :  { %597 = vmatprep.mubr.bf16.mxu0 %v1549_v38  ;;  %1458 = vmatprep.mubr.msk.bf16.mxu1 %vm476_vm0, %v1551_v39 }
  0x4a   :  { %598 = vmatmul.mubr.bf16.gmra.mrb[20].mxu0 %v1552_v40  ;;  %1459 = vmatmul.mubr.msk.bf16.gmra.mrb[20].mxu1 %vm476_vm0, %v1553_v41 }
  0x4b   :  { %605 = vmatprep.mubr.bf16.mxu0 %v1554_v42  ;;  %1462 = vmatprep.mubr.msk.bf16.mxu1 %vm476_vm0, %v1556_v43 }
  0x52   :  { %606 = vmatmul.mubr.bf16.gmra.mrb[24].mxu0 %v1557_v44  ;;  %1463 = vmatmul.mubr.msk.bf16.gmra.mrb[24].mxu1 %vm476_vm0, %v1558_v45 }
  0x53   :  { %613 = vmatprep.mubr.bf16.mxu0 %v1559_v46  ;;  %1466 = vmatprep.mubr.msk.bf16.mxu1 %vm476_vm0, %v1561_v47 }
  0x5a   :  { %614 = vmatmul.mubr.bf16.gmra.mrb[28].mxu0 %v1562_v48  ;;  %1467 = vmatmul.mubr.msk.bf16.gmra.mrb[28].mxu1 %vm476_vm0, %v1563_v49 }
  0x5b   :  { %621 = vmatprep.mubr.bf16.mxu0 %v1564_v50  ;;  %1470 = vmatprep.mubr.msk.bf16.mxu1 %vm476_vm0, %v1566_v51  ;;  %v1849_v50 = vld [vmem:[%s2338_s2] ss:$0 sm:$0xff] }
  0x62   :  { %622 = vmatmul.mubr.bf16.gmra.mrb[32].mxu0 %v1567_v52  ;;  %1471 = vmatmul.mubr.msk.bf16.gmra.mrb[32].mxu1 %vm476_vm0, %v1568_v53 }
  0x63   :  { %629 = vmatprep.mubr.bf16.mxu0 %v1569_v54  ;;  %1474 = vmatprep.mubr.msk.bf16.mxu1 %vm476_vm0, %v1571_v55 }
  0x6a   :  { %630 = vmatmul.mubr.bf16.gmra.mrb[36].mxu0 %v1572_v56  ;;  %1475 = vmatmul.mubr.msk.bf16.gmra.mrb[36].mxu1 %vm476_vm0, %v1573_v57 }
  0x6b   :  { %637 = vmatprep.mubr.bf16.mxu0 %v1574_v58  ;;  %1478 = vmatprep.mubr.msk.bf16.mxu1 %vm476_vm0, %v1576_v59 }
  0x72   :  { %638 = vmatmul.mubr.bf16.gmra.mrb[40].mxu0 %v1577_v60  ;;  %1479 = vmatmul.mubr.msk.bf16.gmra.mrb[40].mxu1 %vm476_vm0, %v1578_v61 }
  0x73   :  { %645 = vmatprep.mubr.bf16.mxu0 %v1579_v62  ;;  %1482 = vmatprep.mubr.msk.bf16.mxu1 %vm476_vm0, %v1581_v63 }
  0x7a   :  { %646 = vmatmul.mubr.bf16.gmra.mrb[44].mxu0 %v1582_v0  ;;  %1483 = vmatmul.mubr.msk.bf16.gmra.mrb[44].mxu1 %vm476_vm0, %v1583_v1 }
  0xf5   :  { %v1336_v2 = vpop.f32.mrb[0].mxu0  ;;  %v1408_v3 = vpop.f32.mrb[0].mxu1 }
  0xf6   :  { %v1337_v4 = vpop.f32.mrb[1].mxu0  ;;  %v1409_v5 = vpop.f32.mrb[1].mxu1 }
  0xf7   :  { %v1338_v6 = vadd.f32 %v1337_v4, %v1336_v2  ;;  %v1339_v7 = vpop.f32.mrb[2].mxu0  ;;  %v1830_v8 = vadd.f32 %v1409_v5, %v1408_v3  ;;  %v1411_v9 = vpop.f32.mrb[2].mxu1 }
  0xf8   :  { %v1340_v10 = vpop.f32.mrb[3].mxu0  ;;  %v1412_v11 = vpop.f32.mrb[3].mxu1 }
  0xf9   :  { %v1341_v12 = vadd.f32 %v1340_v10, %v1339_v7  ;;  %v1832_v13 = vadd.f32 %v1412_v11, %v1411_v9  ;;  %v560_v54 = vadd.f32 %v1338_v6, %v1849_v50 }
  0xfb   :  { %v563_v63 = vadd.f32 %v1341_v12, %v1849_v50 }
  0xfd   :  { %v1342_v14 = vpop.f32.mrb[4].mxu0  ;;  %v1414_v15 = vpop.f32.mrb[4].mxu1 }
  0xfe   :  { %v1343_v16 = vpop.f32.mrb[5].mxu0  ;;  %v1415_v17 = vpop.f32.mrb[5].mxu1 }
  0xff   :  { %v1344_v18 = vadd.f32 %v1343_v16, %v1342_v14  ;;  %v1345_v19 = vpop.f32.mrb[6].mxu0  ;;  %v1834_v20 = vadd.f32 %v1415_v17, %v1414_v15  ;;  %v1417_v21 = vpop.f32.mrb[6].mxu1 }
 0x100   :  { %v1346_v22 = vpop.f32.mrb[7].mxu0  ;;  %v1418_v23 = vpop.f32.mrb[7].mxu1 }
 0x101   :  { %v1347_v24 = vadd.f32 %v1346_v22, %v1345_v19  ;;  %v1836_v25 = vadd.f32 %v1418_v23, %v1417_v21  ;;  %v568_v51 = vadd.f32 %v1344_v18, %v1849_v50 }
 0x103   :  { %v571_v58 = vadd.f32 %v1347_v24, %v1849_v50 }
 0x105   :  { %v1348_v26 = vpop.f32.mrb[8].mxu0  ;;  %v1420_v27 = vpop.f32.mrb[8].mxu1 }
 0x106   :  { %v1349_v28 = vpop.f32.mrb[9].mxu0  ;;  %v1421_v29 = vpop.f32.mrb[9].mxu1 }
 0x107   :  { %v1350_v30 = vadd.f32 %v1349_v28, %v1348_v26  ;;  %v1351_v31 = vpop.f32.mrb[10].mxu0  ;;  %v1838_v32 = vadd.f32 %v1421_v29, %v1420_v27  ;;  %v1423_v33 = vpop.f32.mrb[10].mxu1 }
 0x108   :  { %v1352_v34 = vpop.f32.mrb[11].mxu0  ;;  %v1424_v35 = vpop.f32.mrb[11].mxu1 }
 0x109   :  { %v1353_v36 = vadd.f32 %v1352_v34, %v1351_v31  ;;  %v1840_v37 = vadd.f32 %v1424_v35, %v1423_v33  ;;  %v576_v11 = vadd.f32 %v1350_v30, %v1849_v50 }
 0x10b   :  { %v579_v12 = vadd.f32 %v1353_v36, %v1849_v50 }
 0x10d   :  { %v1354_v38 = vpop.f32.mrb[12].mxu0  ;;  %v1426_v39 = vpop.f32.mrb[12].mxu1 }
 0x10e   :  { %v1355_v40 = vpop.f32.mrb[13].mxu0  ;;  %v1427_v41 = vpop.f32.mrb[13].mxu1 }
 0x10f   :  { %v1356_v42 = vadd.f32 %v1355_v40, %v1354_v38  ;;  %v1357_v43 = vpop.f32.mrb[14].mxu0  ;;  %v1842_v44 = vadd.f32 %v1427_v41, %v1426_v39  ;;  %v1429_v45 = vpop.f32.mrb[14].mxu1 }
 0x110   :  { %v1358_v46 = vpop.f32.mrb[15].mxu0  ;;  %v1430_v47 = vpop.f32.mrb[15].mxu1 }
 0x111   :  { %v1359_v48 = vadd.f32 %v1358_v46, %v1357_v43  ;;  %v1844_v49 = vadd.f32 %v1430_v47, %v1429_v45  ;;  %v584_v17 = vadd.f32 %v1356_v42, %v1849_v50 }
 0x113   :  { %v587_v23 = vadd.f32 %v1359_v48, %v1849_v50 }
 0x115   :  { %v1360_v52 = vpop.f32.mrb[16].mxu0  ;;  %v1456_v53 = vpop.f32.mrb[16].mxu1 }
 0x116   :  { %v729_v55 = vadd.f32 %v1456_v53, %v568_v51  ;;  %v1361_v56 = vpop.f32.mrb[17].mxu0  ;;  %v720_v57 = vpop.f32.mrb[17].mxu1 }
 0x117   :  { %v1362_v59 = vadd.f32 %v1361_v56, %v1360_v52  ;;  %v721_v60 = vadd.f32 %v720_v57, %v560_v54  ;;  %v1363_v61 = vpop.f32.mrb[18].mxu0  ;;  %v1457_v62 = vpop.f32.mrb[18].mxu1 }
 0x118   :  { %vm849_vm1 = vcmp.ge.f32.partialorder %v729_v55, 0.0  ;;  %v881_v0 = vmul.f32 0.2, %v729_v55  ;;  %v732_v1 = vadd.f32 %v1457_v62, %v571_v58  ;;  %v1364_v2 = vpop.f32.mrb[19].mxu0  ;;  %v723_v3 = vpop.f32.mrb[19].mxu1 }
 0x119   :  { %vm847_vm2 = vcmp.ge.f32.partialorder %v721_v60, 0.0  ;;  %v879_v4 = vmul.f32 0.2, %v721_v60  ;;  %v1855_v5 = vadd.f32 %v1364_v2, %v1363_v61  ;;  %v724_v6 = vadd.f32 %v723_v3, %v563_v63 }
 0x11a   :  { %v1857_v7 = vsel %vm849_vm1, %v729_v55, %v881_v0  ;;  %vm850_vm4 = vcmp.ge.f32.partialorder %v732_v1, 0.0  ;;  %v882_v9 = vmul.f32 0.2, %v732_v1  ;;  %v1874_v24 = vadd.f32 %v1362_v59, %v1849_v50 }
 0x11b   :  { %v1859_v10 = vsel %vm847_vm2, %v721_v60, %v879_v4  ;;  %vm848_vm5 = vcmp.ge.f32.partialorder %v724_v6, 0.0  ;;  %v880_v16 = vmul.f32 0.2, %v724_v6  ;;  %v947_v18 = vsel %vm943_vm3, %v1857_v7, 0.0 }
 0x11c   :  { %v1013_v14 = vmul.f32 %v1859_v10, %v1859_v10  ;;  %v1865_v15 = vsel %vm850_vm4, %v732_v1, %v882_v9  ;;  %v1015_v19 = vmul.f32 %v1857_v7, %v1857_v7  ;;  %v944_v26 = vsel %vm943_vm3, %v1859_v10, 0.0 }
 0x11d   :  { %v1366_v21 = vpop.f32.mrb[20].mxu0  ;;  %v1460_v22 = vpop.f32.mrb[20].mxu1  ;;  %v1016_v27 = vmul.f32 %v1865_v15, %v1865_v15  ;;  %v1880_v28 = vsel %vm848_vm5, %v724_v6, %v880_v16  ;;  %v949_v56 = vsel %vm943_vm3, %v1865_v15, 0.0 }
 0x11e   :  { %v745_v29 = vadd.f32 %v1460_v22, %v584_v17  ;;  %v1367_v30 = vpop.f32.mrb[21].mxu0  ;;  %v736_v31 = vpop.f32.mrb[21].mxu1  ;;  %v1045_v33 = vsel %vm943_vm3, %v1013_v14, 0.0  ;;  %v945_v34 = vsel %vm943_vm3, %v1880_v28, 0.0  ;;  %v1014_v35 = vmul.f32 %v1880_v28, %v1880_v28 }
 0x11f   :  { %v1368_v36 = vadd.f32 %v1367_v30, %v1366_v21  ;;  %v1369_v38 = vpop.f32.mrb[22].mxu0  ;;  %v1461_v39 = vpop.f32.mrb[22].mxu1  ;;  %v946_v40 = vadd.f32 %v945_v34, %v944_v26  ;;  %v737_v42 = vadd.f32 %v736_v31, %v576_v11  ;;  %v1048_v55 = vsel %vm943_vm3, %v1015_v19, 0.0 }
 0x120   :  { %vm853_vm6 = vcmp.ge.f32.partialorder %v745_v29, 0.0  ;;  %v885_v41 = vmul.f32 0.2, %v745_v29  ;;  %v1370_v43 = vpop.f32.mrb[23].mxu0  ;;  %v739_v45 = vpop.f32.mrb[23].mxu1  ;;  %v1046_v46 = vsel %vm943_vm3, %v1014_v35, 0.0  ;;  %v748_v47 = vadd.f32 %v1461_v39, %v587_v23 }
 0x121   :  { %v1371_v48 = vadd.f32 %v1370_v43, %v1369_v38  ;;  %v740_v51 = vadd.f32 %v739_v45, %v579_v12  ;;  %v948_v52 = vadd.f32 %v947_v18, %v946_v40  ;;  %v1047_v53 = vadd.f32 %v1046_v46, %v1045_v33 }
 0x122   :  { %v1888_v54 = vsel %vm853_vm6, %v745_v29, %v885_v41  ;;  %vm851_vm7 = vcmp.ge.f32.partialorder %v737_v42, 0.0  ;;  %v883_v57 = vmul.f32 0.2, %v737_v42  ;;  %vm854_vm8 = vcmp.ge.f32.partialorder %v748_v47, 0.0 }
 0x123   :  { %v1049_v58 = vadd.f32 %v1048_v55, %v1047_v53  ;;  %v950_v59 = vadd.f32 %v949_v56, %v948_v52  ;;  %v886_v60 = vmul.f32 0.2, %v748_v47  ;;  %vm852_vm9 = vcmp.ge.f32.partialorder %v740_v51, 0.0 }
 0x124   :  { %v1050_v61 = vsel %vm943_vm3, %v1016_v27, 0.0  ;;  %v1019_v62 = vmul.f32 %v1888_v54, %v1888_v54  ;;  %v1896_v63 = vsel %vm851_vm7, %v737_v42, %v883_v57  ;;  %v884_v0 = vmul.f32 0.2, %v740_v51 }
 0x125   :  { %v1372_v1 = vpop.f32.mrb[24].mxu0  ;;  %v1464_v2 = vpop.f32.mrb[24].mxu1  ;;  %v951_v3 = vsel %vm943_vm3, %v1896_v63, 0.0  ;;  %v1017_v4 = vmul.f32 %v1896_v63, %v1896_v63  ;;  %v1051_v6 = vadd.f32 %v1050_v61, %v1049_v58  ;;  %v600_v9 = vadd.f32 %v1368_v36, %v1849_v50 }
 0x126   :  { %v1373_v11 = vpop.f32.mrb[25].mxu0  ;;  %v752_v12 = vpop.f32.mrb[25].mxu1  ;;  %v952_v14 = vadd.f32 %v951_v3, %v950_v59  ;;  %v1904_v16 = vsel %vm854_vm8, %v748_v47, %v886_v60  ;;  %v1906_v17 = vsel %vm852_vm9, %v740_v51, %v884_v0  ;;  %v595_v21 = vadd.f32 %v1855_v5, %v1849_v50 }
 0x127   :  { %v1375_v18 = vpop.f32.mrb[26].mxu0  ;;  %v1465_v19 = vpop.f32.mrb[26].mxu1  ;;  %v1052_v22 = vsel %vm943_vm3, %v1017_v4, 0.0  ;;  %v953_v23 = vsel %vm943_vm3, %v1906_v17, 0.0  ;;  %v1018_v26 = vmul.f32 %v1906_v17, %v1906_v17  ;;  %v761_v27 = vadd.f32 %v1464_v2, %v600_v9 }
 0x128   :  { %v1376_v29 = vpop.f32.mrb[27].mxu0  ;;  %v755_v30 = vpop.f32.mrb[27].mxu1  ;;  %v955_v31 = vsel %vm943_vm3, %v1888_v54, 0.0  ;;  %v1053_v33 = vadd.f32 %v1052_v22, %v1051_v6  ;;  %v954_v34 = vadd.f32 %v953_v23, %v952_v14  ;;  %v1374_v35 = vadd.f32 %v1373_v11, %v1372_v1 }
 0x129   :  { %v1056_v36 = vsel %vm943_vm3, %v1019_v62, 0.0  ;;  %v957_v5 = vsel %vm943_vm3, %v1904_v16, 0.0  ;;  %v1054_v38 = vsel %vm943_vm3, %v1018_v26, 0.0  ;;  %v753_v39 = vadd.f32 %v752_v12, %v1874_v24 }
 0x12a   :  { %v1020_v40 = vmul.f32 %v1904_v16, %v1904_v16  ;;  %v956_v41 = vadd.f32 %v955_v31, %v954_v34  ;;  %v1055_v42 = vadd.f32 %v1054_v38, %v1053_v33  ;;  %v1377_v43 = vadd.f32 %v1376_v29, %v1375_v18 }
 0x12b   :  { %vm855_vm10 = vcmp.ge.f32.partialorder %v753_v39, 0.0  ;;  %v887_v45 = vmul.f32 0.2, %v753_v39  ;;  %v603_v46 = vadd.f32 %v1371_v48, %v1849_v50  ;;  %v756_v47 = vadd.f32 %v755_v30, %v595_v21 }
 0x12c   :  { %v1057_v51 = vadd.f32 %v1056_v36, %v1055_v42  ;;  %v958_v52 = vadd.f32 %v957_v5, %v956_v41  ;;  %v1058_v60 = vsel %vm943_vm3, %v1020_v40, 0.0  ;;  %v889_v61 = vmul.f32 0.2, %v761_v27 }
 0x12d   :  { %v1378_v53 = vpop.f32.mrb[28].mxu0  ;;  %v1468_v55 = vpop.f32.mrb[28].mxu1  ;;  %v1925_v56 = vsel %vm855_vm10, %v753_v39, %v887_v45  ;;  %v764_v57 = vadd.f32 %v1465_v19, %v603_v46  ;;  %vm856_vm11 = vcmp.ge.f32.partialorder %v756_v47, 0.0  ;;  %v888_v24 = vmul.f32 0.2, %v756_v47 }
 0x12e   :  { %v1379_v58 = vpop.f32.mrb[29].mxu0  ;;  %v768_v59 = vpop.f32.mrb[29].mxu1  ;;  %v959_v62 = vsel %vm943_vm3, %v1925_v56, 0.0  ;;  %v1021_v48 = vmul.f32 %v1925_v56, %v1925_v56  ;;  %vm857_vm12 = vcmp.ge.f32.partialorder %v761_v27, 0.0  ;;  %v1059_v3 = vadd.f32 %v1058_v60, %v1057_v51 }
 0x12f   :  { %v1381_v0 = vpop.f32.mrb[30].mxu0  ;;  %v1469_v1 = vpop.f32.mrb[30].mxu1  ;;  %v960_v2 = vadd.f32 %v959_v62, %v958_v52  ;;  %v1932_v4 = vsel %vm856_vm11, %v756_v47, %v888_v24  ;;  %v1380_v18 = vadd.f32 %v1379_v58, %v1378_v53  ;;  %v608_v19 = vadd.f32 %v1374_v35, %v1849_v50 }
 0x130   :  { %v1382_v6 = vpop.f32.mrb[31].mxu0  ;;  %v771_v9 = vpop.f32.mrb[31].mxu1  ;;  %v1060_v11 = vsel %vm943_vm3, %v1021_v48, 0.0  ;;  %v961_v12 = vsel %vm943_vm3, %v1932_v4, 0.0  ;;  %v1022_v14 = vmul.f32 %v1932_v4, %v1932_v4  ;;  %v1940_v21 = vsel %vm857_vm12, %v761_v27, %v889_v61 }
 0x131   :  { %v890_v22 = vmul.f32 0.2, %v764_v57  ;;  %v616_v23 = vadd.f32 %v1380_v18, %v1849_v50  ;;  %v1061_v26 = vadd.f32 %v1060_v11, %v1059_v3  ;;  %v962_v29 = vadd.f32 %v961_v12, %v960_v2 }
 0x132   :  { %v769_v30 = vadd.f32 %v768_v59, %v608_v19  ;;  %v1383_v31 = vadd.f32 %v1382_v6, %v1381_v0  ;;  %vm858_vm13 = vcmp.ge.f32.partialorder %v764_v57, 0.0  ;;  %v1062_v33 = vsel %vm943_vm3, %v1022_v14, 0.0 }
 0x133   :  { %v777_v34 = vadd.f32 %v1468_v55, %v616_v23  ;;  %v611_v36 = vadd.f32 %v1377_v43, %v1849_v50  ;;  %v963_v35 = vsel %vm943_vm3, %v1940_v21, 0.0  ;;  %v1023_v41 = vmul.f32 %v1940_v21, %v1940_v21 }
 0x134   :  { %v891_v27 = vmul.f32 0.2, %v769_v30  ;;  %vm859_vm14 = vcmp.ge.f32.partialorder %v769_v30, 0.0  ;;  %v619_v42 = vadd.f32 %v1383_v31, %v1849_v50  ;;  %v1951_v51 = vsel %vm858_vm13, %v764_v57, %v890_v22 }
 0x135   :  { %v1384_v5 = vpop.f32.mrb[32].mxu0  ;;  %v1472_v38 = vpop.f32.mrb[32].mxu1  ;;  %v772_v45 = vadd.f32 %v771_v9, %v611_v36  ;;  %v964_v43 = vadd.f32 %v963_v35, %v962_v29  ;;  %v1063_v52 = vadd.f32 %v1062_v33, %v1061_v26  ;;  %v1064_v61 = vsel %vm943_vm3, %v1023_v41, 0.0 }
 0x136   :  { %v1385_v39 = vpop.f32.mrb[33].mxu0  ;;  %v784_v40 = vpop.f32.mrb[33].mxu1  ;;  %v780_v58 = vadd.f32 %v1469_v1, %v619_v42  ;;  %v1953_v59 = vsel %vm859_vm14, %v769_v30, %v891_v27  ;;  %v965_v62 = vsel %vm943_vm3, %v1951_v51, 0.0  ;;  %v1024_v48 = vmul.f32 %v1951_v51, %v1951_v51 }
 0x137   :  { %v1387_v46 = vpop.f32.mrb[34].mxu0  ;;  %v1473_v47 = vpop.f32.mrb[34].mxu1  ;;  %v1386_v53 = vadd.f32 %v1385_v39, %v1384_v5  ;;  %v892_v60 = vmul.f32 0.2, %v772_v45  ;;  %vm860_vm15 = vcmp.ge.f32.partialorder %v772_v45, 0.0  ;;  %v1065_v57 = vadd.f32 %v1064_v61, %v1063_v52 }
 0x138   :  { %v1388_v55 = vpop.f32.mrb[35].mxu0  ;;  %v787_v24 = vpop.f32.mrb[35].mxu1  ;;  %v966_v0 = vadd.f32 %v965_v62, %v964_v43  ;;  %v967_v3 = vsel %vm943_vm3, %v1953_v59, 0.0  ;;  %v1025_v1 = vmul.f32 %v1953_v59, %v1953_v59  ;;  %v893_v12 = vmul.f32 0.2, %v777_v34 }
 0x139   :  { %v1389_v2 = vadd.f32 %v1388_v55, %v1387_v46  ;;  %v624_v6 = vadd.f32 %v1386_v53, %v1849_v50  ;;  %v1967_v14 = vsel %vm860_vm15, %v772_v45, %v892_v60  ;;  %v1066_v23 = vsel %vm943_vm3, %v1024_v48, 0.0 }
 0x13a   :  { %vm861_vm0 = vcmp.ge.f32.partialorder %v777_v34, 0.0  ;;  %v968_v33 = vadd.f32 %v967_v3, %v966_v0  ;;  %v1067_v36 = vadd.f32 %v1066_v23, %v1065_v57  ;;  %v1068_v39 = vsel %vm943_vm3, %v1025_v1, 0.0 }
 0x13b   :  { %v627_v18 = vadd.f32 %v1389_v2, %v1849_v50  ;;  %v785_v26 = vadd.f32 %v784_v40, %v624_v6  ;;  %v1026_v41 = vmul.f32 %v1967_v14, %v1967_v14  ;;  %v1981_v46 = vsel %vm861_vm0, %v777_v34, %v893_v12 }
 0x13c   :  { %v894_v40 = vmul.f32 0.2, %v780_v58  ;;  %v969_v43 = vsel %vm943_vm3, %v1967_v14, 0.0  ;;  %vm862_vm1 = vcmp.ge.f32.partialorder %v780_v58, 0.0  ;;  %v1069_v55 = vadd.f32 %v1068_v39, %v1067_v36 }
 0x13d   :  { %v1390_v9 = vpop.f32.mrb[36].mxu0  ;;  %v1965_v11 = vpop.f32.mrb[36].mxu1  ;;  %v788_v5 = vadd.f32 %v787_v24, %v627_v18  ;;  %v895_v24 = vmul.f32 0.2, %v785_v26  ;;  %v664_v60 = vadd.f32 %v1834_v20, %v1849_v50  ;;  %v1027_v61 = vmul.f32 %v1981_v46, %v1981_v46 }
 0x13e   :  { %v1391_v19 = vpop.f32.mrb[37].mxu0  ;;  %v1970_v22 = vpop.f32.mrb[37].mxu1  ;;  %v970_v62 = vadd.f32 %v969_v43, %v968_v33  ;;  %v1070_v34 = vsel %vm943_vm3, %v1026_v41, 0.0  ;;  %vm863_vm2 = vcmp.ge.f32.partialorder %v785_v26, 0.0  ;;  %v1991_v0 = vsel %vm862_vm1, %v780_v58, %v894_v40 }
 0x13f   :  { %v1392_v29 = vadd.f32 %v1391_v19, %v1390_v9  ;;  %v1393_v30 = vpop.f32.mrb[38].mxu0  ;;  %v1973_v31 = vpop.f32.mrb[38].mxu1  ;;  %v1071_v18 = vadd.f32 %v1070_v34, %v1069_v55  ;;  %v1997_v19 = vsel %vm863_vm2, %v785_v26, %v895_v24  ;;  %v896_v23 = vmul.f32 0.2, %v788_v5 }
 0x140   :  { %v1394_v35 = vpop.f32.mrb[39].mxu0  ;;  %v1975_v27 = vpop.f32.mrb[39].mxu1  ;;  %v1028_v33 = vmul.f32 %v1991_v0, %v1991_v0  ;;  %v1072_v36 = vsel %vm943_vm3, %v1027_v61, 0.0  ;;  %vm864_vm4 = vcmp.ge.f32.partialorder %v788_v5, 0.0  ;;  %v667_v40 = vadd.f32 %v1836_v25, %v1849_v50 }
 0x141   :  { %v632_v42 = vadd.f32 %v1392_v29, %v1849_v50  ;;  %v1395_v45 = vadd.f32 %v1394_v35, %v1393_v30  ;;  %v656_v29 = vadd.f32 %v1830_v8, %v1849_v50  ;;  %v973_v35 = vsel %vm943_vm3, %v1991_v0, 0.0 }
 0x142   :  { %v1029_v8 = vmul.f32 %v1997_v19, %v1997_v19  ;;  %v659_v43 = vadd.f32 %v1832_v13, %v1849_v50  ;;  %v975_v55 = vsel %vm943_vm3, %v1997_v19, 0.0  ;;  %v1074_v24 = vsel %vm943_vm3, %v1028_v33, 0.0 }
 0x143   :  { %v793_v52 = vadd.f32 %v1472_v38, %v632_v42  ;;  %v635_v53 = vadd.f32 %v1395_v45, %v1849_v50  ;;  %v971_v38 = vsel %vm943_vm3, %v1981_v46, 0.0  ;;  %v1073_v42 = vadd.f32 %v1072_v36, %v1071_v18 }
 0x144   :  { %v2011_v45 = vsel %vm864_vm4, %v788_v5, %v896_v23  ;;  %v1076_v13 = vsel %vm943_vm3, %v1029_v8, 0.0 }
 0x145   :  { %v1396_v48 = vpop.f32.mrb[40].mxu0  ;;  %v1480_v57 = vpop.f32.mrb[40].mxu1  ;;  %v796_v2 = vadd.f32 %v1473_v47, %v635_v53  ;;  %v972_v47 = vadd.f32 %v971_v38, %v970_v62  ;;  %v897_v39 = vmul.f32 0.2, %v793_v52  ;;  %vm865_vm5 = vcmp.ge.f32.partialorder %v793_v52, 0.0 }
 0x146   :  { %v1995_v3 = vadd.f32 %v1480_v57, %v664_v60  ;;  %v1397_v1 = vpop.f32.mrb[41].mxu0  ;;  %v816_v6 = vpop.f32.mrb[41].mxu1  ;;  %v1075_v23 = vadd.f32 %v1074_v24, %v1073_v42  ;;  %v683_v42 = vadd.f32 %v1844_v49, %v1849_v50 }
 0x147   :  { %v1398_v20 = vadd.f32 %v1397_v1, %v1396_v48  ;;  %v1399_v9 = vpop.f32.mrb[42].mxu0  ;;  %v1481_v12 = vpop.f32.mrb[42].mxu1  ;;  %v2007_v41 = vadd.f32 %v816_v6, %v656_v29  ;;  %v974_v53 = vadd.f32 %v973_v35, %v972_v47  ;;  %v2021_v34 = vsel %vm865_vm5, %v793_v52, %v897_v39 }
 0x148   :  { %v1400_v58 = vpop.f32.mrb[43].mxu0  ;;  %v819_v30 = vpop.f32.mrb[43].mxu1  ;;  %v898_v5 = vmul.f32 0.2, %v796_v2  ;;  %v2023_v48 = vadd.f32 %v1481_v12, %v667_v40  ;;  %v1030_v1 = vmul.f32 %v2011_v45, %v2011_v45  ;;  %vm866_vm6 = vcmp.ge.f32.partialorder %v796_v2, 0.0 }
 0x149   :  { %v640_v26 = vadd.f32 %v1398_v20, %v1849_v50  ;;  %v1401_v57 = vadd.f32 %v1400_v58, %v1399_v9  ;;  %v2028_v6 = vadd.f32 %v819_v30, %v659_v43  ;;  %v976_v18 = vadd.f32 %v975_v55, %v974_v53 }
 0x14a   :  { %v977_v9 = vsel %vm943_vm3, %v2011_v45, 0.0  ;;  %v1031_v12 = vmul.f32 %v2021_v34, %v2021_v34  ;;  %v1077_v47 = vadd.f32 %v1076_v13, %v1075_v23  ;;  %v2035_v36 = vsel %vm866_vm6, %v796_v2, %v898_v5 }
 0x14b   :  { %v801_v60 = vadd.f32 %v1970_v22, %v640_v26  ;;  %v643_v58 = vadd.f32 %v1401_v57, %v1849_v50  ;;  %v680_v30 = vadd.f32 %v1842_v44, %v1849_v50  ;;  %v672_v35 = vadd.f32 %v1838_v32, %v1849_v50 }
 0x14c   :  { %v1078_v39 = vsel %vm943_vm3, %v1030_v1, 0.0  ;;  %v979_v26 = vsel %vm943_vm3, %v2021_v34, 0.0  ;;  %v978_v40 = vadd.f32 %v977_v9, %v976_v18  ;;  %v1080_v44 = vsel %vm943_vm3, %v1031_v12, 0.0 }
 0x14d   :  { %v1402_v61 = vpop.f32.mrb[44].mxu0  ;;  %v1484_v62 = vpop.f32.mrb[44].mxu1  ;;  %v899_v52 = vmul.f32 0.2, %v801_v60  ;;  %vm867_vm7 = vcmp.ge.f32.partialorder %v801_v60, 0.0  ;;  %v804_v8 = vadd.f32 %v1975_v27, %v643_v58  ;;  %v1032_v32 = vmul.f32 %v2035_v36, %v2035_v36 }
 0x14e   :  { %v1403_v25 = vpop.f32.mrb[45].mxu0  ;;  %v832_v38 = vpop.f32.mrb[45].mxu1  ;;  %v2049_v2 = vadd.f32 %v1484_v62, %v680_v30  ;;  %v1079_v24 = vadd.f32 %v1078_v39, %v1077_v47  ;;  %v980_v5 = vadd.f32 %v979_v26, %v978_v40  ;;  %v981_v27 = vsel %vm943_vm3, %v2035_v36, 0.0 }
 0x14f   :  { %v1405_v20 = vpop.f32.mrb[46].mxu0  ;;  %v1485_v22 = vpop.f32.mrb[46].mxu1  ;;  %v2047_v43 = vsel %vm867_vm7, %v801_v60, %v899_v52  ;;  %v1404_v53 = vadd.f32 %v1403_v25, %v1402_v61  ;;  %vm868_vm8 = vcmp.ge.f32.partialorder %v804_v8, 0.0  ;;  %v900_v55 = vmul.f32 0.2, %v804_v8 }
 0x150   :  { %v1406_v29 = vpop.f32.mrb[47].mxu0  ;;  %v835_v33 = vpop.f32.mrb[47].mxu1  ;;  %v1033_v49 = vmul.f32 %v2047_v43, %v2047_v43  ;;  %v2059_v62 = vadd.f32 %v832_v38, %v672_v35  ;;  %v2061_v61 = vadd.f32 %v1485_v22, %v683_v42  ;;  %v1081_v57 = vadd.f32 %v1080_v44, %v1079_v24 }
 0x151   :  { %v648_v60 = vadd.f32 %v1404_v53, %v1849_v50  ;;  %v2063_v25 = vsel %vm868_vm8, %v804_v8, %v900_v55  ;;  %v1082_v13 = vsel %vm943_vm3, %v1032_v32, 0.0  ;;  %v983_v1 = vsel %vm943_vm3, %v2047_v43, 0.0 }
 0x152   :  { %v982_v23 = vadd.f32 %v981_v27, %v980_v5  ;;  %v675_v52 = vadd.f32 %v1840_v37, %v1849_v50  ;;  %v1084_v9 = vsel %vm943_vm3, %v1033_v49, 0.0  ;;  %v1034_v38 = vmul.f32 %v2063_v25, %v2063_v25 }
 0x153   :  { %v809_v18 = vadd.f32 %v1965_v11, %v648_v60  ;;  %v1083_v12 = vadd.f32 %v1082_v13, %v1081_v57  ;;  %v1407_v47 = vadd.f32 %v1406_v29, %v1405_v20  ;;  %v903_v35 = vmul.f32 0.2, %v2007_v41 }
 0x154   :  { %v984_v58 = vadd.f32 %v983_v1, %v982_v23  ;;  %v836_v30 = vadd.f32 %v835_v33, %v675_v52  ;;  %v985_v11 = vsel %vm943_vm3, %v2063_v25, 0.0  ;;  %vm871_vm10 = vcmp.ge.f32.partialorder %v2007_v41, 0.0 }
 0x155   :  { %vm869_vm9 = vcmp.ge.f32.partialorder %v809_v18, 0.0  ;;  %v901_v22 = vmul.f32 0.2, %v809_v18  ;;  %v1085_v26 = vadd.f32 %v1084_v9, %v1083_v12  ;;  %v651_v8 = vadd.f32 %v1407_v47, %v1849_v50 }
 0x156   :  { %v1086_v42 = vsel %vm943_vm3, %v1034_v38, 0.0  ;;  %v986_v29 = vadd.f32 %v985_v11, %v984_v58  ;;  %v904_v33 = vmul.f32 0.2, %v2028_v6  ;;  %v905_v53 = vmul.f32 0.2, %v1995_v3 }
 0x157   :  { %v2077_v39 = vsel %vm869_vm9, %v809_v18, %v901_v22  ;;  %v812_v40 = vadd.f32 %v1973_v31, %v651_v8  ;;  %v2090_v44 = vsel %vm871_vm10, %v2007_v41, %v903_v35  ;;  %vm872_vm11 = vcmp.ge.f32.partialorder %v2028_v6, 0.0 }
 0x158   :  { %v1035_v37 = vmul.f32 %v2077_v39, %v2077_v39  ;;  %v987_v20 = vsel %vm943_vm3, %v2077_v39, 0.0  ;;  %v1087_v50 = vadd.f32 %v1086_v42, %v1085_v26  ;;  %vm873_vm13 = vcmp.ge.f32.partialorder %v1995_v3, 0.0 }
 0x159   :  { %v988_v55 = vadd.f32 %v987_v20, %v986_v29  ;;  %vm870_vm12 = vcmp.ge.f32.partialorder %v812_v40, 0.0  ;;  %v902_v24 = vmul.f32 0.2, %v812_v40  ;;  %v906_v5 = vmul.f32 0.2, %v2023_v48 }
 0x15a   :  { %v1088_v32 = vsel %vm943_vm3, %v1035_v37, 0.0  ;;  %v2097_v27 = vsel %vm872_vm11, %v2028_v6, %v904_v33  ;;  %v1037_v41 = vmul.f32 %v2090_v44, %v2090_v44  ;;  %vm874_vm14 = vcmp.ge.f32.partialorder %v2023_v48, 0.0 }
 0x15b   :  { %v1089_v31 = vadd.f32 %v1088_v32, %v1087_v50  ;;  %v2099_v49 = vsel %vm870_vm12, %v812_v40, %v902_v24  ;;  %v2109_v13 = vsel %vm873_vm13, %v1995_v3, %v905_v53  ;;  %v907_v6 = vmul.f32 0.2, %v2059_v62 }
 0x15c   :  { %v989_v60 = vsel %vm943_vm3, %v2099_v49, 0.0  ;;  %v1036_v57 = vmul.f32 %v2099_v49, %v2099_v49  ;;  %v991_v18 = vsel %vm943_vm3, %v2090_v44, 0.0  ;;  %v1038_v23 = vmul.f32 %v2097_v27, %v2097_v27 }
 0x15d   :  { %v990_v1 = vadd.f32 %v989_v60, %v988_v55  ;;  %vm875_vm15 = vcmp.ge.f32.partialorder %v2059_v62, 0.0  ;;  %v2119_v9 = vsel %vm874_vm14, %v2023_v48, %v906_v5  ;;  %v908_v3 = vmul.f32 0.2, %v836_v30 }
 0x15e   :  { %v1090_v52 = vsel %vm943_vm3, %v1036_v57, 0.0  ;;  %v1039_v12 = vmul.f32 %v2109_v13, %v2109_v13  ;;  %v1092_v58 = vsel %vm943_vm3, %v1037_v41, 0.0  ;;  %v993_v47 = vsel %vm943_vm3, %v2097_v27, 0.0 }
 0x15f   :  { %v992_v38 = vadd.f32 %v991_v18, %v990_v1  ;;  %v1091_v22 = vadd.f32 %v1090_v52, %v1089_v31  ;;  %vm876_vm0 = vcmp.ge.f32.partialorder %v836_v30, 0.0  ;;  %v909_v35 = vmul.f32 0.2, %v2049_v2 }
 0x160   :  { %v2128_v11 = vsel %vm875_vm15, %v2059_v62, %v907_v6  ;;  %v995_v37 = vsel %vm943_vm3, %v2109_v13, 0.0  ;;  %v1040_v8 = vmul.f32 %v2119_v9, %v2119_v9  ;;  %v1094_v42 = vsel %vm943_vm3, %v1038_v23, 0.0 }
 0x161   :  { %v1093_v26 = vadd.f32 %v1092_v58, %v1091_v22  ;;  %v994_v48 = vadd.f32 %v993_v47, %v992_v38  ;;  %vm877_vm1 = vcmp.ge.f32.partialorder %v2049_v2, 0.0  ;;  %v910_v20 = vmul.f32 0.2, %v2061_v61 }
 0x162   :  { %v2137_v29 = vsel %vm876_vm0, %v836_v30, %v908_v3  ;;  %v1096_v62 = vsel %vm943_vm3, %v1039_v12, 0.0  ;;  %v997_v53 = vsel %vm943_vm3, %v2119_v9, 0.0  ;;  %v1041_v32 = vmul.f32 %v2128_v11, %v2128_v11 }
 0x163   :  { %v996_v33 = vadd.f32 %v995_v37, %v994_v48  ;;  %v1095_v40 = vadd.f32 %v1094_v42, %v1093_v26  ;;  %vm878_vm2 = vcmp.ge.f32.partialorder %v2061_v61, 0.0  ;;  %v2146_v50 = vsel %vm877_vm1, %v2049_v2, %v909_v35 }
 0x164   :  { %v1098_v30 = vsel %vm943_vm3, %v1040_v8, 0.0  ;;  %v999_v5 = vsel %vm943_vm3, %v2128_v11, 0.0  ;;  %v1042_v31 = vmul.f32 %v2137_v29, %v2137_v29  ;;  %v2154_v41 = vsel %vm878_vm2, %v2061_v61, %v910_v20 }
 0x165   :  { %v998_v55 = vadd.f32 %v997_v53, %v996_v33  ;;  %v1097_v24 = vadd.f32 %v1096_v62, %v1095_v40  ;;  %v1043_v6 = vmul.f32 %v2146_v50, %v2146_v50  ;;  %v1100_v2 = vsel %vm943_vm3, %v1041_v32, 0.0 }
 0x166   :  { %v1001_v1 = vsel %vm943_vm3, %v2137_v29, 0.0  ;;  %v1003_v52 = vsel %vm943_vm3, %v2146_v50, 0.0  ;;  %v1044_v38 = vmul.f32 %v2154_v41, %v2154_v41  ;;  %v1102_v61 = vsel %vm943_vm3, %v1042_v31, 0.0 }
 0x167   :  { %v1000_v60 = vadd.f32 %v999_v5, %v998_v55  ;;  %v1099_v57 = vadd.f32 %v1098_v30, %v1097_v24  ;;  %v1104_v12 = vsel %vm943_vm3, %v1043_v6, 0.0  ;;  %v1005_v58 = vsel %vm943_vm3, %v2154_v41, 0.0 }
 0x168   :  { %v1106_v26 = vsel %vm943_vm3, %v1044_v38, 0.0 }
 0x169   :  { %v1002_v18 = vadd.f32 %v1001_v1, %v1000_v60  ;;  %v1101_v23 = vadd.f32 %v1100_v2, %v1099_v57  ;;  %v1126_v2 = vlaneseq }
 0x16b   :  { %v1004_v22 = vadd.f32 %v1003_v52, %v1002_v18  ;;  %v1103_v3 = vadd.f32 %v1102_v61, %v1101_v23  ;;  %v1127_v1 = vshrl.u32 %v1126_v2, 7  ;;  %v1118_v18 = vld [vmem:[%s2339_s3] sm:$0x1] }
 0x16c   :  { %v1122_v61 = vld [vmem:[%s2340_s4] sm:$0x1] }
 0x16d   :  { %v1006_v47 = vadd.f32 %v1005_v58, %v1004_v22  ;;  %v1105_v35 = vadd.f32 %v1104_v12, %v1103_v3  ;;  %v1128_v23 = vsub.s32 0, %v1127_v1 }
 0x16f   :  { %v1007_v48 = vrot.slane %v1006_v47, 4  ;;  %v1107_v37 = vadd.f32 %v1106_v26, %v1105_v35 }
 0x171   :  { %v1008_v8 = vadd.f32 %v1007_v48, %v1006_v47  ;;  %v1108_v42 = vrot.slane %v1107_v37, 4 }
 0x173   :  { %v1009_v20 = vrot.slane %v1008_v8, 2  ;;  %v1109_v33 = vadd.f32 %v1108_v42, %v1107_v37 }
 0x175   :  { %v1010_v40 = vadd.f32 %v1009_v20, %v1008_v8  ;;  %v1110_v62 = vrot.slane %v1109_v33, 2 }
 0x177   :  { %v1011_v53 = vrot.slane %v1010_v40, 1  ;;  %v1111_v32 = vadd.f32 %v1110_v62, %v1109_v33 }
 0x179   :  { %v1012_v55 = vadd.f32 %v1011_v53, %v1010_v40  ;;  %v1112_v24 = vrot.slane %v1111_v32, 1 }
 0x17b   :  { %v1113_v30 = vadd.f32 %v1112_v24, %v1111_v32  ;;  %v1114_v5 = vmul.f32 0.00390625, %v1012_v55 }
 0x17d   :  { %v1115_v31 = vmul.f32 0.00390625, %v1113_v30  ;;  %v1116_v60 = vmul.f32 %v1114_v5, %v1114_v5 }
 0x17f   :  { %v1117_v57 = vsub.f32 %v1115_v31, %v1116_v60 }
 0x181   :  { %v1119_v6 = vadd.f32 0.8, %v1117_v57 }
 0x183   :  { %1584 = vrsqrt.f32 %v1119_v6 }
 0x18d   :  { %v1585_v52 = vpop.eup %1584 }
 0x18e   :  { %v1121_v38 = vmul.f32 %v1585_v52, %v1118_v18 }
 0x190   :  { %v1123_v22 = vmul.f32 %v1121_v38, %v1114_v5  ;;  %v1129_v3 = vrot.slane %v1121_v38, %v1128_v23 }
 0x192   :  { %v1124_v12 = vsub.f32 %v1122_v61, %v1123_v22  ;;  %v1131_v58 = vmul.f32 %v1129_v3, %v1859_v10  ;;  %v1132_v47 = vmul.f32 %v1129_v3, %v1880_v28  ;;  %v1133_v35 = vmul.f32 %v1129_v3, %v1857_v7 }
 0x193   :  { %v1134_v26 = vmul.f32 %v1129_v3, %v1865_v15  ;;  %v1135_v48 = vmul.f32 %v1129_v3, %v1896_v63  ;;  %v1136_v37 = vmul.f32 %v1129_v3, %v1906_v17  ;;  %v1137_v8 = vmul.f32 %v1129_v3, %v1888_v54 }
 0x194   :  { %v1138_v42 = vmul.f32 %v1129_v3, %v1904_v16  ;;  %v1139_v20 = vmul.f32 %v1129_v3, %v1925_v56  ;;  %v1140_v33 = vmul.f32 %v1129_v3, %v1932_v4  ;;  %v1141_v10 = vmul.f32 %v1129_v3, %v1940_v21 }
 0x195   :  { %v1142_v28 = vmul.f32 %v1129_v3, %v1951_v51  ;;  %v1143_v7 = vmul.f32 %v1129_v3, %v1953_v59  ;;  %v1144_v15 = vmul.f32 %v1129_v3, %v1967_v14  ;;  %v1145_v63 = vmul.f32 %v1129_v3, %v1981_v46 }
 0x196   :  { %v1146_v17 = vmul.f32 %v1129_v3, %v1991_v0  ;;  %v1153_v54 = vmul.f32 %v1129_v3, %v2077_v39  ;;  %v1154_v16 = vmul.f32 %v1129_v3, %v2099_v49  ;;  %v1155_v56 = vmul.f32 %v1129_v3, %v2090_v44 }
 0x197   :  { %v1156_v4 = vmul.f32 %v1129_v3, %v2097_v27  ;;  %v1157_v21 = vmul.f32 %v1129_v3, %v2109_v13  ;;  %v1158_v51 = vmul.f32 %v1129_v3, %v2119_v9  ;;  %v1159_v59 = vmul.f32 %v1129_v3, %v2128_v11 }
 0x198   :  { %v1160_v14 = vmul.f32 %v1129_v3, %v2137_v29  ;;  %v1161_v46 = vmul.f32 %v1129_v3, %v2146_v50  ;;  %v1147_v0 = vmul.f32 %v1129_v3, %v1997_v19  ;;  %v1148_v39 = vmul.f32 %v1129_v3, %v2011_v45 }
 0x199   :  { %v1162_v49 = vmul.f32 %v1129_v3, %v2154_v41  ;;  %v1167_v40 = vrot.slane %v1124_v12, %v1128_v23  ;;  %v1149_v44 = vmul.f32 %v1129_v3, %v2021_v34  ;;  %v1150_v27 = vmul.f32 %v1129_v3, %v2035_v36 }
 0x19a   :  { %v1151_v13 = vmul.f32 %v1129_v3, %v2047_v43  ;;  %v1152_v9 = vmul.f32 %v1129_v3, %v2063_v25 }
 0x19b   :  { %v1169_v11 = vadd.f32 %v1167_v40, %v1131_v58  ;;  %v1170_v62 = vadd.f32 %v1167_v40, %v1132_v47  ;;  %v1171_v29 = vadd.f32 %v1167_v40, %v1133_v35  ;;  %v1172_v53 = vadd.f32 %v1167_v40, %v1134_v26 }
 0x19c   :  { %v1173_v50 = vadd.f32 %v1167_v40, %v1135_v48  ;;  %v1174_v32 = vadd.f32 %v1167_v40, %v1136_v37  ;;  %v1175_v19 = vadd.f32 %v1167_v40, %v1137_v8  ;;  %v1176_v55 = vadd.f32 %v1167_v40, %v1138_v42 }
 0x19d   :  { %v1177_v45 = vadd.f32 %v1167_v40, %v1139_v20  ;;  %v1178_v24 = vadd.f32 %v1167_v40, %v1140_v33  ;;  %v1179_v41 = vadd.f32 %v1167_v40, %v1141_v10  ;;  %v1180_v30 = vadd.f32 %v1167_v40, %v1142_v28  ;;  %1201 = vst.msk [vmem:[%s2341_s5] sm:$0xff] %vm943_vm3, %v1169_v11 }
 0x19e   :  { %1202 = vst.msk [vmem:[%s2341_s5 + $0x8] sm:$0xff] %vm943_vm3, %v1170_v62  ;;  %1203 = vst.msk [vmem:[%s2341_s5 + $0x10] sm:$0xff] %vm943_vm3, %v1171_v29  ;;  %v1181_v34 = vadd.f32 %v1167_v40, %v1143_v7  ;;  %v1182_v36 = vadd.f32 %v1167_v40, %v1144_v15  ;;  %v1183_v43 = vadd.f32 %v1167_v40, %v1145_v63 }
 0x19f   :  { %1204 = vst.msk [vmem:[%s2341_s5 + $0x18] sm:$0xff] %vm943_vm3, %v1172_v53  ;;  %v1184_v25 = vadd.f32 %v1167_v40, %v1146_v17  ;;  %1205 = vst.msk [vmem:[%s2341_s5 + $0x20] sm:$0xff] %vm943_vm3, %v1173_v50  ;;  %v1185_v5 = vadd.f32 %v1167_v40, %v1147_v0  ;;  %v1186_v31 = vadd.f32 %v1167_v40, %v1148_v39 }
 0x1a0   :  { %1206 = vst.msk [vmem:[%s2341_s5 + $0x28] sm:$0xff] %vm943_vm3, %v1174_v32  ;;  %1207 = vst.msk [vmem:[%s2341_s5 + $0x30] sm:$0xff] %vm943_vm3, %v1175_v19  ;;  %v1187_v60 = vadd.f32 %v1167_v40, %v1149_v44  ;;  %v1188_v57 = vadd.f32 %v1167_v40, %v1150_v27  ;;  %v1189_v6 = vadd.f32 %v1167_v40, %v1151_v13 }
 0x1a1   :  { %1208 = vst.msk [vmem:[%s2341_s5 + $0x38] sm:$0xff] %vm943_vm3, %v1176_v55  ;;  %1209 = vst.msk [vmem:[%s2341_s5 + $0x40] sm:$0xff] %vm943_vm3, %v1177_v45  ;;  %v1190_v2 = vadd.f32 %v1167_v40, %v1152_v9  ;;  %v1191_v1 = vadd.f32 %v1167_v40, %v1153_v54  ;;  %v1192_v18 = vadd.f32 %v1167_v40, %v1154_v16 }
 0x1a2   :  { %1210 = vst.msk [vmem:[%s2341_s5 + $0x48] sm:$0xff] %vm943_vm3, %v1178_v24  ;;  %1211 = vst.msk [vmem:[%s2341_s5 + $0x50] sm:$0xff] %vm943_vm3, %v1179_v41  ;;  %v1193_v23 = vadd.f32 %v1167_v40, %v1155_v56  ;;  %v1194_v52 = vadd.f32 %v1167_v40, %v1156_v4  ;;  %v1195_v38 = vadd.f32 %v1167_v40, %v1157_v21 }
 0x1a3   :  { %1212 = vst.msk [vmem:[%s2341_s5 + $0x58] sm:$0xff] %vm943_vm3, %v1180_v30  ;;  %1213 = vst.msk [vmem:[%s2341_s5 + $0x60] sm:$0xff] %vm943_vm3, %v1181_v34  ;;  %v1196_v61 = vadd.f32 %v1167_v40, %v1158_v51  ;;  %v1197_v22 = vadd.f32 %v1167_v40, %v1159_v59  ;;  %v1198_v3 = vadd.f32 %v1167_v40, %v1160_v14 }
 0x1a4   :  { %1214 = vst.msk [vmem:[%s2341_s5 + $0x68] sm:$0xff] %vm943_vm3, %v1182_v36  ;;  %1215 = vst.msk [vmem:[%s2341_s5 + $0x70] sm:$0xff] %vm943_vm3, %v1183_v43  ;;  %v1199_v12 = vadd.f32 %v1167_v40, %v1161_v46  ;;  %v1200_v58 = vadd.f32 %v1167_v40, %v1162_v49 }
 0x1a5   :  { %1216 = vst.msk [vmem:[%s2341_s5 + $0x78] sm:$0xff] %vm943_vm3, %v1184_v25  ;;  %1217 = vst.msk [vmem:[%s2341_s5 + $0x80] sm:$0xff] %vm943_vm3, %v1185_v5 }
 0x1a6   :  { %1218 = vst.msk [vmem:[%s2341_s5 + $0x88] sm:$0xff] %vm943_vm3, %v1186_v31  ;;  %1219 = vst.msk [vmem:[%s2341_s5 + $0x90] sm:$0xff] %vm943_vm3, %v1187_v60 }
 0x1a7   :  { %1220 = vst.msk [vmem:[%s2341_s5 + $0x98] sm:$0xff] %vm943_vm3, %v1188_v57  ;;  %1221 = vst.msk [vmem:[%s2341_s5 + $0xa0] sm:$0xff] %vm943_vm3, %v1189_v6 }
 0x1a8   :  { %1222 = vst.msk [vmem:[%s2341_s5 + $0xa8] sm:$0xff] %vm943_vm3, %v1190_v2  ;;  %1223 = vst.msk [vmem:[%s2341_s5 + $0xb0] sm:$0xff] %vm943_vm3, %v1191_v1 }
 0x1a9   :  { %1224 = vst.msk [vmem:[%s2341_s5 + $0xb8] sm:$0xff] %vm943_vm3, %v1192_v18  ;;  %1225 = vst.msk [vmem:[%s2341_s5 + $0xc0] sm:$0xff] %vm943_vm3, %v1193_v23 }
 0x1aa   :  { %1226 = vst.msk [vmem:[%s2341_s5 + $0xc8] sm:$0xff] %vm943_vm3, %v1194_v52  ;;  %1227 = vst.msk [vmem:[%s2341_s5 + $0xd0] sm:$0xff] %vm943_vm3, %v1195_v38 }
 0x1ab   :  { %1228 = vst.msk [vmem:[%s2341_s5 + $0xd8] sm:$0xff] %vm943_vm3, %v1196_v61  ;;  %1229 = vst.msk [vmem:[%s2341_s5 + $0xe0] sm:$0xff] %vm943_vm3, %v1197_v22 }
 0x1ac   :  { %1230 = vst.msk [vmem:[%s2341_s5 + $0xe8] sm:$0xff] %vm943_vm3, %v1198_v3  ;;  %1231 = vst.msk [vmem:[%s2341_s5 + $0xf0] sm:$0xff] %vm943_vm3, %v1199_v12 }
 0x1ad   :  { %1232 = vst.msk [vmem:[%s2341_s5 + $0xf8] sm:$0xff] %vm943_vm3, %v1200_v58 }

// kernel: discriminator_forward.8
= control target key start
LH: loop header
LB: loop body
LE: loop exit
PB: predicated region body
PF: predicated region fallthrough
CT: control target
= control target key end

     0   :  { %vm440_vm0 = vcmask 523264   ;;  %s1254_s1 = inlined_call_operand.vmem [shape: bf16[576,128], index: 1, kind: input, shape index: {}]   ;;  %s1255_s0 = inlined_call_operand.vmem [shape: bf16[64,576], index: 0, kind: input, shape index: {}]   ;;  %s1256_s2 = inlined_call_operand.vmem [shape: f32[1,128], index: 2, kind: input, shape index: {}]   ;;  %s1257_s3 = inlined_call_operand.vmem [shape: f32[1,128], index: 3, kind: input, shape index: {}]   ;;  %s1258_s4 = inlined_call_operand.vmem [shape: f32[1,128], index: 4, kind: input, shape index: {}]   ;;  %s1259_s5 = inlined_call_operand.vmem [shape: f32[64,128], index: 5, kind: output, shape index: {}]  }
   0x1   :  { %v930_v0 = vld [vmem:[%s1254_s1 + $0x40] sm:$0xff]   ;;  %v934_v4 = vld [vmem:[%s1254_s1 + $0x48] sm:$0xff]   ;;  %v938_v8 = vld [vmem:[%s1254_s1 + $0x50] sm:$0xff]  }
   0x2   :  { %v931_v1 = vld [vmem:[%s1254_s1 + $0xc0] sm:$0xff]   ;;  %818 = vmatprep.subr.bf16.mxu0 %v930_v0  ;;  %v935_v5 = vld [vmem:[%s1254_s1 + $0xc8] sm:$0xff]   ;;  %v939_v9 = vld [vmem:[%s1254_s1 + $0xd0] sm:$0xff]  }
   0x3   :  { %v932_v2 = vld [vmem:[%s1254_s1] sm:$0xff]   ;;  %858 = vmatprep.subr.bf16.mxu1 %v931_v1  ;;  %v936_v6 = vld [vmem:[%s1254_s1 + $0x8] sm:$0xff]   ;;  %v940_v10 = vld [vmem:[%s1254_s1 + $0x10] sm:$0xff]  }
   0x4   :  { %v933_v3 = vld [vmem:[%s1254_s1 + $0x80] sm:$0xff]   ;;  %819 = vmatpush3.bf16.msra.mxu0 %v932_v2  ;;  %v937_v7 = vld [vmem:[%s1254_s1 + $0x88] sm:$0xff]   ;;  %v941_v11 = vld [vmem:[%s1254_s1 + $0x90] sm:$0xff]  }
   0x5   :  { %859 = vmatpush3.bf16.msra.mxu1 %v933_v3  ;;  %820 = vmatprep.subr.bf16.mxu0 %v934_v4  ;;  %v942_v12 = vld [vmem:[%s1254_s1 + $0x58] sm:$0xff]   ;;  %v946_v16 = vld [vmem:[%s1254_s1 + $0x60] sm:$0xff]   ;;  %v950_v20 = vld [vmem:[%s1254_s1 + $0x68] sm:$0xff]  }
   0x6   :  { %860 = vmatprep.subr.bf16.mxu1 %v935_v5  ;;  %v943_v13 = vld [vmem:[%s1254_s1 + $0xd8] sm:$0xff]   ;;  %v947_v17 = vld [vmem:[%s1254_s1 + $0xe0] sm:$0xff]   ;;  %v951_v21 = vld [vmem:[%s1254_s1 + $0xe8] sm:$0xff]  }
   0x7   :  { %v944_v14 = vld [vmem:[%s1254_s1 + $0x18] sm:$0xff]   ;;  %v948_v18 = vld [vmem:[%s1254_s1 + $0x20] sm:$0xff]   ;;  %v952_v22 = vld [vmem:[%s1254_s1 + $0x28] sm:$0xff]  }
   0x8   :  { %821 = vmatpush3.bf16.msra.mxu0 %v936_v6  ;;  %v945_v15 = vld [vmem:[%s1254_s1 + $0x98] sm:$0xff]   ;;  %v949_v19 = vld [vmem:[%s1254_s1 + $0xa0] sm:$0xff]   ;;  %v953_v23 = vld [vmem:[%s1254_s1 + $0xa8] sm:$0xff]  }
   0x9   :  { %861 = vmatpush3.bf16.msra.mxu1 %v937_v7  ;;  %822 = vmatprep.subr.bf16.mxu0 %v938_v8  ;;  %v954_v24 = vld [vmem:[%s1254_s1 + $0x70] sm:$0xff]   ;;  %v958_v28 = vld [vmem:[%s1254_s1 + $0x78] sm:$0xff]   ;;  %v967_v35 = vld [vmem:[%s1255_s0 + $0xc] ss:$20 sps:$4 sm:$0xff]  }
   0xa   :  { %862 = vmatprep.subr.bf16.mxu1 %v939_v9  ;;  %v955_v25 = vld [vmem:[%s1254_s1 + $0xf0] sm:$0xff]   ;;  %v959_v29 = vld [vmem:[%s1254_s1 + $0xf8] sm:$0xff]   ;;  %v968_v36 = vld [vmem:[%s1254_s1 + $0x100] sm:$0xff]   ;;  %550 = vmatprep.mubr.bf16.mxu1 %v967_v35 }
   0xb   :  { %v956_v26 = vld [vmem:[%s1254_s1 + $0x30] sm:$0xff]   ;;  %v960_v30 = vld [vmem:[%s1254_s1 + $0x38] sm:$0xff]   ;;  %v969_v37 = vld [vmem:[%s1255_s0 + $0x2c] ss:$20 sps:$4 sm:$0xff]  }
   0xc   :  { %823 = vmatpush3.bf16.msra.mxu0 %v940_v10  ;;  %v957_v27 = vld [vmem:[%s1254_s1 + $0xb0] sm:$0xff]   ;;  %v961_v31 = vld [vmem:[%s1254_s1 + $0xb8] sm:$0xff]   ;;  %v975_v39 = vld [vmem:[%s1254_s1 + $0x108] sm:$0xff]  }
   0xd   :  { %863 = vmatpush3.bf16.msra.mxu1 %v941_v11  ;;  %824 = vmatprep.subr.bf16.mxu0 %v942_v12  ;;  %v962_v32 = vld [vmem:[%s1255_s0] ss:$20 sps:$4 sm:$0xff]   ;;  %v964_v33 = vld [vmem:[%s1255_s0 + $0x4] ss:$20 sps:$4 sm:$0xff]   ;;  %v965_v34 = vld [vmem:[%s1255_s0 + $0x8] ss:$20 sps:$4 sm:$0xff]  }
   0xe   :  { %864 = vmatprep.subr.bf16.mxu1 %v943_v13  ;;  %485 = vmatprep.mubr.bf16.mxu0 %v964_v33  ;;  %v971_v38 = vld [vmem:[%s1255_s0 + $0x34] ss:$20 sps:$4 sm:$0xff]   ;;  %v974_v41 = vld [vmem:[%s1255_s0 + $0x30] ss:$20 sps:$4 sm:$0xff]   ;;  %v989_v45 = vld [vmem:[%s1254_s1 + $0x118] sm:$0xff]  }
   0xf   :  { %v973_v40 = vld [vmem:[%s1255_s0 + $0x28] ss:$20 sps:$4 sm:$0xff]   ;;  %v982_v44 = vld [vmem:[%s1254_s1 + $0x110] sm:$0xff]   ;;  %v981_v47 = vld [vmem:[%s1255_s0 + $0x58] ss:$20 sps:$4 sm:$0xff]  }
  0x10   :  { %825 = vmatpush3.bf16.msra.mxu0 %v944_v14  ;;  %v976_v42 = vld [vmem:[%s1255_s0 + $0x54] ss:$20 sps:$4 sm:$0xff]   ;;  %v978_v43 = vld [vmem:[%s1255_s0 + $0x5c] ss:$20 sps:$4 sm:$0xff]   ;;  %v985_v49 = vld [vmem:[%s1255_s0 + $0x84] ss:$20 sps:$4 sm:$0xff]  }
  0x11   :  { %865 = vmatpush3.bf16.msra.mxu1 %v945_v15  ;;  %826 = vmatprep.subr.bf16.mxu0 %v946_v16  ;;  %v980_v46 = vld [vmem:[%s1255_s0 + $0x50] ss:$20 sps:$4 sm:$0xff]   ;;  %v987_v50 = vld [vmem:[%s1255_s0 + $0x78] ss:$20 sps:$4 sm:$0xff]   ;;  %v988_v51 = vld [vmem:[%s1255_s0 + $0x80] ss:$20 sps:$4 sm:$0xff]  }
  0x12   :  { %866 = vmatprep.subr.bf16.mxu1 %v947_v17  ;;  %v983_v48 = vld [vmem:[%s1255_s0 + $0x7c] ss:$20 sps:$4 sm:$0xff]   ;;  %v991_v53 = vld [vmem:[%s1255_s0 + $0x60] ss:$20 sps:$4 sm:$0xff]   ;;  %v992_v54 = vld [vmem:[%s1255_s0 + $0x38] ss:$20 sps:$4 sm:$0xff]  }
  0x13   :  { %v990_v52 = vld [vmem:[%s1255_s0 + $0x10] ss:$20 sps:$4 sm:$0xff]   ;;  %v993_v55 = vld [vmem:[%s1255_s0 + $0x88] ss:$20 sps:$4 sm:$0xff]   ;;  %v757_v57 = vld [vmem:[%s1256_s2] ss:$0 sm:$0xff] }
  0x14   :  { %827 = vmatpush3.bf16.msra.mxu0 %v948_v18 }
  0x15   :  { %867 = vmatpush3.bf16.msra.mxu1 %v949_v19  ;;  %828 = vmatprep.subr.bf16.mxu0 %v950_v20 }
  0x16   :  { %868 = vmatprep.subr.bf16.mxu1 %v951_v21 }
  0x18   :  { %829 = vmatpush3.bf16.msra.mxu0 %v952_v22 }
  0x19   :  { %869 = vmatpush3.bf16.msra.mxu1 %v953_v23  ;;  %830 = vmatprep.subr.bf16.mxu0 %v954_v24 }
  0x1a   :  { %870 = vmatprep.subr.bf16.mxu1 %v955_v25 }
  0x1c   :  { %831 = vmatpush3.bf16.msra.mxu0 %v956_v26 }
  0x1d   :  { %871 = vmatpush3.bf16.msra.mxu1 %v957_v27  ;;  %832 = vmatprep.subr.bf16.mxu0 %v958_v28 }
  0x1e   :  { %872 = vmatprep.subr.bf16.mxu1 %v959_v29 }
  0x20   :  { %833 = vmatpush3.bf16.msra.mxu0 %v960_v30 }
  0x21   :  { %873 = vmatpush3.bf16.msra.mxu1 %v961_v31  ;;  %906 = vmatprep.subr.bf16.mxu0 %v968_v36 }
  0x22   :  { %922 = vmatprep.subr.bf16.mxu1 %v968_v36 }
  0x23   :  { %486 = vmatmul.mubr.bf16.vlgmr.msra.gmra.mrb[0].mxu0 %v962_v32 }
  0x24   :  { %551 = vmatmul.mubr.bf16.vlgmr.msra.gmra.mrb[0].mxu1 %v965_v34  ;;  %907 = vmatpush3.bf16.msra.mxu0 %v968_v36 }
  0x25   :  { %493 = vmatprep.mubr.bf16.mxu0 %v969_v37  ;;  %558 = vmatprep.mubr.bf16.mxu1 %v971_v38 }
  0x26   :  { %926 = vmatpush3.bf16.msra.mxu1 %v968_v36  ;;  %908 = vmatprep.subr.bf16.mxu0 %v975_v39 }
  0x27   :  { %923 = vmatprep.subr.bf16.mxu1 %v975_v39 }
  0x28   :  { %909 = vmatpush3.bf16.msra.mxu0 %v975_v39 }
  0x29   :  { %910 = vmatprep.subr.bf16.mxu0 %v982_v44 }
  0x2a   :  { %927 = vmatpush3.bf16.msra.mxu1 %v975_v39 }
  0x2b   :  { %494 = vmatmul.mubr.bf16.gmra.mrb[4].mxu0 %v973_v40  ;;  %924 = vmatprep.subr.bf16.mxu1 %v982_v44 }
  0x2c   :  { %559 = vmatmul.mubr.bf16.gmra.mrb[4].mxu1 %v974_v41  ;;  %501 = vmatprep.mubr.bf16.mxu0 %v976_v42 }
  0x2d   :  { %566 = vmatprep.mubr.bf16.mxu1 %v978_v43  ;;  %911 = vmatpush3.bf16.msra.mxu0 %v982_v44 }
  0x2e   :  { %912 = vmatprep.subr.bf16.mxu0 %v989_v45  ;;  %928 = vmatpush3.bf16.msra.mxu1 %v982_v44 }
  0x2f   :  { %925 = vmatprep.subr.bf16.mxu1 %v989_v45 }
  0x31   :  { %913 = vmatpush3.bf16.msra.mxu0 %v989_v45 }
  0x32   :  { %929 = vmatpush3.bf16.msra.mxu1 %v989_v45 }
  0x33   :  { %502 = vmatmul.mubr.bf16.gmra.mrb[8].mxu0 %v980_v46 }
  0x34   :  { %567 = vmatmul.mubr.bf16.gmra.mrb[8].mxu1 %v981_v47  ;;  %509 = vmatprep.mubr.bf16.mxu0 %v983_v48 }
  0x35   :  { %574 = vmatprep.mubr.bf16.mxu1 %v985_v49 }
  0x3b   :  { %510 = vmatmul.mubr.bf16.gmra.mrb[12].mxu0 %v987_v50 }
  0x3c   :  { %575 = vmatmul.mubr.bf16.gmra.mrb[12].mxu1 %v988_v51  ;;  %914 = vmatprep.mubr.msk.bf16.mxu0 %vm440_vm0, %v990_v52 }
  0x3d   :  { %918 = vmatprep.mubr.msk.bf16.mxu1 %vm440_vm0, %v991_v53 }
  0x43   :  { %915 = vmatmul.mubr.msk.bf16.vlgmr.msra.gmra.mrb[16].mxu0 %vm440_vm0, %v992_v54 }
  0x44   :  { %919 = vmatmul.mubr.msk.bf16.vlgmr.msra.gmra.mrb[16].mxu1 %vm440_vm0, %v993_v55 }
  0xf6   :  { %v834_v56 = vpop.f32.mrb[0].mxu0 }
  0xf7   :  { %v835_v58 = vpop.f32.mrb[1].mxu0  ;;  %v874_v59 = vpop.f32.mrb[0].mxu1 }
  0xf8   :  { %v836_v60 = vadd.f32 %v835_v58, %v834_v56  ;;  %v837_v61 = vpop.f32.mrb[2].mxu0  ;;  %v875_v62 = vpop.f32.mrb[1].mxu1 }
  0xf9   :  { %v838_v63 = vpop.f32.mrb[3].mxu0  ;;  %v876_v0 = vadd.f32 %v875_v62, %v874_v59  ;;  %v877_v1 = vpop.f32.mrb[2].mxu1 }
  0xfa   :  { %v488_v2 = vadd.f32 %v836_v60, %v757_v57  ;;  %v839_v3 = vadd.f32 %v838_v63, %v837_v61  ;;  %v878_v4 = vpop.f32.mrb[3].mxu1 }
  0xfb   :  { %v879_v5 = vadd.f32 %v878_v4, %v877_v1 }
  0xfc   :  { %v491_v6 = vadd.f32 %v839_v3, %v757_v57  ;;  %v553_v7 = vadd.f32 %v876_v0, %v488_v2 }
  0xfe   :  { %v840_v8 = vpop.f32.mrb[4].mxu0  ;;  %v1197_v9 = vadd.f32 %v879_v5, %v491_v6 }
  0xff   :  { %v841_v10 = vpop.f32.mrb[5].mxu0  ;;  %v880_v11 = vpop.f32.mrb[4].mxu1 }
 0x100   :  { %v842_v12 = vadd.f32 %v841_v10, %v840_v8  ;;  %v843_v13 = vpop.f32.mrb[6].mxu0  ;;  %v881_v14 = vpop.f32.mrb[5].mxu1 }
 0x101   :  { %v844_v15 = vpop.f32.mrb[7].mxu0  ;;  %v882_v16 = vadd.f32 %v881_v14, %v880_v11  ;;  %v883_v17 = vpop.f32.mrb[6].mxu1 }
 0x102   :  { %v496_v18 = vadd.f32 %v842_v12, %v757_v57  ;;  %v845_v19 = vadd.f32 %v844_v15, %v843_v13  ;;  %v884_v20 = vpop.f32.mrb[7].mxu1 }
 0x103   :  { %v885_v21 = vadd.f32 %v884_v20, %v883_v17 }
 0x104   :  { %v499_v22 = vadd.f32 %v845_v19, %v757_v57  ;;  %v561_v23 = vadd.f32 %v882_v16, %v496_v18 }
 0x106   :  { %v846_v24 = vpop.f32.mrb[8].mxu0  ;;  %v564_v25 = vadd.f32 %v885_v21, %v499_v22 }
 0x107   :  { %v847_v26 = vpop.f32.mrb[9].mxu0  ;;  %v886_v27 = vpop.f32.mrb[8].mxu1 }
 0x108   :  { %v848_v28 = vadd.f32 %v847_v26, %v846_v24  ;;  %v849_v29 = vpop.f32.mrb[10].mxu0  ;;  %v887_v30 = vpop.f32.mrb[9].mxu1 }
 0x109   :  { %v850_v31 = vpop.f32.mrb[11].mxu0  ;;  %v888_v32 = vadd.f32 %v887_v30, %v886_v27  ;;  %v889_v33 = vpop.f32.mrb[10].mxu1 }
 0x10a   :  { %v504_v34 = vadd.f32 %v848_v28, %v757_v57  ;;  %v851_v35 = vadd.f32 %v850_v31, %v849_v29  ;;  %v890_v36 = vpop.f32.mrb[11].mxu1 }
 0x10b   :  { %v891_v37 = vadd.f32 %v890_v36, %v889_v33 }
 0x10c   :  { %v507_v38 = vadd.f32 %v851_v35, %v757_v57  ;;  %v569_v39 = vadd.f32 %v888_v32, %v504_v34 }
 0x10e   :  { %v852_v40 = vpop.f32.mrb[12].mxu0  ;;  %v572_v41 = vadd.f32 %v891_v37, %v507_v38 }
 0x10f   :  { %v853_v42 = vpop.f32.mrb[13].mxu0  ;;  %v892_v43 = vpop.f32.mrb[12].mxu1 }
 0x110   :  { %v854_v44 = vadd.f32 %v853_v42, %v852_v40  ;;  %v855_v45 = vpop.f32.mrb[14].mxu0  ;;  %v893_v46 = vpop.f32.mrb[13].mxu1 }
 0x111   :  { %v856_v47 = vpop.f32.mrb[15].mxu0  ;;  %v894_v48 = vadd.f32 %v893_v46, %v892_v43  ;;  %v895_v49 = vpop.f32.mrb[14].mxu1 }
 0x112   :  { %v512_v50 = vadd.f32 %v854_v44, %v757_v57  ;;  %v857_v51 = vadd.f32 %v856_v47, %v855_v45  ;;  %v896_v52 = vpop.f32.mrb[15].mxu1 }
 0x113   :  { %v897_v53 = vadd.f32 %v896_v52, %v895_v49 }
 0x114   :  { %v515_v54 = vadd.f32 %v857_v51, %v757_v57  ;;  %v577_v55 = vadd.f32 %v894_v48, %v512_v50 }
 0x116   :  { %v916_v56 = vpop.f32.mrb[16].mxu0  ;;  %v580_v58 = vadd.f32 %v897_v53, %v515_v54 }
 0x117   :  { %v626_v59 = vadd.f32 %v916_v56, %v561_v23  ;;  %v920_v60 = vpop.f32.mrb[16].mxu1  ;;  %v617_v61 = vpop.f32.mrb[17].mxu0 }
 0x118   :  { %v642_v62 = vadd.f32 %v920_v60, %v577_v55  ;;  %v618_v63 = vadd.f32 %v617_v61, %v553_v7  ;;  %v633_v0 = vpop.f32.mrb[17].mxu1  ;;  %v917_v1 = vpop.f32.mrb[18].mxu0 }
 0x119   :  { %v634_v2 = vadd.f32 %v633_v0, %v569_v39  ;;  %v629_v3 = vadd.f32 %v917_v1, %v564_v25  ;;  %v921_v4 = vpop.f32.mrb[18].mxu1  ;;  %v620_v5 = vpop.f32.mrb[19].mxu0  ;;  %v658_v11 = vmul.f32 0.2, %v626_v59  ;;  %vm650_vm2 = vcmp.ge.f32.partialorder %v626_v59, 0.0 }
 0x11a   :  { %v636_v6 = vpop.f32.mrb[19].mxu1  ;;  %v656_v8 = vmul.f32 0.2, %v618_v63  ;;  %vm648_vm1 = vcmp.ge.f32.partialorder %v618_v63, 0.0  ;;  %v645_v10 = vadd.f32 %v921_v4, %v580_v58  ;;  %v621_v57 = vadd.f32 %v620_v5, %v1197_v9 }
 0x11b   :  { %v637_v12 = vadd.f32 %v636_v6, %v572_v41  ;;  %v659_v14 = vmul.f32 0.2, %v629_v3  ;;  %vm651_vm4 = vcmp.ge.f32.partialorder %v629_v3, 0.0  ;;  %v1202_v15 = vsel %vm650_vm2, %v626_v59, %v658_v11 }
 0x11c   :  { %v1200_v13 = vsel %vm648_vm1, %v618_v63, %v656_v8  ;;  %vm649_vm3 = vcmp.ge.f32.partialorder %v621_v57, 0.0  ;;  %v657_v7 = vmul.f32 0.2, %v621_v57  ;;  %v660_v16 = vmul.f32 0.2, %v634_v2 }
 0x11d   :  { %v685_v18 = vmul.f32 %v1200_v13, %v1200_v13  ;;  %vm652_vm5 = vcmp.ge.f32.partialorder %v634_v2, 0.0  ;;  %v1212_v20 = vsel %vm651_vm4, %v629_v3, %v659_v14  ;;  %v661_v21 = vmul.f32 0.2, %v637_v12  ;;  %v710_v3 = vld [vmem:[%s1257_s3] sm:$0x1] }
 0x11e   :  { %v1204_v17 = vsel %vm649_vm3, %v621_v57, %v657_v7  ;;  %v687_v22 = vmul.f32 %v1202_v15, %v1202_v15  ;;  %vm653_vm6 = vcmp.ge.f32.partialorder %v637_v12, 0.0  ;;  %v662_v25 = vmul.f32 0.2, %v642_v62  ;;  %v714_v8 = vld [vmem:[%s1258_s4] sm:$0x1] }
 0x11f   :  { %v672_v9 = vadd.f32 %v1204_v17, %v1200_v13  ;;  %v686_v19 = vmul.f32 %v1204_v17, %v1204_v17  ;;  %v668_v26 = vsel %vm652_vm5, %v634_v2, %v660_v16  ;;  %vm654_vm7 = vcmp.ge.f32.partialorder %v642_v62, 0.0 }
 0x120   :  { %v688_v27 = vmul.f32 %v1212_v20, %v1212_v20  ;;  %v663_v30 = vmul.f32 0.2, %v645_v10  ;;  %v669_v31 = vsel %vm653_vm6, %v637_v12, %v661_v21  ;;  %v689_v32 = vmul.f32 %v668_v26, %v668_v26 }
 0x121   :  { %v673_v23 = vadd.f32 %v672_v9, %v1202_v15  ;;  %v693_v24 = vadd.f32 %v686_v19, %v685_v18  ;;  %vm655_vm8 = vcmp.ge.f32.partialorder %v645_v10, 0.0  ;;  %v670_v35 = vsel %vm654_vm7, %v642_v62, %v662_v25 }
 0x122   :  { %v690_v37 = vmul.f32 %v669_v31, %v669_v31  ;;  %v671_v39 = vsel %vm655_vm8, %v645_v10, %v663_v30  ;;  %v691_v40 = vmul.f32 %v670_v35, %v670_v35  ;;  %v718_v1 = vlaneseq }
 0x123   :  { %v694_v28 = vadd.f32 %v693_v24, %v687_v22  ;;  %v674_v29 = vadd.f32 %v673_v23, %v1212_v20  ;;  %v692_v43 = vmul.f32 %v671_v39, %v671_v39 }
 0x124   :  { %v719_v2 = vshrl.u32 %v718_v1, 7 }
 0x125   :  { %v675_v33 = vadd.f32 %v674_v29, %v668_v26  ;;  %v695_v34 = vadd.f32 %v694_v28, %v688_v27 }
 0x126   :  { %v720_v4 = vsub.s32 0, %v719_v2 }
 0x127   :  { %v676_v36 = vadd.f32 %v675_v33, %v669_v31  ;;  %v696_v38 = vadd.f32 %v695_v34, %v689_v32 }
 0x129   :  { %v677_v41 = vadd.f32 %v676_v36, %v670_v35  ;;  %v697_v42 = vadd.f32 %v696_v38, %v690_v37 }
 0x12b   :  { %v678_v44 = vadd.f32 %v677_v41, %v671_v39  ;;  %v698_v45 = vadd.f32 %v697_v42, %v691_v40 }
 0x12d   :  { %v679_v46 = vrot.slane %v678_v44, 4  ;;  %v699_v47 = vadd.f32 %v698_v45, %v692_v43 }
 0x12f   :  { %v680_v48 = vadd.f32 %v679_v46, %v678_v44  ;;  %v700_v49 = vrot.slane %v699_v47, 4 }
 0x131   :  { %v681_v50 = vrot.slane %v680_v48, 2  ;;  %v701_v51 = vadd.f32 %v700_v49, %v699_v47 }
 0x133   :  { %v682_v52 = vadd.f32 %v681_v50, %v680_v48  ;;  %v702_v53 = vrot.slane %v701_v51, 2 }
 0x135   :  { %v683_v54 = vrot.slane %v682_v52, 1  ;;  %v703_v55 = vadd.f32 %v702_v53, %v701_v51 }
 0x137   :  { %v684_v56 = vadd.f32 %v683_v54, %v682_v52  ;;  %v704_v58 = vrot.slane %v703_v55, 1 }
 0x139   :  { %v705_v59 = vadd.f32 %v704_v58, %v703_v55  ;;  %v706_v60 = vmul.f32 0.015625, %v684_v56 }
 0x13b   :  { %v707_v61 = vmul.f32 0.015625, %v705_v59  ;;  %v708_v62 = vmul.f32 %v706_v60, %v706_v60 }
 0x13d   :  { %v709_v63 = vsub.f32 %v707_v61, %v708_v62 }
 0x13f   :  { %v711_v0 = vadd.f32 0.8, %v709_v63 }
 0x141   :  { %994 = vrsqrt.f32 %v711_v0 }
 0x14b   :  { %v995_v5 = vpop.eup %994 }
 0x14c   :  { %v713_v6 = vmul.f32 %v995_v5, %v710_v3 }
 0x14e   :  { %v715_v10 = vmul.f32 %v713_v6, %v706_v60  ;;  %v721_v11 = vrot.slane %v713_v6, %v720_v4 }
 0x150   :  { %v716_v57 = vsub.f32 %v714_v8, %v715_v10  ;;  %v723_v12 = vmul.f32 %v721_v11, %v1200_v13  ;;  %v724_v14 = vmul.f32 %v721_v11, %v1204_v17  ;;  %v725_v7 = vmul.f32 %v721_v11, %v1202_v15 }
 0x151   :  { %v726_v16 = vmul.f32 %v721_v11, %v1212_v20  ;;  %v727_v18 = vmul.f32 %v721_v11, %v668_v26  ;;  %v728_v9 = vmul.f32 %v721_v11, %v669_v31  ;;  %v729_v19 = vmul.f32 %v721_v11, %v670_v35 }
 0x152   :  { %v730_v21 = vmul.f32 %v721_v11, %v671_v39  ;;  %v735_v22 = vrot.slane %v716_v57, %v720_v4 }
 0x154   :  { %v737_v23 = vadd.f32 %v735_v22, %v723_v12  ;;  %v738_v24 = vadd.f32 %v735_v22, %v724_v14  ;;  %v739_v25 = vadd.f32 %v735_v22, %v725_v7  ;;  %v740_v27 = vadd.f32 %v735_v22, %v726_v16 }
 0x155   :  { %v741_v28 = vadd.f32 %v735_v22, %v727_v18  ;;  %v742_v29 = vadd.f32 %v735_v22, %v728_v9  ;;  %v743_v30 = vadd.f32 %v735_v22, %v729_v19  ;;  %v744_v32 = vadd.f32 %v735_v22, %v730_v21 }
 0x156   :  { %745 = vst [vmem:[%s1259_s5] sm:$0xff] %v737_v23  ;;  %746 = vst [vmem:[%s1259_s5 + $0x8] sm:$0xff] %v738_v24 }
 0x157   :  { %747 = vst [vmem:[%s1259_s5 + $0x10] sm:$0xff] %v739_v25  ;;  %748 = vst [vmem:[%s1259_s5 + $0x18] sm:$0xff] %v740_v27 }
 0x158   :  { %749 = vst [vmem:[%s1259_s5 + $0x20] sm:$0xff] %v741_v28  ;;  %750 = vst [vmem:[%s1259_s5 + $0x28] sm:$0xff] %v742_v29 }
 0x159   :  { %751 = vst [vmem:[%s1259_s5 + $0x30] sm:$0xff] %v743_v30  ;;  %752 = vst [vmem:[%s1259_s5 + $0x38] sm:$0xff] %v744_v32 }

// kernel: discriminator_forward.9
= control target key start
LH: loop header
LB: loop body
LE: loop exit
PB: predicated region body
PF: predicated region fallthrough
CT: control target
= control target key end

     0   :  { %s1510_s0 = inlined_call_operand.vmem [shape: bf16[16,520], index: 0, kind: input, shape index: {}]   ;;  %s1511_s1 = inlined_call_operand.vmem [shape: bf16[520,1], index: 1, kind: input, shape index: {}]   ;;  %s1512_s2 = inlined_call_operand.<no memory space> [shape: f32[1,1], index: 2, kind: input, shape index: {}]   ;;  %s1513_s3 = inlined_call_operand.vmem [shape: bf16[520,9], index: 3, kind: input, shape index: {}]   ;;  %s1514_s4 = inlined_call_operand.vmem [shape: f32[1,9], index: 4, kind: input, shape index: {}]   ;;  %s1515_s5 = inlined_call_operand.vmem [shape: f32[16,1], index: 5, kind: output, shape index: {0}]   ;;  %s1516_s6 = inlined_call_operand.hbm [shape: f32[16,9], index: 6, kind: output, shape index: {1}]  }
   0x1   :  { %v12_v0 = vstv %s1512_s2 }
   0x2   :  { %13 = vst [vmem:[#allocation2] sm:$0x1] %v12_v0 }
   0x3   :  { %v1092_v1 = vld [vmem:[%s1511_s1 + $0x40] sm:$0xff]   ;;  %v1096_v5 = vld [vmem:[%s1511_s1 + $0x48] sm:$0xff]   ;;  %v1100_v9 = vld [vmem:[%s1511_s1 + $0x50] sm:$0xff]   ;;  %v1205_v34 = vmov 0.0   ;;  %vm328_vm0 = vcmask 1043456   ;;  %vm1206_vm1 = vmmov 0  }
   0x4   :  { %v1093_v2 = vld [vmem:[%s1511_s1] sm:$0xff]   ;;  %983 = vmatprep.subr.bf16.mxu0 %v1092_v1  ;;  %v1097_v6 = vld [vmem:[%s1511_s1 + $0x8] sm:$0xff]   ;;  %v1101_v10 = vld [vmem:[%s1511_s1 + $0x10] sm:$0xff]   ;;  %vm324_vm2 = vcmask 64512  }
   0x5   :  { %v1094_v3 = vld [vmem:[%s1511_s1 + $0xc0] sm:$0xff]   ;;  %984 = vmatpush3.bf16.msra.mxu0 %v1093_v2  ;;  %v1098_v7 = vld [vmem:[%s1511_s1 + $0xc8] sm:$0xff]   ;;  %v1102_v11 = vld [vmem:[%s1511_s1 + $0xd0] sm:$0xff]  }
   0x6   :  { %v1095_v4 = vld [vmem:[%s1511_s1 + $0x80] sm:$0xff]   ;;  %1005 = vmatprep.subr.bf16.mxu1 %v1094_v3  ;;  %985 = vmatprep.subr.bf16.mxu0 %v1096_v5  ;;  %v1099_v8 = vld [vmem:[%s1511_s1 + $0x88] sm:$0xff]   ;;  %v1103_v12 = vld [vmem:[%s1511_s1 + $0x90] sm:$0xff]  }
   0x7   :  { %1006 = vmatpush3.bf16.msra.mxu1 %v1095_v4  ;;  %v1104_v13 = vld [vmem:[%s1511_s1 + $0x58] sm:$0xff]   ;;  %v1108_v17 = vld [vmem:[%s1511_s1 + $0x60] sm:$0xff]   ;;  %v1112_v21 = vld [vmem:[%s1511_s1 + $0x68] sm:$0xff]  }
   0x8   :  { %1007 = vmatprep.subr.bf16.mxu1 %v1098_v7  ;;  %v1105_v14 = vld [vmem:[%s1511_s1 + $0x18] sm:$0xff]   ;;  %v1109_v18 = vld [vmem:[%s1511_s1 + $0x20] sm:$0xff]   ;;  %v1113_v22 = vld [vmem:[%s1511_s1 + $0x28] sm:$0xff]  }
   0x9   :  { %986 = vmatpush3.bf16.msra.mxu0 %v1097_v6  ;;  %v1106_v15 = vld [vmem:[%s1511_s1 + $0xd8] sm:$0xff]   ;;  %v1110_v19 = vld [vmem:[%s1511_s1 + $0xe0] sm:$0xff]   ;;  %v1114_v23 = vld [vmem:[%s1511_s1 + $0xe8] sm:$0xff]  }
   0xa   :  { %987 = vmatprep.subr.bf16.mxu0 %v1100_v9  ;;  %v1107_v16 = vld [vmem:[%s1511_s1 + $0x98] sm:$0xff]   ;;  %v1111_v20 = vld [vmem:[%s1511_s1 + $0xa0] sm:$0xff]   ;;  %v1115_v24 = vld [vmem:[%s1511_s1 + $0xa8] sm:$0xff]  }
   0xb   :  { %1008 = vmatpush3.bf16.msra.mxu1 %v1099_v8  ;;  %v1116_v25 = vld [vmem:[%s1511_s1 + $0x70] sm:$0xff]   ;;  %v1120_v29 = vld [vmem:[%s1511_s1 + $0x78] sm:$0xff]   ;;  %v1129_v37 = vld [vmem:[%s1510_s0 + $0xc] ss:$20 sps:$4 sm:$0xff]  }
   0xc   :  { %1009 = vmatprep.subr.bf16.mxu1 %v1102_v11  ;;  %v1117_v26 = vld [vmem:[%s1511_s1 + $0x30] sm:$0xff]   ;;  %v1121_v30 = vld [vmem:[%s1511_s1 + $0x38] sm:$0xff]   ;;  %v1130_v38 = vld [vmem:[%s1511_s1 + $0x100] ss:$0 sps:$4 sm:$0xff]   ;;  %405 = vmatprep.mubr.bf16.mxu1 %v1129_v37 }
   0xd   :  { %988 = vmatpush3.bf16.msra.mxu0 %v1101_v10  ;;  %v1118_v27 = vld [vmem:[%s1511_s1 + $0xf0] sm:$0xff]   ;;  %v1122_v31 = vld [vmem:[%s1511_s1 + $0xf8] sm:$0xff]   ;;  %v1131_v39 = vld [vmem:[%s1513_s3 + $0x40] sm:$0xff]   ;;  %v330_v40 = vsel %vm328_vm0, %v1130_v38, 0 }
   0xe   :  { %989 = vmatprep.subr.bf16.mxu0 %v1104_v13  ;;  %v1119_v28 = vld [vmem:[%s1511_s1 + $0xb0] sm:$0xff]   ;;  %v1125_v33 = vld [vmem:[%s1510_s0 + $0x4] ss:$20 sps:$4 sm:$0xff]   ;;  %v1356_v36 = vld [vmem:[%s1510_s0 + $0x8] ss:$20 sps:$4 sm:$0xff]  }
   0xf   :  { %1010 = vmatpush3.bf16.msra.mxu1 %v1103_v12  ;;  %v1344_v32 = vld [vmem:[%s1510_s0] ss:$20 sps:$4 sm:$0xff]   ;;  %v1126_v35 = vld [vmem:[%s1511_s1 + $0xb8] sm:$0xff]   ;;  %364 = vmatprep.mubr.bf16.mxu0 %v1125_v33  ;;  %v1133_v42 = vld [vmem:[%s1513_s3 + $0x48] sm:$0xff]  }
  0x10   :  { %1011 = vmatprep.subr.bf16.mxu1 %v1106_v15  ;;  %v1132_v41 = vld [vmem:[%s1513_s3] sm:$0xff]   ;;  %v1134_v43 = vld [vmem:[%s1513_s3 + $0x8] sm:$0xff]   ;;  %v1138_v47 = vld [vmem:[%s1513_s3 + $0x50] sm:$0xff]  }
  0x11   :  { %990 = vmatpush3.bf16.msra.mxu0 %v1105_v14  ;;  %v1135_v44 = vld [vmem:[%s1513_s3 + $0xc0] sm:$0xff]   ;;  %v1139_v48 = vld [vmem:[%s1513_s3 + $0x10] sm:$0xff]   ;;  %v1140_v49 = vld [vmem:[%s1513_s3 + $0xc8] sm:$0xff]  }
  0x12   :  { %991 = vmatprep.subr.bf16.mxu0 %v1108_v17  ;;  %v1387_v45 = vld [vmem:[%s1510_s0 + $0x10] ss:$20 sps:$4 sm:$0xff]   ;;  %v1141_v50 = vld [vmem:[%s1513_s3 + $0x88] sm:$0xff]   ;;  %v1142_v51 = vld [vmem:[%s1513_s3 + $0x58] sm:$0xff]  }
  0x13   :  { %1012 = vmatpush3.bf16.msra.mxu1 %v1107_v16  ;;  %v1137_v46 = vld [vmem:[%s1513_s3 + $0x80] sm:$0xff]   ;;  %v1143_v52 = vld [vmem:[%s1513_s3 + $0x18] sm:$0xff]   ;;  %v1144_v53 = vld [vmem:[%s1513_s3 + $0xd0] sm:$0xff]  }
  0x14   :  { %1013 = vmatprep.subr.bf16.mxu1 %v1110_v19  ;;  %v1145_v54 = vld [vmem:[%s1513_s3 + $0x90] sm:$0xff]   ;;  %v1146_v55 = vld [vmem:[%s1513_s3 + $0x60] sm:$0xff]   ;;  %v1148_v57 = vld [vmem:[%s1513_s3 + $0xd8] sm:$0xff]  }
  0x15   :  { %992 = vmatpush3.bf16.msra.mxu0 %v1109_v18  ;;  %v1147_v56 = vld [vmem:[%s1513_s3 + $0x20] sm:$0xff]   ;;  %v1149_v58 = vld [vmem:[%s1513_s3 + $0x98] sm:$0xff]   ;;  %v1150_v59 = vld [vmem:[%s1513_s3 + $0x68] sm:$0xff]  }
  0x16   :  { %993 = vmatprep.subr.bf16.mxu0 %v1112_v21  ;;  %v1151_v60 = vld [vmem:[%s1513_s3 + $0x28] sm:$0xff]   ;;  %v1152_v61 = vld [vmem:[%s1513_s3 + $0xe0] sm:$0xff]   ;;  %v1154_v63 = vld [vmem:[%s1513_s3 + $0x70] sm:$0xff]  }
  0x17   :  { %1014 = vmatpush3.bf16.msra.mxu1 %v1111_v20  ;;  %v1153_v62 = vld [vmem:[%s1513_s3 + $0xa0] sm:$0xff]   ;;  %v1155_v0 = vld [vmem:[%s1513_s3 + $0x30] sm:$0xff]   ;;  %v1156_v1 = vld [vmem:[%s1513_s3 + $0xe8] sm:$0xff]  }
  0x18   :  { %1015 = vmatprep.subr.bf16.mxu1 %v1114_v23  ;;  %v1157_v2 = vld [vmem:[%s1513_s3 + $0xa8] sm:$0xff]   ;;  %v1158_v3 = vld [vmem:[%s1513_s3 + $0x78] sm:$0xff]   ;;  %v1160_v5 = vld [vmem:[%s1513_s3 + $0xf0] sm:$0xff]  }
  0x19   :  { %994 = vmatpush3.bf16.msra.mxu0 %v1113_v22  ;;  %v1159_v4 = vld [vmem:[%s1513_s3 + $0x38] sm:$0xff]   ;;  %v1161_v6 = vld [vmem:[%s1513_s3 + $0xb0] sm:$0xff]   ;;  %v1164_v9 = vld [vmem:[%s1513_s3 + $0x100] ss:$0 sps:$4 sm:$0xff]  }
  0x1a   :  { %995 = vmatprep.subr.bf16.mxu0 %v1116_v25  ;;  %v1162_v7 = vld [vmem:[%s1513_s3 + $0xf8] sm:$0xff]  }
  0x1b   :  { %1016 = vmatpush3.bf16.msra.mxu1 %v1115_v24  ;;  %v1163_v8 = vld [vmem:[%s1513_s3 + $0xb8] sm:$0xff]  }
  0x1c   :  { %1017 = vmatprep.subr.bf16.mxu1 %v1118_v27 }
  0x1d   :  { %996 = vmatpush3.bf16.msra.mxu0 %v1117_v26 }
  0x1e   :  { %997 = vmatprep.subr.bf16.mxu0 %v1120_v29 }
  0x1f   :  { %1018 = vmatpush3.bf16.msra.mxu1 %v1119_v28 }
  0x20   :  { %1019 = vmatprep.subr.bf16.mxu1 %v1122_v31 }
  0x21   :  { %998 = vmatpush3.bf16.msra.mxu0 %v1121_v30 }
  0x22   :  { %1075 = vmatprep.subr.bf16.mxu0 %v1205_v34 }
  0x23   :  { %1020 = vmatpush3.bf16.msra.mxu1 %v1126_v35 }
  0x24   :  { %365 = vmatmul.mubr.bf16.vlgmr.msra.gmra.mrb[0].mxu0 %v1344_v32  ;;  %1029 = vmatprep.subr.bf16.mxu1 %v1131_v39 }
  0x25   :  { %1077 = vmatprep.mubr.msk.bf16.mxu0 %vm1206_vm1, %v1205_v34  ;;  %1076 = vmatpush3.bf16.msra.mxu0 %v330_v40 }
  0x26   :  { %406 = vmatmul.mubr.bf16.vlgmr.msra.gmra.mrb[0].mxu1 %v1356_v36  ;;  %1051 = vmatprep.subr.bf16.mxu0 %v1135_v44 }
  0x27   :  { %772 = vmatprep.mubr.bf16.mxu1 %v1125_v33  ;;  %1030 = vmatpush3.bf16.msra.mxu1 %v1132_v41 }
  0x28   :  { %1031 = vmatprep.subr.bf16.mxu1 %v1133_v42 }
  0x2b   :  { %1032 = vmatpush3.bf16.msra.mxu1 %v1134_v43 }
  0x2c   :  { %1078 = vmatmul.mubr.msk.bf16.vlgmr.msra.gmra.mrb[4].mxu0 %vm324_vm2, %v1387_v45  ;;  %1033 = vmatprep.subr.bf16.mxu1 %v1138_v47 }
  0x2d   :  { %1052 = vmatpush3.bf16.msra.mxu0 %v1137_v46  ;;  %813 = vmatprep.mubr.bf16.mxu0 %v1129_v37 }
  0x2e   :  { %1053 = vmatprep.subr.bf16.mxu0 %v1140_v49 }
  0x2f   :  { %1034 = vmatpush3.bf16.msra.mxu1 %v1139_v48 }
  0x30   :  { %1035 = vmatprep.subr.bf16.mxu1 %v1142_v51 }
  0x31   :  { %1054 = vmatpush3.bf16.msra.mxu0 %v1141_v50 }
  0x32   :  { %1055 = vmatprep.subr.bf16.mxu0 %v1144_v53 }
  0x33   :  { %1036 = vmatpush3.bf16.msra.mxu1 %v1143_v52 }
  0x34   :  { %1037 = vmatprep.subr.bf16.mxu1 %v1146_v55 }
  0x35   :  { %1056 = vmatpush3.bf16.msra.mxu0 %v1145_v54 }
  0x36   :  { %1057 = vmatprep.subr.bf16.mxu0 %v1148_v57 }
  0x37   :  { %1038 = vmatpush3.bf16.msra.mxu1 %v1147_v56 }
  0x38   :  { %1039 = vmatprep.subr.bf16.mxu1 %v1150_v59 }
  0x39   :  { %1058 = vmatpush3.bf16.msra.mxu0 %v1149_v58 }
  0x3a   :  { %1059 = vmatprep.subr.bf16.mxu0 %v1152_v61 }
  0x3b   :  { %1040 = vmatpush3.bf16.msra.mxu1 %v1151_v60 }
  0x3c   :  { %1041 = vmatprep.subr.bf16.mxu1 %v1154_v63 }
  0x3d   :  { %1060 = vmatpush3.bf16.msra.mxu0 %v1153_v62 }
  0x3e   :  { %1061 = vmatprep.subr.bf16.mxu0 %v1156_v1 }
  0x3f   :  { %1042 = vmatpush3.bf16.msra.mxu1 %v1155_v0 }
  0x40   :  { %1043 = vmatprep.subr.bf16.mxu1 %v1158_v3 }
  0x41   :  { %1062 = vmatpush3.bf16.msra.mxu0 %v1157_v2 }
  0x42   :  { %1063 = vmatprep.subr.bf16.mxu0 %v1160_v5 }
  0x43   :  { %1044 = vmatpush3.bf16.msra.mxu1 %v1159_v4 }
  0x44   :  { %1081 = vmatprep.subr.bf16.mxu1 %v1205_v34 }
  0x45   :  { %1064 = vmatpush3.bf16.msra.mxu0 %v1161_v6 }
  0x46   :  { %1065 = vmatprep.subr.bf16.mxu0 %v1162_v7 }
  0x47   :  { %14 = vsyncpa [#allocation4], 0  ;;  %v738_v10 = vsel %vm328_vm0, %v1164_v9, 0  ;;  %773 = vmatmul.mubr.bf16.vlgmr.msra.gmra.mrb[4].mxu1 %v1344_v32  ;;  %v908_v12 = vld [vmem:[#allocation2] ss:$0 sm:$0xff]  ;;  %vm467_vm3 = vcmask 7168  }
  0x48   :  { %1082 = vmatpush3.bf16.msra.mxu1 %v738_v10  ;;  %1083 = vmatprep.mubr.msk.bf16.mxu1 %vm1206_vm1, %v1205_v34  ;;  %v948_v47 = vld [vmem:[%s1514_s4] ss:$0 sm:$0xff]  ;;  %vm863_vm4 = vcmask 72704   ;;  %s1207_s4 = smov [#allocation3]  }
  0x49   :  { %1066 = vmatpush3.bf16.msra.mxu0 %v1163_v8 }
  0x4c   :  { %814 = vmatmul.mubr.bf16.vlgmr.msra.gmra.mrb[8].mxu0 %v1356_v36 }
  0x4f   :  { %1084 = vmatmul.mubr.msk.bf16.vlgmr.msra.gmra.mrb[8].mxu1 %vm324_vm2, %v1387_v45 }
  0xf7   :  { %v999_v11 = vpop.f32.mrb[0].mxu0 }
  0xf8   :  { %v1000_v13 = vpop.f32.mrb[1].mxu0 }
  0xf9   :  { %v1001_v14 = vadd.f32 %v1000_v13, %v999_v11  ;;  %v1002_v15 = vpop.f32.mrb[2].mxu0  ;;  %v1021_v16 = vpop.f32.mrb[0].mxu1 }
  0xfa   :  { %v1003_v17 = vpop.f32.mrb[3].mxu0  ;;  %v1022_v20 = vpop.f32.mrb[1].mxu1 }
  0xfb   :  { %v367_v18 = vadd.f32 %v1001_v14, %v908_v12  ;;  %v1004_v19 = vadd.f32 %v1003_v17, %v1002_v15  ;;  %v1023_v21 = vadd.f32 %v1022_v20, %v1021_v16  ;;  %v1024_v22 = vpop.f32.mrb[2].mxu1 }
  0xfc   :  { %v1025_v24 = vpop.f32.mrb[3].mxu1 }
  0xfd   :  { %v370_v23 = vadd.f32 %v1004_v19, %v908_v12  ;;  %v1026_v25 = vadd.f32 %v1025_v24, %v1024_v22  ;;  %v408_v26 = vadd.f32 %v1023_v21, %v367_v18 }
  0xff   :  { %v448_v27 = vpop.f32.mrb[4].mxu0  ;;  %v411_v30 = vadd.f32 %v1026_v25, %v370_v23 }
 0x100   :  { %v449_v28 = vadd.f32 %v448_v27, %v408_v26  ;;  %v1079_v29 = vpop.f32.mrb[5].mxu0 }
 0x101   :  { %v451_v31 = vpop.f32.mrb[6].mxu0 }
 0x102   :  { %v455_v32 = vsub.f32 0.0, %v449_v28  ;;  %v452_v33 = vadd.f32 %v451_v31, %v411_v30  ;;  %v1080_v34 = vpop.f32.mrb[7].mxu0 }
 0x104   :  { %v457_v35 = vmul.f32 1.442695, %v455_v32  ;;  %v456_v36 = vsub.f32 0.0, %v452_v33 }
 0x106   :  { %1165 = vpow2.f32 %v457_v35  ;;  %v459_v37 = vmul.f32 1.442695, %v456_v36 }
 0x108   :  { %1167 = vpow2.f32 %v459_v37 }
 0x110   :  { %v1166_v38 = vpop.eup %1165 }
 0x111   :  { %v461_v39 = vadd.f32 1.0, %v1166_v38 }
 0x112   :  { %v1168_v40 = vpop.eup %1167 }
 0x113   :  { %1169 = vrcp.f32 %v461_v39  ;;  %v462_v41 = vadd.f32 1.0, %v1168_v40 }
 0x115   :  { %1171 = vrcp.f32 %v462_v41 }
 0x11a   :  { %v1045_v42 = vpop.f32.mrb[4].mxu1 }
 0x11b   :  { %v1046_v43 = vpop.f32.mrb[5].mxu1 }
 0x11c   :  { %v1047_v45 = vadd.f32 %v1046_v43, %v1045_v42  ;;  %v1048_v46 = vpop.f32.mrb[6].mxu1 }
 0x11d   :  { %v1170_v44 = vpop.eup %1169  ;;  %v1049_v48 = vpop.f32.mrb[7].mxu1 }
 0x11e   :  { %468 = vst.msk [vmem:[%s1515_s5] sm:$0xff] %vm467_vm3, %v1170_v44  ;;  %v1050_v50 = vadd.f32 %v1049_v48, %v1048_v46  ;;  %v775_v53 = vadd.f32 %v1047_v45, %v948_v47 }
 0x11f   :  { %v1172_v49 = vpop.eup %1171  ;;  %v1067_v51 = vpop.f32.mrb[8].mxu0 }
 0x120   :  { %469 = vst.msk [vmem:[%s1515_s5 + $0x8] sm:$0xff] %vm467_vm3, %v1172_v49  ;;  %v1068_v52 = vpop.f32.mrb[9].mxu0  ;;  %v778_v57 = vadd.f32 %v1050_v50, %v948_v47  ;;  %s895_s5 = sshll.u32 %s1207_s4, 4  ;;  %s896_s5 = int_to_ptr.vmem [resolvable:$true] %s895_s5 }
 0x121   :  { %v1069_v54 = vadd.f32 %v1068_v52, %v1067_v51  ;;  %v1070_v55 = vpop.f32.mrb[10].mxu0  ;;  %s1181_s14 = scalar_lea.vmem %s896_s5, 256  ;;  %p1186_p1 = scmp.lt.s32.totalorder %s896_s5, %s896_s5 }
 0x122   :  { %v1071_v56 = vpop.f32.mrb[11].mxu0  ;;  %v856_v60 = vpop.f32.mrb[8].mxu1  ;;  %p1182_p0 = scmp.ne.s32.totalorder %s896_s5, %s1181_s14  ;;  %p1187_p2 = scmp.lt.s32.totalorder %s1181_s14, %s1181_s14 }
 0x123   :  { %v1072_v58 = vadd.f32 %v1071_v56, %v1070_v55  ;;  %v816_v59 = vadd.f32 %v1069_v54, %v775_v53  ;;  %v1085_v61 = vpop.f32.mrb[9].mxu1 }
 0x124   :  { %v859_v0 = vpop.f32.mrb[10].mxu1  ;;  %p1188_p3 = por %p1187_p2, %p1186_p1 }
 0x125   :  { %v857_v62 = vadd.f32 %v856_v60, %v816_v59  ;;  %v819_v63 = vadd.f32 %v1072_v58, %v778_v57  ;;  %v1086_v1 = vpop.f32.mrb[11].mxu1 }
 0x126   :  { %p1189_p4 = pnand %p1188_p3, %p1182_p0 }
 0x127   :  { %v860_v2 = vadd.f32 %v859_v0, %v819_v63  ;;  %v864_v3 = vsel %vm863_vm4, %v857_v62, -inf }
 0x128   :  { %865 = vmax.xlane.f32.xlu0 %v864_v3 }
 0x129   :  { %v867_v4 = vsel %vm863_vm4, %v860_v2, -inf }
 0x12c   :  { %868 = vmax.xlane.f32.xlu0 %v867_v4 }
 0x1b5   :  { %v866_v5 = vpop.xlane.xlu0 %865 }
 0x1b6   :  { %v870_v6 = vsub.f32 %v857_v62, %v866_v5 }
 0x1b8   :  { %v872_v7 = vmul.f32 1.442695, %v870_v6 }
 0x1b9   :  { %v869_v8 = vpop.xlane.xlu0 %868 }
 0x1ba   :  { %1173 = vpow2.f32 %v872_v7  ;;  %v871_v9 = vsub.f32 %v860_v2, %v869_v8 }
 0x1bc   :  { %v874_v10 = vmul.f32 1.442695, %v871_v9 }
 0x1be   :  { %1175 = vpow2.f32 %v874_v10 }
 0x1c4   :  { %v1174_v11 = vpop.eup %1173 }
 0x1c5   :  { %v876_v12 = vsel %vm863_vm4, %v1174_v11, 0.0 }
 0x1c6   :  { %877 = vadd.xlane.f32.xlu1 %v876_v12 }
 0x1c8   :  { %v1176_v13 = vpop.eup %1175 }
 0x1c9   :  { %v879_v14 = vsel %vm863_vm4, %v1176_v13, 0.0 }
 0x1ca   :  { %880 = vadd.xlane.f32.xlu1 %v879_v14 }
 0x253   :  { %v878_v15 = vpop.xlane.xlu1 %877 }
 0x254   :  { %1177 = vrcp.f32 %v878_v15 }
 0x257   :  { %v881_v16 = vpop.xlane.xlu1 %880 }
 0x258   :  { %1179 = vrcp.f32 %v881_v16 }
 0x25e   :  { %v1178_v17 = vpop.eup %1177 }
 0x25f   :  { %v883_v18 = vmul.f32 %v1178_v17, %v1174_v11 }
 0x261   :  { %886 = vst.msk [vmem:[#allocation3] sm:$0xff] %vm863_vm4, %v883_v18 }
 0x262   :  { %v1180_v19 = vpop.eup %1179 }
 0x263   :  { %v885_v20 = vmul.f32 %v1180_v19, %v1176_v13 }
 0x265   :  { %887 = vst.msk [vmem:[#allocation3 + $0x8] sm:$0xff] %vm863_vm4, %v885_v20 }
 0x266   :  { %1192 = shalt.err (!%p1189_p4)
}
 0x267   :  { %s1193_s17 = scalar_lea.hbm %s1516_s6, 256 }
 0x268   :  { %p1194_p5 = scmp.ne.s32.totalorder %s1516_s6, %s1193_s17  ;;  %p1197_p6 = scmp.lt.u32.totalorder %s1193_s17, %s1516_s6 }
 0x26a   :  { %p1199_p7 = pnand %p1197_p6, %p1194_p5 }
 0x26c   :  { %1202 = shalt.err (!%p1199_p7)
}
 0x26d   :  { %s1208_s22 = smov 128   ;;  %s1209_s23 = smov 8  }
 0x26e   :  { %901 = dma.vmem_to_hbm [thread:$0]  %s896_s5, 256, %s1516_s6, [#allocation4], %s1208_s22, %s1208_s22, %s1209_s23  }
 0x26f   :  { %1203 = dma.done.wait [#allocation4], 256  }
 0x270   :  { %1204 = vsyncadd [#allocation4], 4294967040 }
 0x271   :  { %907 = vsyncpa [#allocation4], 1 }

</bundles_post_ra>
